<compile_context>
chip_gen: v7x
topology: tpu7x:2x2x1
jax: 0.10.0
libtpu: 0.0.40
codegen_flags: <defaults>
</compile_context>

<pallas_src>
import jax
import jax.numpy as jnp
from jax.experimental import pallas as pl
from jax.experimental.pallas import tpu as pltpu


def _round_up(x, m):
    return (x + m - 1) // m * m


def _pick_tm(M, cap):
    """Largest multiple-of-8 tile <= cap that divides M; else M itself if it fits
    (full-dim blocks are always legal); else a non-dividing multiple-of-8 tile
    (Pallas masks the ragged tail, and rows are independent here)."""
    cap = min(cap, M)
    for t in range(cap - cap % 8, 7, -8):
        if M % t == 0:
            return t
    return M if M <= cap else max(8, cap - cap % 8)


# ----------------------------- Pallas kernels ------------------------------ #

def _conv_pool_kernel(cols_ref, w_ref, s_ref, o_ref, acc_ref):
    """Fused conv(+BN scale in weights) + MaxPool2x2 + BN shift + ReLU.

    Grid = (M-blocks, 4).  Axis 1 enumerates the four 2x2-pool taps; each tap's conv
    output (one matmul) is max-accumulated into the f32 scratch, and the epilogue
    (shift + ReLU + single bf16 cast) runs once on the final tap.
    """
    t = pl.program_id(1)
    y = jnp.dot(cols_ref[...], w_ref[...], preferred_element_type=jnp.float32)

    @pl.when(t == 0)
    def _():
        acc_ref[...] = y

    @pl.when(t > 0)
    def _():
        acc_ref[...] = jnp.maximum(acc_ref[...], y)

    @pl.when(t == pl.num_programs(1) - 1)
    def _():
        o_ref[...] = jnp.maximum(acc_ref[...] + s_ref[...], 0.0).astype(o_ref.dtype)


def _classifier_kernel(x_ref, w1_ref, b1_ref, w2_ref, b2_ref, o_ref):
    """fc1 + ReLU + (eval-mode Dropout2d == identity) + fc2; hidden stays in VMEM."""
    h = jnp.dot(x_ref[...], w1_ref[...], preferred_element_type=jnp.float32)
    h = jnp.maximum(h + b1_ref[...], 0.0)
    # TODO(synk): Dropout2d(p=0.5) is identity in eval mode; training-mode channel mask
    # not implemented.
    out = jnp.dot(h.astype(jnp.bfloat16), w2_ref[...],
                  preferred_element_type=jnp.float32) + b2_ref[...]
    o_ref[...] = out.astype(o_ref.dtype)


# ------------------------------ pallas wrappers ----------------------------- #

def conv_bn_relu_pool(cols, w, shift, cout, *, tm_cap=512):
    """cols: [4, M, K] bf16 per-pool-tap patches; w: [K, cout] bf16 (BN scale folded);
    shift: [1, cout] f32.  Returns the pooled+ReLU'd activation as [M, cout] bf16,
    rows ordered (n, h_pooled, w_pooled)."""
    _, M, K = cols.shape
    TM = _pick_tm(M, tm_cap)
    grid = (pl.cdiv(M, TM), 4)
    return pl.pallas_call(
        _conv_pool_kernel,
        out_shape=jax.ShapeDtypeStruct((M, cout), jnp.bfloat16),
        grid=grid,
        in_specs=[
            pl.BlockSpec((None, TM, K), lambda i, t: (t, i, 0)),
            pl.BlockSpec((K, cout), lambda i, t: (0, 0)),   # constant index -> DMA'd once
            pl.BlockSpec((1, cout), lambda i, t: (0, 0)),
        ],
        out_specs=pl.BlockSpec((TM, cout), lambda i, t: (i, 0)),
        scratch_shapes=[pltpu.VMEM((TM, cout), jnp.float32)],
        compiler_params=pltpu.CompilerParams(
            dimension_semantics=("parallel", "arbitrary")),
    )(cols, w, shift)


def classifier_fused(feat, w1, b1, w2, b2, *, tm_cap=256):
    """Single pallas_call for the whole classifier, tiled over batch rows."""
    M, K1 = feat.shape
    N1 = w1.shape[1]
    N2 = w2.shape[1]
    # v7x has two TensorCores; keep the parallel M grid at >= 2 steps when the batch
    # allows it so both cores get work (at batch <= tile size this is moot).
    cap = tm_cap if M > 2 * tm_cap else max(8, _round_up((M + 1) // 2, 8))
    TM = _pick_tm(M, cap)
    grid = (pl.cdiv(M, TM),)
    return pl.pallas_call(
        _classifier_kernel,
        out_shape=jax.ShapeDtypeStruct((M, N2), jnp.float32),
        grid=grid,
        in_specs=[
            pl.BlockSpec((TM, K1), lambda i: (i, 0)),
            pl.BlockSpec((K1, N1), lambda i: (0, 0)),   # 6.5 MiB bf16, DMA'd once
            pl.BlockSpec((1, N1), lambda i: (0, 0)),
            pl.BlockSpec((N1, N2), lambda i: (0, 0)),
            pl.BlockSpec((1, N2), lambda i: (0, 0)),
        ],
        out_specs=pl.BlockSpec((TM, N2), lambda i: (i, 0)),
        compiler_params=pltpu.CompilerParams(
            dimension_semantics=("parallel",),
            # fc1 weight double-buffer reservation (~13 MiB) + activations fit easily;
            # stays well under v7x's 64 MiB physical VMEM.
            vmem_limit_bytes=40 << 20),
    )(feat, w1, b1, w2, b2)


# ------------------------------ host-side glue ----------------------------- #

def pool_tap_cols(x, k):
    """Per-pool-tap im2col for a valid k x k conv followed by MaxPool2d(2).

    x: [N, H, W, C] channels-last.  Returns (cols, P) with cols: [4, N*P*P, k*k*C]
    where P = (H-k+1)//2; cols[2a+b, n*P*P + i*P + j, (di*k+dj)*C + c]
      = x[n, 2i+a+di, 2j+b+dj, c], i.e. the conv patch of output pixel (2i+a, 2j+b).
    Feature order (di, dj, c) matches the BN-folded weight rows.
    TODO(synk): build these patches inside the conv kernel (VMEM) to avoid the HBM
    expansion entirely; kept on the host for Mosaic-lowering robustness.
    """
    N, H, W, C = x.shape
    O = H - k + 1
    P = O // 2
    taps = []
    for a in (0, 1):
        for b in (0, 1):
            pieces = [
                x[:, a + di: a + di + 2 * P - 1: 2,
                  b + dj: b + dj + 2 * P - 1: 2, :]
                for di in range(k) for dj in range(k)
            ]
            cols = jnp.concatenate(pieces, axis=-1)            # [N, P, P, k*k*C]
            taps.append(cols.reshape(N * P * P, k * k * C))    # leading-dim merge (free)
    return jnp.stack(taps, axis=0), P                          # [4, N*P*P, k*k*C]


def init_params(key):
    """PyTorch-layout params (Conv2d [Cout,Cin,kh,kw], Linear [out,in]), eval-mode BN stats."""
    ks = jax.random.split(key, 12)

    def nrm(k, shape, s=0.05):
        return jax.random.normal(k, shape, jnp.float32) * s

    p = {}
    p['conv1_w'] = nrm(ks[0], (64, 3, 5, 5));    p['conv1_b'] = nrm(ks[1], (64,))
    p['bn1_gamma'] = 1.0 + nrm(ks[2], (64,));    p['bn1_beta'] = nrm(ks[3], (64,))
    p['bn1_mean'] = jnp.zeros((64,), jnp.float32)
    p['bn1_var'] = jnp.ones((64,), jnp.float32)
    p['conv2_w'] = nrm(ks[4], (128, 64, 5, 5));  p['conv2_b'] = nrm(ks[5], (128,))
    p['bn2_gamma'] = 1.0 + nrm(ks[6], (128,));   p['bn2_beta'] = nrm(ks[7], (128,))
    p['bn2_mean'] = jnp.zeros((128,), jnp.float32)
    p['bn2_var'] = jnp.ones((128,), jnp.float32)
    p['fc1_w'] = nrm(ks[8], (1024, 128 * 5 * 5), 0.02)
    p['fc1_b'] = nrm(ks[9], (1024,))
    p['fc2_w'] = nrm(ks[10], (256, 1024), 0.02)
    p['fc2_b'] = nrm(ks[11], (256,))
    return p


def prepare_params(p, eps=1e-5):
    """One-time prep: fold BN scale into conv weights, reorder weights to the (di,dj,c)
    patch order, permute fc1 rows to the NHWC flatten order, pre-transpose the linears,
    and cast all weights to bf16 (biases/shifts stay f32)."""
    def fold_conv(w, b, gamma, beta, mean, var):
        cout, cin, kh, kw = w.shape
        scale = gamma / jnp.sqrt(var + eps)
        w2 = w.transpose(2, 3, 1, 0).reshape(kh * kw * cin, cout)   # rows ordered (di, dj, c)
        w2 = (w2 * scale[None, :]).astype(jnp.bfloat16)
        shift = ((b - mean) * scale + beta).reshape(1, cout).astype(jnp.float32)
        return w2, shift

    q = {}
    q['conv1_w'], q['conv1_s'] = fold_conv(p['conv1_w'], p['conv1_b'], p['bn1_gamma'],
                                           p['bn1_beta'], p['bn1_mean'], p['bn1_var'])
    q['conv2_w'], q['conv2_s'] = fold_conv(p['conv2_w'], p['conv2_b'], p['bn2_gamma'],
                                           p['bn2_beta'], p['bn2_mean'], p['bn2_var'])
    # PyTorch flattens NCHW (index c*25 + i*5 + j); our feature is NHWC-flat ((i*5+j)*128 + c).
    w1 = p['fc1_w'].reshape(1024, 128, 5, 5).transpose(2, 3, 1, 0).reshape(128 * 5 * 5, 1024)
    q['fc1_w'] = w1.astype(jnp.bfloat16)
    q['fc1_b'] = p['fc1_b'].reshape(1, -1).astype(jnp.float32)
    q['fc2_w'] = p['fc2_w'].T.astype(jnp.bfloat16)                  # [1024, 256]
    q['fc2_b'] = p['fc2_b'].reshape(1, -1).astype(jnp.float32)
    return q


def lenet_fc_forward(prep, x_nchw):
    N = x_nchw.shape[0]
    x = jnp.transpose(x_nchw, (0, 2, 3, 1)).astype(jnp.bfloat16)    # NHWC once, bf16

    # conv1 + BN1 + MaxPool2x2 + ReLU fused in one pallas_call (pool via the tap axis);
    # the 28x28x64 conv map never reaches HBM.
    cols1, P1 = pool_tap_cols(x, 5)                                 # [4, N*196, 75]
    y1 = conv_bn_relu_pool(cols1, prep['conv1_w'], prep['conv1_s'], 64)
    pooled1 = y1.reshape(N, P1, P1, 64)                             # [N, 14, 14, 64]

    # conv2 + BN2 + MaxPool2x2 + ReLU, same fused structure.
    cols2, P2 = pool_tap_cols(pooled1, 5)                           # [4, N*25, 1600]
    y2 = conv_bn_relu_pool(cols2, prep['conv2_w'], prep['conv2_s'], 128)

    # classifier: fc1 + ReLU + dropout(eval) + fc2 fused in a single pallas_call.
    feat = y2.reshape(N, P2 * P2 * 128)                             # NHWC flatten (fc1 rows pre-permuted)
    return classifier_fused(feat, prep['fc1_w'], prep['fc1_b'],
                            prep['fc2_w'], prep['fc2_b'])           # [N, 256] f32


if __name__ == "__main__":
    key = jax.random.PRNGKey(0)
    pkey, xkey = jax.random.split(key)
    params = init_params(pkey)
    prep = prepare_params(params)
    # LeNetFc's 128*5*5 flatten implies 32x32 RGB input.
    x = jax.random.normal(xkey, (2, 3, 32, 32), jnp.float32)

    fwd = jax.jit(lenet_fc_forward)
    out = jax.block_until_ready(fwd(prep, x))
    assert out.shape == (2, 256), out.shape
    assert out.dtype == jnp.float32, out.dtype
    print("KERNEL_OK")
</pallas_src>

<mosaic_0001>
module attributes {stable_mosaic.version = 11 : i64} {
  func.func @_conv_pool_kernel(%arg0: i32, %arg1: i32, %arg2: memref<1x392x75xbf16, #tpu.memory_space<vmem>>, %arg3: memref<75x64xbf16, #tpu.memory_space<vmem>>, %arg4: memref<1x64xf32, #tpu.memory_space<vmem>>, %arg5: memref<392x64xbf16, #tpu.memory_space<vmem>>, %arg6: memref<392x64xf32, #tpu.memory_space<vmem>>) attributes {dimension_semantics = [#tpu.dimension_semantics<parallel>, #tpu.dimension_semantics<arbitrary>], iteration_bounds = array<i64: 1, 4>, scalar_prefetch = 0 : i64, scratch_operands = 1 : i64, tpu.core_type = #tpu.core_type<tc>, window_params = [{transform_indices = @transform_0, window_bounds = array<i64: 1, 392, 75>}, {pipeline_mode = #tpu.pipeline_mode<synchronous>, transform_indices = @transform_1, window_bounds = array<i64: 75, 64>}, {pipeline_mode = #tpu.pipeline_mode<synchronous>, transform_indices = @transform_2, window_bounds = array<i64: 1, 64>}, {transform_indices = @transform_3, window_bounds = array<i64: 392, 64>}]} {
    %c0 = arith.constant 0 : index
    %c0_0 = arith.constant 0 : index
    %c0_1 = arith.constant 0 : index
    %0 = vector.load %arg2[%c0, %c0_0, %c0_1] : memref<1x392x75xbf16, #tpu.memory_space<vmem>>, vector<1x392x75xbf16>
    %1 = vector.shape_cast %0 : vector<1x392x75xbf16> to vector<392x75xbf16>
    %c0_2 = arith.constant 0 : index
    %c0_3 = arith.constant 0 : index
    %2 = vector.load %arg3[%c0_2, %c0_3] : memref<75x64xbf16, #tpu.memory_space<vmem>>, vector<75x64xbf16>
    %cst = arith.constant dense<0.000000e+00> : vector<392x64xf32>
    %3 = tpu.matmul %1, %2, %cst {dimension_numbers = #tpu.dot_dimension_numbers<[1], [0], [0], [1], [0, 0, 1, 1], [], []>} : vector<392x75xbf16>, vector<75x64xbf16>, vector<392x64xf32> -> vector<392x64xf32>
    %c0_i32 = arith.constant 0 : i32
    %4 = arith.cmpi eq, %arg1, %c0_i32 : i32
    %5 = arith.extui %4 : i1 to i32
    %c0_i32_4 = arith.constant 0 : i32
    %6 = arith.cmpi ne, %5, %c0_i32_4 : i32
    scf.if %6 {
      %c0_8 = arith.constant 0 : index
      %c0_9 = arith.constant 0 : index
      %13 = vector.load %arg6[%c0_8, %c0_9] : memref<392x64xf32, #tpu.memory_space<vmem>>, vector<392x64xf32>
      tpu.vector_store %arg6[%c0_8, %c0_9], %3 {strides = array<i32>} : memref<392x64xf32, #tpu.memory_space<vmem>>, vector<392x64xf32>,
    } else {
    }
    %c0_i32_5 = arith.constant 0 : i32
    %7 = arith.cmpi sgt, %arg1, %c0_i32_5 : i32
    %8 = arith.extui %7 : i1 to i32
    %c0_i32_6 = arith.constant 0 : i32
    %9 = arith.cmpi ne, %8, %c0_i32_6 : i32
    scf.if %9 {
      %c0_8 = arith.constant 0 : index
      %c0_9 = arith.constant 0 : index
      %13 = vector.load %arg6[%c0_8, %c0_9] : memref<392x64xf32, #tpu.memory_space<vmem>>, vector<392x64xf32>
      %14 = arith.maximumf %13, %3 : vector<392x64xf32>
      %c0_10 = arith.constant 0 : index
      %c0_11 = arith.constant 0 : index
      %15 = vector.load %arg6[%c0_10, %c0_11] : memref<392x64xf32, #tpu.memory_space<vmem>>, vector<392x64xf32>
      tpu.vector_store %arg6[%c0_10, %c0_11], %14 {strides = array<i32>} : memref<392x64xf32, #tpu.memory_space<vmem>>, vector<392x64xf32>,
    } else {
    }
    %c3_i32 = arith.constant 3 : i32
    %10 = arith.cmpi eq, %arg1, %c3_i32 : i32
    %11 = arith.extui %10 : i1 to i32
    %c0_i32_7 = arith.constant 0 : i32
    %12 = arith.cmpi ne, %11, %c0_i32_7 : i32
    scf.if %12 {
      %c0_8 = arith.constant 0 : index
      %c0_9 = arith.constant 0 : index
      %13 = vector.load %arg6[%c0_8, %c0_9] : memref<392x64xf32, #tpu.memory_space<vmem>>, vector<392x64xf32>
      %c0_10 = arith.constant 0 : index
      %c0_11 = arith.constant 0 : index
      %14 = vector.load %arg4[%c0_10, %c0_11] : memref<1x64xf32, #tpu.memory_space<vmem>>, vector<1x64xf32>
      %15 = vector.broadcast %14 : vector<1x64xf32> to vector<392x64xf32>
      %16 = arith.addf %13, %15 : vector<392x64xf32>
      %cst_12 = arith.constant 0.000000e+00 : f32
      %17 = vector.broadcast %cst_12 : f32 to vector<392x64xf32>
      %18 = arith.maximumf %16, %17 : vector<392x64xf32>
      %19 = arith.truncf %18 : vector<392x64xf32> to vector<392x64xbf16>
      %c0_13 = arith.constant 0 : index
      %c0_14 = arith.constant 0 : index
      %20 = vector.load %arg5[%c0_13, %c0_14] : memref<392x64xbf16, #tpu.memory_space<vmem>>, vector<392x64xbf16>
      tpu.vector_store %arg5[%c0_13, %c0_14], %19 {strides = array<i32>} : memref<392x64xbf16, #tpu.memory_space<vmem>>, vector<392x64xbf16>,
    } else {
    }
    return
  }
  func.func @transform_0(%arg0: i32, %arg1: i32) -> (i32, i32, i32) {
    %c0_i32 = arith.constant 0 : i32
    %c0_i32_0 = arith.constant 0 : i32
    return %arg1, %arg0, %c0_i32 : i32, i32, i32
  }
  func.func @transform_1(%arg0: i32, %arg1: i32) -> (i32, i32) {
    %c0_i32 = arith.constant 0 : i32
    %c0_i32_0 = arith.constant 0 : i32
    %c0_i32_1 = arith.constant 0 : i32
    return %c0_i32, %c0_i32_0 : i32, i32
  }
  func.func @transform_2(%arg0: i32, %arg1: i32) -> (i32, i32) {
    %c0_i32 = arith.constant 0 : i32
    %c0_i32_0 = arith.constant 0 : i32
    %c0_i32_1 = arith.constant 0 : i32
    return %c0_i32, %c0_i32_0 : i32, i32
  }
  func.func @transform_3(%arg0: i32, %arg1: i32) -> (i32, i32) {
    %c0_i32 = arith.constant 0 : i32
    %c0_i32_0 = arith.constant 0 : i32
    return %arg0, %c0_i32 : i32, i32
  }
}

module attributes {stable_mosaic.version = 11 : i64} {
  func.func @_conv_pool_kernel(%arg0: i32, %arg1: i32, %arg2: memref<1x50x1600xbf16, #tpu.memory_space<vmem>>, %arg3: memref<1600x128xbf16, #tpu.memory_space<vmem>>, %arg4: memref<1x128xf32, #tpu.memory_space<vmem>>, %arg5: memref<50x128xbf16, #tpu.memory_space<vmem>>, %arg6: memref<50x128xf32, #tpu.memory_space<vmem>>) attributes {dimension_semantics = [#tpu.dimension_semantics<parallel>, #tpu.dimension_semantics<arbitrary>], iteration_bounds = array<i64: 1, 4>, scalar_prefetch = 0 : i64, scratch_operands = 1 : i64, tpu.core_type = #tpu.core_type<tc>, window_params = [{transform_indices = @transform_0, window_bounds = array<i64: 1, 50, 1600>}, {pipeline_mode = #tpu.pipeline_mode<synchronous>, transform_indices = @transform_1, window_bounds = array<i64: 1600, 128>}, {pipeline_mode = #tpu.pipeline_mode<synchronous>, transform_indices = @transform_2, window_bounds = array<i64: 1, 128>}, {transform_indices = @transform_3, window_bounds = array<i64: 50, 128>}]} {
    %c0 = arith.constant 0 : index
    %c0_0 = arith.constant 0 : index
    %c0_1 = arith.constant 0 : index
    %0 = vector.load %arg2[%c0, %c0_0, %c0_1] : memref<1x50x1600xbf16, #tpu.memory_space<vmem>>, vector<1x50x1600xbf16>
    %1 = vector.shape_cast %0 : vector<1x50x1600xbf16> to vector<50x1600xbf16>
    %c0_2 = arith.constant 0 : index
    %c0_3 = arith.constant 0 : index
    %2 = vector.load %arg3[%c0_2, %c0_3] : memref<1600x128xbf16, #tpu.memory_space<vmem>>, vector<1600x128xbf16>
    %cst = arith.constant dense<0.000000e+00> : vector<50x128xf32>
    %3 = tpu.matmul %1, %2, %cst {dimension_numbers = #tpu.dot_dimension_numbers<[1], [0], [0], [1], [0, 0, 1, 1], [], []>} : vector<50x1600xbf16>, vector<1600x128xbf16>, vector<50x128xf32> -> vector<50x128xf32>
    %c0_i32 = arith.constant 0 : i32
    %4 = arith.cmpi eq, %arg1, %c0_i32 : i32
    %5 = arith.extui %4 : i1 to i32
    %c0_i32_4 = arith.constant 0 : i32
    %6 = arith.cmpi ne, %5, %c0_i32_4 : i32
    scf.if %6 {
      %c0_8 = arith.constant 0 : index
      %c0_9 = arith.constant 0 : index
      %13 = vector.load %arg6[%c0_8, %c0_9] : memref<50x128xf32, #tpu.memory_space<vmem>>, vector<50x128xf32>
      tpu.vector_store %arg6[%c0_8, %c0_9], %3 {strides = array<i32>} : memref<50x128xf32, #tpu.memory_space<vmem>>, vector<50x128xf32>,
    } else {
    }
    %c0_i32_5 = arith.constant 0 : i32
    %7 = arith.cmpi sgt, %arg1, %c0_i32_5 : i32
    %8 = arith.extui %7 : i1 to i32
    %c0_i32_6 = arith.constant 0 : i32
    %9 = arith.cmpi ne, %8, %c0_i32_6 : i32
    scf.if %9 {
      %c0_8 = arith.constant 0 : index
      %c0_9 = arith.constant 0 : index
      %13 = vector.load %arg6[%c0_8, %c0_9] : memref<50x128xf32, #tpu.memory_space<vmem>>, vector<50x128xf32>
      %14 = arith.maximumf %13, %3 : vector<50x128xf32>
      %c0_10 = arith.constant 0 : index
      %c0_11 = arith.constant 0 : index
      %15 = vector.load %arg6[%c0_10, %c0_11] : memref<50x128xf32, #tpu.memory_space<vmem>>, vector<50x128xf32>
      tpu.vector_store %arg6[%c0_10, %c0_11], %14 {strides = array<i32>} : memref<50x128xf32, #tpu.memory_space<vmem>>, vector<50x128xf32>,
    } else {
    }
    %c3_i32 = arith.constant 3 : i32
    %10 = arith.cmpi eq, %arg1, %c3_i32 : i32
    %11 = arith.extui %10 : i1 to i32
    %c0_i32_7 = arith.constant 0 : i32
    %12 = arith.cmpi ne, %11, %c0_i32_7 : i32
    scf.if %12 {
      %c0_8 = arith.constant 0 : index
      %c0_9 = arith.constant 0 : index
      %13 = vector.load %arg6[%c0_8, %c0_9] : memref<50x128xf32, #tpu.memory_space<vmem>>, vector<50x128xf32>
      %c0_10 = arith.constant 0 : index
      %c0_11 = arith.constant 0 : index
      %14 = vector.load %arg4[%c0_10, %c0_11] : memref<1x128xf32, #tpu.memory_space<vmem>>, vector<1x128xf32>
      %15 = vector.broadcast %14 : vector<1x128xf32> to vector<50x128xf32>
      %16 = arith.addf %13, %15 : vector<50x128xf32>
      %cst_12 = arith.constant 0.000000e+00 : f32
      %17 = vector.broadcast %cst_12 : f32 to vector<50x128xf32>
      %18 = arith.maximumf %16, %17 : vector<50x128xf32>
      %19 = arith.truncf %18 : vector<50x128xf32> to vector<50x128xbf16>
      %c0_13 = arith.constant 0 : index
      %c0_14 = arith.constant 0 : index
      %20 = vector.load %arg5[%c0_13, %c0_14] : memref<50x128xbf16, #tpu.memory_space<vmem>>, vector<50x128xbf16>
      tpu.vector_store %arg5[%c0_13, %c0_14], %19 {strides = array<i32>} : memref<50x128xbf16, #tpu.memory_space<vmem>>, vector<50x128xbf16>,
    } else {
    }
    return
  }
  func.func @transform_0(%arg0: i32, %arg1: i32) -> (i32, i32, i32) {
    %c0_i32 = arith.constant 0 : i32
    %c0_i32_0 = arith.constant 0 : i32
    return %arg1, %arg0, %c0_i32 : i32, i32, i32
  }
  func.func @transform_1(%arg0: i32, %arg1: i32) -> (i32, i32) {
    %c0_i32 = arith.constant 0 : i32
    %c0_i32_0 = arith.constant 0 : i32
    %c0_i32_1 = arith.constant 0 : i32
    return %c0_i32, %c0_i32_0 : i32, i32
  }
  func.func @transform_2(%arg0: i32, %arg1: i32) -> (i32, i32) {
    %c0_i32 = arith.constant 0 : i32
    %c0_i32_0 = arith.constant 0 : i32
    %c0_i32_1 = arith.constant 0 : i32
    return %c0_i32, %c0_i32_0 : i32, i32
  }
  func.func @transform_3(%arg0: i32, %arg1: i32) -> (i32, i32) {
    %c0_i32 = arith.constant 0 : i32
    %c0_i32_0 = arith.constant 0 : i32
    return %arg0, %c0_i32 : i32, i32
  }
}

module attributes {stable_mosaic.version = 11 : i64} {
  func.func @_classifier_kernel(%arg0: i32, %arg1: memref<2x3200xbf16, #tpu.memory_space<vmem>>, %arg2: memref<3200x1024xbf16, #tpu.memory_space<vmem>>, %arg3: memref<1x1024xf32, #tpu.memory_space<vmem>>, %arg4: memref<1024x256xbf16, #tpu.memory_space<vmem>>, %arg5: memref<1x256xf32, #tpu.memory_space<vmem>>, %arg6: memref<2x256xf32, #tpu.memory_space<vmem>>) attributes {dimension_semantics = [#tpu.dimension_semantics<parallel>], iteration_bounds = array<i64: 1>, scalar_prefetch = 0 : i64, scratch_operands = 0 : i64, tpu.core_type = #tpu.core_type<tc>, window_params = [{transform_indices = @transform_0, window_bounds = array<i64: 2, 3200>}, {pipeline_mode = #tpu.pipeline_mode<synchronous>, transform_indices = @transform_1, window_bounds = array<i64: 3200, 1024>}, {pipeline_mode = #tpu.pipeline_mode<synchronous>, transform_indices = @transform_2, window_bounds = array<i64: 1, 1024>}, {pipeline_mode = #tpu.pipeline_mode<synchronous>, transform_indices = @transform_3, window_bounds = array<i64: 1024, 256>}, {pipeline_mode = #tpu.pipeline_mode<synchronous>, transform_indices = @transform_4, window_bounds = array<i64: 1, 256>}, {transform_indices = @transform_5, window_bounds = array<i64: 2, 256>}]} {
    %c0 = arith.constant 0 : index
    %c0_0 = arith.constant 0 : index
    %0 = vector.load %arg1[%c0, %c0_0] : memref<2x3200xbf16, #tpu.memory_space<vmem>>, vector<2x3200xbf16>
    %c0_1 = arith.constant 0 : index
    %c0_2 = arith.constant 0 : index
    %1 = vector.load %arg2[%c0_1, %c0_2] : memref<3200x1024xbf16, #tpu.memory_space<vmem>>, vector<3200x1024xbf16>
    %cst = arith.constant dense<0.000000e+00> : vector<2x1024xf32>
    %2 = tpu.matmul %0, %1, %cst {dimension_numbers = #tpu.dot_dimension_numbers<[1], [0], [0], [1], [0, 0, 1, 1], [], []>} : vector<2x3200xbf16>, vector<3200x1024xbf16>, vector<2x1024xf32> -> vector<2x1024xf32>
    %c0_3 = arith.constant 0 : index
    %c0_4 = arith.constant 0 : index
    %3 = vector.load %arg3[%c0_3, %c0_4] : memref<1x1024xf32, #tpu.memory_space<vmem>>, vector<1x1024xf32>
    %4 = vector.broadcast %3 : vector<1x1024xf32> to vector<2x1024xf32>
    %5 = arith.addf %2, %4 : vector<2x1024xf32>
    %cst_5 = arith.constant 0.000000e+00 : f32
    %6 = vector.broadcast %cst_5 : f32 to vector<2x1024xf32>
    %7 = arith.maximumf %5, %6 : vector<2x1024xf32>
    %8 = arith.truncf %7 : vector<2x1024xf32> to vector<2x1024xbf16>
    %c0_6 = arith.constant 0 : index
    %c0_7 = arith.constant 0 : index
    %9 = vector.load %arg4[%c0_6, %c0_7] : memref<1024x256xbf16, #tpu.memory_space<vmem>>, vector<1024x256xbf16>
    %cst_8 = arith.constant dense<0.000000e+00> : vector<2x256xf32>
    %10 = tpu.matmul %8, %9, %cst_8 {dimension_numbers = #tpu.dot_dimension_numbers<[1], [0], [0], [1], [0, 0, 1, 1], [], []>} : vector<2x1024xbf16>, vector<1024x256xbf16>, vector<2x256xf32> -> vector<2x256xf32>
    %c0_9 = arith.constant 0 : index
    %c0_10 = arith.constant 0 : index
    %11 = vector.load %arg5[%c0_9, %c0_10] : memref<1x256xf32, #tpu.memory_space<vmem>>, vector<1x256xf32>
    %12 = vector.broadcast %11 : vector<1x256xf32> to vector<2x256xf32>
    %13 = arith.addf %10, %12 : vector<2x256xf32>
    %c0_11 = arith.constant 0 : index
    %c0_12 = arith.constant 0 : index
    %14 = vector.load %arg6[%c0_11, %c0_12] : memref<2x256xf32, #tpu.memory_space<vmem>>, vector<2x256xf32>
    tpu.vector_store %arg6[%c0_11, %c0_12], %13 {strides = array<i32>} : memref<2x256xf32, #tpu.memory_space<vmem>>, vector<2x256xf32>,
    return
  }
  func.func @transform_0(%arg0: i32) -> (i32, i32) {
    %c0_i32 = arith.constant 0 : i32
    %c0_i32_0 = arith.constant 0 : i32
    return %arg0, %c0_i32 : i32, i32
  }
  func.func @transform_1(%arg0: i32) -> (i32, i32) {
    %c0_i32 = arith.constant 0 : i32
    %c0_i32_0 = arith.constant 0 : i32
    %c0_i32_1 = arith.constant 0 : i32
    return %c0_i32, %c0_i32_0 : i32, i32
  }
  func.func @transform_2(%arg0: i32) -> (i32, i32) {
    %c0_i32 = arith.constant 0 : i32
    %c0_i32_0 = arith.constant 0 : i32
    %c0_i32_1 = arith.constant 0 : i32
    return %c0_i32, %c0_i32_0 : i32, i32
  }
  func.func @transform_3(%arg0: i32) -> (i32, i32) {
    %c0_i32 = arith.constant 0 : i32
    %c0_i32_0 = arith.constant 0 : i32
    %c0_i32_1 = arith.constant 0 : i32
    return %c0_i32, %c0_i32_0 : i32, i32
  }
  func.func @transform_4(%arg0: i32) -> (i32, i32) {
    %c0_i32 = arith.constant 0 : i32
    %c0_i32_0 = arith.constant 0 : i32
    %c0_i32_1 = arith.constant 0 : i32
    return %c0_i32, %c0_i32_0 : i32, i32
  }
  func.func @transform_5(%arg0: i32) -> (i32, i32) {
    %c0_i32 = arith.constant 0 : i32
    %c0_i32_0 = arith.constant 0 : i32
    return %arg0, %c0_i32 : i32, i32
  }
}

</mosaic_0001>

<bundles_post_ra>
// kernel: lenet_fc_forward.3
= control target key start
LH: loop header
LB: loop body
LE: loop exit
PB: predicated region body
PF: predicated region fallthrough
CT: control target
= control target key end

     0   :  { %s1827_s12 = smov 0   ;;  %s1829_s13 = smov 0   ;;  %s2535_s0 = inlined_call_operand.vmem [shape: bf16[4,392,75], index: 0, kind: input, shape index: {}]   ;;  %s2536_s1 = inlined_call_operand.vmem [shape: bf16[75,64], index: 1, kind: input, shape index: {}]   ;;  %s2537_s2 = inlined_call_operand.vmem [shape: f32[1,64], index: 2, kind: input, shape index: {}]   ;;  %s2538_s3 = inlined_call_operand.vmem [shape: bf16[392,64], index: 3, kind: output, shape index: {}]  }
   0x1   :  { %s1831_s14 = smov 0  }
   0x2 LB: > { %s22_s15 = sadd.s32 1, %s1798_s13  ;;  %p1409_p0 = scmp.ge.s32.totalorder %s1802_s14, 1  ;;  %s1802_s14 = sphi %s1831_s14, %s13_s14   ;;  %s1798_s13 = sphi %s1829_s13, %s2540_s13   ;;  %s1794_s12 = sphi %s1827_s12, %s2539_s12  }
   0x3   : > { %p23_p1 = scmp.ge.s32.totalorder %s22_s15, 4  ;;  %p156_p2 = scmp.lt.s32.totalorder %s1802_s14, 5 }
   0x5   : > { %s2542_s15 = smov (%p23_p1, %s22_s15), 0  ;;  %p157_p3 = pnand %p1409_p0, %p156_p2 }
   0x6   : > { %v1750_v0 = vld [vmem:[%s2536_s1] sm:$0xff] (!%p157_p3)   ;;  %v1804_v1 = vmov (!%p157_p3), 0.0   ;;  %v1751_v2 = vld [vmem:[%s2536_s1 + $0x8] sm:$0xff] (!%p157_p3)   ;;  %vm488_vm0 = vcmask (!%p157_p3), 1044480   ;;  %p185_p4 = scmp.lt.s32.totalorder (!%p157_p3), %s1794_s12, 3  ;;  %v1752_v3 = vld [vmem:[%s2536_s1 + $0x10] sm:$0xff] (!%p157_p3)  }
   0x7   : > { %160 = sbr.rel (%p157_p3) target bundleno = 412 (0x19c), region = 32  ;;  %1602 = vmatprep.subr.bf16.mxu0 (!%p157_p3), %v1804_v1  ;;  %1712 = vmatprep.subr.bf16.mxu1 (!%p157_p3), %v1804_v1  ;;  %vm489_vm1 = vcmask (!%p157_p3), 1045504   ;;  %v1805_v4 = vmov (!%p157_p3), 65535   ;;  %vm1806_vm2 = vmmov (!%p157_p3), 0   ;;  %v1753_v6 = vld [vmem:[%s2536_s1 + $0x18] sm:$0xff] (!%p157_p3)   ;;  %vm412_vm3 = vcmask (!%p157_p3), 613376  }
   0x8   : > { %1603 = vmatpush3.bf16.msra.mxu0 (!%p157_p3), %v1750_v0  ;;  %1717 = vmatpush3.bf16.msra.mxu1 (!%p157_p3), %v1750_v0  ;;  %v490_v5 = vsel (!%p157_p3), %vm488_vm0, 4294967295, %v1805_v4  ;;  %v1754_v7 = vld [vmem:[%s2536_s1 + $0x20] sm:$0x3f] (!%p157_p3)   ;;  %p1466_p5 = scmp.ne.s32.totalorder (!%p157_p3), %s1794_s12, 0 }
   0x9   : > { %1604 = vmatprep.subr.bf16.mxu0 (!%p157_p3), %v1804_v1  ;;  %1713 = vmatprep.subr.bf16.mxu1 (!%p157_p3), %v1804_v1  ;;  %v491_v8 = vsel (!%p157_p3), %vm489_vm1, %v490_v5, 0 }
   0xa   : > { %1612 = vmatprep.mubr.msk.bf16.mxu0 (!%p157_p3), %vm1806_vm2, %v1804_v1  ;;  %1664 = vmatprep.mubr.msk.bf16.mxu1 (!%p157_p3), %vm1806_vm2, %v1804_v1  ;;  %v493_v9 = vand.u32 (!%p157_p3), %v1754_v7, %v491_v8 }
   0xc   : > { %1605 = vmatpush3.bf16.msra.mxu0 (!%p157_p3), %v1751_v2  ;;  %1718 = vmatpush3.bf16.msra.mxu1 (!%p157_p3), %v1751_v2 }
   0xd   : > { %1606 = vmatprep.subr.bf16.mxu0 (!%p157_p3), %v1804_v1  ;;  %1714 = vmatprep.subr.bf16.mxu1 (!%p157_p3), %v1804_v1 }
   0xe   : > { %s186_s22 = scalar_select %p185_p4, %s1794_s12, 3 }
   0xf   : > { %vm731_vm4 = vcmask (!%p1466_p5), 523264  }
  0x10   : > { %s1722_s23 = smul.u32 196, %s186_s22  ;;  %1607 = vmatpush3.bf16.msra.mxu0 %v1752_v3  ;;  %1719 = vmatpush3.bf16.msra.mxu1 %v1752_v3 }
  0x11   : > { %1608 = vmatprep.subr.bf16.mxu0 %v1804_v1  ;;  %1715 = vmatprep.subr.bf16.mxu1 %v1804_v1 }
  0x12   : > { %s1879_s30 = scalar_lea.vmem %s2535_s0, %s1722_s23 }
  0x13   : > { %v1755_v10 = vld [vmem:[%s1879_s30] sm:$0xff]   ;;  %v1756_v11 = vld [vmem:[%s1879_s30 + $0x68] sm:$0xff]   ;;  %v1758_v13 = vld [vmem:[%s1879_s30 + $0x70] sm:$0xff]  }
  0x14   : > { %1609 = vmatpush3.bf16.msra.mxu0 %v1753_v6  ;;  %1720 = vmatpush3.bf16.msra.mxu1 %v1753_v6  ;;  %v1757_v12 = vld [vmem:[%s1879_s30 + $0x8] sm:$0xff]   ;;  %v1759_v14 = vld [vmem:[%s1879_s30 + $0x10] sm:$0xff]   ;;  %v1760_v15 = vld [vmem:[%s1879_s30 + $0x78] sm:$0xff]  }
  0x15   : > { %1610 = vmatprep.subr.bf16.mxu0 %v1804_v1  ;;  %1716 = vmatprep.subr.bf16.mxu1 %v1804_v1  ;;  %v1761_v16 = vld [vmem:[%s1879_s30 + $0x18] sm:$0xff]   ;;  %v1762_v17 = vld [vmem:[%s1879_s30 + $0x80] sm:$0xff]   ;;  %v1764_v19 = vld [vmem:[%s1879_s30 + $0x88] sm:$0xff]  }
  0x16   : > { %v1763_v18 = vld [vmem:[%s1879_s30 + $0x20] sm:$0xff]   ;;  %v1765_v20 = vld [vmem:[%s1879_s30 + $0x28] sm:$0xff]   ;;  %v1766_v21 = vld [vmem:[%s1879_s30 + $0x90] sm:$0xff]  }
  0x17   : > { %v1767_v22 = vld [vmem:[%s1879_s30 + $0x30] sm:$0xff]   ;;  %v1768_v23 = vld [vmem:[%s1879_s30 + $0x98] sm:$0xff]   ;;  %v1770_v25 = vld [vmem:[%s1879_s30 + $0xa0] sm:$0xff]  }
  0x18   : > { %1611 = vmatpush3.bf16.msra.mxu0 %v493_v9  ;;  %1721 = vmatpush3.bf16.msra.mxu1 %v493_v9  ;;  %v1769_v24 = vld [vmem:[%s1879_s30 + $0x38] sm:$0xff]   ;;  %v1771_v26 = vld [vmem:[%s1879_s30 + $0x40] sm:$0xff]   ;;  %v1772_v27 = vld [vmem:[%s1879_s30 + $0xa8] sm:$0xff]  }
  0x19   : > { %v1773_v28 = vld [vmem:[%s1879_s30 + $0x48] sm:$0xff]   ;;  %v1774_v29 = vld [vmem:[%s1879_s30 + $0xb0] sm:$0xff]   ;;  %v1776_v31 = vld [vmem:[%s1879_s30 + $0xb8] sm:$0xff]  }
  0x1a   : > { %v1775_v30 = vld [vmem:[%s1879_s30 + $0x50] sm:$0xff]   ;;  %v1777_v32 = vld [vmem:[%s1879_s30 + $0x58] sm:$0xff]   ;;  %v1778_v33 = vld [vmem:[%s1879_s30 + $0xc0] ss:$0 sps:$4 sm:$0xff]  }
  0x1b   : > { %1613 = vmatmul.mubr.msk.bf16.vlgmr.msra.gmra.mrb[0].mxu0 %vm412_vm3, %v1755_v10  ;;  %1665 = vmatmul.mubr.msk.bf16.vlgmr.msra.gmra.mrb[0].mxu1 %vm412_vm3, %v1756_v11  ;;  %v1779_v34 = vld [vmem:[%s1879_s30 + $0x60] sm:$0xff]  }
  0x1c   : > { %1616 = vmatprep.mubr.msk.bf16.mxu0 %vm1806_vm2, %v1804_v1  ;;  %1668 = vmatprep.mubr.msk.bf16.mxu1 %vm1806_vm2, %v1804_v1 }
  0x23   : > { %1617 = vmatmul.mubr.msk.bf16.gmra.mrb[4].mxu0 %vm412_vm3, %v1757_v12  ;;  %1669 = vmatmul.mubr.msk.bf16.gmra.mrb[4].mxu1 %vm412_vm3, %v1758_v13 }
  0x24   : > { %1620 = vmatprep.mubr.msk.bf16.mxu0 %vm1806_vm2, %v1804_v1  ;;  %1672 = vmatprep.mubr.msk.bf16.mxu1 %vm1806_vm2, %v1804_v1 }
  0x2b   : > { %1621 = vmatmul.mubr.msk.bf16.gmra.mrb[8].mxu0 %vm412_vm3, %v1759_v14  ;;  %1673 = vmatmul.mubr.msk.bf16.gmra.mrb[8].mxu1 %vm412_vm3, %v1760_v15 }
  0x2c   : > { %1624 = vmatprep.mubr.msk.bf16.mxu0 %vm1806_vm2, %v1804_v1  ;;  %1676 = vmatprep.mubr.msk.bf16.mxu1 %vm1806_vm2, %v1804_v1 }
  0x33   : > { %1625 = vmatmul.mubr.msk.bf16.gmra.mrb[12].mxu0 %vm412_vm3, %v1761_v16  ;;  %1677 = vmatmul.mubr.msk.bf16.gmra.mrb[12].mxu1 %vm412_vm3, %v1762_v17 }
  0x34   : > { %1628 = vmatprep.mubr.msk.bf16.mxu0 %vm1806_vm2, %v1804_v1  ;;  %1680 = vmatprep.mubr.msk.bf16.mxu1 %vm1806_vm2, %v1804_v1 }
  0x3b   : > { %1629 = vmatmul.mubr.msk.bf16.gmra.mrb[16].mxu0 %vm412_vm3, %v1763_v18  ;;  %1681 = vmatmul.mubr.msk.bf16.gmra.mrb[16].mxu1 %vm412_vm3, %v1764_v19 }
  0x3c   : > { %1632 = vmatprep.mubr.msk.bf16.mxu0 %vm1806_vm2, %v1804_v1  ;;  %1684 = vmatprep.mubr.msk.bf16.mxu1 %vm1806_vm2, %v1804_v1 }
  0x43   : > { %1633 = vmatmul.mubr.msk.bf16.gmra.mrb[20].mxu0 %vm412_vm3, %v1765_v20  ;;  %1685 = vmatmul.mubr.msk.bf16.gmra.mrb[20].mxu1 %vm412_vm3, %v1766_v21 }
  0x44   : > { %1636 = vmatprep.mubr.msk.bf16.mxu0 %vm1806_vm2, %v1804_v1  ;;  %1688 = vmatprep.mubr.msk.bf16.mxu1 %vm1806_vm2, %v1804_v1 }
  0x4b   : > { %1637 = vmatmul.mubr.msk.bf16.gmra.mrb[24].mxu0 %vm412_vm3, %v1767_v22  ;;  %1689 = vmatmul.mubr.msk.bf16.gmra.mrb[24].mxu1 %vm412_vm3, %v1768_v23 }
  0x4c   : > { %1640 = vmatprep.mubr.msk.bf16.mxu0 %vm1806_vm2, %v1804_v1  ;;  %1692 = vmatprep.mubr.msk.bf16.mxu1 %vm1806_vm2, %v1804_v1 }
  0x53   : > { %1641 = vmatmul.mubr.msk.bf16.gmra.mrb[28].mxu0 %vm412_vm3, %v1769_v24  ;;  %1693 = vmatmul.mubr.msk.bf16.gmra.mrb[28].mxu1 %vm412_vm3, %v1770_v25 }
  0x54   : > { %1644 = vmatprep.mubr.msk.bf16.mxu0 %vm1806_vm2, %v1804_v1  ;;  %1696 = vmatprep.mubr.msk.bf16.mxu1 %vm1806_vm2, %v1804_v1 }
  0x5b   : > { %1645 = vmatmul.mubr.msk.bf16.gmra.mrb[32].mxu0 %vm412_vm3, %v1771_v26  ;;  %1697 = vmatmul.mubr.msk.bf16.gmra.mrb[32].mxu1 %vm412_vm3, %v1772_v27 }
  0x5c   : > { %1648 = vmatprep.mubr.msk.bf16.mxu0 %vm1806_vm2, %v1804_v1  ;;  %1700 = vmatprep.mubr.msk.bf16.mxu1 %vm1806_vm2, %v1804_v1 }
  0x63   : > { %1649 = vmatmul.mubr.msk.bf16.gmra.mrb[36].mxu0 %vm412_vm3, %v1773_v28  ;;  %1701 = vmatmul.mubr.msk.bf16.gmra.mrb[36].mxu1 %vm412_vm3, %v1774_v29 }
  0x64   : > { %1652 = vmatprep.mubr.msk.bf16.mxu0 %vm1806_vm2, %v1804_v1  ;;  %1704 = vmatprep.mubr.msk.bf16.mxu1 %vm1806_vm2, %v1804_v1 }
  0x6b   : > { %1653 = vmatmul.mubr.msk.bf16.gmra.mrb[40].mxu0 %vm412_vm3, %v1775_v30  ;;  %1705 = vmatmul.mubr.msk.bf16.gmra.mrb[40].mxu1 %vm412_vm3, %v1776_v31 }
  0x6c   : > { %1656 = vmatprep.mubr.msk.bf16.mxu0 %vm1806_vm2, %v1804_v1  ;;  %1708 = vmatprep.mubr.msk.bf16.mxu1 %vm1806_vm2, %v1804_v1 }
  0x73   : > { %1657 = vmatmul.mubr.msk.bf16.gmra.mrb[44].mxu0 %vm412_vm3, %v1777_v32  ;;  %1709 = vmatmul.mubr.msk.bf16.gmra.mrb[44].mxu1 %vm412_vm3, %v1778_v33 }
  0x74   : > { %1660 = vmatprep.mubr.msk.bf16.mxu0 %vm1806_vm2, %v1804_v1 }
  0x7b   : > { %1661 = vmatmul.mubr.msk.bf16.gmra.mrb[48].mxu0 %vm412_vm3, %v1779_v34 }
  0xee   : > { %v1979_v35 = vpop.f32.mrb[0].mxu0  ;;  %v1981_v36 = vpop.f32.mrb[0].mxu1 }
  0xef   : > { %v1614_v37 = vpop.f32.mrb[1].mxu0  ;;  %v1666_v38 = vpop.f32.mrb[1].mxu1  ;;  %732 = vst.msk [vmem:[#allocation2] sm:$0xff] (!%p1466_p5), %vm731_vm4, %v1979_v35  ;;  %758 = vst.msk [vmem:[#allocation2 + $0xd0] sm:$0xff] (!%p1466_p5), %vm731_vm4, %v1981_v36 }
  0xf0   : > { %v1983_v39 = vpop.f32.mrb[2].mxu0  ;;  %v1985_v40 = vpop.f32.mrb[2].mxu1 }
  0xf1   : > { %v1615_v41 = vpop.f32.mrb[3].mxu0  ;;  %v1667_v42 = vpop.f32.mrb[3].mxu1  ;;  %733 = vst.msk [vmem:[#allocation2 + $0x8] sm:$0xff] (!%p1466_p5), %vm731_vm4, %v1983_v39  ;;  %759 = vst.msk [vmem:[#allocation2 + $0xd8] sm:$0xff] (!%p1466_p5), %vm731_vm4, %v1985_v40 }
  0xf6   : > { %v1987_v43 = vpop.f32.mrb[4].mxu0  ;;  %v1989_v44 = vpop.f32.mrb[4].mxu1 }
  0xf7   : > { %v1618_v45 = vpop.f32.mrb[5].mxu0  ;;  %v1670_v46 = vpop.f32.mrb[5].mxu1  ;;  %734 = vst.msk [vmem:[#allocation2 + $0x10] sm:$0xff] (!%p1466_p5), %vm731_vm4, %v1987_v43  ;;  %760 = vst.msk [vmem:[#allocation2 + $0xe0] sm:$0xff] (!%p1466_p5), %vm731_vm4, %v1989_v44 }
  0xf8   : > { %v1991_v47 = vpop.f32.mrb[6].mxu0  ;;  %v1993_v48 = vpop.f32.mrb[6].mxu1 }
  0xf9   : > { %v1619_v49 = vpop.f32.mrb[7].mxu0  ;;  %v1671_v50 = vpop.f32.mrb[7].mxu1  ;;  %735 = vst.msk [vmem:[#allocation2 + $0x18] sm:$0xff] (!%p1466_p5), %vm731_vm4, %v1991_v47  ;;  %761 = vst.msk [vmem:[#allocation2 + $0xe8] sm:$0xff] (!%p1466_p5), %vm731_vm4, %v1993_v48 }
  0xfe   : > { %v1995_v51 = vpop.f32.mrb[8].mxu0  ;;  %v1997_v52 = vpop.f32.mrb[8].mxu1 }
  0xff   : > { %v1622_v53 = vpop.f32.mrb[9].mxu0  ;;  %v1674_v54 = vpop.f32.mrb[9].mxu1  ;;  %736 = vst.msk [vmem:[#allocation2 + $0x20] sm:$0xff] (!%p1466_p5), %vm731_vm4, %v1995_v51  ;;  %762 = vst.msk [vmem:[#allocation2 + $0xf0] sm:$0xff] (!%p1466_p5), %vm731_vm4, %v1997_v52 }
 0x100   : > { %v1999_v55 = vpop.f32.mrb[10].mxu0  ;;  %v2001_v56 = vpop.f32.mrb[10].mxu1 }
 0x101   : > { %v1623_v57 = vpop.f32.mrb[11].mxu0  ;;  %v1675_v58 = vpop.f32.mrb[11].mxu1  ;;  %737 = vst.msk [vmem:[#allocation2 + $0x28] sm:$0xff] (!%p1466_p5), %vm731_vm4, %v1999_v55  ;;  %763 = vst.msk [vmem:[#allocation2 + $0xf8] sm:$0xff] (!%p1466_p5), %vm731_vm4, %v2001_v56 }
 0x106   : > { %v2003_v59 = vpop.f32.mrb[12].mxu0  ;;  %v2005_v60 = vpop.f32.mrb[12].mxu1 }
 0x107   : > { %v1626_v61 = vpop.f32.mrb[13].mxu0  ;;  %v1678_v62 = vpop.f32.mrb[13].mxu1  ;;  %738 = vst.msk [vmem:[#allocation2 + $0x30] sm:$0xff] (!%p1466_p5), %vm731_vm4, %v2003_v59  ;;  %764 = vst.msk [vmem:[#allocation2 + $0x100] sm:$0xff] (!%p1466_p5), %vm731_vm4, %v2005_v60 }
 0x108   : > { %v2007_v63 = vpop.f32.mrb[14].mxu0  ;;  %v2009_v0 = vpop.f32.mrb[14].mxu1 }
 0x109   : > { %v1627_v1 = vpop.f32.mrb[15].mxu0  ;;  %v1679_v2 = vpop.f32.mrb[15].mxu1  ;;  %739 = vst.msk [vmem:[#allocation2 + $0x38] sm:$0xff] (!%p1466_p5), %vm731_vm4, %v2007_v63  ;;  %765 = vst.msk [vmem:[#allocation2 + $0x108] sm:$0xff] (!%p1466_p5), %vm731_vm4, %v2009_v0 }
 0x10e   : > { %v2011_v3 = vpop.f32.mrb[16].mxu0  ;;  %v2013_v4 = vpop.f32.mrb[16].mxu1 }
 0x10f   : > { %v1630_v5 = vpop.f32.mrb[17].mxu0  ;;  %v1682_v6 = vpop.f32.mrb[17].mxu1  ;;  %740 = vst.msk [vmem:[#allocation2 + $0x40] sm:$0xff] (!%p1466_p5), %vm731_vm4, %v2011_v3  ;;  %766 = vst.msk [vmem:[#allocation2 + $0x110] sm:$0xff] (!%p1466_p5), %vm731_vm4, %v2013_v4 }
 0x110   : > { %v2015_v7 = vpop.f32.mrb[18].mxu0  ;;  %v2017_v8 = vpop.f32.mrb[18].mxu1 }
 0x111   : > { %v1631_v9 = vpop.f32.mrb[19].mxu0  ;;  %v1683_v10 = vpop.f32.mrb[19].mxu1  ;;  %741 = vst.msk [vmem:[#allocation2 + $0x48] sm:$0xff] (!%p1466_p5), %vm731_vm4, %v2015_v7  ;;  %767 = vst.msk [vmem:[#allocation2 + $0x118] sm:$0xff] (!%p1466_p5), %vm731_vm4, %v2017_v8 }
 0x116   : > { %v2019_v11 = vpop.f32.mrb[20].mxu0  ;;  %v2021_v12 = vpop.f32.mrb[20].mxu1 }
 0x117   : > { %v1634_v13 = vpop.f32.mrb[21].mxu0  ;;  %v1686_v14 = vpop.f32.mrb[21].mxu1  ;;  %742 = vst.msk [vmem:[#allocation2 + $0x50] sm:$0xff] (!%p1466_p5), %vm731_vm4, %v2019_v11  ;;  %768 = vst.msk [vmem:[#allocation2 + $0x120] sm:$0xff] (!%p1466_p5), %vm731_vm4, %v2021_v12 }
 0x118   : > { %v2023_v15 = vpop.f32.mrb[22].mxu0  ;;  %v2025_v16 = vpop.f32.mrb[22].mxu1 }
 0x119   : > { %v1635_v17 = vpop.f32.mrb[23].mxu0  ;;  %v1687_v18 = vpop.f32.mrb[23].mxu1  ;;  %743 = vst.msk [vmem:[#allocation2 + $0x58] sm:$0xff] (!%p1466_p5), %vm731_vm4, %v2023_v15  ;;  %769 = vst.msk [vmem:[#allocation2 + $0x128] sm:$0xff] (!%p1466_p5), %vm731_vm4, %v2025_v16 }
 0x11e   : > { %v2027_v19 = vpop.f32.mrb[24].mxu0  ;;  %v2029_v20 = vpop.f32.mrb[24].mxu1 }
 0x11f   : > { %v1638_v21 = vpop.f32.mrb[25].mxu0  ;;  %v1690_v22 = vpop.f32.mrb[25].mxu1  ;;  %744 = vst.msk [vmem:[#allocation2 + $0x60] sm:$0xff] (!%p1466_p5), %vm731_vm4, %v2027_v19  ;;  %770 = vst.msk [vmem:[#allocation2 + $0x130] sm:$0xff] (!%p1466_p5), %vm731_vm4, %v2029_v20 }
 0x120   : > { %v2031_v23 = vpop.f32.mrb[26].mxu0  ;;  %v2033_v24 = vpop.f32.mrb[26].mxu1 }
 0x121   : > { %v1639_v25 = vpop.f32.mrb[27].mxu0  ;;  %v1691_v26 = vpop.f32.mrb[27].mxu1  ;;  %745 = vst.msk [vmem:[#allocation2 + $0x68] sm:$0xff] (!%p1466_p5), %vm731_vm4, %v2031_v23  ;;  %771 = vst.msk [vmem:[#allocation2 + $0x138] sm:$0xff] (!%p1466_p5), %vm731_vm4, %v2033_v24 }
 0x126   : > { %v2035_v27 = vpop.f32.mrb[28].mxu0  ;;  %v2037_v28 = vpop.f32.mrb[28].mxu1 }
 0x127   : > { %v1642_v29 = vpop.f32.mrb[29].mxu0  ;;  %v1694_v30 = vpop.f32.mrb[29].mxu1  ;;  %746 = vst.msk [vmem:[#allocation2 + $0x70] sm:$0xff] (!%p1466_p5), %vm731_vm4, %v2035_v27  ;;  %772 = vst.msk [vmem:[#allocation2 + $0x140] sm:$0xff] (!%p1466_p5), %vm731_vm4, %v2037_v28 }
 0x128   : > { %v2039_v31 = vpop.f32.mrb[30].mxu0  ;;  %v2041_v32 = vpop.f32.mrb[30].mxu1 }
 0x129   : > { %v1643_v33 = vpop.f32.mrb[31].mxu0  ;;  %v1695_v34 = vpop.f32.mrb[31].mxu1  ;;  %747 = vst.msk [vmem:[#allocation2 + $0x78] sm:$0xff] (!%p1466_p5), %vm731_vm4, %v2039_v31  ;;  %773 = vst.msk [vmem:[#allocation2 + $0x148] sm:$0xff] (!%p1466_p5), %vm731_vm4, %v2041_v32 }
 0x12e   : > { %v2043_v37 = vpop.f32.mrb[32].mxu0  ;;  %v2045_v38 = vpop.f32.mrb[32].mxu1 }
 0x12f   : > { %v1646_v41 = vpop.f32.mrb[33].mxu0  ;;  %v1698_v42 = vpop.f32.mrb[33].mxu1  ;;  %748 = vst.msk [vmem:[#allocation2 + $0x80] sm:$0xff] (!%p1466_p5), %vm731_vm4, %v2043_v37  ;;  %774 = vst.msk [vmem:[#allocation2 + $0x150] sm:$0xff] (!%p1466_p5), %vm731_vm4, %v2045_v38 }
 0x130   : > { %v2047_v45 = vpop.f32.mrb[34].mxu0  ;;  %v2049_v46 = vpop.f32.mrb[34].mxu1 }
 0x131   : > { %v1647_v49 = vpop.f32.mrb[35].mxu0  ;;  %v1699_v50 = vpop.f32.mrb[35].mxu1  ;;  %749 = vst.msk [vmem:[#allocation2 + $0x88] sm:$0xff] (!%p1466_p5), %vm731_vm4, %v2047_v45  ;;  %775 = vst.msk [vmem:[#allocation2 + $0x158] sm:$0xff] (!%p1466_p5), %vm731_vm4, %v2049_v46 }
 0x136   : > { %v2051_v53 = vpop.f32.mrb[36].mxu0  ;;  %v2053_v54 = vpop.f32.mrb[36].mxu1 }
 0x137   : > { %v1650_v57 = vpop.f32.mrb[37].mxu0  ;;  %v1702_v58 = vpop.f32.mrb[37].mxu1  ;;  %750 = vst.msk [vmem:[#allocation2 + $0x90] sm:$0xff] (!%p1466_p5), %vm731_vm4, %v2051_v53  ;;  %776 = vst.msk [vmem:[#allocation2 + $0x160] sm:$0xff] (!%p1466_p5), %vm731_vm4, %v2053_v54 }
 0x138   : > { %v2055_v61 = vpop.f32.mrb[38].mxu0  ;;  %v2057_v62 = vpop.f32.mrb[38].mxu1 }
 0x139   : > { %v1651_v1 = vpop.f32.mrb[39].mxu0  ;;  %v1703_v2 = vpop.f32.mrb[39].mxu1  ;;  %751 = vst.msk [vmem:[#allocation2 + $0x98] sm:$0xff] (!%p1466_p5), %vm731_vm4, %v2055_v61  ;;  %777 = vst.msk [vmem:[#allocation2 + $0x168] sm:$0xff] (!%p1466_p5), %vm731_vm4, %v2057_v62 }
 0x13e   : > { %v2059_v5 = vpop.f32.mrb[40].mxu0  ;;  %v2061_v6 = vpop.f32.mrb[40].mxu1 }
 0x13f   : > { %v1654_v9 = vpop.f32.mrb[41].mxu0  ;;  %v1706_v10 = vpop.f32.mrb[41].mxu1  ;;  %752 = vst.msk [vmem:[#allocation2 + $0xa0] sm:$0xff] (!%p1466_p5), %vm731_vm4, %v2059_v5  ;;  %778 = vst.msk [vmem:[#allocation2 + $0x170] sm:$0xff] (!%p1466_p5), %vm731_vm4, %v2061_v6 }
 0x140   : > { %v2063_v13 = vpop.f32.mrb[42].mxu0  ;;  %v2065_v14 = vpop.f32.mrb[42].mxu1 }
 0x141   : > { %v1655_v17 = vpop.f32.mrb[43].mxu0  ;;  %v1707_v18 = vpop.f32.mrb[43].mxu1  ;;  %753 = vst.msk [vmem:[#allocation2 + $0xa8] sm:$0xff] (!%p1466_p5), %vm731_vm4, %v2063_v13  ;;  %779 = vst.msk [vmem:[#allocation2 + $0x178] sm:$0xff] (!%p1466_p5), %vm731_vm4, %v2065_v14 }
 0x146   : > { %v2067_v21 = vpop.f32.mrb[44].mxu0  ;;  %v2069_v22 = vpop.f32.mrb[44].mxu1 }
 0x147   : > { %v1658_v25 = vpop.f32.mrb[45].mxu0  ;;  %v1710_v26 = vpop.f32.mrb[45].mxu1  ;;  %754 = vst.msk [vmem:[#allocation2 + $0xb0] sm:$0xff] (!%p1466_p5), %vm731_vm4, %v2067_v21  ;;  %780 = vst.msk [vmem:[#allocation2 + $0x180] sm:$0xff] (!%p1466_p5), %vm731_vm4, %v2069_v22 }
 0x148   : > { %v2071_v29 = vpop.f32.mrb[46].mxu0  ;;  %v724_v30 = vpop.f32.mrb[46].mxu1 }
 0x149   : > { %v1659_v33 = vpop.f32.mrb[47].mxu0  ;;  %v1711_v34 = vpop.f32.mrb[47].mxu1  ;;  %755 = vst.msk [vmem:[#allocation2 + $0xb8] sm:$0xff] (!%p1466_p5), %vm731_vm4, %v2071_v29 }
 0x14b   : > { %730 = sbr.rel (%p1466_p5) target bundleno = 338 (0x152), region = 36 }
 0x14e   : > { %v2073_v41 = vpop.f32.mrb[48].mxu0 }
 0x14f   : > { %v1662_v42 = vpop.f32.mrb[49].mxu0  ;;  %756 = vst.msk [vmem:[#allocation2 + $0xc0] sm:$0xff] (!%p1466_p5), %vm731_vm4, %v2073_v41 }
 0x150   : > { %v2075_v49 = vpop.f32.mrb[50].mxu0 }
 0x151   : > { %v1663_v50 = vpop.f32.mrb[51].mxu0  ;;  %757 = vst.msk [vmem:[#allocation2 + $0xc8] sm:$0xff] (!%p1466_p5), %vm731_vm4, %v2075_v49 }
 0x152 PF: > { %p1467_p6 = scmp.le.s32.totalorder %s1794_s12, 0 }
 0x153   : > { %v785_v57 = vld [vmem:[#allocation2] sm:$0xff] (!%p1467_p6)  ;;  %vm883_vm5 = vcmask (!%p1467_p6), 523264   ;;  %v786_v58 = vld [vmem:[#allocation2 + $0x8] sm:$0xff] (!%p1467_p6)  ;;  %v787_v1 = vld [vmem:[#allocation2 + $0x10] sm:$0xff] (!%p1467_p6) }
 0x154   : > { %784 = sbr.rel (%p1467_p6) target bundleno = 367 (0x16f), region = 40  ;;  %v834_v2 = vmax.f32 (!%p1467_p6), %v785_v57, %v1979_v35  ;;  %v835_v9 = vmax.f32 (!%p1467_p6), %v786_v58, %v1983_v39  ;;  %v836_v10 = vmax.f32 (!%p1467_p6), %v787_v1, %v1987_v43  ;;  %v788_v17 = vld [vmem:[#allocation2 + $0x18] sm:$0xff] (!%p1467_p6)  ;;  %v789_v18 = vld [vmem:[#allocation2 + $0x20] sm:$0xff] (!%p1467_p6)  ;;  %v790_v25 = vld [vmem:[#allocation2 + $0x28] sm:$0xff] (!%p1467_p6) }
 0x155   : > { %v837_v26 = vmax.f32 (!%p1467_p6), %v788_v17, %v1991_v47  ;;  %v838_v30 = vmax.f32 (!%p1467_p6), %v789_v18, %v1995_v51  ;;  %v839_v33 = vmax.f32 (!%p1467_p6), %v790_v25, %v1999_v55  ;;  %v791_v34 = vld [vmem:[#allocation2 + $0x30] sm:$0xff] (!%p1467_p6)  ;;  %v792_v42 = vld [vmem:[#allocation2 + $0x38] sm:$0xff] (!%p1467_p6)  ;;  %v793_v50 = vld [vmem:[#allocation2 + $0x40] sm:$0xff] (!%p1467_p6) }
 0x156   : > { %884 = vst.msk [vmem:[#allocation2] sm:$0xff] (!%p1467_p6), %vm883_vm5, %v834_v2  ;;  %885 = vst.msk [vmem:[#allocation2 + $0x8] sm:$0xff] (!%p1467_p6), %vm883_vm5, %v835_v9  ;;  %v840_v35 = vmax.f32 (!%p1467_p6), %v791_v34, %v2003_v59  ;;  %v841_v39 = vmax.f32 (!%p1467_p6), %v792_v42, %v2007_v63  ;;  %v842_v43 = vmax.f32 (!%p1467_p6), %v793_v50, %v2011_v3  ;;  %v794_v47 = vld [vmem:[#allocation2 + $0x48] sm:$0xff] (!%p1467_p6)  ;;  %v795_v57 = vld [vmem:[#allocation2 + $0x50] sm:$0xff] (!%p1467_p6) }
 0x157   : > { %886 = vst.msk [vmem:[#allocation2 + $0x10] sm:$0xff] (!%p1467_p6), %vm883_vm5, %v836_v10  ;;  %v796_v51 = vld [vmem:[#allocation2 + $0x58] sm:$0xff] (!%p1467_p6)  ;;  %887 = vst.msk [vmem:[#allocation2 + $0x18] sm:$0xff] (!%p1467_p6), %vm883_vm5, %v837_v26  ;;  %v843_v55 = vmax.f32 (!%p1467_p6), %v794_v47, %v2015_v7  ;;  %v844_v58 = vmax.f32 (!%p1467_p6), %v795_v57, %v2019_v11  ;;  %v797_v59 = vld [vmem:[#allocation2 + $0x60] sm:$0xff] (!%p1467_p6) }
 0x158   : > { %888 = vst.msk [vmem:[#allocation2 + $0x20] sm:$0xff] (!%p1467_p6), %vm883_vm5, %v838_v30  ;;  %889 = vst.msk [vmem:[#allocation2 + $0x28] sm:$0xff] (!%p1467_p6), %vm883_vm5, %v839_v33  ;;  %v845_v1 = vmax.f32 (!%p1467_p6), %v796_v51, %v2023_v15  ;;  %v798_v2 = vld [vmem:[#allocation2 + $0x68] sm:$0xff] (!%p1467_p6)  ;;  %v799_v63 = vld [vmem:[#allocation2 + $0x70] sm:$0xff] (!%p1467_p6)  ;;  %v846_v3 = vmax.f32 (!%p1467_p6), %v797_v59, %v2027_v19 }
 0x159   : > { %890 = vst.msk [vmem:[#allocation2 + $0x30] sm:$0xff] (!%p1467_p6), %vm883_vm5, %v840_v35  ;;  %891 = vst.msk [vmem:[#allocation2 + $0x38] sm:$0xff] (!%p1467_p6), %vm883_vm5, %v841_v39  ;;  %v847_v9 = vmax.f32 (!%p1467_p6), %v798_v2, %v2031_v23  ;;  %v848_v10 = vmax.f32 (!%p1467_p6), %v799_v63, %v2035_v27  ;;  %v800_v7 = vld [vmem:[#allocation2 + $0x78] sm:$0xff] (!%p1467_p6)  ;;  %v801_v17 = vld [vmem:[#allocation2 + $0x80] sm:$0xff] (!%p1467_p6) }
 0x15a   : > { %892 = vst.msk [vmem:[#allocation2 + $0x40] sm:$0xff] (!%p1467_p6), %vm883_vm5, %v842_v43  ;;  %v802_v11 = vld [vmem:[#allocation2 + $0x88] sm:$0xff] (!%p1467_p6)  ;;  %893 = vst.msk [vmem:[#allocation2 + $0x48] sm:$0xff] (!%p1467_p6), %vm883_vm5, %v843_v55  ;;  %v849_v15 = vmax.f32 (!%p1467_p6), %v800_v7, %v2039_v31  ;;  %v850_v18 = vmax.f32 (!%p1467_p6), %v801_v17, %v2043_v37  ;;  %v803_v19 = vld [vmem:[#allocation2 + $0x90] sm:$0xff] (!%p1467_p6) }
 0x15b   : > { %894 = vst.msk [vmem:[#allocation2 + $0x50] sm:$0xff] %vm883_vm5, %v844_v58  ;;  %895 = vst.msk [vmem:[#allocation2 + $0x58] sm:$0xff] %vm883_vm5, %v845_v1  ;;  %v851_v25 = vmax.f32 %v802_v11, %v2047_v45  ;;  %v804_v26 = vld [vmem:[#allocation2 + $0x98] sm:$0xff]  ;;  %v805_v23 = vld [vmem:[#allocation2 + $0xa0] sm:$0xff]  ;;  %v852_v27 = vmax.f32 %v803_v19, %v2051_v53 }
 0x15c   : > { %896 = vst.msk [vmem:[#allocation2 + $0x60] sm:$0xff] %vm883_vm5, %v846_v3  ;;  %897 = vst.msk [vmem:[#allocation2 + $0x68] sm:$0xff] %vm883_vm5, %v847_v9  ;;  %v853_v30 = vmax.f32 %v804_v26, %v2055_v61  ;;  %v854_v33 = vmax.f32 %v805_v23, %v2059_v5  ;;  %v806_v31 = vld [vmem:[#allocation2 + $0xa8] sm:$0xff]  ;;  %v807_v34 = vld [vmem:[#allocation2 + $0xb0] sm:$0xff] }
 0x15d   : > { %898 = vst.msk [vmem:[#allocation2 + $0x70] sm:$0xff] %vm883_vm5, %v848_v10  ;;  %v808_v37 = vld [vmem:[#allocation2 + $0xb8] sm:$0xff]  ;;  %899 = vst.msk [vmem:[#allocation2 + $0x78] sm:$0xff] %vm883_vm5, %v849_v15  ;;  %v855_v45 = vmax.f32 %v806_v31, %v2063_v13  ;;  %v856_v42 = vmax.f32 %v807_v34, %v2067_v21  ;;  %v809_v53 = vld [vmem:[#allocation2 + $0xc0] sm:$0xff] }
 0x15e   : > { %900 = vst.msk [vmem:[#allocation2 + $0x80] sm:$0xff] %vm883_vm5, %v850_v18  ;;  %901 = vst.msk [vmem:[#allocation2 + $0x88] sm:$0xff] %vm883_vm5, %v851_v25  ;;  %v857_v50 = vmax.f32 %v808_v37, %v2071_v29  ;;  %v810_v35 = vld [vmem:[#allocation2 + $0xc8] sm:$0xff]  ;;  %v811_v61 = vld [vmem:[#allocation2 + $0xd0] sm:$0xff]  ;;  %v858_v5 = vmax.f32 %v809_v53, %v2073_v41 }
 0x15f   : > { %902 = vst.msk [vmem:[#allocation2 + $0x90] sm:$0xff] %vm883_vm5, %v852_v27  ;;  %903 = vst.msk [vmem:[#allocation2 + $0x98] sm:$0xff] %vm883_vm5, %v853_v30  ;;  %v859_v39 = vmax.f32 %v810_v35, %v2075_v49  ;;  %v860_v43 = vmax.f32 %v811_v61, %v1981_v36  ;;  %v812_v13 = vld [vmem:[#allocation2 + $0xd8] sm:$0xff]  ;;  %v813_v47 = vld [vmem:[#allocation2 + $0xe0] sm:$0xff] }
 0x160   : > { %904 = vst.msk [vmem:[#allocation2 + $0xa0] sm:$0xff] %vm883_vm5, %v854_v33  ;;  %v814_v21 = vld [vmem:[#allocation2 + $0xe8] sm:$0xff]  ;;  %905 = vst.msk [vmem:[#allocation2 + $0xa8] sm:$0xff] %vm883_vm5, %v855_v45  ;;  %v861_v29 = vmax.f32 %v812_v13, %v1985_v40  ;;  %v862_v57 = vmax.f32 %v813_v47, %v1989_v44  ;;  %v815_v41 = vld [vmem:[#allocation2 + $0xf0] sm:$0xff] }
 0x161   : > { %906 = vst.msk [vmem:[#allocation2 + $0xb0] sm:$0xff] %vm883_vm5, %v856_v42  ;;  %907 = vst.msk [vmem:[#allocation2 + $0xb8] sm:$0xff] %vm883_vm5, %v857_v50  ;;  %v863_v51 = vmax.f32 %v814_v21, %v1993_v48  ;;  %v816_v55 = vld [vmem:[#allocation2 + $0xf8] sm:$0xff]  ;;  %v817_v49 = vld [vmem:[#allocation2 + $0x100] sm:$0xff]  ;;  %v864_v36 = vmax.f32 %v815_v41, %v1997_v52 }
 0x162   : > { %908 = vst.msk [vmem:[#allocation2 + $0xc0] sm:$0xff] %vm883_vm5, %v858_v5  ;;  %909 = vst.msk [vmem:[#allocation2 + $0xc8] sm:$0xff] %vm883_vm5, %v859_v39  ;;  %v865_v58 = vmax.f32 %v816_v55, %v2001_v56  ;;  %v866_v1 = vmax.f32 %v817_v49, %v2005_v60  ;;  %v818_v40 = vld [vmem:[#allocation2 + $0x108] sm:$0xff]  ;;  %v819_v59 = vld [vmem:[#allocation2 + $0x110] sm:$0xff] }
 0x163   : > { %910 = vst.msk [vmem:[#allocation2 + $0xd0] sm:$0xff] %vm883_vm5, %v860_v43  ;;  %v820_v44 = vld [vmem:[#allocation2 + $0x118] sm:$0xff]  ;;  %911 = vst.msk [vmem:[#allocation2 + $0xd8] sm:$0xff] %vm883_vm5, %v861_v29  ;;  %v867_v48 = vmax.f32 %v818_v40, %v2009_v0  ;;  %v868_v2 = vmax.f32 %v819_v59, %v2013_v4  ;;  %v821_v52 = vld [vmem:[#allocation2 + $0x120] sm:$0xff] }
 0x164   : > { %912 = vst.msk [vmem:[#allocation2 + $0xe0] sm:$0xff] %vm883_vm5, %v862_v57  ;;  %913 = vst.msk [vmem:[#allocation2 + $0xe8] sm:$0xff] %vm883_vm5, %v863_v51  ;;  %v869_v63 = vmax.f32 %v820_v44, %v2017_v8  ;;  %v822_v3 = vld [vmem:[#allocation2 + $0x128] sm:$0xff]  ;;  %v823_v56 = vld [vmem:[#allocation2 + $0x130] sm:$0xff]  ;;  %v870_v60 = vmax.f32 %v821_v52, %v2021_v12 }
 0x165   : > { %914 = vst.msk [vmem:[#allocation2 + $0xf0] sm:$0xff] %vm883_vm5, %v864_v36  ;;  %915 = vst.msk [vmem:[#allocation2 + $0xf8] sm:$0xff] %vm883_vm5, %v865_v58  ;;  %v871_v9 = vmax.f32 %v822_v3, %v2025_v16  ;;  %v872_v10 = vmax.f32 %v823_v56, %v2029_v20  ;;  %v824_v0 = vld [vmem:[#allocation2 + $0x138] sm:$0xff]  ;;  %v825_v7 = vld [vmem:[#allocation2 + $0x140] sm:$0xff] }
 0x166   : > { %916 = vst.msk [vmem:[#allocation2 + $0x100] sm:$0xff] %vm883_vm5, %v866_v1  ;;  %v826_v4 = vld [vmem:[#allocation2 + $0x148] sm:$0xff]  ;;  %917 = vst.msk [vmem:[#allocation2 + $0x108] sm:$0xff] %vm883_vm5, %v867_v48  ;;  %v873_v8 = vmax.f32 %v824_v0, %v2033_v24  ;;  %v874_v17 = vmax.f32 %v825_v7, %v2037_v28  ;;  %v827_v12 = vld [vmem:[#allocation2 + $0x150] sm:$0xff] }
 0x167   : > { %918 = vst.msk [vmem:[#allocation2 + $0x110] sm:$0xff] %vm883_vm5, %v868_v2  ;;  %919 = vst.msk [vmem:[#allocation2 + $0x118] sm:$0xff] %vm883_vm5, %v869_v63  ;;  %v875_v11 = vmax.f32 %v826_v4, %v2041_v32  ;;  %v828_v15 = vld [vmem:[#allocation2 + $0x158] sm:$0xff]  ;;  %v829_v16 = vld [vmem:[#allocation2 + $0x160] sm:$0xff]  ;;  %v876_v20 = vmax.f32 %v827_v12, %v2045_v38 }
 0x168   : > { %920 = vst.msk [vmem:[#allocation2 + $0x120] sm:$0xff] %vm883_vm5, %v870_v60  ;;  %921 = vst.msk [vmem:[#allocation2 + $0x128] sm:$0xff] %vm883_vm5, %v871_v9  ;;  %v877_v18 = vmax.f32 %v828_v15, %v2049_v46  ;;  %v878_v25 = vmax.f32 %v829_v16, %v2053_v54  ;;  %v830_v24 = vld [vmem:[#allocation2 + $0x168] sm:$0xff]  ;;  %v831_v19 = vld [vmem:[#allocation2 + $0x170] sm:$0xff] }
 0x169   : > { %922 = vst.msk [vmem:[#allocation2 + $0x130] sm:$0xff] %vm883_vm5, %v872_v10  ;;  %v832_v28 = vld [vmem:[#allocation2 + $0x178] sm:$0xff]  ;;  %923 = vst.msk [vmem:[#allocation2 + $0x138] sm:$0xff] %vm883_vm5, %v873_v8  ;;  %v879_v32 = vmax.f32 %v830_v24, %v2057_v62  ;;  %v880_v26 = vmax.f32 %v831_v19, %v2061_v6  ;;  %v833_v38 = vld [vmem:[#allocation2 + $0x180] sm:$0xff] }
 0x16a   : > { %924 = vst.msk [vmem:[#allocation2 + $0x140] sm:$0xff] %vm883_vm5, %v874_v17  ;;  %925 = vst.msk [vmem:[#allocation2 + $0x148] sm:$0xff] %vm883_vm5, %v875_v11  ;;  %v881_v23 = vmax.f32 %v832_v28, %v2065_v14  ;;  %v882_v46 = vmax.f32 %v833_v38, %v2069_v22 }
 0x16b   : > { %926 = vst.msk [vmem:[#allocation2 + $0x150] sm:$0xff] %vm883_vm5, %v876_v20  ;;  %927 = vst.msk [vmem:[#allocation2 + $0x158] sm:$0xff] %vm883_vm5, %v877_v18 }
 0x16c   : > { %928 = vst.msk [vmem:[#allocation2 + $0x160] sm:$0xff] %vm883_vm5, %v878_v25  ;;  %929 = vst.msk [vmem:[#allocation2 + $0x168] sm:$0xff] %vm883_vm5, %v879_v32 }
 0x16d   : > { %930 = vst.msk [vmem:[#allocation2 + $0x170] sm:$0xff] %vm883_vm5, %v880_v26  ;;  %931 = vst.msk [vmem:[#allocation2 + $0x178] sm:$0xff] %vm883_vm5, %v881_v23 }
 0x16e   : > { %932 = vst.msk [vmem:[#allocation2 + $0x180] sm:$0xff] %vm883_vm5, %v882_v46 }
 0x16f PF: > { %p1468_p7 = scmp.ne.s32.totalorder %s1794_s12, 3 }
 0x170   : > { %v2279_v62 = vld [vmem:[%s2537_s2] ss:$0 sm:$0xff] (!%p1468_p7)  ;;  %vm1288_vm6 = vcmask (!%p1468_p7), 519168   ;;  %v950_v48 = vld [vmem:[#allocation2 + $0x68] sm:$0xff] (!%p1468_p7)  ;;  %v951_v2 = vld [vmem:[#allocation2 + $0x70] sm:$0xff] (!%p1468_p7) }
 0x171   : > { %936 = sbr.rel (%p1468_p7) target bundleno = 412 (0x19c), region = 44  ;;  %v937_v54 = vld [vmem:[#allocation2] sm:$0xff] (!%p1468_p7)  ;;  %v938_v6 = vld [vmem:[#allocation2 + $0x8] sm:$0xff] (!%p1468_p7)  ;;  %v952_v60 = vld [vmem:[#allocation2 + $0x78] sm:$0xff] (!%p1468_p7)  ;;  %v1006_v17 = vadd.f32 (!%p1468_p7), %v2279_v62, %v950_v48  ;;  %v1007_v11 = vadd.f32 (!%p1468_p7), %v2279_v62, %v951_v2 }
 0x172   : > { %v993_v14 = vadd.f32 (!%p1468_p7), %v2279_v62, %v937_v54  ;;  %v994_v22 = vadd.f32 (!%p1468_p7), %v2279_v62, %v938_v6  ;;  %v939_v27 = vld [vmem:[#allocation2 + $0x10] sm:$0xff] (!%p1468_p7)  ;;  %v940_v30 = vld [vmem:[#allocation2 + $0x18] sm:$0xff] (!%p1468_p7)  ;;  %v949_v58 = vld [vmem:[#allocation2 + $0x60] sm:$0xff] (!%p1468_p7)  ;;  %v1008_v20 = vadd.f32 (!%p1468_p7), %v2279_v62, %v952_v60 }
 0x173   : > { %v941_v33 = vld [vmem:[#allocation2 + $0x20] sm:$0xff] (!%p1468_p7)  ;;  %v995_v31 = vadd.f32 (!%p1468_p7), %v2279_v62, %v939_v27  ;;  %v996_v34 = vadd.f32 (!%p1468_p7), %v2279_v62, %v940_v30  ;;  %v942_v45 = vld [vmem:[#allocation2 + $0x28] sm:$0xff] (!%p1468_p7)  ;;  %v1005_v7 = vadd.f32 (!%p1468_p7), %v2279_v62, %v949_v58  ;;  %v1055_v28 = vmax.f32 (!%p1468_p7), %v1006_v17, 0.0  ;;  %v955_v26 = vld [vmem:[#allocation2 + $0x90] sm:$0xff] (!%p1468_p7) }
 0x174   : > { %v997_v37 = vadd.f32 (!%p1468_p7), %v2279_v62, %v941_v33  ;;  %v943_v42 = vld [vmem:[#allocation2 + $0x30] sm:$0xff] (!%p1468_p7)  ;;  %v944_v50 = vld [vmem:[#allocation2 + $0x38] sm:$0xff] (!%p1468_p7)  ;;  %v1042_v53 = vmax.f32 (!%p1468_p7), %v993_v14, 0.0  ;;  %v1043_v35 = vmax.f32 (!%p1468_p7), %v994_v22, 0.0  ;;  %v998_v61 = vadd.f32 (!%p1468_p7), %v2279_v62, %v942_v45  ;;  %v953_v18 = vld [vmem:[#allocation2 + $0x80] sm:$0xff] (!%p1468_p7) }
 0x175   : > { %v999_v5 = vadd.f32 (!%p1468_p7), %v2279_v62, %v943_v42  ;;  %v1044_v39 = vmax.f32 (!%p1468_p7), %v995_v31, 0.0  ;;  %v1045_v43 = vmax.f32 (!%p1468_p7), %v996_v34, 0.0  ;;  %v1000_v47 = vadd.f32 (!%p1468_p7), %v2279_v62, %v944_v50  ;;  %v945_v21 = vld [vmem:[#allocation2 + $0x40] sm:$0xff] (!%p1468_p7)  ;;  %v946_v29 = vld [vmem:[#allocation2 + $0x48] sm:$0xff] (!%p1468_p7)  ;;  %v956_v23 = vld [vmem:[#allocation2 + $0x98] sm:$0xff] (!%p1468_p7) }
 0x176   : > { %v1046_v13 = vmax.f32 (!%p1468_p7), %v997_v37, 0.0  ;;  %v1523_v57 = vpack.c.bf16 (!%p1468_p7), %v1042_v53, %v1042_v53  ;;  %v1524_v51 = vpack.c.bf16 (!%p1468_p7), %v1043_v35, %v1043_v35  ;;  %v1047_v41 = vmax.f32 (!%p1468_p7), %v998_v61, 0.0  ;;  %v947_v49 = vld [vmem:[#allocation2 + $0x50] sm:$0xff] (!%p1468_p7)  ;;  %v948_v36 = vld [vmem:[#allocation2 + $0x58] sm:$0xff] (!%p1468_p7)  ;;  %v954_v25 = vld [vmem:[#allocation2 + $0x88] sm:$0xff] (!%p1468_p7) }
 0x177   : > { %v1048_v55 = vmax.f32 (!%p1468_p7), %v999_v5, 0.0  ;;  %v1525_v1 = vpack.c.bf16 (!%p1468_p7), %v1044_v39, %v1044_v39  ;;  %v1526_v40 = vpack.c.bf16 (!%p1468_p7), %v1045_v43, %v1045_v43  ;;  %v1049_v44 = vmax.f32 (!%p1468_p7), %v1000_v47, 0.0  ;;  %v957_v38 = vld [vmem:[#allocation2 + $0xa0] sm:$0xff] (!%p1468_p7)  ;;  %v958_v22 = vld [vmem:[#allocation2 + $0xa8] sm:$0xff] (!%p1468_p7)  ;;  %v959_v27 = vld [vmem:[#allocation2 + $0xb0] sm:$0xff] (!%p1468_p7) }
 0x178   : > { %v1527_v59 = vpack.c.bf16 %v1046_v13, %v1046_v13  ;;  %1289 = vst.msk [vmem:[%s2538_s3] sm:$0xf] %vm1288_vm6, %v1523_v57  ;;  %1290 = vst.msk [vmem:[%s2538_s3 + $0x4] sm:$0xf] %vm1288_vm6, %v1524_v51  ;;  %v1528_v63 = vpack.c.bf16 %v1047_v41, %v1047_v41  ;;  %v1001_v3 = vadd.f32 %v2279_v62, %v945_v21  ;;  %v1054_v16 = vmax.f32 %v1005_v7, 0.0  ;;  %v960_v37 = vld [vmem:[#allocation2 + $0xb8] sm:$0xff] }
 0x179   : > { %v1529_v52 = vpack.c.bf16 %v1048_v55, %v1048_v55  ;;  %v1002_v56 = vadd.f32 %v2279_v62, %v946_v29  ;;  %1291 = vst.msk [vmem:[%s2538_s3 + $0x8] sm:$0xf] %vm1288_vm6, %v1525_v1  ;;  %1292 = vst.msk [vmem:[%s2538_s3 + $0xc] sm:$0xf] %vm1288_vm6, %v1526_v40  ;;  %v1530_v9 = vpack.c.bf16 %v1049_v44, %v1049_v44  ;;  %v1056_v32 = vmax.f32 %v1007_v11, 0.0  ;;  %v961_v29 = vld [vmem:[#allocation2 + $0xc0] sm:$0xff] }
 0x17a   : > { %1293 = vst.msk [vmem:[%s2538_s3 + $0x10] sm:$0xf] %vm1288_vm6, %v1527_v59  ;;  %v1003_v10 = vadd.f32 %v2279_v62, %v947_v49  ;;  %v1004_v0 = vadd.f32 %v2279_v62, %v948_v36  ;;  %1294 = vst.msk [vmem:[%s2538_s3 + $0x14] sm:$0xf] %vm1288_vm6, %v1528_v63  ;;  %v1050_v4 = vmax.f32 %v1001_v3, 0.0  ;;  %v1535_v6 = vpack.c.bf16 %v1054_v16, %v1054_v16  ;;  %v962_v57 = vld [vmem:[#allocation2 + $0xc8] sm:$0xff] }
 0x17b   : > { %1295 = vst.msk [vmem:[%s2538_s3 + $0x18] sm:$0xf] %vm1288_vm6, %v1529_v52  ;;  %v1051_v8 = vmax.f32 %v1002_v56, 0.0  ;;  %1296 = vst.msk [vmem:[%s2538_s3 + $0x1c] sm:$0xf] %vm1288_vm6, %v1530_v9  ;;  %v1057_v14 = vmax.f32 %v1008_v20, 0.0  ;;  %v1536_v30 = vpack.c.bf16 %v1055_v28, %v1055_v28  ;;  %v1537_v33 = vpack.c.bf16 %v1056_v32, %v1056_v32 }
 0x17c   : > { %v1052_v12 = vmax.f32 %v1003_v10, 0.0  ;;  %v1053_v15 = vmax.f32 %v1004_v0, 0.0  ;;  %v1531_v24 = vpack.c.bf16 %v1050_v4, %v1050_v4  ;;  %v1009_v31 = vadd.f32 %v2279_v62, %v953_v18  ;;  %1301 = vst.msk [vmem:[%s2538_s3 + $0x30] sm:$0xf] %vm1288_vm6, %v1535_v6  ;;  %v963_v36 = vld [vmem:[#allocation2 + $0xd0] sm:$0xff]  ;;  %v964_v58 = vld [vmem:[#allocation2 + $0xd8] sm:$0xff] }
 0x17d   : > { %v1532_v19 = vpack.c.bf16 %v1051_v8, %v1051_v8  ;;  %v1010_v34 = vadd.f32 %v2279_v62, %v954_v25  ;;  %v1538_v45 = vpack.c.bf16 %v1057_v14, %v1057_v14  ;;  %v1011_v42 = vadd.f32 %v2279_v62, %v955_v26  ;;  %1302 = vst.msk [vmem:[%s2538_s3 + $0x34] sm:$0xf] %vm1288_vm6, %v1536_v30  ;;  %v965_v1 = vld [vmem:[#allocation2 + $0xe0] sm:$0xff]  ;;  %v966_v2 = vld [vmem:[#allocation2 + $0xe8] sm:$0xff]  ;;  %v967_v63 = vld [vmem:[#allocation2 + $0xf0] sm:$0xff] }
 0x17e   : > { %v1533_v46 = vpack.c.bf16 %v1052_v12, %v1052_v12  ;;  %v1534_v54 = vpack.c.bf16 %v1053_v15, %v1053_v15  ;;  %1297 = vst.msk [vmem:[%s2538_s3 + $0x20] sm:$0xf] %vm1288_vm6, %v1531_v24  ;;  %v1012_v50 = vadd.f32 %v2279_v62, %v956_v23  ;;  %v1013_v53 = vadd.f32 %v2279_v62, %v957_v38  ;;  %v968_v9 = vld [vmem:[#allocation2 + $0xf8] sm:$0xff]  ;;  %v969_v25 = vld [vmem:[#allocation2 + $0x100] sm:$0xff]  ;;  %v970_v24 = vld [vmem:[#allocation2 + $0x108] sm:$0xff] }
 0x17f   : > { %1298 = vst.msk [vmem:[%s2538_s3 + $0x24] sm:$0xf] %vm1288_vm6, %v1532_v19  ;;  %1303 = vst.msk [vmem:[%s2538_s3 + $0x38] sm:$0xf] %vm1288_vm6, %v1537_v33  ;;  %v1058_v35 = vmax.f32 %v1009_v31, 0.0  ;;  %v1059_v61 = vmax.f32 %v1010_v34, 0.0  ;;  %v1014_v5 = vadd.f32 %v2279_v62, %v958_v22  ;;  %v1015_v39 = vadd.f32 %v2279_v62, %v959_v27 }
 0x180   : > { %1299 = vst.msk [vmem:[%s2538_s3 + $0x28] sm:$0xf] %vm1288_vm6, %v1533_v46  ;;  %1300 = vst.msk [vmem:[%s2538_s3 + $0x2c] sm:$0xf] %vm1288_vm6, %v1534_v54  ;;  %v1060_v43 = vmax.f32 %v1011_v42, 0.0  ;;  %v1061_v13 = vmax.f32 %v1012_v50, 0.0  ;;  %v1016_v21 = vadd.f32 %v2279_v62, %v960_v37  ;;  %v1017_v56 = vadd.f32 %v2279_v62, %v961_v29 }
 0x181   : > { %1304 = vst.msk [vmem:[%s2538_s3 + $0x3c] sm:$0xf] %vm1288_vm6, %v1538_v45  ;;  %v1062_v47 = vmax.f32 %v1013_v53, 0.0  ;;  %v1539_v51 = vpack.c.bf16 %v1058_v35, %v1058_v35  ;;  %v1540_v41 = vpack.c.bf16 %v1059_v61, %v1059_v61  ;;  %v1063_v55 = vmax.f32 %v1014_v5, 0.0  ;;  %v971_v23 = vld [vmem:[#allocation2 + $0x110] sm:$0xff]  ;;  %v972_v38 = vld [vmem:[#allocation2 + $0x118] sm:$0xff] }
 0x182   : > { %v1064_v49 = vmax.f32 %v1015_v39, 0.0  ;;  %v1541_v40 = vpack.c.bf16 %v1060_v43, %v1060_v43  ;;  %v1542_v59 = vpack.c.bf16 %v1061_v13, %v1061_v13  ;;  %v1065_v48 = vmax.f32 %v1016_v21, 0.0  ;;  %v973_v46 = vld [vmem:[#allocation2 + $0x120] sm:$0xff]  ;;  %v974_v27 = vld [vmem:[#allocation2 + $0x128] sm:$0xff]  ;;  %v975_v30 = vld [vmem:[#allocation2 + $0x130] sm:$0xff] }
 0x183   : > { %v1543_v44 = vpack.c.bf16 %v1062_v47, %v1062_v47  ;;  %1305 = vst.msk [vmem:[%s2538_s3 + $0x40] sm:$0xf] %vm1288_vm6, %v1539_v51  ;;  %1306 = vst.msk [vmem:[%s2538_s3 + $0x44] sm:$0xf] %vm1288_vm6, %v1540_v41  ;;  %v1544_v52 = vpack.c.bf16 %v1063_v55, %v1063_v55  ;;  %v1018_v60 = vadd.f32 %v2279_v62, %v962_v57  ;;  %v1066_v8 = vmax.f32 %v1017_v56, 0.0  ;;  %v976_v45 = vld [vmem:[#allocation2 + $0x138] sm:$0xff] }
 0x184   : > { %v1545_v3 = vpack.c.bf16 %v1064_v49, %v1064_v49  ;;  %1307 = vst.msk [vmem:[%s2538_s3 + $0x48] sm:$0xf] %vm1288_vm6, %v1541_v40  ;;  %1308 = vst.msk [vmem:[%s2538_s3 + $0x4c] sm:$0xf] %vm1288_vm6, %v1542_v59  ;;  %v1546_v10 = vpack.c.bf16 %v1065_v48, %v1065_v48  ;;  %v1019_v0 = vadd.f32 %v2279_v62, %v963_v36  ;;  %v977_v57 = vld [vmem:[#allocation2 + $0x140] sm:$0xff]  ;;  %v978_v51 = vld [vmem:[#allocation2 + $0x148] sm:$0xff] }
 0x185   : > { %1309 = vst.msk [vmem:[%s2538_s3 + $0x50] sm:$0xf] %vm1288_vm6, %v1543_v44  ;;  %v1020_v7 = vadd.f32 %v2279_v62, %v964_v58  ;;  %v1021_v4 = vadd.f32 %v2279_v62, %v965_v1  ;;  %1310 = vst.msk [vmem:[%s2538_s3 + $0x54] sm:$0xf] %vm1288_vm6, %v1544_v52  ;;  %v1067_v17 = vmax.f32 %v1018_v60, 0.0  ;;  %v1022_v11 = vadd.f32 %v2279_v62, %v966_v2  ;;  %v979_v58 = vld [vmem:[#allocation2 + $0x150] sm:$0xff] }
 0x186   : > { %1311 = vst.msk [vmem:[%s2538_s3 + $0x58] sm:$0xf] %vm1288_vm6, %v1545_v3  ;;  %v1023_v12 = vadd.f32 %v2279_v62, %v967_v63  ;;  %1312 = vst.msk [vmem:[%s2538_s3 + $0x5c] sm:$0xf] %vm1288_vm6, %v1546_v10  ;;  %v1068_v15 = vmax.f32 %v1019_v0, 0.0  ;;  %v1024_v18 = vadd.f32 %v2279_v62, %v968_v9  ;;  %v1547_v19 = vpack.c.bf16 %v1066_v8, %v1066_v8  ;;  %v980_v1 = vld [vmem:[#allocation2 + $0x158] sm:$0xff] }
 0x187   : > { %v1069_v16 = vmax.f32 %v1020_v7, 0.0  ;;  %v1070_v20 = vmax.f32 %v1021_v4, 0.0  ;;  %v1548_v28 = vpack.c.bf16 %v1067_v17, %v1067_v17  ;;  %v1071_v32 = vmax.f32 %v1022_v11, 0.0  ;;  %v981_v40 = vld [vmem:[#allocation2 + $0x160] sm:$0xff]  ;;  %v982_v63 = vld [vmem:[#allocation2 + $0x168] sm:$0xff]  ;;  %v983_v52 = vld [vmem:[#allocation2 + $0x170] sm:$0xff] }
 0x188   : > { %v1072_v26 = vmax.f32 %v1023_v12, 0.0  ;;  %v1549_v54 = vpack.c.bf16 %v1068_v15, %v1068_v15  ;;  %v1073_v22 = vmax.f32 %v1024_v18, 0.0  ;;  %1313 = vst.msk [vmem:[%s2538_s3 + $0x60] sm:$0xf] %vm1288_vm6, %v1547_v19  ;;  %v1025_v34 = vadd.f32 %v2279_v62, %v969_v25  ;;  %v984_v10 = vld [vmem:[#allocation2 + $0x178] sm:$0xff] }
 0x189   : > { %v1550_v6 = vpack.c.bf16 %v1069_v16, %v1069_v16  ;;  %v1551_v14 = vpack.c.bf16 %v1070_v20, %v1070_v20  ;;  %1314 = vst.msk [vmem:[%s2538_s3 + $0x64] sm:$0xf] %vm1288_vm6, %v1548_v28  ;;  %v1552_v33 = vpack.c.bf16 %v1071_v32, %v1071_v32  ;;  %v1026_v37 = vadd.f32 %v2279_v62, %v970_v24  ;;  %v985_v24 = vld [vmem:[#allocation2 + $0x180] sm:$0xff] }
 0x18a   : > { %v1553_v31 = vpack.c.bf16 %v1072_v26, %v1072_v26  ;;  %1315 = vst.msk [vmem:[%s2538_s3 + $0x68] sm:$0xf] %vm1288_vm6, %v1549_v54  ;;  %v1554_v42 = vpack.c.bf16 %v1073_v22, %v1073_v22  ;;  %v1027_v50 = vadd.f32 %v2279_v62, %v971_v23  ;;  %v1028_v53 = vadd.f32 %v2279_v62, %v972_v38 }
 0x18b   : > { %1316 = vst.msk [vmem:[%s2538_s3 + $0x6c] sm:$0xf] %vm1288_vm6, %v1550_v6  ;;  %1317 = vst.msk [vmem:[%s2538_s3 + $0x70] sm:$0xf] %vm1288_vm6, %v1551_v14  ;;  %v1029_v35 = vadd.f32 %v2279_v62, %v973_v46  ;;  %v1074_v61 = vmax.f32 %v1025_v34, 0.0  ;;  %v1075_v5 = vmax.f32 %v1026_v37, 0.0  ;;  %v1030_v39 = vadd.f32 %v2279_v62, %v974_v27 }
 0x18c   : > { %1318 = vst.msk [vmem:[%s2538_s3 + $0x74] sm:$0xf] %vm1288_vm6, %v1552_v33  ;;  %1319 = vst.msk [vmem:[%s2538_s3 + $0x78] sm:$0xf] %vm1288_vm6, %v1553_v31  ;;  %v1031_v43 = vadd.f32 %v2279_v62, %v975_v30  ;;  %v1076_v13 = vmax.f32 %v1027_v50, 0.0  ;;  %v1077_v47 = vmax.f32 %v1028_v53, 0.0  ;;  %v1032_v29 = vadd.f32 %v2279_v62, %v976_v45 }
 0x18d   : > { %1320 = vst.msk [vmem:[%s2538_s3 + $0x7c] sm:$0xf] %vm1288_vm6, %v1554_v42  ;;  %v1078_v21 = vmax.f32 %v1029_v35, 0.0  ;;  %v1555_v41 = vpack.c.bf16 %v1074_v61, %v1074_v61  ;;  %v1556_v55 = vpack.c.bf16 %v1075_v5, %v1075_v5  ;;  %v1079_v49 = vmax.f32 %v1030_v39, 0.0 }
 0x18e   : > { %v1080_v36 = vmax.f32 %v1031_v43, 0.0  ;;  %v1557_v59 = vpack.c.bf16 %v1076_v13, %v1076_v13  ;;  %v1558_v44 = vpack.c.bf16 %v1077_v47, %v1077_v47  ;;  %v1081_v2 = vmax.f32 %v1032_v29, 0.0 }
 0x18f   : > { %v1559_v48 = vpack.c.bf16 %v1078_v21, %v1078_v21  ;;  %1321 = vst.msk [vmem:[%s2538_s3 + $0x80] sm:$0xf] %vm1288_vm6, %v1555_v41  ;;  %1322 = vst.msk [vmem:[%s2538_s3 + $0x84] sm:$0xf] %vm1288_vm6, %v1556_v55  ;;  %v1560_v3 = vpack.c.bf16 %v1079_v49, %v1079_v49  ;;  %v1033_v60 = vadd.f32 %v2279_v62, %v977_v57 }
 0x190   : > { %v1561_v56 = vpack.c.bf16 %v1080_v36, %v1080_v36  ;;  %v1034_v9 = vadd.f32 %v2279_v62, %v978_v51  ;;  %1323 = vst.msk [vmem:[%s2538_s3 + $0x88] sm:$0xf] %vm1288_vm6, %v1557_v59  ;;  %1324 = vst.msk [vmem:[%s2538_s3 + $0x8c] sm:$0xf] %vm1288_vm6, %v1558_v44  ;;  %v1562_v0 = vpack.c.bf16 %v1081_v2, %v1081_v2 }
 0x191   : > { %1325 = vst.msk [vmem:[%s2538_s3 + $0x90] sm:$0xf] %vm1288_vm6, %v1559_v48  ;;  %v1035_v7 = vadd.f32 %v2279_v62, %v979_v58  ;;  %v1036_v4 = vadd.f32 %v2279_v62, %v980_v1  ;;  %v1037_v8 = vadd.f32 %v2279_v62, %v981_v40  ;;  %1326 = vst.msk [vmem:[%s2538_s3 + $0x94] sm:$0xf] %vm1288_vm6, %v1560_v3  ;;  %v1082_v17 = vmax.f32 %v1033_v60, 0.0 }
 0x192   : > { %1327 = vst.msk [vmem:[%s2538_s3 + $0x98] sm:$0xf] %vm1288_vm6, %v1561_v56  ;;  %v1083_v11 = vmax.f32 %v1034_v9, 0.0  ;;  %v1038_v12 = vadd.f32 %v2279_v62, %v982_v63  ;;  %v1039_v15 = vadd.f32 %v2279_v62, %v983_v52  ;;  %1328 = vst.msk [vmem:[%s2538_s3 + $0x9c] sm:$0xf] %vm1288_vm6, %v1562_v0  ;;  %v1040_v25 = vadd.f32 %v2279_v62, %v984_v10 }
 0x193   : > { %v1084_v16 = vmax.f32 %v1035_v7, 0.0  ;;  %v1085_v20 = vmax.f32 %v1036_v4, 0.0  ;;  %v1086_v18 = vmax.f32 %v1037_v8, 0.0  ;;  %v1563_v19 = vpack.c.bf16 %v1082_v17, %v1082_v17 }
 0x194   : > { %v1564_v28 = vpack.c.bf16 %v1083_v11, %v1083_v11  ;;  %v1087_v32 = vmax.f32 %v1038_v12, 0.0  ;;  %v1088_v26 = vmax.f32 %v1039_v15, 0.0  ;;  %v1089_v54 = vmax.f32 %v1040_v25, 0.0 }
 0x195   : > { %v1565_v23 = vpack.c.bf16 %v1084_v16, %v1084_v16  ;;  %v1566_v38 = vpack.c.bf16 %v1085_v20, %v1085_v20  ;;  %v1567_v46 = vpack.c.bf16 %v1086_v18, %v1086_v18  ;;  %1329 = vst.msk [vmem:[%s2538_s3 + $0xa0] sm:$0xf] %vm1288_vm6, %v1563_v19  ;;  %v1041_v22 = vadd.f32 %v2279_v62, %v985_v24 }
 0x196   : > { %1330 = vst.msk [vmem:[%s2538_s3 + $0xa4] sm:$0xf] %vm1288_vm6, %v1564_v28  ;;  %v1568_v6 = vpack.c.bf16 %v1087_v32, %v1087_v32  ;;  %v1569_v14 = vpack.c.bf16 %v1088_v26, %v1088_v26  ;;  %v1570_v27 = vpack.c.bf16 %v1089_v54, %v1089_v54 }
 0x197   : > { %1331 = vst.msk [vmem:[%s2538_s3 + $0xa8] sm:$0xf] %vm1288_vm6, %v1565_v23  ;;  %1332 = vst.msk [vmem:[%s2538_s3 + $0xac] sm:$0xf] %vm1288_vm6, %v1566_v38  ;;  %v1090_v62 = vmax.f32 %v1041_v22, 0.0 }
 0x198   : > { %1333 = vst.msk [vmem:[%s2538_s3 + $0xb0] sm:$0xf] %vm1288_vm6, %v1567_v46  ;;  %1334 = vst.msk [vmem:[%s2538_s3 + $0xb4] sm:$0xf] %vm1288_vm6, %v1568_v6 }
 0x199   : > { %1335 = vst.msk [vmem:[%s2538_s3 + $0xb8] sm:$0xf] %vm1288_vm6, %v1569_v14  ;;  %1336 = vst.msk [vmem:[%s2538_s3 + $0xbc] sm:$0xf] %vm1288_vm6, %v1570_v27  ;;  %v1571_v30 = vpack.c.bf16 %v1090_v62, %v1090_v62 }
 0x19b   : > { %1337 = vst.msk [vmem:[%s2538_s3 + $0xc0] sm:$0xf] %vm1288_vm6, %v1571_v30 }
 0x19c PF: > { %s13_s14 = sadd.s32 1, %s1802_s14   ;;  %s2539_s12 = smov %s1798_s13 }
 0x19d   : > { %p10_p8 = scmp.ge.s32.totalorder %s13_s14, 6   ;;  %s2540_s13 = smov %s2542_s15 }
 0x19f   :  { %12 = sbr.rel (!%p10_p8) target bundleno = 2 (0x2), region = 74 }

// kernel: lenet_fc_forward.4
= control target key start
LH: loop header
LB: loop body
LE: loop exit
PB: predicated region body
PF: predicated region fallthrough
CT: control target
= control target key end

     0   :  { %s2640_s12 = smov 0   ;;  %s2642_s13 = smov 0   ;;  %s3040_s0 = inlined_call_operand.vmem [shape: bf16[4,50,1600], index: 0, kind: input, shape index: {}]   ;;  %s3041_s1 = inlined_call_operand.vmem [shape: bf16[1600,128], index: 1, kind: input, shape index: {}]   ;;  %s3042_s2 = inlined_call_operand.vmem [shape: f32[1,128], index: 2, kind: input, shape index: {}]   ;;  %s3043_s3 = inlined_call_operand.vmem [shape: bf16[50,128], index: 3, kind: output, shape index: {}]  }
   0x1   :  { %s2644_s14 = smov 0  }
   0x2 LB: > { %s22_s15 = sadd.s32 1, %s2614_s13  ;;  %p1932_p0 = scmp.ge.s32.totalorder %s2618_s14, 1  ;;  %s2618_s14 = sphi %s2644_s14, %s13_s14   ;;  %s2614_s13 = sphi %s2642_s13, %s3045_s13   ;;  %s2610_s12 = sphi %s2640_s12, %s3044_s12  }
   0x3   : > { %p23_p1 = scmp.ge.s32.totalorder %s22_s15, 4  ;;  %p157_p2 = scmp.lt.s32.totalorder %s2618_s14, 5 }
   0x5   : > { %s3047_s15 = smov (%p23_p1, %s22_s15), 0  ;;  %p158_p3 = pnand %p1932_p0, %p157_p2 }
   0x6   : > { %v2426_v0 = vld [vmem:[%s3041_s1 + $0x40] sm:$0xff] (!%p158_p3)   ;;  %v2430_v4 = vld [vmem:[%s3041_s1 + $0x48] sm:$0xff] (!%p158_p3)   ;;  %v2434_v8 = vld [vmem:[%s3041_s1 + $0x50] sm:$0xff] (!%p158_p3)   ;;  %p187_p4 = scmp.lt.s32.totalorder (!%p158_p3), %s2610_s12, 3  ;;  %vm1293_vm0 = vcmask (!%p158_p3), 523264   ;;  %p2090_p5 = scmp.ne.s32.totalorder (!%p158_p3), %s2610_s12, 0 }
   0x7   : > { %161 = sbr.rel (%p158_p3) target bundleno = 381 (0x17d), region = 32  ;;  %v2427_v1 = vld [vmem:[%s3041_s1 + $0xc0] sm:$0xff] (!%p158_p3)   ;;  %2129 = vmatprep.subr.bf16.mxu0 (!%p158_p3), %v2426_v0  ;;  %v2431_v5 = vld [vmem:[%s3041_s1 + $0xc8] sm:$0xff] (!%p158_p3)   ;;  %v2435_v9 = vld [vmem:[%s3041_s1 + $0xd0] sm:$0xff] (!%p158_p3)  }
   0x8   : > { %v2428_v2 = vld [vmem:[%s3041_s1] sm:$0xff] (!%p158_p3)   ;;  %2169 = vmatprep.subr.bf16.mxu1 (!%p158_p3), %v2427_v1  ;;  %v2432_v6 = vld [vmem:[%s3041_s1 + $0x8] sm:$0xff] (!%p158_p3)   ;;  %v2436_v10 = vld [vmem:[%s3041_s1 + $0x10] sm:$0xff] (!%p158_p3)  }
   0x9   : > { %v2429_v3 = vld [vmem:[%s3041_s1 + $0x80] sm:$0xff] (!%p158_p3)   ;;  %2130 = vmatpush3.bf16.msra.mxu0 (!%p158_p3), %v2428_v2  ;;  %v2433_v7 = vld [vmem:[%s3041_s1 + $0x88] sm:$0xff] (!%p158_p3)   ;;  %v2437_v11 = vld [vmem:[%s3041_s1 + $0x90] sm:$0xff] (!%p158_p3)  }
   0xa   : > { %2170 = vmatpush3.bf16.msra.mxu1 (!%p158_p3), %v2429_v3  ;;  %2131 = vmatprep.subr.bf16.mxu0 (!%p158_p3), %v2430_v4  ;;  %v2438_v12 = vld [vmem:[%s3041_s1 + $0x58] sm:$0xff] (!%p158_p3)   ;;  %v2442_v16 = vld [vmem:[%s3041_s1 + $0x60] sm:$0xff] (!%p158_p3)   ;;  %v2446_v20 = vld [vmem:[%s3041_s1 + $0x68] sm:$0xff] (!%p158_p3)  }
   0xb   : > { %2171 = vmatprep.subr.bf16.mxu1 (!%p158_p3), %v2431_v5  ;;  %v2439_v13 = vld [vmem:[%s3041_s1 + $0xd8] sm:$0xff] (!%p158_p3)   ;;  %v2443_v17 = vld [vmem:[%s3041_s1 + $0xe0] sm:$0xff] (!%p158_p3)   ;;  %v2447_v21 = vld [vmem:[%s3041_s1 + $0xe8] sm:$0xff] (!%p158_p3)  }
   0xc   : > { %v2440_v14 = vld [vmem:[%s3041_s1 + $0x18] sm:$0xff] (!%p158_p3)   ;;  %v2444_v18 = vld [vmem:[%s3041_s1 + $0x20] sm:$0xff] (!%p158_p3)   ;;  %v2448_v22 = vld [vmem:[%s3041_s1 + $0x28] sm:$0xff] (!%p158_p3)  }
   0xd   : > { %2132 = vmatpush3.bf16.msra.mxu0 (!%p158_p3), %v2432_v6  ;;  %v2441_v15 = vld [vmem:[%s3041_s1 + $0x98] sm:$0xff] (!%p158_p3)   ;;  %v2445_v19 = vld [vmem:[%s3041_s1 + $0xa0] sm:$0xff] (!%p158_p3)   ;;  %v2449_v23 = vld [vmem:[%s3041_s1 + $0xa8] sm:$0xff] (!%p158_p3)  }
   0xe   : > { %2172 = vmatpush3.bf16.msra.mxu1 %v2433_v7  ;;  %2133 = vmatprep.subr.bf16.mxu0 %v2434_v8  ;;  %s188_s10 = scalar_select %p187_p4, %s2610_s12, 3  ;;  %v2450_v24 = vld [vmem:[%s3041_s1 + $0x70] sm:$0xff]   ;;  %v2454_v28 = vld [vmem:[%s3041_s1 + $0x78] sm:$0xff]   ;;  %v2464_v36 = vld [vmem:[%s3041_s1 + $0x140] sm:$0xff]  }
   0xf   : > { %2173 = vmatprep.subr.bf16.mxu1 %v2435_v9  ;;  %v2451_v25 = vld [vmem:[%s3041_s1 + $0xf0] sm:$0xff]   ;;  %v2455_v29 = vld [vmem:[%s3041_s1 + $0xf8] sm:$0xff]   ;;  %v2465_v37 = vld [vmem:[%s3041_s1 + $0x1c0] sm:$0xff]  }
  0x10   : > { %s2401_s23 = smul.u32 364, %s188_s10  ;;  %v2452_v26 = vld [vmem:[%s3041_s1 + $0x30] sm:$0xff]   ;;  %v2456_v30 = vld [vmem:[%s3041_s1 + $0x38] sm:$0xff]   ;;  %v2466_v38 = vld [vmem:[%s3041_s1 + $0x100] sm:$0xff]  }
  0x11   : > { %2134 = vmatpush3.bf16.msra.mxu0 %v2436_v10  ;;  %v2453_v27 = vld [vmem:[%s3041_s1 + $0xb0] sm:$0xff]   ;;  %v2457_v31 = vld [vmem:[%s3041_s1 + $0xb8] sm:$0xff]   ;;  %v2467_v39 = vld [vmem:[%s3041_s1 + $0x180] sm:$0xff]  }
  0x12   : > { %2174 = vmatpush3.bf16.msra.mxu1 %v2437_v11  ;;  %2135 = vmatprep.subr.bf16.mxu0 %v2438_v12  ;;  %s2755_s7 = scalar_lea.vmem %s3040_s0, %s2401_s23  ;;  %v2468_v40 = vld [vmem:[%s3041_s1 + $0x148] sm:$0xff]   ;;  %v2478_v48 = vld [vmem:[%s3041_s1 + $0x150] sm:$0xff]   ;;  %v2482_v52 = vld [vmem:[%s3041_s1 + $0x158] sm:$0xff]  }
  0x13   : > { %2175 = vmatprep.subr.bf16.mxu1 %v2439_v13  ;;  %v2458_v32 = vld [vmem:[%s2755_s7] ss:$52 sps:$4 sm:$0xff]   ;;  %v2460_v33 = vld [vmem:[%s2755_s7 + $0x4] ss:$52 sps:$4 sm:$0xff]   ;;  %v2461_v34 = vld [vmem:[%s2755_s7 + $0x8] ss:$52 sps:$4 sm:$0xff]  }
  0x14   : > { %v2463_v35 = vld [vmem:[%s2755_s7 + $0xc] ss:$52 sps:$4 sm:$0xff]   ;;  %1338 = vmatprep.mubr.bf16.mxu0 %v2460_v33  ;;  %v2474_v45 = vld [vmem:[%s2755_s7 + $0x74] ss:$52 sps:$4 sm:$0xff]   ;;  %v2477_v47 = vld [vmem:[%s2755_s7 + $0x70] ss:$52 sps:$4 sm:$0xff]  }
  0x15   : > { %2136 = vmatpush3.bf16.msra.mxu0 %v2440_v14  ;;  %1402 = vmatprep.mubr.bf16.mxu1 %v2463_v35  ;;  %v2469_v41 = vld [vmem:[%s3041_s1 + $0x1c8] sm:$0xff]   ;;  %v2479_v49 = vld [vmem:[%s3041_s1 + $0x1d0] sm:$0xff]   ;;  %v2483_v53 = vld [vmem:[%s3041_s1 + $0x1d8] sm:$0xff]  }
  0x16   : > { %2176 = vmatpush3.bf16.msra.mxu1 %v2441_v15  ;;  %2137 = vmatprep.subr.bf16.mxu0 %v2442_v16  ;;  %v2470_v42 = vld [vmem:[%s3041_s1 + $0x108] sm:$0xff]   ;;  %v2480_v50 = vld [vmem:[%s3041_s1 + $0x110] sm:$0xff]   ;;  %v2484_v54 = vld [vmem:[%s3041_s1 + $0x118] sm:$0xff]  }
  0x17   : > { %2177 = vmatprep.subr.bf16.mxu1 %v2443_v17  ;;  %v2471_v43 = vld [vmem:[%s3041_s1 + $0x188] sm:$0xff]   ;;  %v2481_v51 = vld [vmem:[%s3041_s1 + $0x190] sm:$0xff]   ;;  %v2485_v55 = vld [vmem:[%s3041_s1 + $0x198] sm:$0xff]  }
  0x18   : > { %v2472_v44 = vld [vmem:[%s2755_s7 + $0x6c] ss:$52 sps:$4 sm:$0xff]   ;;  %v2476_v46 = vld [vmem:[%s2755_s7 + $0x68] ss:$52 sps:$4 sm:$0xff]   ;;  %v2490_v58 = vld [vmem:[%s2755_s7 + $0xd0] ss:$52 sps:$4 sm:$0xff]  }
  0x19   : > { %2138 = vmatpush3.bf16.msra.mxu0 %v2444_v18  ;;  %v2486_v56 = vld [vmem:[%s2755_s7 + $0xd4] ss:$52 sps:$4 sm:$0xff]   ;;  %v2488_v57 = vld [vmem:[%s2755_s7 + $0xdc] ss:$52 sps:$4 sm:$0xff]   ;;  %v2491_v59 = vld [vmem:[%s2755_s7 + $0xd8] ss:$52 sps:$4 sm:$0xff]  }
  0x1a   : > { %2178 = vmatpush3.bf16.msra.mxu1 %v2445_v19  ;;  %2139 = vmatprep.subr.bf16.mxu0 %v2446_v20  ;;  %v2492_v60 = vld [vmem:[%s3041_s1 + $0x160] sm:$0xff]   ;;  %v2496_v0 = vld [vmem:[%s3041_s1 + $0x168] sm:$0xff]   ;;  %v246_v4 = vld [vmem:[%s2755_s7 + $0x138] sm:$0x11] }
  0x1b   : > { %2179 = vmatprep.subr.bf16.mxu1 %v2447_v21  ;;  %v2493_v61 = vld [vmem:[%s3041_s1 + $0x1e0] sm:$0xff]   ;;  %v2497_v1 = vld [vmem:[%s3041_s1 + $0x1e8] sm:$0xff]   ;;  %v1974_v6 = vcombine.high %v246_v4, %v246_v4  ;;  %v1973_v8 = vcombine.low %v246_v4, %v246_v4  ;;  %v2504_v10 = vld [vmem:[%s3041_s1 + $0x170] sm:$0xff]  }
  0x1c   : > { %v2494_v62 = vld [vmem:[%s3041_s1 + $0x120] sm:$0xff]   ;;  %v2498_v2 = vld [vmem:[%s3041_s1 + $0x128] sm:$0xff]   ;;  %v2505_v11 = vld [vmem:[%s3041_s1 + $0x1f0] sm:$0xff]  }
  0x1d   : > { %2140 = vmatpush3.bf16.msra.mxu0 %v2448_v22  ;;  %v2495_v63 = vld [vmem:[%s3041_s1 + $0x1a0] sm:$0xff]   ;;  %v2499_v3 = vld [vmem:[%s3041_s1 + $0x1a8] sm:$0xff]   ;;  %v2506_v12 = vld [vmem:[%s3041_s1 + $0x130] sm:$0xff]  }
  0x1e   : > { %2180 = vmatpush3.bf16.msra.mxu1 %v2449_v23  ;;  %2141 = vmatprep.subr.bf16.mxu0 %v2450_v24  ;;  %v247_v5 = vld [vmem:[%s2755_s7 + $0x140] sm:$0x11]  ;;  %v2507_v13 = vld [vmem:[%s3041_s1 + $0x1b0] sm:$0xff]   ;;  %v2508_v14 = vld [vmem:[%s3041_s1 + $0x178] sm:$0xff]  }
  0x1f   : > { %2181 = vmatprep.subr.bf16.mxu1 %v2451_v25  ;;  %v1976_v7 = vcombine.high %v247_v5, %v247_v5  ;;  %v1975_v9 = vcombine.low %v247_v5, %v247_v5  ;;  %v2509_v15 = vld [vmem:[%s3041_s1 + $0x1f8] sm:$0xff]   ;;  %v2512_v18 = vld [vmem:[%s2755_s7 + $0x10] ss:$52 sps:$4 sm:$0xff]   ;;  %v2514_v19 = vld [vmem:[%s2755_s7 + $0x14] ss:$52 sps:$4 sm:$0xff]  }
  0x20   : > { %v2510_v16 = vld [vmem:[%s3041_s1 + $0x138] sm:$0xff]   ;;  %v2518_v22 = vld [vmem:[%s3041_s1 + $0x240] sm:$0xff]   ;;  %v2533_v35 = vld [vmem:[%s3041_s1 + $0x2d0] sm:$0xff]  }
  0x21   : > { %2142 = vmatpush3.bf16.msra.mxu0 %v2452_v26  ;;  %v2511_v17 = vld [vmem:[%s3041_s1 + $0x1b8] sm:$0xff]   ;;  %v2519_v23 = vld [vmem:[%s3041_s1 + $0x2c0] sm:$0xff]   ;;  %v2522_v26 = vld [vmem:[%s3041_s1 + $0x248] sm:$0xff]  }
  0x22   : > { %2182 = vmatpush3.bf16.msra.mxu1 %v2453_v27  ;;  %2143 = vmatprep.subr.bf16.mxu0 %v2454_v28  ;;  %v2515_v20 = vld [vmem:[%s2755_s7 + $0x18] ss:$52 sps:$4 sm:$0xff]   ;;  %v2517_v21 = vld [vmem:[%s2755_s7 + $0x1c] ss:$52 sps:$4 sm:$0xff]   ;;  %v2520_v24 = vld [vmem:[%s3041_s1 + $0x200] sm:$0xff]  }
  0x23   : > { %2183 = vmatprep.subr.bf16.mxu1 %v2455_v29  ;;  %v2521_v25 = vld [vmem:[%s3041_s1 + $0x280] sm:$0xff]   ;;  %v2523_v27 = vld [vmem:[%s3041_s1 + $0x2c8] sm:$0xff]  }
  0x24   : > { %v2524_v28 = vld [vmem:[%s3041_s1 + $0x208] sm:$0xff]   ;;  %v2531_v33 = vld [vmem:[%s2755_s7 + $0x80] ss:$52 sps:$4 sm:$0xff]   ;;  %v2568_v5 = vld [vmem:[%s2755_s7 + $0x24] ss:$52 sps:$4 sm:$0xff]  }
  0x25   : > { %2144 = vmatpush3.bf16.msra.mxu0 %v2456_v30  ;;  %v2525_v29 = vld [vmem:[%s3041_s1 + $0x288] sm:$0xff]   ;;  %v2526_v30 = vld [vmem:[%s2755_s7 + $0x7c] ss:$52 sps:$4 sm:$0xff]   ;;  %v2566_v4 = vld [vmem:[%s2755_s7 + $0x20] ss:$52 sps:$4 sm:$0xff]  }
  0x26   : > { %2184 = vmatpush3.bf16.msra.mxu1 %v2457_v31  ;;  %2209 = vmatprep.subr.bf16.mxu0 %v2464_v36  ;;  %v2528_v31 = vld [vmem:[%s2755_s7 + $0x84] ss:$52 sps:$4 sm:$0xff]   ;;  %v2534_v36 = vld [vmem:[%s3041_s1 + $0x210] sm:$0xff]  }
  0x27   : > { %2249 = vmatprep.subr.bf16.mxu1 %v2465_v37  ;;  %v2535_v37 = vld [vmem:[%s3041_s1 + $0x290] sm:$0xff]  }
  0x28   : > { %1339 = vmatmul.mubr.bf16.vlgmr.msra.gmra.mrb[0].mxu0 %v2458_v32  ;;  %v2530_v32 = vld [vmem:[%s2755_s7 + $0x78] ss:$52 sps:$4 sm:$0xff]  }
  0x29   : > { %1403 = vmatmul.mubr.bf16.vlgmr.msra.gmra.mrb[0].mxu1 %v2461_v34  ;;  %2210 = vmatpush3.bf16.msra.mxu0 %v2466_v38  ;;  %v2532_v34 = vld [vmem:[%s3041_s1 + $0x250] sm:$0xff]   ;;  %v2536_v38 = vld [vmem:[%s3041_s1 + $0x258] sm:$0xff]  }
  0x2a   : > { %2250 = vmatpush3.bf16.msra.mxu1 %v2467_v39  ;;  %2211 = vmatprep.subr.bf16.mxu0 %v2468_v40  ;;  %v2537_v39 = vld [vmem:[%s3041_s1 + $0x2d8] sm:$0xff]  }
  0x2b   : > { %2251 = vmatprep.subr.bf16.mxu1 %v2469_v41  ;;  %1346 = vmatprep.mubr.bf16.mxu0 %v2472_v44  ;;  %v2538_v40 = vld [vmem:[%s3041_s1 + $0x218] sm:$0xff]   ;;  %v2544_v44 = vld [vmem:[%s2755_s7 + $0xe0] ss:$52 sps:$4 sm:$0xff]  }
  0x2c   : > { %1410 = vmatprep.mubr.bf16.mxu1 %v2474_v45  ;;  %v2539_v41 = vld [vmem:[%s3041_s1 + $0x298] sm:$0xff]  }
  0x2d   : > { %2212 = vmatpush3.bf16.msra.mxu0 %v2470_v42  ;;  %v2540_v42 = vld [vmem:[%s2755_s7 + $0xe4] ss:$52 sps:$4 sm:$0xff]   ;;  %v2545_v45 = vld [vmem:[%s2755_s7 + $0xe8] ss:$52 sps:$4 sm:$0xff]  }
  0x2e   : > { %2252 = vmatpush3.bf16.msra.mxu1 %v2471_v43  ;;  %2213 = vmatprep.subr.bf16.mxu0 %v2478_v48  ;;  %v2542_v43 = vld [vmem:[%s2755_s7 + $0xec] ss:$52 sps:$4 sm:$0xff]  }
  0x2f   : > { %2253 = vmatprep.subr.bf16.mxu1 %v2479_v49  ;;  %v2548_v48 = vld [vmem:[%s3041_s1 + $0x220] sm:$0xff]  }
  0x30   : > { %1347 = vmatmul.mubr.bf16.gmra.mrb[4].mxu0 %v2476_v46  ;;  %v2546_v46 = vld [vmem:[%s3041_s1 + $0x260] sm:$0xff]  }
  0x31   : > { %1411 = vmatmul.mubr.bf16.gmra.mrb[4].mxu1 %v2477_v47  ;;  %2214 = vmatpush3.bf16.msra.mxu0 %v2480_v50  ;;  %v2547_v47 = vld [vmem:[%s3041_s1 + $0x2e0] sm:$0xff]   ;;  %v2550_v50 = vld [vmem:[%s3041_s1 + $0x268] sm:$0xff]  }
  0x32   : > { %2254 = vmatpush3.bf16.msra.mxu1 %v2481_v51  ;;  %2215 = vmatprep.subr.bf16.mxu0 %v2482_v52  ;;  %v2549_v49 = vld [vmem:[%s3041_s1 + $0x2a0] sm:$0xff]   ;;  %v2551_v51 = vld [vmem:[%s3041_s1 + $0x2e8] sm:$0xff]  }
  0x33   : > { %2255 = vmatprep.subr.bf16.mxu1 %v2483_v53  ;;  %1354 = vmatprep.mubr.bf16.mxu0 %v2486_v56  ;;  %v2552_v52 = vld [vmem:[%s3041_s1 + $0x228] sm:$0xff]   ;;  %v249_v56 = vld [vmem:[%s2755_s7 + $0x150] sm:$0x11] }
  0x34   : > { %1418 = vmatprep.mubr.bf16.mxu1 %v2488_v57  ;;  %v2553_v53 = vld [vmem:[%s3041_s1 + $0x2a8] sm:$0xff]  }
  0x35   : > { %2216 = vmatpush3.bf16.msra.mxu0 %v2484_v54  ;;  %v248_v54 = vld [vmem:[%s2755_s7 + $0x148] sm:$0x11] }
  0x36   : > { %2256 = vmatpush3.bf16.msra.mxu1 %v2485_v55  ;;  %2217 = vmatprep.subr.bf16.mxu0 %v2492_v60  ;;  %v1978_v55 = vcombine.high %v248_v54, %v248_v54  ;;  %v1977_v57 = vcombine.low %v248_v54, %v248_v54  ;;  %v2558_v60 = vld [vmem:[%s3041_s1 + $0x270] sm:$0xff]  }
  0x37   : > { %2257 = vmatprep.subr.bf16.mxu1 %v2493_v61  ;;  %v2559_v61 = vld [vmem:[%s3041_s1 + $0x2f0] sm:$0xff]  }
  0x38   : > { %1355 = vmatmul.mubr.bf16.gmra.mrb[8].mxu0 %v2490_v58  ;;  %v1980_v58 = vcombine.high %v249_v56, %v249_v56 }
  0x39   : > { %1419 = vmatmul.mubr.bf16.gmra.mrb[8].mxu1 %v2491_v59  ;;  %2218 = vmatpush3.bf16.msra.mxu0 %v2494_v62  ;;  %v1979_v59 = vcombine.low %v249_v56, %v249_v56  ;;  %v2560_v62 = vld [vmem:[%s3041_s1 + $0x230] sm:$0xff]  }
  0x3a   : > { %2258 = vmatpush3.bf16.msra.mxu1 %v2495_v63  ;;  %2219 = vmatprep.subr.bf16.mxu0 %v2496_v0  ;;  %v2561_v63 = vld [vmem:[%s3041_s1 + $0x2b0] sm:$0xff]   ;;  %v2562_v0 = vld [vmem:[%s3041_s1 + $0x278] sm:$0xff]  }
  0x3b   : > { %2259 = vmatprep.subr.bf16.mxu1 %v2497_v1  ;;  %1362 = vmatprep.mubr.bf16.mxu0 %v1974_v6  ;;  %v2563_v1 = vld [vmem:[%s3041_s1 + $0x2f8] sm:$0xff]  }
  0x3c   : > { %1426 = vmatprep.mubr.bf16.mxu1 %v1976_v7  ;;  %v2569_v6 = vld [vmem:[%s2755_s7 + $0x28] ss:$52 sps:$4 sm:$0xff]   ;;  %v2571_v7 = vld [vmem:[%s2755_s7 + $0x2c] ss:$52 sps:$4 sm:$0xff]  }
  0x3d   : > { %2220 = vmatpush3.bf16.msra.mxu0 %v2498_v2  ;;  %v2564_v2 = vld [vmem:[%s3041_s1 + $0x238] sm:$0xff]  }
  0x3e   : > { %2260 = vmatpush3.bf16.msra.mxu1 %v2499_v3  ;;  %2221 = vmatprep.subr.bf16.mxu0 %v2504_v10  ;;  %v2565_v3 = vld [vmem:[%s3041_s1 + $0x2b8] sm:$0xff]   ;;  %v2575_v10 = vld [vmem:[%s2755_s7 + $0x94] ss:$52 sps:$4 sm:$0xff]  }
  0x3f   : > { %2261 = vmatprep.subr.bf16.mxu1 %v2505_v11  ;;  %v2579_v11 = vld [vmem:[%s3041_s1 + $0x308] sm:$0xff]  }
  0x40   : > { %1363 = vmatmul.mubr.bf16.gmra.mrb[12].mxu0 %v1973_v8  ;;  %v2572_v8 = vld [vmem:[%s3041_s1 + $0x300] sm:$0xff]  }
  0x41   : > { %1427 = vmatmul.mubr.bf16.gmra.mrb[12].mxu1 %v1975_v9  ;;  %2222 = vmatpush3.bf16.msra.mxu0 %v2506_v12  ;;  %v2573_v9 = vld [vmem:[%s2755_s7 + $0x8c] ss:$52 sps:$4 sm:$0xff]   ;;  %v2577_v12 = vld [vmem:[%s2755_s7 + $0x88] ss:$52 sps:$4 sm:$0xff]  }
  0x42   : > { %2262 = vmatpush3.bf16.msra.mxu1 %v2507_v13  ;;  %2223 = vmatprep.subr.bf16.mxu0 %v2508_v14  ;;  %v2578_v13 = vld [vmem:[%s2755_s7 + $0x90] ss:$52 sps:$4 sm:$0xff]   ;;  %v2580_v14 = vld [vmem:[%s2755_s7 + $0xf4] ss:$52 sps:$4 sm:$0xff]  }
  0x43   : > { %2263 = vmatprep.subr.bf16.mxu1 %v2509_v15  ;;  %1466 = vmatprep.mubr.bf16.mxu0 %v2514_v19  ;;  %v2582_v15 = vld [vmem:[%s2755_s7 + $0xfc] ss:$52 sps:$4 sm:$0xff]   ;;  %v251_v19 = vld [vmem:[%s2755_s7 + $0x160] sm:$0x11] }
  0x44   : > { %1530 = vmatprep.mubr.bf16.mxu1 %v2517_v21  ;;  %v2585_v21 = vld [vmem:[%s2755_s7 + $0xf8] ss:$52 sps:$4 sm:$0xff]  }
  0x45   : > { %2224 = vmatpush3.bf16.msra.mxu0 %v2510_v16  ;;  %v2586_v16 = vld [vmem:[%s3041_s1 + $0x310] sm:$0xff]  }
  0x46   : > { %2264 = vmatpush3.bf16.msra.mxu1 %v2511_v17  ;;  %2289 = vmatprep.subr.bf16.mxu0 %v2518_v22  ;;  %v2591_v17 = vld [vmem:[%s3041_s1 + $0x318] sm:$0xff]  }
  0x47   : > { %2329 = vmatprep.subr.bf16.mxu1 %v2519_v23  ;;  %v1984_v23 = vcombine.high %v251_v19, %v251_v19 }
  0x48   : > { %1467 = vmatmul.mubr.bf16.vlgmr.msra.gmra.mrb[16].mxu0 %v2512_v18  ;;  %v250_v18 = vld [vmem:[%s2755_s7 + $0x158] sm:$0x11] }
  0x49   : > { %1531 = vmatmul.mubr.bf16.vlgmr.msra.gmra.mrb[16].mxu1 %v2515_v20  ;;  %2290 = vmatpush3.bf16.msra.mxu0 %v2520_v24  ;;  %v2584_v20 = vld [vmem:[%s2755_s7 + $0xf0] ss:$52 sps:$4 sm:$0xff]   ;;  %v1982_v22 = vcombine.high %v250_v18, %v250_v18  ;;  %v1981_v24 = vcombine.low %v250_v18, %v250_v18 }
  0x4a   : > { %2330 = vmatpush3.bf16.msra.mxu1 %v2521_v25  ;;  %2291 = vmatprep.subr.bf16.mxu0 %v2522_v26  ;;  %v1983_v25 = vcombine.low %v251_v19, %v251_v19  ;;  %v2592_v26 = vld [vmem:[%s2755_s7 + $0x30] ss:$52 sps:$4 sm:$0xff]  }
  0x4b   : > { %2331 = vmatprep.subr.bf16.mxu1 %v2523_v27  ;;  %1474 = vmatprep.mubr.bf16.mxu0 %v2526_v30  ;;  %v2593_v27 = vld [vmem:[%s2755_s7 + $0x100] ss:$52 sps:$4 sm:$0xff]  }
  0x4c   : > { %1538 = vmatprep.mubr.bf16.mxu1 %v2528_v31 }
  0x4d   : > { %2292 = vmatpush3.bf16.msra.mxu0 %v2524_v28  ;;  %v2594_v28 = vld [vmem:[%s2755_s7 + $0x98] ss:$52 sps:$4 sm:$0xff]  }
  0x4e   : > { %2332 = vmatpush3.bf16.msra.mxu1 %v2525_v29  ;;  %2293 = vmatprep.subr.bf16.mxu0 %v2532_v34  ;;  %v2595_v29 = vld [vmem:[%s2755_s7 + $0x168] ss:$0 sps:$4 sm:$0x11]  }
  0x4f   : > { %2333 = vmatprep.subr.bf16.mxu1 %v2533_v35 }
  0x50   : > { %1475 = vmatmul.mubr.bf16.gmra.mrb[20].mxu0 %v2530_v32 }
  0x51   : > { %1539 = vmatmul.mubr.bf16.gmra.mrb[20].mxu1 %v2531_v33  ;;  %2294 = vmatpush3.bf16.msra.mxu0 %v2534_v36 }
  0x52   : > { %2334 = vmatpush3.bf16.msra.mxu1 %v2535_v37  ;;  %2295 = vmatprep.subr.bf16.mxu0 %v2536_v38 }
  0x53   : > { %2335 = vmatprep.subr.bf16.mxu1 %v2537_v39  ;;  %1482 = vmatprep.mubr.bf16.mxu0 %v2540_v42 }
  0x54   : > { %1546 = vmatprep.mubr.bf16.mxu1 %v2542_v43 }
  0x55   : > { %2296 = vmatpush3.bf16.msra.mxu0 %v2538_v40 }
  0x56   : > { %2336 = vmatpush3.bf16.msra.mxu1 %v2539_v41  ;;  %2297 = vmatprep.subr.bf16.mxu0 %v2546_v46 }
  0x57   : > { %2337 = vmatprep.subr.bf16.mxu1 %v2547_v47 }
  0x58   : > { %1483 = vmatmul.mubr.bf16.gmra.mrb[24].mxu0 %v2544_v44 }
  0x59   : > { %1547 = vmatmul.mubr.bf16.gmra.mrb[24].mxu1 %v2545_v45  ;;  %2298 = vmatpush3.bf16.msra.mxu0 %v2548_v48 }
  0x5a   : > { %2338 = vmatpush3.bf16.msra.mxu1 %v2549_v49  ;;  %2299 = vmatprep.subr.bf16.mxu0 %v2550_v50 }
  0x5b   : > { %2339 = vmatprep.subr.bf16.mxu1 %v2551_v51  ;;  %1490 = vmatprep.mubr.bf16.mxu0 %v1978_v55 }
  0x5c   : > { %1554 = vmatprep.mubr.bf16.mxu1 %v1980_v58 }
  0x5d   : > { %2300 = vmatpush3.bf16.msra.mxu0 %v2552_v52 }
  0x5e   : > { %2340 = vmatpush3.bf16.msra.mxu1 %v2553_v53  ;;  %2301 = vmatprep.subr.bf16.mxu0 %v2558_v60 }
  0x5f   : > { %2341 = vmatprep.subr.bf16.mxu1 %v2559_v61 }
  0x60   : > { %1491 = vmatmul.mubr.bf16.gmra.mrb[28].mxu0 %v1977_v57 }
  0x61   : > { %1555 = vmatmul.mubr.bf16.gmra.mrb[28].mxu1 %v1979_v59  ;;  %2302 = vmatpush3.bf16.msra.mxu0 %v2560_v62 }
  0x62   : > { %2342 = vmatpush3.bf16.msra.mxu1 %v2561_v63  ;;  %2303 = vmatprep.subr.bf16.mxu0 %v2562_v0 }
  0x63   : > { %2343 = vmatprep.subr.bf16.mxu1 %v2563_v1  ;;  %1594 = vmatprep.mubr.bf16.mxu0 %v2568_v5 }
  0x64   : > { %1658 = vmatprep.mubr.bf16.mxu1 %v2571_v7 }
  0x65   : > { %2304 = vmatpush3.bf16.msra.mxu0 %v2564_v2 }
  0x66   : > { %2344 = vmatpush3.bf16.msra.mxu1 %v2565_v3  ;;  %2377 = vmatprep.subr.bf16.mxu0 %v2572_v8 }
  0x67   : > { %2393 = vmatprep.subr.bf16.mxu1 %v2572_v8 }
  0x68   : > { %1595 = vmatmul.mubr.bf16.vlgmr.msra.gmra.mrb[32].mxu0 %v2566_v4 }
  0x69   : > { %1659 = vmatmul.mubr.bf16.vlgmr.msra.gmra.mrb[32].mxu1 %v2569_v6  ;;  %2378 = vmatpush3.bf16.msra.mxu0 %v2572_v8 }
  0x6a   : > { %2397 = vmatpush3.bf16.msra.mxu1 %v2572_v8  ;;  %1602 = vmatprep.mubr.bf16.mxu0 %v2573_v9 }
  0x6b   : > { %1666 = vmatprep.mubr.bf16.mxu1 %v2575_v10  ;;  %2379 = vmatprep.subr.bf16.mxu0 %v2579_v11 }
  0x6c   : > { %2394 = vmatprep.subr.bf16.mxu1 %v2579_v11 }
  0x6d   : > { %2380 = vmatpush3.bf16.msra.mxu0 %v2579_v11 }
  0x6e   : > { %2398 = vmatpush3.bf16.msra.mxu1 %v2579_v11  ;;  %2381 = vmatprep.subr.bf16.mxu0 %v2586_v16 }
  0x6f   : > { %2395 = vmatprep.subr.bf16.mxu1 %v2586_v16 }
  0x70   : > { %1603 = vmatmul.mubr.bf16.gmra.mrb[36].mxu0 %v2577_v12 }
  0x71   : > { %1667 = vmatmul.mubr.bf16.gmra.mrb[36].mxu1 %v2578_v13  ;;  %1610 = vmatprep.mubr.bf16.mxu0 %v2580_v14 }
  0x72   : > { %1674 = vmatprep.mubr.bf16.mxu1 %v2582_v15  ;;  %2382 = vmatpush3.bf16.msra.mxu0 %v2586_v16 }
  0x73   : > { %2399 = vmatpush3.bf16.msra.mxu1 %v2586_v16  ;;  %2383 = vmatprep.subr.bf16.mxu0 %v2591_v17 }
  0x74   : > { %2396 = vmatprep.subr.bf16.mxu1 %v2591_v17 }
  0x76   : > { %2384 = vmatpush3.bf16.msra.mxu0 %v2591_v17 }
  0x77   : > { %2400 = vmatpush3.bf16.msra.mxu1 %v2591_v17 }
  0x78   : > { %1611 = vmatmul.mubr.bf16.gmra.mrb[40].mxu0 %v2584_v20 }
  0x79   : > { %1675 = vmatmul.mubr.bf16.gmra.mrb[40].mxu1 %v2585_v21  ;;  %1618 = vmatprep.mubr.bf16.mxu0 %v1982_v22 }
  0x7a   : > { %1682 = vmatprep.mubr.bf16.mxu1 %v1984_v23 }
  0x80   : > { %1619 = vmatmul.mubr.bf16.gmra.mrb[44].mxu0 %v1981_v24 }
  0x81   : > { %1683 = vmatmul.mubr.bf16.gmra.mrb[44].mxu1 %v1983_v25  ;;  %2385 = vmatprep.mubr.msk.bf16.mxu0 %vm1293_vm0, %v2592_v26 }
  0x82   : > { %2389 = vmatprep.mubr.msk.bf16.mxu1 %vm1293_vm0, %v2593_v27 }
  0x88   : > { %2386 = vmatmul.mubr.msk.bf16.vlgmr.msra.gmra.mrb[48].mxu0 %vm1293_vm0, %v2594_v28 }
  0x89   : > { %2390 = vmatmul.mubr.msk.bf16.vlgmr.msra.gmra.mrb[48].mxu1 %vm1293_vm0, %v2595_v29 }
  0xfb   : > { %v2145_v30 = vpop.f32.mrb[0].mxu0 }
  0xfc   : > { %v2185_v31 = vpop.f32.mrb[0].mxu1  ;;  %v2146_v32 = vpop.f32.mrb[1].mxu0 }
  0xfd   : > { %v2147_v33 = vadd.f32 %v2146_v32, %v2145_v30  ;;  %v2186_v34 = vpop.f32.mrb[1].mxu1  ;;  %v2148_v35 = vpop.f32.mrb[2].mxu0 }
  0xfe   : > { %v2187_v36 = vadd.f32 %v2186_v34, %v2185_v31  ;;  %v2188_v37 = vpop.f32.mrb[2].mxu1  ;;  %v2149_v38 = vpop.f32.mrb[3].mxu0 }
  0xff   : > { %v2150_v39 = vadd.f32 %v2149_v38, %v2148_v35  ;;  %v2189_v40 = vpop.f32.mrb[3].mxu1 }
 0x100   : > { %v1405_v41 = vadd.f32 %v2187_v36, %v2147_v33  ;;  %v2190_v42 = vadd.f32 %v2189_v40, %v2188_v37 }
 0x102   : > { %v1408_v43 = vadd.f32 %v2190_v42, %v2150_v39 }
 0x103   : > { %v2151_v44 = vpop.f32.mrb[4].mxu0 }
 0x104   : > { %v2191_v45 = vpop.f32.mrb[4].mxu1  ;;  %v2152_v46 = vpop.f32.mrb[5].mxu0 }
 0x105   : > { %v2153_v47 = vadd.f32 %v2152_v46, %v2151_v44  ;;  %v2192_v48 = vpop.f32.mrb[5].mxu1  ;;  %v2154_v49 = vpop.f32.mrb[6].mxu0 }
 0x106   : > { %v2193_v50 = vadd.f32 %v2192_v48, %v2191_v45  ;;  %v2194_v51 = vpop.f32.mrb[6].mxu1  ;;  %v2155_v52 = vpop.f32.mrb[7].mxu0 }
 0x107   : > { %v2156_v53 = vadd.f32 %v2155_v52, %v2154_v49  ;;  %v2195_v54 = vpop.f32.mrb[7].mxu1 }
 0x108   : > { %v1413_v55 = vadd.f32 %v2193_v50, %v2153_v47  ;;  %v2196_v56 = vadd.f32 %v2195_v54, %v2194_v51 }
 0x10a   : > { %v1416_v57 = vadd.f32 %v2196_v56, %v2156_v53 }
 0x10b   : > { %v2157_v58 = vpop.f32.mrb[8].mxu0 }
 0x10c   : > { %v2197_v59 = vpop.f32.mrb[8].mxu1  ;;  %v2158_v60 = vpop.f32.mrb[9].mxu0 }
 0x10d   : > { %v2159_v61 = vadd.f32 %v2158_v60, %v2157_v58  ;;  %v2198_v62 = vpop.f32.mrb[9].mxu1  ;;  %v2160_v63 = vpop.f32.mrb[10].mxu0 }
 0x10e   : > { %v2199_v0 = vadd.f32 %v2198_v62, %v2197_v59  ;;  %v2200_v1 = vpop.f32.mrb[10].mxu1  ;;  %v2161_v2 = vpop.f32.mrb[11].mxu0 }
 0x10f   : > { %v2162_v3 = vadd.f32 %v2161_v2, %v2160_v63  ;;  %v2201_v4 = vpop.f32.mrb[11].mxu1 }
 0x110   : > { %v1421_v5 = vadd.f32 %v2199_v0, %v2159_v61  ;;  %v2202_v6 = vadd.f32 %v2201_v4, %v2200_v1 }
 0x112   : > { %v1424_v7 = vadd.f32 %v2202_v6, %v2162_v3 }
 0x113   : > { %v2163_v8 = vpop.f32.mrb[12].mxu0 }
 0x114   : > { %v2203_v9 = vpop.f32.mrb[12].mxu1  ;;  %v2164_v10 = vpop.f32.mrb[13].mxu0 }
 0x115   : > { %v2204_v11 = vpop.f32.mrb[13].mxu1  ;;  %v2165_v12 = vadd.f32 %v2164_v10, %v2163_v8  ;;  %v2166_v14 = vpop.f32.mrb[14].mxu0 }
 0x116   : > { %v2205_v13 = vadd.f32 %v2204_v11, %v2203_v9  ;;  %v2206_v15 = vpop.f32.mrb[14].mxu1  ;;  %v2167_v16 = vpop.f32.mrb[15].mxu0 }
 0x117   : > { %v2207_v17 = vpop.f32.mrb[15].mxu1 }
 0x118   : > { %v1429_v18 = vadd.f32 %v2205_v13, %v2165_v12 }
 0x11b   : > { %v2225_v19 = vpop.f32.mrb[16].mxu0 }
 0x11c   : > { %v2265_v20 = vpop.f32.mrb[16].mxu1  ;;  %v2226_v21 = vpop.f32.mrb[17].mxu0 }
 0x11d   : > { %v2227_v22 = vadd.f32 %v2226_v21, %v2225_v19  ;;  %v2266_v23 = vpop.f32.mrb[17].mxu1  ;;  %v2228_v24 = vpop.f32.mrb[18].mxu0 }
 0x11e   : > { %v2267_v25 = vadd.f32 %v2266_v23, %v2265_v20  ;;  %v2268_v26 = vpop.f32.mrb[18].mxu1  ;;  %v2229_v27 = vpop.f32.mrb[19].mxu0 }
 0x11f   : > { %v1469_v28 = vadd.f32 %v2227_v22, %v1405_v41  ;;  %v2230_v29 = vadd.f32 %v2229_v27, %v2228_v24  ;;  %v2269_v30 = vpop.f32.mrb[19].mxu1 }
 0x120   : > { %v2270_v31 = vadd.f32 %v2269_v30, %v2268_v26 }
 0x121   : > { %v1533_v32 = vadd.f32 %v2267_v25, %v1469_v28  ;;  %v1472_v33 = vadd.f32 %v2230_v29, %v1408_v43 }
 0x123   : > { %v1536_v34 = vadd.f32 %v2270_v31, %v1472_v33  ;;  %v2231_v35 = vpop.f32.mrb[20].mxu0 }
 0x124   : > { %v2271_v36 = vpop.f32.mrb[20].mxu1  ;;  %v2232_v37 = vpop.f32.mrb[21].mxu0 }
 0x125   : > { %v2233_v38 = vadd.f32 %v2232_v37, %v2231_v35  ;;  %v2272_v39 = vpop.f32.mrb[21].mxu1  ;;  %v2234_v40 = vpop.f32.mrb[22].mxu0 }
 0x126   : > { %v2273_v42 = vadd.f32 %v2272_v39, %v2271_v36  ;;  %v2274_v44 = vpop.f32.mrb[22].mxu1  ;;  %v2235_v45 = vpop.f32.mrb[23].mxu0 }
 0x127   : > { %v1477_v46 = vadd.f32 %v2233_v38, %v1413_v55  ;;  %v2236_v47 = vadd.f32 %v2235_v45, %v2234_v40  ;;  %v2275_v48 = vpop.f32.mrb[23].mxu1 }
 0x128   : > { %v2276_v49 = vadd.f32 %v2275_v48, %v2274_v44 }
 0x129   : > { %v1541_v41 = vadd.f32 %v2273_v42, %v1477_v46  ;;  %v1480_v50 = vadd.f32 %v2236_v47, %v1416_v57 }
 0x12b   : > { %v1544_v51 = vadd.f32 %v2276_v49, %v1480_v50  ;;  %v2237_v52 = vpop.f32.mrb[24].mxu0 }
 0x12c   : > { %v2277_v53 = vpop.f32.mrb[24].mxu1  ;;  %v2238_v43 = vpop.f32.mrb[25].mxu0 }
 0x12d   : > { %v2278_v54 = vpop.f32.mrb[25].mxu1  ;;  %v2239_v56 = vadd.f32 %v2238_v43, %v2237_v52  ;;  %v2240_v59 = vpop.f32.mrb[26].mxu0 }
 0x12e   : > { %v2279_v58 = vadd.f32 %v2278_v54, %v2277_v53  ;;  %v2280_v60 = vpop.f32.mrb[26].mxu1  ;;  %v2241_v61 = vpop.f32.mrb[27].mxu0 }
 0x12f   : > { %v2281_v62 = vpop.f32.mrb[27].mxu1  ;;  %v1485_v63 = vadd.f32 %v2239_v56, %v1421_v5  ;;  %v2242_v0 = vadd.f32 %v2241_v61, %v2240_v59 }
 0x130   : > { %v2282_v1 = vadd.f32 %v2281_v62, %v2280_v60 }
 0x131   : > { %v1549_v55 = vadd.f32 %v2279_v58, %v1485_v63  ;;  %v1488_v2 = vadd.f32 %v2242_v0, %v1424_v7 }
 0x133   : > { %v1552_v3 = vadd.f32 %v2282_v1, %v1488_v2  ;;  %v2243_v4 = vpop.f32.mrb[28].mxu0 }
 0x134   : > { %v2283_v6 = vpop.f32.mrb[28].mxu1  ;;  %v2244_v57 = vpop.f32.mrb[29].mxu0 }
 0x135   : > { %v2245_v8 = vadd.f32 %v2244_v57, %v2243_v4  ;;  %v2284_v9 = vpop.f32.mrb[29].mxu1  ;;  %v2246_v10 = vpop.f32.mrb[30].mxu0 }
 0x136   : > { %v2285_v11 = vadd.f32 %v2284_v9, %v2283_v6  ;;  %v2286_v12 = vpop.f32.mrb[30].mxu1  ;;  %v2247_v13 = vpop.f32.mrb[31].mxu0 }
 0x137   : > { %v1493_v14 = vadd.f32 %v2245_v8, %v1429_v18  ;;  %v2287_v15 = vpop.f32.mrb[31].mxu1 }
 0x139   : > { %v1557_v16 = vadd.f32 %v2285_v11, %v1493_v14 }
 0x13b   : > { %v2305_v17 = vpop.f32.mrb[32].mxu0 }
 0x13c   : > { %v2345_v19 = vpop.f32.mrb[32].mxu1  ;;  %v2306_v5 = vpop.f32.mrb[33].mxu0 }
 0x13d   : > { %v2307_v20 = vadd.f32 %v2306_v5, %v2305_v17  ;;  %v2346_v21 = vpop.f32.mrb[33].mxu1  ;;  %v2308_v22 = vpop.f32.mrb[34].mxu0 }
 0x13e   : > { %v2347_v7 = vadd.f32 %v2346_v21, %v2345_v19  ;;  %v2348_v23 = vpop.f32.mrb[34].mxu1  ;;  %v2309_v24 = vpop.f32.mrb[35].mxu0 }
 0x13f   : > { %v1597_v25 = vadd.f32 %v2307_v20, %v1533_v32  ;;  %v2310_v26 = vadd.f32 %v2309_v24, %v2308_v22  ;;  %v2349_v27 = vpop.f32.mrb[35].mxu1 }
 0x140   : > { %v2350_v28 = vadd.f32 %v2349_v27, %v2348_v23 }
 0x141   : > { %v1600_v29 = vadd.f32 %v2310_v26, %v1536_v34  ;;  %v1661_v30 = vadd.f32 %v2347_v7, %v1597_v25 }
 0x143   : > { %v2311_v31 = vpop.f32.mrb[36].mxu0  ;;  %v1664_v33 = vadd.f32 %v2350_v28, %v1600_v29 }
 0x144   : > { %v2351_v18 = vpop.f32.mrb[36].mxu1  ;;  %v2312_v35 = vpop.f32.mrb[37].mxu0 }
 0x145   : > { %v2313_v36 = vadd.f32 %v2312_v35, %v2311_v31  ;;  %v2352_v37 = vpop.f32.mrb[37].mxu1  ;;  %v2314_v38 = vpop.f32.mrb[38].mxu0 }
 0x146   : > { %v2353_v39 = vadd.f32 %v2352_v37, %v2351_v18  ;;  %v2354_v40 = vpop.f32.mrb[38].mxu1  ;;  %v2315_v42 = vpop.f32.mrb[39].mxu0 }
 0x147   : > { %v1605_v44 = vadd.f32 %v2313_v36, %v1541_v41  ;;  %v2316_v45 = vadd.f32 %v2315_v42, %v2314_v38  ;;  %v2355_v46 = vpop.f32.mrb[39].mxu1 }
 0x148   : > { %v2356_v47 = vadd.f32 %v2355_v46, %v2354_v40 }
 0x149   : > { %v1608_v32 = vadd.f32 %v2316_v45, %v1544_v51  ;;  %v1669_v48 = vadd.f32 %v2353_v39, %v1605_v44 }
 0x14b   : > { %v2317_v49 = vpop.f32.mrb[40].mxu0  ;;  %v1672_v50 = vadd.f32 %v2356_v47, %v1608_v32 }
 0x14c   : > { %v2357_v34 = vpop.f32.mrb[40].mxu1  ;;  %v2318_v52 = vpop.f32.mrb[41].mxu0 }
 0x14d   : > { %v2319_v53 = vadd.f32 %v2318_v52, %v2317_v49  ;;  %v2358_v43 = vpop.f32.mrb[41].mxu1  ;;  %v2320_v54 = vpop.f32.mrb[42].mxu0 }
 0x14e   : > { %v2359_v56 = vadd.f32 %v2358_v43, %v2357_v34  ;;  %v2360_v58 = vpop.f32.mrb[42].mxu1  ;;  %v2321_v59 = vpop.f32.mrb[43].mxu0 }
 0x14f   : > { %v1613_v60 = vadd.f32 %v2319_v53, %v1549_v55  ;;  %v2322_v61 = vadd.f32 %v2321_v59, %v2320_v54  ;;  %v2361_v62 = vpop.f32.mrb[43].mxu1 }
 0x150   : > { %v2362_v63 = vadd.f32 %v2361_v62, %v2360_v58 }
 0x151   : > { %v1616_v41 = vadd.f32 %v2322_v61, %v1552_v3  ;;  %v1677_v0 = vadd.f32 %v2359_v56, %v1613_v60 }
 0x153   : > { %v2323_v1 = vpop.f32.mrb[44].mxu0  ;;  %v1680_v2 = vadd.f32 %v2362_v63, %v1616_v41 }
 0x154   : > { %v2363_v51 = vpop.f32.mrb[44].mxu1  ;;  %v2324_v4 = vpop.f32.mrb[45].mxu0 }
 0x155   : > { %v2325_v6 = vadd.f32 %v2324_v4, %v2323_v1  ;;  %v2364_v57 = vpop.f32.mrb[45].mxu1  ;;  %v2326_v8 = vpop.f32.mrb[46].mxu0 }
 0x156   : > { %v2365_v9 = vadd.f32 %v2364_v57, %v2363_v51  ;;  %v2366_v10 = vpop.f32.mrb[46].mxu1  ;;  %v2327_v11 = vpop.f32.mrb[47].mxu0 }
 0x157   : > { %v1621_v12 = vadd.f32 %v2325_v6, %v1557_v16  ;;  %v2367_v13 = vpop.f32.mrb[47].mxu1 }
 0x159   : > { %v1685_v14 = vadd.f32 %v2365_v9, %v1621_v12 }
 0x15a   : > { %1757 = sbr.rel (%p2090_p5) target bundleno = 355 (0x163), region = 36 }
 0x15b   : > { %v2387_v15 = vpop.f32.mrb[48].mxu0 }
 0x15c   : > { %v1733_v55 = vadd.f32 %v2387_v15, %v1669_v48  ;;  %v2391_v17 = vpop.f32.mrb[48].mxu1  ;;  %v1724_v19 = vpop.f32.mrb[49].mxu0 }
 0x15d   : > { %v1749_v5 = vadd.f32 %v2391_v17, %v1685_v14  ;;  %v1725_v3 = vadd.f32 %v1724_v19, %v1661_v30  ;;  %v1740_v20 = vpop.f32.mrb[49].mxu1  ;;  %v2388_v21 = vpop.f32.mrb[50].mxu0 }
 0x15e   : > { %v1741_v22 = vadd.f32 %v1740_v20, %v1677_v0  ;;  %v1736_v7 = vadd.f32 %v2388_v21, %v1672_v50  ;;  %v2392_v23 = vpop.f32.mrb[50].mxu1  ;;  %v1727_v24 = vpop.f32.mrb[51].mxu0  ;;  %1760 = vst [vmem:[#allocation2 + $0x10] sm:$0xff] (!%p2090_p5), %v1733_v55 }
 0x15f   : > { %v1728_v25 = vadd.f32 %v1727_v24, %v1664_v33  ;;  %v1743_v26 = vpop.f32.mrb[51].mxu1  ;;  %1758 = vst [vmem:[#allocation2] sm:$0xff] (!%p2090_p5), %v1725_v3  ;;  %1764 = vst [vmem:[#allocation2 + $0x30] sm:$0x3] (!%p2090_p5), %v1749_v5 }
 0x160   : > { %v1744_v27 = vadd.f32 %v1743_v26, %v1680_v2  ;;  %1761 = vst [vmem:[#allocation2 + $0x18] sm:$0xff] (!%p2090_p5), %v1736_v7  ;;  %1762 = vst [vmem:[#allocation2 + $0x20] sm:$0xff] (!%p2090_p5), %v1741_v22 }
 0x161   : > { %1759 = vst [vmem:[#allocation2 + $0x8] sm:$0xff] %v1728_v25 }
 0x162   : > { %1763 = vst [vmem:[#allocation2 + $0x28] sm:$0xff] %v1744_v27 }
 0x163 PF: > { %p2091_p6 = scmp.le.s32.totalorder %s2610_s12, 0 }
 0x165   : > { %1768 = sbr.rel (%p2091_p6) target bundleno = 366 (0x16e), region = 40 }
 0x167   : > { %v1771_v29 = vld [vmem:[#allocation2 + $0x10] sm:$0xff] (!%p2091_p6) }
 0x168   : > { %v1769_v16 = vld [vmem:[#allocation2] sm:$0xff] (!%p2091_p6)  ;;  %v1778_v33 = vmax.f32 (!%p2091_p6), %v1771_v29, %v1733_v55  ;;  %v1775_v40 = vld [vmem:[#allocation2 + $0x30] sm:$0x3] (!%p2091_p6) }
 0x169   : > { %v1776_v30 = vmax.f32 (!%p2091_p6), %v1769_v16, %v1725_v3  ;;  %v1772_v18 = vld [vmem:[#allocation2 + $0x18] sm:$0xff] (!%p2091_p6)  ;;  %v1773_v35 = vld [vmem:[#allocation2 + $0x20] sm:$0xff] (!%p2091_p6)  ;;  %v1774_v36 = vld [vmem:[#allocation2 + $0x28] sm:$0xff] (!%p2091_p6)  ;;  %v1782_v42 = vmax.f32 (!%p2091_p6), %v1775_v40, %v1749_v5 }
 0x16a   : > { %v1770_v28 = vld [vmem:[#allocation2 + $0x8] sm:$0xff] (!%p2091_p6)  ;;  %v1779_v37 = vmax.f32 (!%p2091_p6), %v1772_v18, %v1736_v7  ;;  %v1780_v38 = vmax.f32 (!%p2091_p6), %v1773_v35, %v1741_v22  ;;  %v1781_v39 = vmax.f32 (!%p2091_p6), %v1774_v36, %v1744_v27  ;;  %1785 = vst [vmem:[#allocation2 + $0x10] sm:$0xff] (!%p2091_p6), %v1778_v33 }
 0x16b   : > { %v1777_v31 = vmax.f32 (!%p2091_p6), %v1770_v28, %v1728_v25  ;;  %1783 = vst [vmem:[#allocation2] sm:$0xff] (!%p2091_p6), %v1776_v30  ;;  %1789 = vst [vmem:[#allocation2 + $0x30] sm:$0x3] (!%p2091_p6), %v1782_v42 }
 0x16c   : > { %1786 = vst [vmem:[#allocation2 + $0x18] sm:$0xff] %v1779_v37  ;;  %1787 = vst [vmem:[#allocation2 + $0x20] sm:$0xff] %v1780_v38 }
 0x16d   : > { %1784 = vst [vmem:[#allocation2 + $0x8] sm:$0xff] %v1777_v31  ;;  %1788 = vst [vmem:[#allocation2 + $0x28] sm:$0xff] %v1781_v39 }
 0x16e PF: > { %p2092_p7 = scmp.ne.s32.totalorder %s2610_s12, 3 }
 0x16f   : > { %v2093_v46 = vld [vmem:[%s3042_s2] ss:$0 sm:$0xff] (!%p2092_p7) }
 0x170   : > { %1793 = sbr.rel (%p2092_p7) target bundleno = 381 (0x17d), region = 44 }
 0x173   : > { %v1796_v48 = vld [vmem:[#allocation2 + $0x10] sm:$0xff] (!%p2092_p7) }
 0x174   : > { %v1794_v44 = vld [vmem:[#allocation2] sm:$0xff] (!%p2092_p7)  ;;  %v1795_v45 = vld [vmem:[#allocation2 + $0x8] sm:$0xff] (!%p2092_p7)  ;;  %v1810_v34 = vadd.f32 (!%p2092_p7), %v2093_v46, %v1796_v48  ;;  %v1800_v54 = vld [vmem:[#allocation2 + $0x30] sm:$0x3] (!%p2092_p7) }
 0x175   : > { %v1808_v47 = vadd.f32 (!%p2092_p7), %v2093_v46, %v1794_v44  ;;  %v1809_v32 = vadd.f32 (!%p2092_p7), %v2093_v46, %v1795_v45  ;;  %v1797_v49 = vld [vmem:[#allocation2 + $0x18] sm:$0xff] (!%p2092_p7)  ;;  %v1798_v50 = vld [vmem:[#allocation2 + $0x20] sm:$0xff] (!%p2092_p7)  ;;  %v1799_v53 = vld [vmem:[#allocation2 + $0x28] sm:$0xff] (!%p2092_p7)  ;;  %v1814_v60 = vadd.f32 (!%p2092_p7), %v2093_v46, %v1800_v54 }
 0x176   : > { %v1811_v52 = vadd.f32 (!%p2092_p7), %v2093_v46, %v1797_v49  ;;  %v1812_v43 = vadd.f32 (!%p2092_p7), %v2093_v46, %v1798_v50  ;;  %v1813_v59 = vadd.f32 (!%p2092_p7), %v2093_v46, %v1799_v53  ;;  %v1817_v61 = vmax.f32 (!%p2092_p7), %v1810_v34, 0.0 }
 0x177   : > { %v1815_v56 = vmax.f32 %v1808_v47, 0.0  ;;  %v1816_v58 = vmax.f32 %v1809_v32, 0.0  ;;  %v1821_v1 = vmax.f32 %v1814_v60, 0.0 }
 0x178   : > { %v1818_v62 = vmax.f32 %v1811_v52, 0.0  ;;  %v1819_v63 = vmax.f32 %v1812_v43, 0.0  ;;  %v1820_v0 = vmax.f32 %v1813_v59, 0.0 }
 0x179   : > { %v2115_v41 = vpack.c.bf16 %v1816_v58, %v1815_v56  ;;  %v2111_v4 = vpack.c.bf16 %v1821_v1, %v1821_v1 }
 0x17a   : > { %v2120_v2 = vpack.c.bf16 %v1818_v62, %v1817_v61  ;;  %v2125_v51 = vpack.c.bf16 %v1820_v0, %v1819_v63 }
 0x17b   : > { %2116 = vst [vmem:[%s3043_s3] sm:$0xff] %v2115_v41   ;;  %1857 = vst [vmem:[%s3043_s3 + $0x18] sm:$0x1] %v2111_v4 }
 0x17c   : > { %2127 = vst [vmem:[%s3043_s3 + $0x8] sm:$0xff] %v2120_v2   ;;  %2128 = vst [vmem:[%s3043_s3 + $0x10] sm:$0xff] %v2125_v51  }
 0x17d PF: > { %s13_s14 = sadd.s32 1, %s2618_s14   ;;  %s3044_s12 = smov %s2614_s13 }
 0x17e   : > { %p10_p8 = scmp.ge.s32.totalorder %s13_s14, 6   ;;  %s3045_s13 = smov %s3047_s15 }
 0x180   :  { %12 = sbr.rel (!%p10_p8) target bundleno = 2 (0x2), region = 74 }

// kernel: lenet_fc_forward.5
= control target key start
LH: loop header
LB: loop body
LE: loop exit
PB: predicated region body
PF: predicated region fallthrough
CT: control target
= control target key end

     0   :  { %v1628_v32 = vlaneseq  ;;  %v15142_v33 = vmov 1966171168   ;;  %s20677_s0 = inlined_call_operand.vmem [shape: bf16[2,3200], index: 0, kind: input, shape index: {}]   ;;  %s20678_s1 = inlined_call_operand.vmem [shape: bf16[3200,1024], index: 1, kind: input, shape index: {}]   ;;  %s20679_s2 = inlined_call_operand.vmem [shape: f32[1,1024], index: 2, kind: input, shape index: {}]   ;;  %s20680_s3 = inlined_call_operand.vmem [shape: bf16[1024,256], index: 3, kind: input, shape index: {}]   ;;  %s20681_s4 = inlined_call_operand.vmem [shape: f32[1,256], index: 4, kind: input, shape index: {}]   ;;  %s20682_s5 = inlined_call_operand.hbm [shape: f32[2,256], index: 5, kind: output, shape index: {}]  }
   0x1   :  { %v26_v0 = vld [vmem:[%s20678_s1] sm:$0xff]  ;;  %v1674_v34 = vunpack.c.l.s4 %v15142_v33 }
   0x2   :  { %v30_v1 = vld [vmem:[%s20678_s1 + $0x20] sm:$0xff]  ;;  %v15241_v43 = vshrl.u32 %v1628_v32, 7 }
   0x3   :  { %v282_v2 = vld [vmem:[%s20678_s1 + $0x800] sm:$0xff]  ;;  %v12978_v3 = vcombine.high %v26_v0, %v30_v1  ;;  %v12977_v5 = vcombine.low %v26_v0, %v30_v1  ;;  %v1675_v44 = vunpack.c.0.s8 %v1674_v34 }
   0x4   :  { %v286_v4 = vld [vmem:[%s20678_s1 + $0x820] sm:$0xff] }
   0x5   :  { %v34_v6 = vld [vmem:[%s20678_s1 + $0x40] sm:$0xff]  ;;  %v13234_v8 = vcombine.high %v282_v2, %v286_v4  ;;  %v13233_v9 = vcombine.low %v282_v2, %v286_v4  ;;  %9858 = vmatprep.subr.bf16.mxu1 %v12978_v3  ;;  %v15256_v53 = vsub.s32 %v1675_v44, %v15241_v43 }
   0x6   :  { %v38_v7 = vld [vmem:[%s20678_s1 + $0x60] sm:$0xff]  ;;  %9859 = vmatpush1.bf16.msra.mxu1 %v12977_v5 }
   0x7   :  { %v12986_v10 = vcombine.high %v34_v6, %v38_v7  ;;  %v290_v11 = vld [vmem:[%s20678_s1 + $0x840] sm:$0xff]  ;;  %9940 = vmatprep.subr.bf16.mxu0 %v13234_v8  ;;  %v12985_v18 = vcombine.low %v34_v6, %v38_v7 }
   0x8   :  { %v294_v12 = vld [vmem:[%s20678_s1 + $0x860] sm:$0xff]  ;;  %9941 = vmatpush1.bf16.msra.mxu0 %v13233_v9 }
   0x9   :  { %v42_v13 = vld [vmem:[%s20678_s1 + $0x80] sm:$0xff]  ;;  %v13242_v14 = vcombine.high %v290_v11, %v294_v12  ;;  %9860 = vmatprep.subr.bf16.mxu1 %v12986_v10  ;;  %v13241_v19 = vcombine.low %v290_v11, %v294_v12 }
   0xa   :  { %v46_v15 = vld [vmem:[%s20678_s1 + $0xa0] sm:$0xff]  ;;  %9861 = vmatpush1.bf16.msra.mxu1 %v12985_v18 }
   0xb   :  { %v298_v16 = vld [vmem:[%s20678_s1 + $0x880] sm:$0xff]  ;;  %v12994_v20 = vcombine.high %v42_v13, %v46_v15  ;;  %9942 = vmatprep.subr.bf16.mxu0 %v13242_v14  ;;  %v12993_v26 = vcombine.low %v42_v13, %v46_v15 }
   0xc   :  { %v302_v17 = vld [vmem:[%s20678_s1 + $0x8a0] sm:$0xff]  ;;  %9943 = vmatpush1.bf16.msra.mxu0 %v13241_v19 }
   0xd   :  { %v13250_v21 = vcombine.high %v298_v16, %v302_v17  ;;  %v50_v22 = vld [vmem:[%s20678_s1 + $0xc0] sm:$0xff]  ;;  %9862 = vmatprep.subr.bf16.mxu1 %v12994_v20  ;;  %v13249_v27 = vcombine.low %v298_v16, %v302_v17 }
   0xe   :  { %v54_v23 = vld [vmem:[%s20678_s1 + $0xe0] sm:$0xff]  ;;  %9863 = vmatpush1.bf16.msra.mxu1 %v12993_v26 }
   0xf   :  { %v306_v24 = vld [vmem:[%s20678_s1 + $0x8c0] sm:$0xff]  ;;  %v13002_v28 = vcombine.high %v50_v22, %v54_v23  ;;  %9944 = vmatprep.subr.bf16.mxu0 %v13250_v21  ;;  %v13001_v37 = vcombine.low %v50_v22, %v54_v23 }
  0x10   :  { %v310_v25 = vld [vmem:[%s20678_s1 + $0x8e0] sm:$0xff]  ;;  %9945 = vmatpush1.bf16.msra.mxu0 %v13249_v27 }
  0x11   :  { %v13258_v29 = vcombine.high %v306_v24, %v310_v25  ;;  %v58_v30 = vld [vmem:[%s20678_s1 + $0x100] sm:$0xff]  ;;  %9864 = vmatprep.subr.bf16.mxu1 %v13002_v28  ;;  %v13257_v38 = vcombine.low %v306_v24, %v310_v25 }
  0x12   :  { %v62_v31 = vld [vmem:[%s20678_s1 + $0x120] sm:$0xff]  ;;  %9865 = vmatpush1.bf16.msra.mxu1 %v13001_v37 }
  0x13   :  { %v314_v35 = vld [vmem:[%s20678_s1 + $0x900] sm:$0xff]  ;;  %v13010_v39 = vcombine.high %v58_v30, %v62_v31  ;;  %9946 = vmatprep.subr.bf16.mxu0 %v13258_v29  ;;  %v13009_v47 = vcombine.low %v58_v30, %v62_v31 }
  0x14   :  { %v318_v36 = vld [vmem:[%s20678_s1 + $0x920] sm:$0xff]  ;;  %9947 = vmatpush1.bf16.msra.mxu0 %v13257_v38 }
  0x15   :  { %v13266_v40 = vcombine.high %v314_v35, %v318_v36  ;;  %v66_v41 = vld [vmem:[%s20678_s1 + $0x140] sm:$0xff]  ;;  %9866 = vmatprep.subr.bf16.mxu1 %v13010_v39  ;;  %v13265_v48 = vcombine.low %v314_v35, %v318_v36 }
  0x16   :  { %v70_v42 = vld [vmem:[%s20678_s1 + $0x160] sm:$0xff]  ;;  %9867 = vmatpush1.bf16.msra.mxu1 %v13009_v47 }
  0x17   :  { %v322_v45 = vld [vmem:[%s20678_s1 + $0x940] sm:$0xff]  ;;  %v13018_v49 = vcombine.high %v66_v41, %v70_v42  ;;  %9948 = vmatprep.subr.bf16.mxu0 %v13266_v40  ;;  %v13017_v56 = vcombine.low %v66_v41, %v70_v42 }
  0x18   :  { %v326_v46 = vld [vmem:[%s20678_s1 + $0x960] sm:$0xff]  ;;  %9949 = vmatpush1.bf16.msra.mxu0 %v13265_v48 }
  0x19   :  { %v13274_v50 = vcombine.high %v322_v45, %v326_v46  ;;  %v74_v51 = vld [vmem:[%s20678_s1 + $0x180] sm:$0xff]  ;;  %9868 = vmatprep.subr.bf16.mxu1 %v13018_v49  ;;  %v13273_v57 = vcombine.low %v322_v45, %v326_v46 }
  0x1a   :  { %v78_v52 = vld [vmem:[%s20678_s1 + $0x1a0] sm:$0xff]  ;;  %9869 = vmatpush1.bf16.msra.mxu1 %v13017_v56 }
  0x1b   :  { %v330_v54 = vld [vmem:[%s20678_s1 + $0x980] sm:$0xff]  ;;  %v13026_v58 = vcombine.high %v74_v51, %v78_v52  ;;  %9950 = vmatprep.subr.bf16.mxu0 %v13274_v50  ;;  %v13025_v3 = vcombine.low %v74_v51, %v78_v52 }
  0x1c   :  { %v334_v55 = vld [vmem:[%s20678_s1 + $0x9a0] sm:$0xff]  ;;  %9951 = vmatpush1.bf16.msra.mxu0 %v13273_v57 }
  0x1d   :  { %v22_v59 = vld [vmem:[%s20677_s0] sm:$0xff]  ;;  %v13282_v60 = vcombine.high %v330_v54, %v334_v55  ;;  %9870 = vmatprep.subr.bf16.mxu1 %v13026_v58  ;;  %v13281_v6 = vcombine.low %v330_v54, %v334_v55 }
  0x1e   :  { %v82_v61 = vld [vmem:[%s20678_s1 + $0x1c0] sm:$0xff]  ;;  %v15274_v63 = vrot.slane %v22_v59, %v15256_v53  ;;  %v1672_v0 = vcombine.high %v22_v59, %v22_v59  ;;  %9871 = vmatpush1.bf16.msra.mxu1 %v13025_v3 }
  0x1f   :  { %v86_v62 = vld [vmem:[%s20678_s1 + $0x1e0] sm:$0xff]  ;;  %9952 = vmatprep.subr.bf16.mxu0 %v13282_v60 }
  0x20   :  { %v338_v1 = vld [vmem:[%s20678_s1 + $0x9c0] sm:$0xff]  ;;  %v1687_v4 = vcombine.high %v15274_v63, %v15274_v63  ;;  %v15285_v5 = vrot.slane %v1672_v0, %v15256_v53  ;;  %v13034_v7 = vcombine.high %v82_v61, %v86_v62  ;;  %v13033_v15 = vcombine.low %v82_v61, %v86_v62  ;;  %9953 = vmatpush1.bf16.msra.mxu0 %v13281_v6 }
  0x21   :  { %v342_v2 = vld [vmem:[%s20678_s1 + $0x9e0] sm:$0xff] }
  0x22   :  { %v13290_v8 = vcombine.high %v338_v1, %v342_v2  ;;  %v90_v9 = vld [vmem:[%s20678_s1 + $0x200] sm:$0xff]  ;;  %v15294_v11 = vrot.slane %v1687_v4, %v15256_v53  ;;  %v1688_v12 = vcombine.high %v15285_v5, %v15285_v5  ;;  %9872 = vmatprep.subr.bf16.mxu1 %v13034_v7  ;;  %v13289_v17 = vcombine.low %v338_v1, %v342_v2 }
  0x23   :  { %v94_v10 = vld [vmem:[%s20678_s1 + $0x220] sm:$0xff]  ;;  %9873 = vmatpush1.bf16.msra.mxu1 %v13033_v15 }
  0x24   :  { %v346_v13 = vld [vmem:[%s20678_s1 + $0xa00] sm:$0xff]  ;;  %9890 = vmatprep.mubr.bf16.mxu1 %v15294_v11  ;;  %v15306_v16 = vrot.slane %v1688_v12, %v15256_v53  ;;  %v13042_v18 = vcombine.high %v90_v9, %v94_v10  ;;  %9954 = vmatprep.subr.bf16.mxu0 %v13290_v8  ;;  %v13041_v24 = vcombine.low %v90_v9, %v94_v10 }
  0x25   :  { %v350_v14 = vld [vmem:[%s20678_s1 + $0xa20] sm:$0xff]  ;;  %9955 = vmatpush1.bf16.msra.mxu0 %v13289_v17 }
  0x26   :  { %v13298_v19 = vcombine.high %v346_v13, %v350_v14  ;;  %v98_v20 = vld [vmem:[%s20678_s1 + $0x240] sm:$0xff]  ;;  %9972 = vmatprep.mubr.bf16.mxu0 %v15306_v16  ;;  %9874 = vmatprep.subr.bf16.mxu1 %v13042_v18  ;;  %v13297_v25 = vcombine.low %v346_v13, %v350_v14 }
  0x27   :  { %v102_v21 = vld [vmem:[%s20678_s1 + $0x260] sm:$0xff]  ;;  %9875 = vmatpush1.bf16.msra.mxu1 %v13041_v24 }
  0x28   :  { %v354_v22 = vld [vmem:[%s20678_s1 + $0xa40] sm:$0xff]  ;;  %v13050_v26 = vcombine.high %v98_v20, %v102_v21  ;;  %9956 = vmatprep.subr.bf16.mxu0 %v13298_v19  ;;  %v13049_v32 = vcombine.low %v98_v20, %v102_v21 }
  0x29   :  { %v358_v23 = vld [vmem:[%s20678_s1 + $0xa60] sm:$0xff]  ;;  %9957 = vmatpush1.bf16.msra.mxu0 %v13297_v25 }
  0x2a   :  { %v13306_v27 = vcombine.high %v354_v22, %v358_v23  ;;  %v106_v28 = vld [vmem:[%s20678_s1 + $0x280] sm:$0xff]  ;;  %9876 = vmatprep.subr.bf16.mxu1 %v13050_v26  ;;  %v13305_v33 = vcombine.low %v354_v22, %v358_v23 }
  0x2b   :  { %v110_v29 = vld [vmem:[%s20678_s1 + $0x2a0] sm:$0xff]  ;;  %9877 = vmatpush1.bf16.msra.mxu1 %v13049_v32  ;;  %v15423_v32 = vrot.slane %v15285_v5, %v15256_v53 }
  0x2c   :  { %v362_v30 = vld [vmem:[%s20678_s1 + $0xa80] sm:$0xff]  ;;  %v13058_v34 = vcombine.high %v106_v28, %v110_v29  ;;  %9958 = vmatprep.subr.bf16.mxu0 %v13306_v27  ;;  %v13057_v40 = vcombine.low %v106_v28, %v110_v29  ;;  %v15413_v28 = vrot.slane %v15274_v63, %v15256_v53 }
  0x2d   :  { %v366_v31 = vld [vmem:[%s20678_s1 + $0xaa0] sm:$0xff]  ;;  %9959 = vmatpush1.bf16.msra.mxu0 %v13305_v33 }
  0x2e   :  { %v13314_v35 = vcombine.high %v362_v30, %v366_v31  ;;  %v114_v36 = vld [vmem:[%s20678_s1 + $0x2c0] sm:$0xff]  ;;  %9878 = vmatprep.subr.bf16.mxu1 %v13058_v34  ;;  %v13313_v41 = vcombine.low %v362_v30, %v366_v31 }
  0x2f   :  { %v118_v37 = vld [vmem:[%s20678_s1 + $0x2e0] sm:$0xff]  ;;  %9879 = vmatpush1.bf16.msra.mxu1 %v13057_v40 }
  0x30   :  { %v370_v38 = vld [vmem:[%s20678_s1 + $0xac0] sm:$0xff]  ;;  %v13066_v42 = vcombine.high %v114_v36, %v118_v37  ;;  %9960 = vmatprep.subr.bf16.mxu0 %v13314_v35  ;;  %v13065_v49 = vcombine.low %v114_v36, %v118_v37 }
  0x31   :  { %v374_v39 = vld [vmem:[%s20678_s1 + $0xae0] sm:$0xff]  ;;  %9961 = vmatpush1.bf16.msra.mxu0 %v13313_v41 }
  0x32   :  { %v13322_v44 = vcombine.high %v370_v38, %v374_v39  ;;  %v122_v45 = vld [vmem:[%s20678_s1 + $0x300] sm:$0xff]  ;;  %9880 = vmatprep.subr.bf16.mxu1 %v13066_v42  ;;  %v13321_v50 = vcombine.low %v370_v38, %v374_v39  ;;  %v15439_v38 = vcombine.high %v15294_v11, %v15294_v11  ;;  %v15444_v39 = vcombine.high %v15306_v16, %v15306_v16 }
  0x33   :  { %v126_v46 = vld [vmem:[%s20678_s1 + $0x320] sm:$0xff]  ;;  %9881 = vmatpush1.bf16.msra.mxu1 %v13065_v49 }
  0x34   :  { %v378_v47 = vld [vmem:[%s20678_s1 + $0xb00] sm:$0xff]  ;;  %v13074_v51 = vcombine.high %v122_v45, %v126_v46  ;;  %9962 = vmatprep.subr.bf16.mxu0 %v13322_v44  ;;  %v13073_v58 = vcombine.low %v122_v45, %v126_v46 }
  0x35   :  { %v382_v48 = vld [vmem:[%s20678_s1 + $0xb20] sm:$0xff]  ;;  %9963 = vmatpush1.bf16.msra.mxu0 %v13321_v50 }
  0x36   :  { %v13330_v52 = vcombine.high %v378_v47, %v382_v48  ;;  %v130_v54 = vld [vmem:[%s20678_s1 + $0x340] sm:$0xff]  ;;  %9882 = vmatprep.subr.bf16.mxu1 %v13074_v51  ;;  %v13329_v59 = vcombine.low %v378_v47, %v382_v48 }
  0x37   :  { %v134_v55 = vld [vmem:[%s20678_s1 + $0x360] sm:$0xff]  ;;  %9883 = vmatpush1.bf16.msra.mxu1 %v13073_v58 }
  0x38   :  { %v386_v56 = vld [vmem:[%s20678_s1 + $0xb40] sm:$0xff]  ;;  %v13082_v60 = vcombine.high %v130_v54, %v134_v55  ;;  %9964 = vmatprep.subr.bf16.mxu0 %v13330_v52  ;;  %v13081_v3 = vcombine.low %v130_v54, %v134_v55 }
  0x39   :  { %v390_v57 = vld [vmem:[%s20678_s1 + $0xb60] sm:$0xff]  ;;  %9965 = vmatpush1.bf16.msra.mxu0 %v13329_v59 }
  0x3a   :  { %v13338_v61 = vcombine.high %v386_v56, %v390_v57  ;;  %v138_v62 = vld [vmem:[%s20678_s1 + $0x380] sm:$0xff]  ;;  %9884 = vmatprep.subr.bf16.mxu1 %v13082_v60  ;;  %v13337_v4 = vcombine.low %v386_v56, %v390_v57 }
  0x3b   :  { %v142_v0 = vld [vmem:[%s20678_s1 + $0x3a0] sm:$0xff]  ;;  %9885 = vmatpush1.bf16.msra.mxu1 %v13081_v3 }
  0x3c   :  { %v394_v1 = vld [vmem:[%s20678_s1 + $0xb80] sm:$0xff]  ;;  %v13090_v6 = vcombine.high %v138_v62, %v142_v0  ;;  %9966 = vmatprep.subr.bf16.mxu0 %v13338_v61  ;;  %v13089_v13 = vcombine.low %v138_v62, %v142_v0 }
  0x3d   :  { %v398_v2 = vld [vmem:[%s20678_s1 + $0xba0] sm:$0xff]  ;;  %9967 = vmatpush1.bf16.msra.mxu0 %v13337_v4 }
  0x3e   :  { %v13346_v7 = vcombine.high %v394_v1, %v398_v2  ;;  %v146_v8 = vld [vmem:[%s20678_s1 + $0x3c0] sm:$0xff]  ;;  %9886 = vmatprep.subr.bf16.mxu1 %v13090_v6  ;;  %v13345_v14 = vcombine.low %v394_v1, %v398_v2 }
  0x3f   :  { %v150_v9 = vld [vmem:[%s20678_s1 + $0x3e0] sm:$0xff]  ;;  %9887 = vmatpush1.bf16.msra.mxu1 %v13089_v13 }
  0x40   :  { %v402_v10 = vld [vmem:[%s20678_s1 + $0xbc0] sm:$0xff]  ;;  %v13098_v15 = vcombine.high %v146_v8, %v150_v9  ;;  %9968 = vmatprep.subr.bf16.mxu0 %v13346_v7  ;;  %v13097_v22 = vcombine.low %v146_v8, %v150_v9 }
  0x41   :  { %v406_v12 = vld [vmem:[%s20678_s1 + $0xbe0] sm:$0xff]  ;;  %9969 = vmatpush1.bf16.msra.mxu0 %v13345_v14 }
  0x42   :  { %v13354_v17 = vcombine.high %v402_v10, %v406_v12  ;;  %v154_v18 = vld [vmem:[%s20678_s1 + $0x400] sm:$0xff]  ;;  %9888 = vmatprep.subr.bf16.mxu1 %v13098_v15  ;;  %v13353_v23 = vcombine.low %v402_v10, %v406_v12 }
  0x43   :  { %v158_v19 = vld [vmem:[%s20678_s1 + $0x420] sm:$0xff]  ;;  %9889 = vmatpush1.bf16.msra.mxu1 %v13097_v22 }
  0x44   :  { %v410_v20 = vld [vmem:[%s20678_s1 + $0xc00] sm:$0xff]  ;;  %v13106_v24 = vcombine.high %v154_v18, %v158_v19  ;;  %9970 = vmatprep.subr.bf16.mxu0 %v13354_v17  ;;  %v13105_v31 = vcombine.low %v154_v18, %v158_v19 }
  0x45   :  { %v414_v21 = vld [vmem:[%s20678_s1 + $0xc20] sm:$0xff]  ;;  %9971 = vmatpush1.bf16.msra.mxu0 %v13353_v23 }
  0x46   :  { %v13362_v25 = vcombine.high %v410_v20, %v414_v21  ;;  %v162_v26 = vld [vmem:[%s20678_s1 + $0x440] sm:$0xff]  ;;  %9899 = vmatprep.subr.bf16.mxu1 %v13106_v24  ;;  %v13361_v33 = vcombine.low %v410_v20, %v414_v21  ;;  %9891 = vmatmul.mubr.bf16.vlgmr.msra.gmra.mrb[0].mxu1 %v15413_v28 }
  0x47   :  { %v166_v27 = vld [vmem:[%s20678_s1 + $0x460] sm:$0xff]  ;;  %9900 = vmatpush1.bf16.msra.mxu1 %v13105_v31  ;;  %9931 = vmatprep.mubr.bf16.mxu1 %v15439_v38 }
  0x48   :  { %v418_v29 = vld [vmem:[%s20678_s1 + $0xc40] sm:$0xff]  ;;  %v13114_v34 = vcombine.high %v162_v26, %v166_v27  ;;  %9981 = vmatprep.subr.bf16.mxu0 %v13362_v25  ;;  %9973 = vmatmul.mubr.bf16.vlgmr.msra.gmra.mrb[0].mxu0 %v15423_v32  ;;  %v13113_v40 = vcombine.low %v162_v26, %v166_v27 }
  0x49   :  { %v422_v30 = vld [vmem:[%s20678_s1 + $0xc60] sm:$0xff]  ;;  %9982 = vmatpush1.bf16.msra.mxu0 %v13361_v33  ;;  %10013 = vmatprep.mubr.bf16.mxu0 %v15444_v39 }
  0x4a   :  { %v170_v63 = vld [vmem:[%s20678_s1 + $0x480] sm:$0xff]  ;;  %v13370_v37 = vcombine.high %v418_v29, %v422_v30  ;;  %9901 = vmatprep.subr.bf16.mxu1 %v13114_v34  ;;  %v13369_v41 = vcombine.low %v418_v29, %v422_v30 }
  0x4b   :  { %v174_v35 = vld [vmem:[%s20678_s1 + $0x4a0] sm:$0xff]  ;;  %9902 = vmatpush1.bf16.msra.mxu1 %v13113_v40 }
  0x4c   :  { %v426_v36 = vld [vmem:[%s20678_s1 + $0xc80] sm:$0xff]  ;;  %v13122_v42 = vcombine.high %v170_v63, %v174_v35  ;;  %9983 = vmatprep.subr.bf16.mxu0 %v13370_v37  ;;  %v13121_v49 = vcombine.low %v170_v63, %v174_v35 }
  0x4d   :  { %v430_v5 = vld [vmem:[%s20678_s1 + $0xca0] sm:$0xff]  ;;  %9984 = vmatpush1.bf16.msra.mxu0 %v13369_v41 }
  0x4e   :  { %v178_v44 = vld [vmem:[%s20678_s1 + $0x4c0] sm:$0xff]  ;;  %v13378_v47 = vcombine.high %v426_v36, %v430_v5  ;;  %9903 = vmatprep.subr.bf16.mxu1 %v13122_v42  ;;  %v13377_v50 = vcombine.low %v426_v36, %v430_v5 }
  0x4f   :  { %v182_v45 = vld [vmem:[%s20678_s1 + $0x4e0] sm:$0xff]  ;;  %9904 = vmatpush1.bf16.msra.mxu1 %v13121_v49 }
  0x50   :  { %v434_v46 = vld [vmem:[%s20678_s1 + $0xcc0] sm:$0xff]  ;;  %v13130_v51 = vcombine.high %v178_v44, %v182_v45  ;;  %9985 = vmatprep.subr.bf16.mxu0 %v13378_v47  ;;  %v13129_v58 = vcombine.low %v178_v44, %v182_v45 }
  0x51   :  { %v438_v48 = vld [vmem:[%s20678_s1 + $0xce0] sm:$0xff]  ;;  %9986 = vmatpush1.bf16.msra.mxu0 %v13377_v50 }
  0x52   :  { %v186_v52 = vld [vmem:[%s20678_s1 + $0x500] sm:$0xff]  ;;  %v13386_v56 = vcombine.high %v434_v46, %v438_v48  ;;  %9905 = vmatprep.subr.bf16.mxu1 %v13130_v51  ;;  %v13385_v59 = vcombine.low %v434_v46, %v438_v48 }
  0x53   :  { %v190_v54 = vld [vmem:[%s20678_s1 + $0x520] sm:$0xff]  ;;  %9906 = vmatpush1.bf16.msra.mxu1 %v13129_v58 }
  0x54   :  { %v442_v55 = vld [vmem:[%s20678_s1 + $0xd00] sm:$0xff]  ;;  %v13138_v60 = vcombine.high %v186_v52, %v190_v54  ;;  %9987 = vmatprep.subr.bf16.mxu0 %v13386_v56  ;;  %v13137_v3 = vcombine.low %v186_v52, %v190_v54 }
  0x55   :  { %v446_v57 = vld [vmem:[%s20678_s1 + $0xd20] sm:$0xff]  ;;  %9988 = vmatpush1.bf16.msra.mxu0 %v13385_v59 }
  0x56   :  { %v194_v61 = vld [vmem:[%s20678_s1 + $0x540] sm:$0xff]  ;;  %v13394_v1 = vcombine.high %v442_v55, %v446_v57  ;;  %9907 = vmatprep.subr.bf16.mxu1 %v13138_v60  ;;  %v13393_v4 = vcombine.low %v442_v55, %v446_v57 }
  0x57   :  { %v198_v62 = vld [vmem:[%s20678_s1 + $0x560] sm:$0xff]  ;;  %9908 = vmatpush1.bf16.msra.mxu1 %v13137_v3 }
  0x58   :  { %v450_v0 = vld [vmem:[%s20678_s1 + $0xd40] sm:$0xff]  ;;  %v13146_v6 = vcombine.high %v194_v61, %v198_v62  ;;  %9989 = vmatprep.subr.bf16.mxu0 %v13394_v1  ;;  %v13145_v13 = vcombine.low %v194_v61, %v198_v62 }
  0x59   :  { %v454_v2 = vld [vmem:[%s20678_s1 + $0xd60] sm:$0xff]  ;;  %9990 = vmatpush1.bf16.msra.mxu0 %v13393_v4 }
  0x5a   :  { %v202_v7 = vld [vmem:[%s20678_s1 + $0x580] sm:$0xff]  ;;  %v13402_v10 = vcombine.high %v450_v0, %v454_v2  ;;  %9909 = vmatprep.subr.bf16.mxu1 %v13146_v6  ;;  %v13401_v14 = vcombine.low %v450_v0, %v454_v2 }
  0x5b   :  { %v206_v8 = vld [vmem:[%s20678_s1 + $0x5a0] sm:$0xff]  ;;  %9910 = vmatpush1.bf16.msra.mxu1 %v13145_v13 }
  0x5c   :  { %v458_v9 = vld [vmem:[%s20678_s1 + $0xd80] sm:$0xff]  ;;  %v13154_v15 = vcombine.high %v202_v7, %v206_v8  ;;  %9991 = vmatprep.subr.bf16.mxu0 %v13402_v10  ;;  %v13153_v22 = vcombine.low %v202_v7, %v206_v8 }
  0x5d   :  { %v462_v12 = vld [vmem:[%s20678_s1 + $0xda0] sm:$0xff]  ;;  %9992 = vmatpush1.bf16.msra.mxu0 %v13401_v14 }
  0x5e   :  { %v210_v17 = vld [vmem:[%s20678_s1 + $0x5c0] sm:$0xff]  ;;  %v13410_v20 = vcombine.high %v458_v9, %v462_v12  ;;  %9911 = vmatprep.subr.bf16.mxu1 %v13154_v15  ;;  %v13409_v23 = vcombine.low %v458_v9, %v462_v12 }
  0x5f   :  { %v214_v18 = vld [vmem:[%s20678_s1 + $0x5e0] sm:$0xff]  ;;  %9912 = vmatpush1.bf16.msra.mxu1 %v13153_v22 }
  0x60   :  { %v466_v19 = vld [vmem:[%s20678_s1 + $0xdc0] sm:$0xff]  ;;  %v13162_v24 = vcombine.high %v210_v17, %v214_v18  ;;  %9993 = vmatprep.subr.bf16.mxu0 %v13410_v20  ;;  %v13161_v31 = vcombine.low %v210_v17, %v214_v18 }
  0x61   :  { %v470_v21 = vld [vmem:[%s20678_s1 + $0xde0] sm:$0xff]  ;;  %9994 = vmatpush1.bf16.msra.mxu0 %v13409_v23 }
  0x62   :  { %v218_v25 = vld [vmem:[%s20678_s1 + $0x600] sm:$0xff]  ;;  %v13418_v29 = vcombine.high %v466_v19, %v470_v21  ;;  %9913 = vmatprep.subr.bf16.mxu1 %v13162_v24  ;;  %v13417_v33 = vcombine.low %v466_v19, %v470_v21 }
  0x63   :  { %v222_v26 = vld [vmem:[%s20678_s1 + $0x620] sm:$0xff]  ;;  %9914 = vmatpush1.bf16.msra.mxu1 %v13161_v31  ;;  %v15608_v31 = vld [vmem:[%s20677_s0 + $0x8] sm:$0xff] }
  0x64   :  { %v474_v27 = vld [vmem:[%s20678_s1 + $0xe00] sm:$0xff]  ;;  %v13170_v34 = vcombine.high %v218_v25, %v222_v26  ;;  %9995 = vmatprep.subr.bf16.mxu0 %v13418_v29  ;;  %v13169_v40 = vcombine.low %v218_v25, %v222_v26 }
  0x65   :  { %v478_v30 = vld [vmem:[%s20678_s1 + $0xe20] sm:$0xff]  ;;  %9996 = vmatpush1.bf16.msra.mxu0 %v13417_v33 }
  0x66   :  { %v226_v63 = vld [vmem:[%s20678_s1 + $0x640] sm:$0xff]  ;;  %v13426_v37 = vcombine.high %v474_v27, %v478_v30  ;;  %9915 = vmatprep.subr.bf16.mxu1 %v13170_v34  ;;  %v13425_v41 = vcombine.low %v474_v27, %v478_v30 }
  0x67   :  { %v230_v35 = vld [vmem:[%s20678_s1 + $0x660] sm:$0xff]  ;;  %9916 = vmatpush1.bf16.msra.mxu1 %v13169_v40  ;;  %v31_v40 = vld [vmem:[%s20678_s1 + $0x28] sm:$0xff] }
  0x68   :  { %v482_v36 = vld [vmem:[%s20678_s1 + $0xe40] sm:$0xff]  ;;  %v13178_v42 = vcombine.high %v226_v63, %v230_v35  ;;  %9997 = vmatprep.subr.bf16.mxu0 %v13426_v37  ;;  %v13177_v49 = vcombine.low %v226_v63, %v230_v35  ;;  %v27_v37 = vld [vmem:[%s20678_s1 + $0x8] sm:$0xff] }
  0x69   :  { %v486_v5 = vld [vmem:[%s20678_s1 + $0xe60] sm:$0xff]  ;;  %9998 = vmatpush1.bf16.msra.mxu0 %v13425_v41  ;;  %v15624_v41 = vrot.slane %v15608_v31, %v15256_v53 }
  0x6a   :  { %v234_v44 = vld [vmem:[%s20678_s1 + $0x680] sm:$0xff]  ;;  %v13434_v47 = vcombine.high %v482_v36, %v486_v5  ;;  %9917 = vmatprep.subr.bf16.mxu1 %v13178_v42  ;;  %v13433_v50 = vcombine.low %v482_v36, %v486_v5 }
  0x6b   :  { %v238_v45 = vld [vmem:[%s20678_s1 + $0x6a0] sm:$0xff]  ;;  %9918 = vmatpush1.bf16.msra.mxu1 %v13177_v49 }
  0x6c   :  { %v490_v46 = vld [vmem:[%s20678_s1 + $0xe80] sm:$0xff]  ;;  %v13186_v51 = vcombine.high %v234_v44, %v238_v45  ;;  %9999 = vmatprep.subr.bf16.mxu0 %v13434_v47  ;;  %v13185_v58 = vcombine.low %v234_v44, %v238_v45  ;;  %v12980_v45 = vcombine.high %v27_v37, %v31_v40 }
  0x6d   :  { %v494_v48 = vld [vmem:[%s20678_s1 + $0xea0] sm:$0xff]  ;;  %10000 = vmatpush1.bf16.msra.mxu0 %v13433_v50  ;;  %v39_v50 = vld [vmem:[%s20678_s1 + $0x68] sm:$0xff] }
  0x6e   :  { %v242_v52 = vld [vmem:[%s20678_s1 + $0x6c0] sm:$0xff]  ;;  %v13442_v56 = vcombine.high %v490_v46, %v494_v48  ;;  %9919 = vmatprep.subr.bf16.mxu1 %v13186_v51  ;;  %v13441_v59 = vcombine.low %v490_v46, %v494_v48  ;;  %v35_v48 = vld [vmem:[%s20678_s1 + $0x48] sm:$0xff]  ;;  %v1736_v51 = vcombine.high %v15624_v41, %v15624_v41 }
  0x6f   :  { %v246_v54 = vld [vmem:[%s20678_s1 + $0x6e0] sm:$0xff]  ;;  %9920 = vmatpush1.bf16.msra.mxu1 %v13185_v58 }
  0x70   :  { %v498_v55 = vld [vmem:[%s20678_s1 + $0xec0] sm:$0xff]  ;;  %v13194_v60 = vcombine.high %v242_v52, %v246_v54  ;;  %10001 = vmatprep.subr.bf16.mxu0 %v13442_v56  ;;  %v13193_v3 = vcombine.low %v242_v52, %v246_v54  ;;  %v15642_v52 = vcombine.high %v15413_v28, %v15413_v28  ;;  %v12979_v54 = vcombine.low %v27_v37, %v31_v40 }
  0x71   :  { %v502_v57 = vld [vmem:[%s20678_s1 + $0xee0] sm:$0xff]  ;;  %10002 = vmatpush1.bf16.msra.mxu0 %v13441_v59 }
  0x72   :  { %v250_v61 = vld [vmem:[%s20678_s1 + $0x700] sm:$0xff]  ;;  %v13450_v1 = vcombine.high %v498_v55, %v502_v57  ;;  %9921 = vmatprep.subr.bf16.mxu1 %v13194_v60  ;;  %v13449_v4 = vcombine.low %v498_v55, %v502_v57  ;;  %v15646_v55 = vcombine.high %v15423_v32, %v15423_v32 }
  0x73   :  { %v254_v62 = vld [vmem:[%s20678_s1 + $0x720] sm:$0xff]  ;;  %9922 = vmatpush1.bf16.msra.mxu1 %v13193_v3 }
  0x74   :  { %v506_v0 = vld [vmem:[%s20678_s1 + $0xf00] sm:$0xff]  ;;  %v13202_v6 = vcombine.high %v250_v61, %v254_v62  ;;  %10003 = vmatprep.subr.bf16.mxu0 %v13450_v1  ;;  %v13201_v13 = vcombine.low %v250_v61, %v254_v62 }
  0x75   :  { %v510_v2 = vld [vmem:[%s20678_s1 + $0xf20] sm:$0xff]  ;;  %10004 = vmatpush1.bf16.msra.mxu0 %v13449_v4 }
  0x76   :  { %v258_v7 = vld [vmem:[%s20678_s1 + $0x740] sm:$0xff]  ;;  %v13458_v10 = vcombine.high %v506_v0, %v510_v2  ;;  %9923 = vmatprep.subr.bf16.mxu1 %v13202_v6  ;;  %v13457_v14 = vcombine.low %v506_v0, %v510_v2 }
  0x77   :  { %v262_v8 = vld [vmem:[%s20678_s1 + $0x760] sm:$0xff]  ;;  %9924 = vmatpush1.bf16.msra.mxu1 %v13201_v13 }
  0x78   :  { %v514_v9 = vld [vmem:[%s20678_s1 + $0xf40] sm:$0xff]  ;;  %v13210_v15 = vcombine.high %v258_v7, %v262_v8  ;;  %10005 = vmatprep.subr.bf16.mxu0 %v13458_v10  ;;  %v13209_v22 = vcombine.low %v258_v7, %v262_v8 }
  0x79   :  { %v518_v12 = vld [vmem:[%s20678_s1 + $0xf60] sm:$0xff]  ;;  %10006 = vmatpush1.bf16.msra.mxu0 %v13457_v14 }
  0x7a   :  { %v266_v17 = vld [vmem:[%s20678_s1 + $0x780] sm:$0xff]  ;;  %v13466_v20 = vcombine.high %v514_v9, %v518_v12  ;;  %9925 = vmatprep.subr.bf16.mxu1 %v13210_v15  ;;  %v13465_v24 = vcombine.low %v514_v9, %v518_v12 }
  0x7b   :  { %v270_v18 = vld [vmem:[%s20678_s1 + $0x7a0] sm:$0xff]  ;;  %9926 = vmatpush1.bf16.msra.mxu1 %v13209_v22 }
  0x7c   :  { %v522_v19 = vld [vmem:[%s20678_s1 + $0xf80] sm:$0xff]  ;;  %v13218_v25 = vcombine.high %v266_v17, %v270_v18  ;;  %10007 = vmatprep.subr.bf16.mxu0 %v13466_v20  ;;  %v13217_v33 = vcombine.low %v266_v17, %v270_v18 }
  0x7d   :  { %v526_v21 = vld [vmem:[%s20678_s1 + $0xfa0] sm:$0xff]  ;;  %10008 = vmatpush1.bf16.msra.mxu0 %v13465_v24 }
  0x7e   :  { %v274_v23 = vld [vmem:[%s20678_s1 + $0x7c0] sm:$0xff]  ;;  %v13474_v30 = vcombine.high %v522_v19, %v526_v21  ;;  %9927 = vmatprep.subr.bf16.mxu1 %v13218_v25  ;;  %v13473_v34 = vcombine.low %v522_v19, %v526_v21 }
  0x7f   :  { %v278_v26 = vld [vmem:[%s20678_s1 + $0x7e0] sm:$0xff]  ;;  %9928 = vmatpush1.bf16.msra.mxu1 %v13217_v33 }
  0x80   :  { %v530_v27 = vld [vmem:[%s20678_s1 + $0xfc0] sm:$0xff]  ;;  %v13226_v63 = vcombine.high %v274_v23, %v278_v26  ;;  %10009 = vmatprep.subr.bf16.mxu0 %v13474_v30  ;;  %v13225_v42 = vcombine.low %v274_v23, %v278_v26 }
  0x81   :  { %v534_v29 = vld [vmem:[%s20678_s1 + $0xfe0] sm:$0xff]  ;;  %10010 = vmatpush1.bf16.msra.mxu0 %v13473_v34 }
  0x82   :  { %v538_v35 = vld [vmem:[%s20678_s1 + $0x1000] sm:$0xff]  ;;  %v13482_v5 = vcombine.high %v530_v27, %v534_v29  ;;  %9929 = vmatprep.subr.bf16.mxu1 %v13226_v63  ;;  %v13481_v44 = vcombine.low %v530_v27, %v534_v29 }
  0x83   :  { %v542_v36 = vld [vmem:[%s20678_s1 + $0x1020] sm:$0xff]  ;;  %9930 = vmatpush1.bf16.msra.mxu1 %v13225_v42 }
  0x84   :  { %v546_v46 = vld [vmem:[%s20678_s1 + $0x1040] sm:$0xff]  ;;  %10011 = vmatprep.subr.bf16.mxu0 %v13482_v5  ;;  %v13490_v49 = vcombine.high %v538_v35, %v542_v36 }
  0x85   :  { %v550_v47 = vld [vmem:[%s20678_s1 + $0x1060] sm:$0xff] }
  0x86   :  { %10 = vsyncpa [#allocation3], 0  ;;  %10012 = vmatpush1.bf16.msra.mxu0 %v13481_v44  ;;  %v13489_v56 = vcombine.low %v538_v35, %v542_v36  ;;  %10391 = vmatprep.subr.bf16.mxu1 %v12980_v45  ;;  %v12988_v57 = vcombine.high %v35_v48, %v39_v50  ;;  %v13498_v58 = vcombine.high %v546_v46, %v550_v47  ;;  %v43_v59 = vld [vmem:[%s20678_s1 + $0x88] sm:$0xff]  ;;  %v554_v62 = vld [vmem:[%s20678_s1 + $0x1080] sm:$0xff] }
  0x87   :  { %10022 = vmatprep.subr.bf16.mxu0 %v13490_v49  ;;  %v47_v60 = vld [vmem:[%s20678_s1 + $0xa8] sm:$0xff]  ;;  %v15655_v61 = vrot.slane %v1736_v51, %v15256_v53  ;;  %9932 = vmatmul.mubr.bf16.vlgmr.msra.gmra.mrb[0].mxu1 %v15642_v52  ;;  %v558_v0 = vld [vmem:[%s20678_s1 + $0x10a0] sm:$0xff]  ;;  %v12987_v1 = vcombine.low %v35_v48, %v39_v50  ;;  %v13497_v2 = vcombine.low %v546_v46, %v550_v47 }
  0x88   :  { %10392 = vmatpush1.bf16.msra.mxu1 %v12979_v54  ;;  %v12996_v3 = vcombine.high %v43_v59, %v47_v60  ;;  %v13506_v4 = vcombine.high %v554_v62, %v558_v0  ;;  %v51_v6 = vld [vmem:[%s20678_s1 + $0xc8] sm:$0xff]  ;;  %v562_v8 = vld [vmem:[%s20678_s1 + $0x10c0] sm:$0xff]  ;;  %10423 = vmatprep.mubr.bf16.mxu1 %v15294_v11  ;;  %v12995_v10 = vcombine.low %v43_v59, %v47_v60 }
  0x89   :  { %10014 = vmatmul.mubr.bf16.vlgmr.msra.gmra.mrb[0].mxu0 %v15646_v55  ;;  %10393 = vmatprep.subr.bf16.mxu1 %v12988_v57  ;;  %v55_v7 = vld [vmem:[%s20678_s1 + $0xe8] sm:$0xff]  ;;  %v566_v9 = vld [vmem:[%s20678_s1 + $0x10e0] sm:$0xff]  ;;  %v13505_v12 = vcombine.low %v554_v62, %v558_v0 }
  0x8a   :  { %10023 = vmatpush1.bf16.msra.mxu0 %v13489_v56  ;;  %10054 = vmatprep.mubr.bf16.mxu0 %v15655_v61  ;;  %v13004_v13 = vcombine.high %v51_v6, %v55_v7  ;;  %v13514_v14 = vcombine.high %v562_v8, %v566_v9  ;;  %v59_v15 = vld [vmem:[%s20678_s1 + $0x108] sm:$0xff]  ;;  %v570_v18 = vld [vmem:[%s20678_s1 + $0x1100] sm:$0xff]  ;;  %v13003_v20 = vcombine.low %v51_v6, %v55_v7 }
  0x8b   :  { %10024 = vmatprep.subr.bf16.mxu0 %v13498_v58  ;;  %v63_v17 = vld [vmem:[%s20678_s1 + $0x128] sm:$0xff]  ;;  %v574_v19 = vld [vmem:[%s20678_s1 + $0x1120] sm:$0xff]  ;;  %v13513_v21 = vcombine.low %v562_v8, %v566_v9 }
  0x8c   :  { %10394 = vmatpush1.bf16.msra.mxu1 %v12987_v1  ;;  %v13012_v22 = vcombine.high %v59_v15, %v63_v17  ;;  %v13522_v23 = vcombine.high %v570_v18, %v574_v19  ;;  %v67_v24 = vld [vmem:[%s20678_s1 + $0x148] sm:$0xff]  ;;  %v578_v26 = vld [vmem:[%s20678_s1 + $0x1140] sm:$0xff]  ;;  %v13011_v29 = vcombine.low %v59_v15, %v63_v17  ;;  %v13521_v30 = vcombine.low %v570_v18, %v574_v19 }
  0x8d   :  { %10395 = vmatprep.subr.bf16.mxu1 %v12996_v3  ;;  %v71_v25 = vld [vmem:[%s20678_s1 + $0x168] sm:$0xff]  ;;  %v582_v27 = vld [vmem:[%s20678_s1 + $0x1160] sm:$0xff] }
  0x8e   :  { %10025 = vmatpush1.bf16.msra.mxu0 %v13497_v2  ;;  %v13020_v33 = vcombine.high %v67_v24, %v71_v25  ;;  %v13530_v34 = vcombine.high %v578_v26, %v582_v27  ;;  %v75_v63 = vld [vmem:[%s20678_s1 + $0x188] sm:$0xff]  ;;  %v586_v36 = vld [vmem:[%s20678_s1 + $0x1180] sm:$0xff]  ;;  %v13019_v5 = vcombine.low %v67_v24, %v71_v25  ;;  %v13529_v40 = vcombine.low %v578_v26, %v582_v27 }
  0x8f   :  { %10026 = vmatprep.subr.bf16.mxu0 %v13506_v4  ;;  %v79_v35 = vld [vmem:[%s20678_s1 + $0x1a8] sm:$0xff]  ;;  %v590_v37 = vld [vmem:[%s20678_s1 + $0x11a0] sm:$0xff] }
  0x90   :  { %10396 = vmatpush1.bf16.msra.mxu1 %v12995_v10  ;;  %v13028_v42 = vcombine.high %v75_v63, %v79_v35  ;;  %v13538_v44 = vcombine.high %v586_v36, %v590_v37  ;;  %v83_v45 = vld [vmem:[%s20678_s1 + $0x1c8] sm:$0xff]  ;;  %v594_v47 = vld [vmem:[%s20678_s1 + $0x11c0] sm:$0xff]  ;;  %v13027_v49 = vcombine.low %v75_v63, %v79_v35  ;;  %v13537_v50 = vcombine.low %v586_v36, %v590_v37 }
  0x91   :  { %10397 = vmatprep.subr.bf16.mxu1 %v13004_v13  ;;  %v87_v46 = vld [vmem:[%s20678_s1 + $0x1e8] sm:$0xff]  ;;  %v598_v48 = vld [vmem:[%s20678_s1 + $0x11e0] sm:$0xff] }
  0x92   :  { %10027 = vmatpush1.bf16.msra.mxu0 %v13505_v12  ;;  %v13036_v51 = vcombine.high %v83_v45, %v87_v46  ;;  %v13546_v54 = vcombine.high %v594_v47, %v598_v48  ;;  %v91_v56 = vld [vmem:[%s20678_s1 + $0x208] sm:$0xff]  ;;  %v602_v58 = vld [vmem:[%s20678_s1 + $0x1200] sm:$0xff]  ;;  %v13035_v60 = vcombine.low %v83_v45, %v87_v46  ;;  %v13545_v62 = vcombine.low %v594_v47, %v598_v48 }
  0x93   :  { %10028 = vmatprep.subr.bf16.mxu0 %v13514_v14  ;;  %v95_v57 = vld [vmem:[%s20678_s1 + $0x228] sm:$0xff]  ;;  %v606_v59 = vld [vmem:[%s20678_s1 + $0x1220] sm:$0xff] }
  0x94   :  { %10398 = vmatpush1.bf16.msra.mxu1 %v13003_v20  ;;  %v13044_v0 = vcombine.high %v91_v56, %v95_v57  ;;  %v13554_v1 = vcombine.high %v602_v58, %v606_v59  ;;  %v99_v2 = vld [vmem:[%s20678_s1 + $0x248] sm:$0xff]  ;;  %v610_v4 = vld [vmem:[%s20678_s1 + $0x1240] sm:$0xff]  ;;  %v13043_v7 = vcombine.low %v91_v56, %v95_v57  ;;  %v13553_v8 = vcombine.low %v602_v58, %v606_v59 }
  0x95   :  { %10399 = vmatprep.subr.bf16.mxu1 %v13012_v22  ;;  %v103_v3 = vld [vmem:[%s20678_s1 + $0x268] sm:$0xff]  ;;  %v614_v6 = vld [vmem:[%s20678_s1 + $0x1260] sm:$0xff] }
  0x96   :  { %10029 = vmatpush1.bf16.msra.mxu0 %v13513_v21  ;;  %v13052_v9 = vcombine.high %v99_v2, %v103_v3  ;;  %v13562_v10 = vcombine.high %v610_v4, %v614_v6  ;;  %v107_v12 = vld [vmem:[%s20678_s1 + $0x288] sm:$0xff]  ;;  %v618_v14 = vld [vmem:[%s20678_s1 + $0x1280] sm:$0xff]  ;;  %v13051_v17 = vcombine.low %v99_v2, %v103_v3  ;;  %v13561_v18 = vcombine.low %v610_v4, %v614_v6 }
  0x97   :  { %10030 = vmatprep.subr.bf16.mxu0 %v13522_v23  ;;  %v111_v13 = vld [vmem:[%s20678_s1 + $0x2a8] sm:$0xff]  ;;  %v622_v15 = vld [vmem:[%s20678_s1 + $0x12a0] sm:$0xff] }
  0x98   :  { %10400 = vmatpush1.bf16.msra.mxu1 %v13011_v29  ;;  %v13060_v19 = vcombine.high %v107_v12, %v111_v13  ;;  %v13570_v20 = vcombine.high %v618_v14, %v622_v15  ;;  %v115_v21 = vld [vmem:[%s20678_s1 + $0x2c8] sm:$0xff]  ;;  %v626_v23 = vld [vmem:[%s20678_s1 + $0x12c0] sm:$0xff]  ;;  %v13059_v25 = vcombine.low %v107_v12, %v111_v13  ;;  %v13569_v26 = vcombine.low %v618_v14, %v622_v15 }
  0x99   :  { %10401 = vmatprep.subr.bf16.mxu1 %v13020_v33  ;;  %v119_v22 = vld [vmem:[%s20678_s1 + $0x2e8] sm:$0xff]  ;;  %v630_v24 = vld [vmem:[%s20678_s1 + $0x12e0] sm:$0xff] }
  0x9a   :  { %10031 = vmatpush1.bf16.msra.mxu0 %v13521_v30  ;;  %v13068_v27 = vcombine.high %v115_v21, %v119_v22  ;;  %v13578_v29 = vcombine.high %v626_v23, %v630_v24  ;;  %v123_v30 = vld [vmem:[%s20678_s1 + $0x308] sm:$0xff]  ;;  %v638_v63 = vld [vmem:[%s20678_s1 + $0x1320] sm:$0xff]  ;;  %v13067_v35 = vcombine.low %v115_v21, %v119_v22  ;;  %v13577_v36 = vcombine.low %v626_v23, %v630_v24 }
  0x9b   :  { %10032 = vmatprep.subr.bf16.mxu0 %v13530_v34  ;;  %v127_v33 = vld [vmem:[%s20678_s1 + $0x328] sm:$0xff]  ;;  %v634_v34 = vld [vmem:[%s20678_s1 + $0x1300] sm:$0xff]  ;;  %v15849_v23 = vrot.slane %v15624_v41, %v15256_v53 }
  0x9c   :  { %10402 = vmatpush1.bf16.msra.mxu1 %v13019_v5  ;;  %v13076_v37 = vcombine.high %v123_v30, %v127_v33  ;;  %v13586_v5 = vcombine.high %v634_v34, %v638_v63  ;;  %v646_v45 = vld [vmem:[%s20678_s1 + $0x1360] sm:$0xff]  ;;  %v13075_v46 = vcombine.low %v123_v30, %v127_v33  ;;  %v13585_v47 = vcombine.low %v634_v34, %v638_v63 }
  0x9d   :  { %10403 = vmatprep.subr.bf16.mxu1 %v13028_v42  ;;  %v135_v42 = vld [vmem:[%s20678_s1 + $0x368] sm:$0xff]  ;;  %v654_v56 = vld [vmem:[%s20678_s1 + $0x13a0] sm:$0xff]  ;;  %v15859_v30 = vcombine.high %v15655_v61, %v15655_v61 }
  0x9e   :  { %10033 = vmatpush1.bf16.msra.mxu0 %v13529_v40  ;;  %v131_v40 = vld [vmem:[%s20678_s1 + $0x348] sm:$0xff]  ;;  %v662_v2 = vld [vmem:[%s20678_s1 + $0x13e0] sm:$0xff] }
  0x9f   :  { %10034 = vmatprep.subr.bf16.mxu0 %v13538_v44  ;;  %v642_v44 = vld [vmem:[%s20678_s1 + $0x1340] sm:$0xff]  ;;  %v13084_v48 = vcombine.high %v131_v40, %v135_v42  ;;  %v13083_v57 = vcombine.low %v131_v40, %v135_v42 }
  0xa0   :  { %10404 = vmatpush1.bf16.msra.mxu1 %v13027_v49  ;;  %v13594_v49 = vcombine.high %v642_v44, %v646_v45  ;;  %v13593_v58 = vcombine.low %v642_v44, %v646_v45  ;;  %v670_v12 = vld [vmem:[%s20678_s1 + $0x1420] sm:$0xff] }
  0xa1   :  { %10405 = vmatprep.subr.bf16.mxu1 %v13036_v51  ;;  %v143_v51 = vld [vmem:[%s20678_s1 + $0x3a8] sm:$0xff]  ;;  %v678_v21 = vld [vmem:[%s20678_s1 + $0x1460] sm:$0xff] }
  0xa2   :  { %10035 = vmatpush1.bf16.msra.mxu0 %v13537_v50  ;;  %v139_v50 = vld [vmem:[%s20678_s1 + $0x388] sm:$0xff]  ;;  %v682_v41 = vld [vmem:[%s20678_s1 + $0x1480] sm:$0xff] }
  0xa3   :  { %10036 = vmatprep.subr.bf16.mxu0 %v13546_v54  ;;  %v650_v54 = vld [vmem:[%s20678_s1 + $0x1380] sm:$0xff]  ;;  %v13092_v59 = vcombine.high %v139_v50, %v143_v51  ;;  %v13091_v3 = vcombine.low %v139_v50, %v143_v51 }
  0xa4   :  { %10406 = vmatpush1.bf16.msra.mxu1 %v13035_v60  ;;  %v13602_v60 = vcombine.high %v650_v54, %v654_v56  ;;  %v13601_v4 = vcombine.low %v650_v54, %v654_v56  ;;  %v686_v33 = vld [vmem:[%s20678_s1 + $0x14a0] sm:$0xff] }
  0xa5   :  { %10407 = vmatprep.subr.bf16.mxu1 %v13044_v0  ;;  %v151_v0 = vld [vmem:[%s20678_s1 + $0x3e8] sm:$0xff]  ;;  %v690_v40 = vld [vmem:[%s20678_s1 + $0x14c0] sm:$0xff]  ;;  %v13633_v45 = vcombine.low %v682_v41, %v686_v33 }
  0xa6   :  { %10037 = vmatpush1.bf16.msra.mxu0 %v13545_v62  ;;  %v147_v62 = vld [vmem:[%s20678_s1 + $0x3c8] sm:$0xff]  ;;  %v694_v42 = vld [vmem:[%s20678_s1 + $0x14e0] sm:$0xff] }
  0xa7   :  { %10038 = vmatprep.subr.bf16.mxu0 %v13554_v1  ;;  %v658_v1 = vld [vmem:[%s20678_s1 + $0x13c0] sm:$0xff]  ;;  %v13100_v6 = vcombine.high %v147_v62, %v151_v0  ;;  %v13099_v13 = vcombine.low %v147_v62, %v151_v0  ;;  %v13641_v56 = vcombine.low %v690_v40, %v694_v42 }
  0xa8   :  { %10408 = vmatpush1.bf16.msra.mxu1 %v13043_v7  ;;  %v13610_v7 = vcombine.high %v658_v1, %v662_v2  ;;  %v13609_v14 = vcombine.low %v658_v1, %v662_v2  ;;  %v698_v50 = vld [vmem:[%s20678_s1 + $0x1500] sm:$0xff] }
  0xa9   :  { %10409 = vmatprep.subr.bf16.mxu1 %v13052_v9  ;;  %v159_v9 = vld [vmem:[%s20678_s1 + $0x428] sm:$0xff]  ;;  %v702_v51 = vld [vmem:[%s20678_s1 + $0x1520] sm:$0xff] }
  0xaa   :  { %10039 = vmatpush1.bf16.msra.mxu0 %v13553_v8  ;;  %v155_v8 = vld [vmem:[%s20678_s1 + $0x408] sm:$0xff]  ;;  %v706_v62 = vld [vmem:[%s20678_s1 + $0x1540] sm:$0xff]  ;;  %v13649_v2 = vcombine.low %v698_v50, %v702_v51 }
  0xab   :  { %10040 = vmatprep.subr.bf16.mxu0 %v13562_v10  ;;  %v666_v10 = vld [vmem:[%s20678_s1 + $0x1400] sm:$0xff]  ;;  %v13108_v15 = vcombine.high %v155_v8, %v159_v9  ;;  %v13107_v22 = vcombine.low %v155_v8, %v159_v9 }
  0xac   :  { %10410 = vmatpush1.bf16.msra.mxu1 %v13051_v17  ;;  %v13618_v17 = vcombine.high %v666_v10, %v670_v12  ;;  %v13617_v24 = vcombine.low %v666_v10, %v670_v12  ;;  %v710_v0 = vld [vmem:[%s20678_s1 + $0x1560] sm:$0xff] }
  0xad   :  { %10411 = vmatprep.subr.bf16.mxu1 %v13060_v19  ;;  %v167_v19 = vld [vmem:[%s20678_s1 + $0x468] sm:$0xff]  ;;  %v714_v8 = vld [vmem:[%s20678_s1 + $0x1580] sm:$0xff]  ;;  %v13657_v12 = vcombine.low %v706_v62, %v710_v0 }
  0xae   :  { %10041 = vmatpush1.bf16.msra.mxu0 %v13561_v18  ;;  %v163_v18 = vld [vmem:[%s20678_s1 + $0x448] sm:$0xff]  ;;  %v718_v9 = vld [vmem:[%s20678_s1 + $0x15a0] sm:$0xff] }
  0xaf   :  { %10042 = vmatprep.subr.bf16.mxu0 %v13570_v20  ;;  %v674_v20 = vld [vmem:[%s20678_s1 + $0x1440] sm:$0xff]  ;;  %v13115_v34 = vcombine.low %v163_v18, %v167_v19 }
  0xb0   :  { %10412 = vmatpush1.bf16.msra.mxu1 %v13059_v25  ;;  %v13116_v25 = vcombine.high %v163_v18, %v167_v19  ;;  %v13625_v63 = vcombine.low %v674_v20, %v678_v21  ;;  %v722_v18 = vld [vmem:[%s20678_s1 + $0x15c0] sm:$0xff] }
  0xb1   :  { %10413 = vmatprep.subr.bf16.mxu1 %v13068_v27  ;;  %v171_v27 = vld [vmem:[%s20678_s1 + $0x488] sm:$0xff]  ;;  %v726_v19 = vld [vmem:[%s20678_s1 + $0x15e0] sm:$0xff] }
  0xb2   :  { %10043 = vmatpush1.bf16.msra.mxu0 %v13569_v26  ;;  %v13626_v26 = vcombine.high %v674_v20, %v678_v21  ;;  %v13665_v21 = vcombine.low %v714_v8, %v718_v9 }
  0xb3   :  { %10044 = vmatprep.subr.bf16.mxu0 %v13578_v29  ;;  %v175_v29 = vld [vmem:[%s20678_s1 + $0x4a8] sm:$0xff] }
  0xb4   :  { %10414 = vmatpush1.bf16.msra.mxu1 %v13067_v35  ;;  %v13124_v35 = vcombine.high %v171_v27, %v175_v29  ;;  %v13123_v44 = vcombine.low %v171_v27, %v175_v29  ;;  %v730_v27 = vld [vmem:[%s20678_s1 + $0x1600] sm:$0xff] }
  0xb5   :  { %10415 = vmatprep.subr.bf16.mxu1 %v13076_v37  ;;  %v179_v37 = vld [vmem:[%s20678_s1 + $0x4c8] sm:$0xff]  ;;  %v734_v29 = vld [vmem:[%s20678_s1 + $0x1620] sm:$0xff] }
  0xb6   :  { %10045 = vmatpush1.bf16.msra.mxu0 %v13577_v36  ;;  %v13634_v36 = vcombine.high %v682_v41, %v686_v33  ;;  %v13673_v33 = vcombine.low %v722_v18, %v726_v19 }
  0xb7   :  { %10046 = vmatprep.subr.bf16.mxu0 %v13586_v5  ;;  %v183_v5 = vld [vmem:[%s20678_s1 + $0x4e8] sm:$0xff] }
  0xb8   :  { %10416 = vmatpush1.bf16.msra.mxu1 %v13075_v46  ;;  %v13132_v46 = vcombine.high %v179_v37, %v183_v5  ;;  %v13131_v54 = vcombine.low %v179_v37, %v183_v5  ;;  %v738_v37 = vld [vmem:[%s20678_s1 + $0x1640] sm:$0xff] }
  0xb9   :  { %10417 = vmatprep.subr.bf16.mxu1 %v13084_v48  ;;  %v187_v48 = vld [vmem:[%s20678_s1 + $0x508] sm:$0xff]  ;;  %v742_v5 = vld [vmem:[%s20678_s1 + $0x1660] sm:$0xff] }
  0xba   :  { %10047 = vmatpush1.bf16.msra.mxu0 %v13585_v47  ;;  %v13642_v47 = vcombine.high %v690_v40, %v694_v42  ;;  %v13681_v42 = vcombine.low %v730_v27, %v734_v29 }
  0xbb   :  { %10048 = vmatprep.subr.bf16.mxu0 %v13594_v49  ;;  %v191_v49 = vld [vmem:[%s20678_s1 + $0x528] sm:$0xff] }
  0xbc   :  { %10418 = vmatpush1.bf16.msra.mxu1 %v13083_v57  ;;  %v13140_v57 = vcombine.high %v187_v48, %v191_v49  ;;  %v13139_v1 = vcombine.low %v187_v48, %v191_v49  ;;  %v746_v48 = vld [vmem:[%s20678_s1 + $0x1680] sm:$0xff] }
  0xbd   :  { %10419 = vmatprep.subr.bf16.mxu1 %v13092_v59  ;;  %v195_v59 = vld [vmem:[%s20678_s1 + $0x548] sm:$0xff]  ;;  %v750_v49 = vld [vmem:[%s20678_s1 + $0x16a0] sm:$0xff] }
  0xbe   :  { %10049 = vmatpush1.bf16.msra.mxu0 %v13593_v58  ;;  %v13650_v58 = vcombine.high %v698_v50, %v702_v51  ;;  %v13689_v51 = vcombine.low %v738_v37, %v742_v5 }
  0xbf   :  { %10050 = vmatprep.subr.bf16.mxu0 %v13602_v60  ;;  %v199_v60 = vld [vmem:[%s20678_s1 + $0x568] sm:$0xff] }
  0xc0   :  { %10420 = vmatpush1.bf16.msra.mxu1 %v13091_v3  ;;  %v13148_v3 = vcombine.high %v195_v59, %v199_v60  ;;  %v13147_v10 = vcombine.low %v195_v59, %v199_v60  ;;  %v754_v59 = vld [vmem:[%s20678_s1 + $0x16c0] sm:$0xff] }
  0xc1   :  { %10421 = vmatprep.subr.bf16.mxu1 %v13100_v6  ;;  %v203_v6 = vld [vmem:[%s20678_s1 + $0x588] sm:$0xff]  ;;  %v758_v60 = vld [vmem:[%s20678_s1 + $0x16e0] sm:$0xff] }
  0xc2   :  { %10051 = vmatpush1.bf16.msra.mxu0 %v13601_v4  ;;  %v13658_v4 = vcombine.high %v706_v62, %v710_v0  ;;  %v13697_v0 = vcombine.low %v746_v48, %v750_v49 }
  0xc3   :  { %10052 = vmatprep.subr.bf16.mxu0 %v13610_v7  ;;  %v207_v7 = vld [vmem:[%s20678_s1 + $0x5a8] sm:$0xff] }
  0xc4   :  { %10422 = vmatpush1.bf16.msra.mxu1 %v13099_v13  ;;  %v13156_v13 = vcombine.high %v203_v6, %v207_v7  ;;  %v13155_v20 = vcombine.low %v203_v6, %v207_v7  ;;  %v762_v6 = vld [vmem:[%s20678_s1 + $0x1700] sm:$0xff] }
  0xc5   :  { %10432 = vmatprep.subr.bf16.mxu1 %v13108_v15  ;;  %v211_v15 = vld [vmem:[%s20678_s1 + $0x5c8] sm:$0xff]  ;;  %v766_v7 = vld [vmem:[%s20678_s1 + $0x1720] sm:$0xff] }
  0xc6   :  { %10053 = vmatpush1.bf16.msra.mxu0 %v13609_v14  ;;  %v13666_v14 = vcombine.high %v714_v8, %v718_v9  ;;  %v13705_v9 = vcombine.low %v754_v59, %v758_v60 }
  0xc7   :  { %10063 = vmatprep.subr.bf16.mxu0 %v13618_v17  ;;  %10424 = vmatmul.mubr.bf16.vlgmr.msra.gmra.mrb[4].mxu1 %v15413_v28  ;;  %v215_v17 = vld [vmem:[%s20678_s1 + $0x5e8] sm:$0xff] }
  0xc8   :  { %10433 = vmatpush1.bf16.msra.mxu1 %v13107_v22  ;;  %10464 = vmatprep.mubr.bf16.mxu1 %v15439_v38  ;;  %v13164_v22 = vcombine.high %v211_v15, %v215_v17  ;;  %v13163_v41 = vcombine.low %v211_v15, %v215_v17  ;;  %v770_v15 = vld [vmem:[%s20678_s1 + $0x1740] sm:$0xff] }
  0xc9   :  { %10055 = vmatmul.mubr.bf16.vlgmr.msra.gmra.mrb[0].mxu0 %v15849_v23  ;;  %10434 = vmatprep.subr.bf16.mxu1 %v13116_v25  ;;  %v219_v25 = vld [vmem:[%s20678_s1 + $0x608] sm:$0xff]  ;;  %v774_v17 = vld [vmem:[%s20678_s1 + $0x1760] sm:$0xff] }
  0xca   :  { %10064 = vmatpush1.bf16.msra.mxu0 %v13617_v24  ;;  %10095 = vmatprep.mubr.bf16.mxu0 %v15859_v30  ;;  %v13674_v24 = vcombine.high %v722_v18, %v726_v19  ;;  %v13713_v19 = vcombine.low %v762_v6, %v766_v7 }
  0xcb   :  { %10065 = vmatprep.subr.bf16.mxu0 %v13626_v26  ;;  %v223_v26 = vld [vmem:[%s20678_s1 + $0x628] sm:$0xff] }
  0xcc   :  { %10435 = vmatpush1.bf16.msra.mxu1 %v13115_v34  ;;  %v13172_v34 = vcombine.high %v219_v25, %v223_v26  ;;  %v13171_v40 = vcombine.low %v219_v25, %v223_v26  ;;  %v778_v25 = vld [vmem:[%s20678_s1 + $0x1780] sm:$0xff] }
  0xcd   :  { %10436 = vmatprep.subr.bf16.mxu1 %v13124_v35  ;;  %v227_v35 = vld [vmem:[%s20678_s1 + $0x648] sm:$0xff]  ;;  %v782_v26 = vld [vmem:[%s20678_s1 + $0x17a0] sm:$0xff] }
  0xce   :  { %10066 = vmatpush1.bf16.msra.mxu0 %v13625_v63  ;;  %v13682_v63 = vcombine.high %v730_v27, %v734_v29  ;;  %v13721_v29 = vcombine.low %v770_v15, %v774_v17 }
  0xcf   :  { %10067 = vmatprep.subr.bf16.mxu0 %v13634_v36  ;;  %v231_v36 = vld [vmem:[%s20678_s1 + $0x668] sm:$0xff] }
  0xd0   :  { %10437 = vmatpush1.bf16.msra.mxu1 %v13123_v44  ;;  %v13180_v44 = vcombine.high %v227_v35, %v231_v36  ;;  %v13179_v50 = vcombine.low %v227_v35, %v231_v36  ;;  %v1721_v35 = vcombine.high %v15608_v31, %v15608_v31  ;;  %v786_v36 = vld [vmem:[%s20678_s1 + $0x17c0] sm:$0xff]  ;;  %v283_v31 = vld [vmem:[%s20678_s1 + $0x808] sm:$0xff] }
  0xd1   :  { %10438 = vmatprep.subr.bf16.mxu1 %v13132_v46  ;;  %v235_v46 = vld [vmem:[%s20678_s1 + $0x688] sm:$0xff] }
  0xd2   :  { %10068 = vmatpush1.bf16.msra.mxu0 %v13633_v45  ;;  %v13690_v45 = vcombine.high %v738_v37, %v742_v5  ;;  %v790_v37 = vld [vmem:[%s20678_s1 + $0x17e0] sm:$0xff] }
  0xd3   :  { %10069 = vmatprep.subr.bf16.mxu0 %v13642_v47  ;;  %v239_v47 = vld [vmem:[%s20678_s1 + $0x6a8] sm:$0xff] }
  0xd4   :  { %10439 = vmatpush1.bf16.msra.mxu1 %v13131_v54  ;;  %v13188_v54 = vcombine.high %v235_v46, %v239_v47  ;;  %v13187_v62 = vcombine.low %v235_v46, %v239_v47  ;;  %v16036_v46 = vrot.slane %v1721_v35, %v15256_v53  ;;  %v794_v47 = vld [vmem:[%s20678_s1 + $0x1800] sm:$0xff]  ;;  %v323_v35 = vld [vmem:[%s20678_s1 + $0x948] sm:$0xff] }
  0xd5   :  { %10440 = vmatprep.subr.bf16.mxu1 %v13140_v57  ;;  %v243_v57 = vld [vmem:[%s20678_s1 + $0x6c8] sm:$0xff] }
  0xd6   :  { %10070 = vmatpush1.bf16.msra.mxu0 %v13641_v56  ;;  %v13698_v56 = vcombine.high %v746_v48, %v750_v49  ;;  %v798_v48 = vld [vmem:[%s20678_s1 + $0x1820] sm:$0xff] }
  0xd7   :  { %10071 = vmatprep.subr.bf16.mxu0 %v13650_v58  ;;  %v247_v58 = vld [vmem:[%s20678_s1 + $0x6e8] sm:$0xff] }
  0xd8   :  { %10441 = vmatpush1.bf16.msra.mxu1 %v13139_v1  ;;  %v13196_v1 = vcombine.high %v243_v57, %v247_v58  ;;  %v13195_v8 = vcombine.low %v243_v57, %v247_v58  ;;  %v295_v57 = vld [vmem:[%s20678_s1 + $0x868] sm:$0xff]  ;;  %v1737_v58 = vcombine.high %v16036_v46, %v16036_v46 }
  0xd9   :  { %10442 = vmatprep.subr.bf16.mxu1 %v13148_v3  ;;  %v251_v3 = vld [vmem:[%s20678_s1 + $0x708] sm:$0xff] }
  0xda   :  { %10072 = vmatpush1.bf16.msra.mxu0 %v13649_v2  ;;  %v13706_v2 = vcombine.high %v754_v59, %v758_v60  ;;  %v802_v59 = vld [vmem:[%s20678_s1 + $0x1840] sm:$0xff] }
  0xdb   :  { %10073 = vmatprep.subr.bf16.mxu0 %v13658_v4  ;;  %v255_v4 = vld [vmem:[%s20678_s1 + $0x728] sm:$0xff]  ;;  %v806_v60 = vld [vmem:[%s20678_s1 + $0x1860] sm:$0xff] }
  0xdc   :  { %10443 = vmatpush1.bf16.msra.mxu1 %v13147_v10  ;;  %v13204_v10 = vcombine.high %v251_v3, %v255_v4  ;;  %v13203_v18 = vcombine.low %v251_v3, %v255_v4  ;;  %v13754_v3 = vcombine.high %v802_v59, %v806_v60  ;;  %v299_v4 = vld [vmem:[%s20678_s1 + $0x888] sm:$0xff] }
  0xdd   :  { %10444 = vmatprep.subr.bf16.mxu1 %v13156_v13  ;;  %v259_v13 = vld [vmem:[%s20678_s1 + $0x748] sm:$0xff] }
  0xde   :  { %10074 = vmatpush1.bf16.msra.mxu0 %v13657_v12  ;;  %v13714_v12 = vcombine.high %v762_v6, %v766_v7  ;;  %v303_v6 = vld [vmem:[%s20678_s1 + $0x8a8] sm:$0xff]  ;;  %v16069_v7 = vrot.slane %v1737_v58, %v15256_v53 }
  0xdf   :  { %10075 = vmatprep.subr.bf16.mxu0 %v13666_v14  ;;  %v263_v14 = vld [vmem:[%s20678_s1 + $0x768] sm:$0xff] }
  0xe0   :  { %10445 = vmatpush1.bf16.msra.mxu1 %v13155_v20  ;;  %v13212_v20 = vcombine.high %v259_v13, %v263_v14  ;;  %v13211_v27 = vcombine.low %v259_v13, %v263_v14  ;;  %v13252_v13 = vcombine.high %v299_v4, %v303_v6  ;;  %v343_v58 = vld [vmem:[%s20678_s1 + $0x9e8] sm:$0xff] }
  0xe1   :  { %10446 = vmatprep.subr.bf16.mxu1 %v13164_v22  ;;  %v267_v22 = vld [vmem:[%s20678_s1 + $0x788] sm:$0xff] }
  0xe2   :  { %10076 = vmatpush1.bf16.msra.mxu0 %v13665_v21  ;;  %v13722_v21 = vcombine.high %v770_v15, %v774_v17  ;;  %v307_v15 = vld [vmem:[%s20678_s1 + $0x8c8] sm:$0xff] }
  0xe3   :  { %10077 = vmatprep.subr.bf16.mxu0 %v13674_v24  ;;  %v271_v24 = vld [vmem:[%s20678_s1 + $0x7a8] sm:$0xff] }
  0xe4   :  { %10447 = vmatpush1.bf16.msra.mxu1 %v13163_v41  ;;  %v13220_v41 = vcombine.high %v267_v22, %v271_v24  ;;  %v13219_v5 = vcombine.low %v267_v22, %v271_v24  ;;  %v311_v17 = vld [vmem:[%s20678_s1 + $0x8e8] sm:$0xff] }
  0xe5   :  { %10448 = vmatprep.subr.bf16.mxu1 %v13172_v34  ;;  %v275_v34 = vld [vmem:[%s20678_s1 + $0x7c8] sm:$0xff]  ;;  %v13260_v22 = vcombine.high %v307_v15, %v311_v17 }
  0xe6   :  { %10078 = vmatpush1.bf16.msra.mxu0 %v13673_v33  ;;  %v13730_v33 = vcombine.high %v778_v25, %v782_v26 }
  0xe7   :  { %10079 = vmatprep.subr.bf16.mxu0 %v13682_v63  ;;  %v279_v63 = vld [vmem:[%s20678_s1 + $0x7e8] sm:$0xff] }
  0xe8   :  { %10449 = vmatpush1.bf16.msra.mxu1 %v13171_v40  ;;  %v13729_v40 = vcombine.low %v778_v25, %v782_v26  ;;  %v13227_v49 = vcombine.low %v275_v34, %v279_v63  ;;  %v315_v25 = vld [vmem:[%s20678_s1 + $0x908] sm:$0xff] }
  0xe9   :  { %10450 = vmatprep.subr.bf16.mxu1 %v13180_v44  ;;  %v13738_v44 = vcombine.high %v786_v36, %v790_v37  ;;  %v319_v26 = vld [vmem:[%s20678_s1 + $0x928] sm:$0xff] }
  0xea   :  { %10080 = vmatpush1.bf16.msra.mxu0 %v13681_v42  ;;  %v13228_v42 = vcombine.high %v275_v34, %v279_v63  ;;  %v13268_v34 = vcombine.high %v315_v25, %v319_v26 }
  0xeb   :  { %10081 = vmatprep.subr.bf16.mxu0 %v13690_v45  ;;  %v287_v45 = vld [vmem:[%s20678_s1 + $0x828] sm:$0xff] }
  0xec   :  { %10451 = vmatpush1.bf16.msra.mxu1 %v13179_v50  ;;  %v13737_v50 = vcombine.low %v786_v36, %v790_v37  ;;  %v327_v36 = vld [vmem:[%s20678_s1 + $0x968] sm:$0xff]  ;;  %v834_v37 = vld [vmem:[%s20678_s1 + $0x1940] sm:$0xff] }
  0xed   :  { %10452 = vmatprep.subr.bf16.mxu1 %v13188_v54  ;;  %v13746_v54 = vcombine.high %v794_v47, %v798_v48 }
  0xee   :  { %10082 = vmatpush1.bf16.msra.mxu0 %v13689_v51  ;;  %v13236_v51 = vcombine.high %v283_v31, %v287_v45 }
  0xef   :  { %10083 = vmatprep.subr.bf16.mxu0 %v13698_v56  ;;  %v291_v56 = vld [vmem:[%s20678_s1 + $0x848] sm:$0xff] }
  0xf0   :  { %10453 = vmatpush1.bf16.msra.mxu1 %v13187_v62  ;;  %v13235_v62 = vcombine.low %v283_v31, %v287_v45  ;;  %v331_v45 = vld [vmem:[%s20678_s1 + $0x988] sm:$0xff] }
  0xf1   :  { %10454 = vmatprep.subr.bf16.mxu1 %v13196_v1  ;;  %v13745_v1 = vcombine.low %v794_v47, %v798_v48  ;;  %v335_v47 = vld [vmem:[%s20678_s1 + $0x9a8] sm:$0xff]  ;;  %v842_v48 = vld [vmem:[%s20678_s1 + $0x1980] sm:$0xff] }
  0xf2   :  { %10084 = vmatpush1.bf16.msra.mxu0 %v13697_v0  ;;  %v16060_v0 = vcombine.high %v15849_v23, %v15849_v23 }
  0xf3   :  { %10085 = vmatprep.subr.bf16.mxu0 %v13706_v2  ;;  %v13244_v2 = vcombine.high %v291_v56, %v295_v57 }
  0xf4   :  { %10455 = vmatpush1.bf16.msra.mxu1 %v13195_v8  ;;  %v810_v8 = vld [vmem:[%s20678_s1 + $0x1880] sm:$0xff] }
  0xf5   :  { %10456 = vmatprep.subr.bf16.mxu1 %v13204_v10  ;;  %v13243_v10 = vcombine.low %v291_v56, %v295_v57  ;;  %v339_v57 = vld [vmem:[%s20678_s1 + $0x9c8] sm:$0xff] }
  0xf6   :  { %10086 = vmatpush1.bf16.msra.mxu0 %v13705_v9  ;;  %v814_v9 = vld [vmem:[%s20678_s1 + $0x18a0] sm:$0xff] }
  0xf7   :  { %10087 = vmatprep.subr.bf16.mxu0 %v13714_v12  ;;  %v13753_v12 = vcombine.low %v802_v59, %v806_v60  ;;  %v13762_v14 = vcombine.high %v810_v8, %v814_v9  ;;  %v850_v59 = vld [vmem:[%s20678_s1 + $0x19c0] sm:$0xff] }
  0xf8   :  { %10457 = vmatpush1.bf16.msra.mxu1 %v13203_v18  ;;  %v818_v18 = vld [vmem:[%s20678_s1 + $0x18c0] sm:$0xff] }
  0xf9   :  { %10458 = vmatprep.subr.bf16.mxu1 %v13212_v20  ;;  %v13251_v20 = vcombine.low %v299_v4, %v303_v6  ;;  %v854_v60 = vld [vmem:[%s20678_s1 + $0x19e0] sm:$0xff]  ;;  %v347_v4 = vld [vmem:[%s20678_s1 + $0xa08] sm:$0xff] }
  0xfa   :  { %10088 = vmatpush1.bf16.msra.mxu0 %v13713_v19  ;;  %v822_v19 = vld [vmem:[%s20678_s1 + $0x18e0] sm:$0xff]  ;;  %v351_v6 = vld [vmem:[%s20678_s1 + $0xa28] sm:$0xff] }
  0xfb   :  { %10089 = vmatprep.subr.bf16.mxu0 %v13722_v21  ;;  %v13761_v21 = vcombine.low %v810_v8, %v814_v9  ;;  %v13770_v24 = vcombine.high %v818_v18, %v822_v19  ;;  %v858_v8 = vld [vmem:[%s20678_s1 + $0x1a00] sm:$0xff] }
  0xfc   :  { %10459 = vmatpush1.bf16.msra.mxu1 %v13211_v27  ;;  %v826_v27 = vld [vmem:[%s20678_s1 + $0x1900] sm:$0xff] }
  0xfd   :  { %10460 = vmatprep.subr.bf16.mxu1 %v13220_v41  ;;  %v13259_v41 = vcombine.low %v307_v15, %v311_v17  ;;  %v862_v9 = vld [vmem:[%s20678_s1 + $0x1a20] sm:$0xff]  ;;  %v355_v15 = vld [vmem:[%s20678_s1 + $0xa48] sm:$0xff] }
  0xfe   :  { %10090 = vmatpush1.bf16.msra.mxu0 %v13721_v29  ;;  %v830_v29 = vld [vmem:[%s20678_s1 + $0x1920] sm:$0xff]  ;;  %v359_v17 = vld [vmem:[%s20678_s1 + $0xa68] sm:$0xff] }
  0xff   :  { %10091 = vmatprep.subr.bf16.mxu0 %v13730_v33  ;;  %v13769_v33 = vcombine.low %v818_v18, %v822_v19  ;;  %v13778_v63 = vcombine.high %v826_v27, %v830_v29  ;;  %v866_v18 = vld [vmem:[%s20678_s1 + $0x1a40] sm:$0xff] }
 0x100   :  { %10461 = vmatpush1.bf16.msra.mxu1 %v13219_v5  ;;  %v838_v5 = vld [vmem:[%s20678_s1 + $0x1960] sm:$0xff] }
 0x101   :  { %10462 = vmatprep.subr.bf16.mxu1 %v13228_v42  ;;  %v13777_v42 = vcombine.low %v826_v27, %v830_v29  ;;  %v13786_v31 = vcombine.high %v834_v37, %v838_v5  ;;  %v870_v19 = vld [vmem:[%s20678_s1 + $0x1a60] sm:$0xff] }
 0x102   :  { %10092 = vmatpush1.bf16.msra.mxu0 %v13729_v40  ;;  %v13267_v40 = vcombine.low %v315_v25, %v319_v26  ;;  %v363_v25 = vld [vmem:[%s20678_s1 + $0xa88] sm:$0xff]  ;;  %v874_v27 = vld [vmem:[%s20678_s1 + $0x1a80] sm:$0xff] }
 0x103   :  { %10093 = vmatprep.subr.bf16.mxu0 %v13738_v44  ;;  %v13276_v44 = vcombine.high %v323_v35, %v327_v36  ;;  %v367_v26 = vld [vmem:[%s20678_s1 + $0xaa8] sm:$0xff]  ;;  %v878_v29 = vld [vmem:[%s20678_s1 + $0x1aa0] sm:$0xff] }
 0x104   :  { %10463 = vmatpush1.bf16.msra.mxu1 %v13227_v49  ;;  %v846_v49 = vld [vmem:[%s20678_s1 + $0x19a0] sm:$0xff] }
 0x105   :  { %10473 = vmatprep.subr.bf16.mxu1 %v13236_v51  ;;  %v13785_v51 = vcombine.low %v834_v37, %v838_v5  ;;  %v13794_v56 = vcombine.high %v842_v48, %v846_v49  ;;  %v882_v37 = vld [vmem:[%s20678_s1 + $0x1ac0] sm:$0xff] }
 0x106   :  { %10094 = vmatpush1.bf16.msra.mxu0 %v13737_v50  ;;  %v13275_v50 = vcombine.low %v323_v35, %v327_v36  ;;  %v371_v35 = vld [vmem:[%s20678_s1 + $0xac8] sm:$0xff]  ;;  %v886_v5 = vld [vmem:[%s20678_s1 + $0x1ae0] sm:$0xff] }
 0x107   :  { %10104 = vmatprep.subr.bf16.mxu0 %v13746_v54  ;;  %10465 = vmatmul.mubr.bf16.vlgmr.msra.gmra.mrb[4].mxu1 %v15642_v52  ;;  %v13284_v54 = vcombine.high %v331_v45, %v335_v47  ;;  %v375_v36 = vld [vmem:[%s20678_s1 + $0xae8] sm:$0xff] }
 0x108   :  { %10474 = vmatpush1.bf16.msra.mxu1 %v13235_v62  ;;  %10505 = vmatprep.mubr.bf16.mxu1 %v15306_v16  ;;  %v13283_v62 = vcombine.low %v331_v45, %v335_v47  ;;  %v379_v45 = vld [vmem:[%s20678_s1 + $0xb08] sm:$0xff] }
 0x109   :  { %10096 = vmatmul.mubr.bf16.vlgmr.msra.gmra.mrb[0].mxu0 %v16060_v0  ;;  %10475 = vmatprep.subr.bf16.mxu1 %v13244_v2  ;;  %v13292_v2 = vcombine.high %v339_v57, %v343_v58  ;;  %v383_v47 = vld [vmem:[%s20678_s1 + $0xb28] sm:$0xff] }
 0x10a   :  { %10105 = vmatpush1.bf16.msra.mxu0 %v13745_v1  ;;  %10136 = vmatprep.mubr.bf16.mxu0 %v16069_v7  ;;  %v13793_v1 = vcombine.low %v842_v48, %v846_v49  ;;  %v890_v48 = vld [vmem:[%s20678_s1 + $0x1b00] sm:$0xff] }
 0x10b   :  { %10106 = vmatprep.subr.bf16.mxu0 %v13754_v3  ;;  %v13802_v3 = vcombine.high %v850_v59, %v854_v60  ;;  %v894_v49 = vld [vmem:[%s20678_s1 + $0x1b20] sm:$0xff] }
 0x10c   :  { %10476 = vmatpush1.bf16.msra.mxu1 %v13243_v10  ;;  %v13291_v10 = vcombine.low %v339_v57, %v343_v58  ;;  %v387_v57 = vld [vmem:[%s20678_s1 + $0xb48] sm:$0xff] }
 0x10d   :  { %10477 = vmatprep.subr.bf16.mxu1 %v13252_v13  ;;  %v13300_v13 = vcombine.high %v347_v4, %v351_v6  ;;  %v391_v58 = vld [vmem:[%s20678_s1 + $0xb68] sm:$0xff] }
 0x10e   :  { %10107 = vmatpush1.bf16.msra.mxu0 %v13753_v12  ;;  %v13801_v12 = vcombine.low %v850_v59, %v854_v60  ;;  %v898_v59 = vld [vmem:[%s20678_s1 + $0x1b40] sm:$0xff] }
 0x10f   :  { %10108 = vmatprep.subr.bf16.mxu0 %v13762_v14  ;;  %v13810_v14 = vcombine.high %v858_v8, %v862_v9  ;;  %v902_v60 = vld [vmem:[%s20678_s1 + $0x1b60] sm:$0xff] }
 0x110   :  { %10478 = vmatpush1.bf16.msra.mxu1 %v13251_v20  ;;  %v13299_v20 = vcombine.low %v347_v4, %v351_v6  ;;  %v395_v4 = vld [vmem:[%s20678_s1 + $0xb88] sm:$0xff] }
 0x111   :  { %10479 = vmatprep.subr.bf16.mxu1 %v13260_v22  ;;  %v13308_v22 = vcombine.high %v355_v15, %v359_v17  ;;  %v399_v6 = vld [vmem:[%s20678_s1 + $0xba8] sm:$0xff] }
 0x112   :  { %10109 = vmatpush1.bf16.msra.mxu0 %v13761_v21  ;;  %v13809_v21 = vcombine.low %v858_v8, %v862_v9  ;;  %v906_v8 = vld [vmem:[%s20678_s1 + $0x1b80] sm:$0xff] }
 0x113   :  { %10110 = vmatprep.subr.bf16.mxu0 %v13770_v24  ;;  %v13818_v24 = vcombine.high %v866_v18, %v870_v19  ;;  %v910_v9 = vld [vmem:[%s20678_s1 + $0x1ba0] sm:$0xff] }
 0x114   :  { %10480 = vmatpush1.bf16.msra.mxu1 %v13259_v41  ;;  %v13307_v41 = vcombine.low %v355_v15, %v359_v17  ;;  %v403_v15 = vld [vmem:[%s20678_s1 + $0xbc8] sm:$0xff] }
 0x115   :  { %10481 = vmatprep.subr.bf16.mxu1 %v13268_v34  ;;  %v13316_v34 = vcombine.high %v363_v25, %v367_v26  ;;  %v407_v17 = vld [vmem:[%s20678_s1 + $0xbe8] sm:$0xff] }
 0x116   :  { %10111 = vmatpush1.bf16.msra.mxu0 %v13769_v33  ;;  %v13817_v33 = vcombine.low %v866_v18, %v870_v19  ;;  %v914_v18 = vld [vmem:[%s20678_s1 + $0x1bc0] sm:$0xff] }
 0x117   :  { %10112 = vmatprep.subr.bf16.mxu0 %v13778_v63  ;;  %v13826_v63 = vcombine.high %v874_v27, %v878_v29  ;;  %v918_v19 = vld [vmem:[%s20678_s1 + $0x1be0] sm:$0xff] }
 0x118   :  { %10482 = vmatpush1.bf16.msra.mxu1 %v13267_v40  ;;  %v13315_v40 = vcombine.low %v363_v25, %v367_v26  ;;  %v411_v25 = vld [vmem:[%s20678_s1 + $0xc08] sm:$0xff] }
 0x119   :  { %10483 = vmatprep.subr.bf16.mxu1 %v13276_v44  ;;  %v13324_v44 = vcombine.high %v371_v35, %v375_v36  ;;  %v415_v26 = vld [vmem:[%s20678_s1 + $0xc28] sm:$0xff] }
 0x11a   :  { %10113 = vmatpush1.bf16.msra.mxu0 %v13777_v42  ;;  %v13825_v42 = vcombine.low %v874_v27, %v878_v29  ;;  %v922_v27 = vld [vmem:[%s20678_s1 + $0x1c00] sm:$0xff] }
 0x11b   :  { %10114 = vmatprep.subr.bf16.mxu0 %v13786_v31  ;;  %v13834_v31 = vcombine.high %v882_v37, %v886_v5  ;;  %v926_v29 = vld [vmem:[%s20678_s1 + $0x1c20] sm:$0xff] }
 0x11c   :  { %10484 = vmatpush1.bf16.msra.mxu1 %v13275_v50  ;;  %v13323_v50 = vcombine.low %v371_v35, %v375_v36  ;;  %v419_v35 = vld [vmem:[%s20678_s1 + $0xc48] sm:$0xff] }
 0x11d   :  { %10485 = vmatprep.subr.bf16.mxu1 %v13284_v54  ;;  %v13332_v54 = vcombine.high %v379_v45, %v383_v47  ;;  %v423_v36 = vld [vmem:[%s20678_s1 + $0xc68] sm:$0xff] }
 0x11e   :  { %10115 = vmatpush1.bf16.msra.mxu0 %v13785_v51  ;;  %v13833_v51 = vcombine.low %v882_v37, %v886_v5  ;;  %v930_v37 = vld [vmem:[%s20678_s1 + $0x1c40] sm:$0xff] }
 0x11f   :  { %10116 = vmatprep.subr.bf16.mxu0 %v13794_v56  ;;  %v13842_v56 = vcombine.high %v890_v48, %v894_v49  ;;  %v934_v5 = vld [vmem:[%s20678_s1 + $0x1c60] sm:$0xff] }
 0x120   :  { %10486 = vmatpush1.bf16.msra.mxu1 %v13283_v62  ;;  %v13331_v62 = vcombine.low %v379_v45, %v383_v47  ;;  %v13882_v45 = vcombine.high %v930_v37, %v934_v5  ;;  %v427_v47 = vld [vmem:[%s20678_s1 + $0xc88] sm:$0xff] }
 0x121   :  { %10487 = vmatprep.subr.bf16.mxu1 %v13292_v2  ;;  %v13340_v2 = vcombine.high %v387_v57, %v391_v58 }
 0x122   :  { %10117 = vmatpush1.bf16.msra.mxu0 %v13793_v1  ;;  %v13841_v1 = vcombine.low %v890_v48, %v894_v49  ;;  %v431_v48 = vld [vmem:[%s20678_s1 + $0xca8] sm:$0xff]  ;;  %v16273_v49 = vcombine.high %v16069_v7, %v16069_v7 }
 0x123   :  { %10118 = vmatprep.subr.bf16.mxu0 %v13802_v3  ;;  %v13850_v3 = vcombine.high %v898_v59, %v902_v60 }
 0x124   :  { %10488 = vmatpush1.bf16.msra.mxu1 %v13291_v10  ;;  %v13339_v10 = vcombine.low %v387_v57, %v391_v58  ;;  %v435_v58 = vld [vmem:[%s20678_s1 + $0xcc8] sm:$0xff] }
 0x125   :  { %10489 = vmatprep.subr.bf16.mxu1 %v13300_v13  ;;  %v13348_v13 = vcombine.high %v395_v4, %v399_v6 }
 0x126   :  { %10119 = vmatpush1.bf16.msra.mxu0 %v13801_v12  ;;  %v13849_v12 = vcombine.low %v898_v59, %v902_v60  ;;  %v439_v59 = vld [vmem:[%s20678_s1 + $0xce8] sm:$0xff]  ;;  %v946_v60 = vld [vmem:[%s20678_s1 + $0x1cc0] sm:$0xff] }
 0x127   :  { %10120 = vmatprep.subr.bf16.mxu0 %v13810_v14  ;;  %v13858_v14 = vcombine.high %v906_v8, %v910_v9 }
 0x128   :  { %10490 = vmatpush1.bf16.msra.mxu1 %v13299_v20  ;;  %v13347_v20 = vcombine.low %v395_v4, %v399_v6  ;;  %v443_v6 = vld [vmem:[%s20678_s1 + $0xd08] sm:$0xff] }
 0x129   :  { %10491 = vmatprep.subr.bf16.mxu1 %v13308_v22  ;;  %v13356_v22 = vcombine.high %v403_v15, %v407_v17 }
 0x12a   :  { %10121 = vmatpush1.bf16.msra.mxu0 %v13809_v21  ;;  %v13857_v21 = vcombine.low %v906_v8, %v910_v9  ;;  %v447_v8 = vld [vmem:[%s20678_s1 + $0xd28] sm:$0xff]  ;;  %v954_v9 = vld [vmem:[%s20678_s1 + $0x1d00] sm:$0xff] }
 0x12b   :  { %10122 = vmatprep.subr.bf16.mxu0 %v13818_v24  ;;  %v13866_v24 = vcombine.high %v914_v18, %v918_v19 }
 0x12c   :  { %10492 = vmatpush1.bf16.msra.mxu1 %v13307_v41  ;;  %v13355_v41 = vcombine.low %v403_v15, %v407_v17  ;;  %v451_v17 = vld [vmem:[%s20678_s1 + $0xd48] sm:$0xff] }
 0x12d   :  { %10493 = vmatprep.subr.bf16.mxu1 %v13316_v34  ;;  %v13364_v34 = vcombine.high %v411_v25, %v415_v26 }
 0x12e   :  { %10123 = vmatpush1.bf16.msra.mxu0 %v13817_v33  ;;  %v13865_v33 = vcombine.low %v914_v18, %v918_v19  ;;  %v455_v18 = vld [vmem:[%s20678_s1 + $0xd68] sm:$0xff]  ;;  %v962_v19 = vld [vmem:[%s20678_s1 + $0x1d40] sm:$0xff] }
 0x12f   :  { %10124 = vmatprep.subr.bf16.mxu0 %v13826_v63  ;;  %v13874_v63 = vcombine.high %v922_v27, %v926_v29 }
 0x130   :  { %10494 = vmatpush1.bf16.msra.mxu1 %v13315_v40  ;;  %v13363_v40 = vcombine.low %v411_v25, %v415_v26  ;;  %v459_v26 = vld [vmem:[%s20678_s1 + $0xd88] sm:$0xff] }
 0x131   :  { %10495 = vmatprep.subr.bf16.mxu1 %v13324_v44  ;;  %v13873_v44 = vcombine.low %v922_v27, %v926_v29  ;;  %v463_v27 = vld [vmem:[%s20678_s1 + $0xda8] sm:$0xff]  ;;  %v970_v29 = vld [vmem:[%s20678_s1 + $0x1d80] sm:$0xff] }
 0x132   :  { %10125 = vmatpush1.bf16.msra.mxu0 %v13825_v42  ;;  %v16263_v42 = vrot.slane %v16036_v46, %v15256_v53  ;;  %v938_v46 = vld [vmem:[%s20678_s1 + $0x1c80] sm:$0xff] }
 0x133   :  { %10126 = vmatprep.subr.bf16.mxu0 %v13834_v31  ;;  %v13372_v31 = vcombine.high %v419_v35, %v423_v36 }
 0x134   :  { %10496 = vmatpush1.bf16.msra.mxu1 %v13323_v50  ;;  %v942_v50 = vld [vmem:[%s20678_s1 + $0x1ca0] sm:$0xff] }
 0x135   :  { %10497 = vmatprep.subr.bf16.mxu1 %v13332_v54  ;;  %v13881_v54 = vcombine.low %v930_v37, %v934_v5  ;;  %v13890_v57 = vcombine.high %v938_v46, %v942_v50  ;;  %v467_v37 = vld [vmem:[%s20678_s1 + $0xdc8] sm:$0xff] }
 0x136   :  { %10127 = vmatpush1.bf16.msra.mxu0 %v13833_v51  ;;  %v13371_v51 = vcombine.low %v419_v35, %v423_v36  ;;  %v471_v5 = vld [vmem:[%s20678_s1 + $0xde8] sm:$0xff] }
 0x137   :  { %10128 = vmatprep.subr.bf16.mxu0 %v13842_v56  ;;  %v13380_v56 = vcombine.high %v427_v47, %v431_v48 }
 0x138   :  { %10498 = vmatpush1.bf16.msra.mxu1 %v13331_v62  ;;  %v950_v62 = vld [vmem:[%s20678_s1 + $0x1ce0] sm:$0xff] }
 0x139   :  { %10499 = vmatprep.subr.bf16.mxu1 %v13340_v2  ;;  %v13889_v2 = vcombine.low %v938_v46, %v942_v50  ;;  %v13898_v4 = vcombine.high %v946_v60, %v950_v62  ;;  %v13420_v50 = vcombine.high %v467_v37, %v471_v5 }
 0x13a   :  { %10129 = vmatpush1.bf16.msra.mxu0 %v13841_v1  ;;  %v13379_v1 = vcombine.low %v427_v47, %v431_v48  ;;  %v13411_v47 = vcombine.low %v459_v26, %v463_v27 }
 0x13b   :  { %10130 = vmatprep.subr.bf16.mxu0 %v13850_v3  ;;  %v13388_v3 = vcombine.high %v435_v58, %v439_v59 }
 0x13c   :  { %10500 = vmatpush1.bf16.msra.mxu1 %v13339_v10  ;;  %v958_v10 = vld [vmem:[%s20678_s1 + $0x1d20] sm:$0xff] }
 0x13d   :  { %10501 = vmatprep.subr.bf16.mxu1 %v13348_v13  ;;  %v13897_v13 = vcombine.low %v946_v60, %v950_v62  ;;  %v13906_v15 = vcombine.high %v954_v9, %v958_v10 }
 0x13e   :  { %10131 = vmatpush1.bf16.msra.mxu0 %v13849_v12  ;;  %v13387_v12 = vcombine.low %v435_v58, %v439_v59  ;;  %v990_v58 = vld [vmem:[%s20678_s1 + $0x1e20] sm:$0xff]  ;;  %v13419_v59 = vcombine.low %v467_v37, %v471_v5 }
 0x13f   :  { %10132 = vmatprep.subr.bf16.mxu0 %v13858_v14  ;;  %v13396_v14 = vcombine.high %v443_v6, %v447_v8  ;;  %v1022_v37 = vld [vmem:[%s20678_s1 + $0x1f20] sm:$0xff] }
 0x140   :  { %10502 = vmatpush1.bf16.msra.mxu1 %v13347_v20  ;;  %v966_v20 = vld [vmem:[%s20678_s1 + $0x1d60] sm:$0xff] }
 0x141   :  { %10503 = vmatprep.subr.bf16.mxu1 %v13356_v22  ;;  %v13905_v22 = vcombine.low %v954_v9, %v958_v10  ;;  %v13914_v25 = vcombine.high %v962_v19, %v966_v20 }
 0x142   :  { %10133 = vmatpush1.bf16.msra.mxu0 %v13857_v21  ;;  %v13395_v21 = vcombine.low %v443_v6, %v447_v8  ;;  %v998_v6 = vld [vmem:[%s20678_s1 + $0x1e60] sm:$0xff] }
 0x143   :  { %10134 = vmatprep.subr.bf16.mxu0 %v13866_v24  ;;  %v13404_v24 = vcombine.high %v451_v17, %v455_v18 }
 0x144   :  { %10504 = vmatpush1.bf16.msra.mxu1 %v13355_v41  ;;  %v974_v41 = vld [vmem:[%s20678_s1 + $0x1da0] sm:$0xff] }
 0x145   :  { %10514 = vmatprep.subr.bf16.mxu1 %v13364_v34  ;;  %v13913_v34 = vcombine.low %v962_v19, %v966_v20  ;;  %v13922_v36 = vcombine.high %v970_v29, %v974_v41  ;;  %v13921_v46 = vcombine.low %v970_v29, %v974_v41 }
 0x146   :  { %10135 = vmatpush1.bf16.msra.mxu0 %v13865_v33  ;;  %v13403_v33 = vcombine.low %v451_v17, %v455_v18  ;;  %v1006_v17 = vld [vmem:[%s20678_s1 + $0x1ea0] sm:$0xff] }
 0x147   :  { %10145 = vmatprep.subr.bf16.mxu0 %v13874_v63  ;;  %10506 = vmatmul.mubr.bf16.vlgmr.msra.gmra.mrb[4].mxu1 %v15423_v32  ;;  %v13412_v63 = vcombine.high %v459_v26, %v463_v27  ;;  %v1014_v26 = vld [vmem:[%s20678_s1 + $0x1ee0] sm:$0xff] }
 0x148   :  { %10515 = vmatpush1.bf16.msra.mxu1 %v13363_v40  ;;  %10546 = vmatprep.mubr.bf16.mxu1 %v15444_v39 }
 0x149   :  { %10137 = vmatmul.mubr.bf16.vlgmr.msra.gmra.mrb[0].mxu0 %v16263_v42  ;;  %10516 = vmatprep.subr.bf16.mxu1 %v13372_v31  ;;  %v982_v31 = vld [vmem:[%s20678_s1 + $0x1de0] sm:$0xff] }
 0x14a   :  { %10146 = vmatpush1.bf16.msra.mxu0 %v13873_v44  ;;  %10177 = vmatprep.mubr.bf16.mxu0 %v16273_v49  ;;  %v978_v44 = vld [vmem:[%s20678_s1 + $0x1dc0] sm:$0xff] }
 0x14b   :  { %10147 = vmatprep.subr.bf16.mxu0 %v13882_v45  ;;  %v13929_v60 = vcombine.low %v978_v44, %v982_v31 }
 0x14c   :  { %10517 = vmatpush1.bf16.msra.mxu1 %v13371_v51  ;;  %v13930_v51 = vcombine.high %v978_v44, %v982_v31 }
 0x14d   :  { %10518 = vmatprep.subr.bf16.mxu1 %v13380_v56  ;;  %v479_v56 = vld [vmem:[%s20678_s1 + $0xe28] sm:$0xff] }
 0x14e   :  { %10148 = vmatpush1.bf16.msra.mxu0 %v13881_v54  ;;  %v475_v54 = vld [vmem:[%s20678_s1 + $0xe08] sm:$0xff] }
 0x14f   :  { %10149 = vmatprep.subr.bf16.mxu0 %v13890_v57  ;;  %v986_v57 = vld [vmem:[%s20678_s1 + $0x1e00] sm:$0xff]  ;;  %v13428_v62 = vcombine.high %v475_v54, %v479_v56  ;;  %v13427_v8 = vcombine.low %v475_v54, %v479_v56 }
 0x150   :  { %10519 = vmatpush1.bf16.msra.mxu1 %v13379_v1  ;;  %v13938_v1 = vcombine.high %v986_v57, %v990_v58  ;;  %v13937_v9 = vcombine.low %v986_v57, %v990_v58  ;;  %v523_v58 = vld [vmem:[%s20678_s1 + $0xf88] sm:$0xff] }
 0x151   :  { %10520 = vmatprep.subr.bf16.mxu1 %v13388_v3  ;;  %v487_v3 = vld [vmem:[%s20678_s1 + $0xe68] sm:$0xff] }
 0x152   :  { %10150 = vmatpush1.bf16.msra.mxu0 %v13889_v2  ;;  %v483_v2 = vld [vmem:[%s20678_s1 + $0xe48] sm:$0xff] }
 0x153   :  { %10151 = vmatprep.subr.bf16.mxu0 %v13898_v4  ;;  %v994_v4 = vld [vmem:[%s20678_s1 + $0x1e40] sm:$0xff]  ;;  %v13436_v10 = vcombine.high %v483_v2, %v487_v3  ;;  %v13435_v18 = vcombine.low %v483_v2, %v487_v3 }
 0x154   :  { %10521 = vmatpush1.bf16.msra.mxu1 %v13387_v12  ;;  %v13946_v12 = vcombine.high %v994_v4, %v998_v6  ;;  %v13945_v19 = vcombine.low %v994_v4, %v998_v6  ;;  %v531_v6 = vld [vmem:[%s20678_s1 + $0xfc8] sm:$0xff] }
 0x155   :  { %10522 = vmatprep.subr.bf16.mxu1 %v13396_v14  ;;  %v495_v14 = vld [vmem:[%s20678_s1 + $0xea8] sm:$0xff] }
 0x156   :  { %10152 = vmatpush1.bf16.msra.mxu0 %v13897_v13  ;;  %v491_v13 = vld [vmem:[%s20678_s1 + $0xe88] sm:$0xff] }
 0x157   :  { %10153 = vmatprep.subr.bf16.mxu0 %v13906_v15  ;;  %v1002_v15 = vld [vmem:[%s20678_s1 + $0x1e80] sm:$0xff]  ;;  %v13444_v20 = vcombine.high %v491_v13, %v495_v14  ;;  %v13443_v27 = vcombine.low %v491_v13, %v495_v14 }
 0x158   :  { %10523 = vmatpush1.bf16.msra.mxu1 %v13395_v21  ;;  %v13954_v21 = vcombine.high %v1002_v15, %v1006_v17  ;;  %v13953_v29 = vcombine.low %v1002_v15, %v1006_v17 }
 0x159   :  { %10524 = vmatprep.subr.bf16.mxu1 %v13404_v24  ;;  %v503_v24 = vld [vmem:[%s20678_s1 + $0xee8] sm:$0xff] }
 0x15a   :  { %10154 = vmatpush1.bf16.msra.mxu0 %v13905_v22  ;;  %v16333_v35 = vpop.f32.mrb[0].mxu1  ;;  %v499_v22 = vld [vmem:[%s20678_s1 + $0xec8] sm:$0xff] }
 0x15b   :  { %10155 = vmatprep.subr.bf16.mxu0 %v13914_v25  ;;  %v16341_v40 = vpop.f32.mrb[1].mxu1  ;;  %v1010_v25 = vld [vmem:[%s20678_s1 + $0x1ec0] sm:$0xff]  ;;  %v13452_v41 = vcombine.high %v499_v22, %v503_v24  ;;  %v13451_v5 = vcombine.low %v499_v22, %v503_v24 }
 0x15c   :  { %v9937_v45 = vpop.f32.mrb[2].mxu1  ;;  %10525 = vmatpush1.bf16.msra.mxu1 %v13403_v33  ;;  %v13962_v33 = vcombine.high %v1010_v25, %v1014_v26  ;;  %v13961_v44 = vcombine.low %v1010_v25, %v1014_v26  ;;  %v1054_v22 = vld [vmem:[%s20678_s1 + $0x2020] sm:$0xff] }
 0x15d   :  { %v9938_v48 = vpop.f32.mrb[3].mxu1  ;;  %10526 = vmatprep.subr.bf16.mxu1 %v13412_v63  ;;  %v511_v63 = vld [vmem:[%s20678_s1 + $0xf28] sm:$0xff] }
 0x15e   :  { %10156 = vmatpush1.bf16.msra.mxu0 %v13913_v34  ;;  %v507_v34 = vld [vmem:[%s20678_s1 + $0xf08] sm:$0xff] }
 0x15f   :  { %10157 = vmatprep.subr.bf16.mxu0 %v13922_v36  ;;  %v1018_v36 = vld [vmem:[%s20678_s1 + $0x1f00] sm:$0xff]  ;;  %v13460_v31 = vcombine.high %v507_v34, %v511_v63  ;;  %v519_v48 = vld [vmem:[%s20678_s1 + $0xf68] sm:$0xff] }
 0x160   :  { %10527 = vmatpush1.bf16.msra.mxu1 %v13411_v47  ;;  %v13970_v45 = vcombine.high %v1018_v36, %v1022_v37  ;;  %v515_v47 = vld [vmem:[%s20678_s1 + $0xf48] sm:$0xff]  ;;  %v13969_v54 = vcombine.low %v1018_v36, %v1022_v37  ;;  %v16482_v37 = vcombine.high %v16263_v42, %v16263_v42 }
 0x161   :  { %10528 = vmatprep.subr.bf16.mxu1 %v13420_v50  ;;  %v1030_v50 = vld [vmem:[%s20678_s1 + $0x1f60] sm:$0xff]  ;;  %v13468_v56 = vcombine.high %v515_v47, %v519_v48 }
 0x162   :  { %10158 = vmatpush1.bf16.msra.mxu0 %v13921_v46  ;;  %v1026_v46 = vld [vmem:[%s20678_s1 + $0x1f40] sm:$0xff] }
 0x163   :  { %10159 = vmatprep.subr.bf16.mxu0 %v13930_v51  ;;  %v13459_v51 = vcombine.low %v507_v34, %v511_v63  ;;  %v13978_v57 = vcombine.high %v1026_v46, %v1030_v50  ;;  %v13977_v2 = vcombine.low %v1026_v46, %v1030_v50  ;;  %v1058_v34 = vld [vmem:[%s20678_s1 + $0x2040] sm:$0xff] }
 0x164   :  { %10529 = vmatpush1.bf16.msra.mxu1 %v13419_v59  ;;  %v527_v59 = vld [vmem:[%s20678_s1 + $0xfa8] sm:$0xff]  ;;  %v1062_v63 = vld [vmem:[%s20678_s1 + $0x2060] sm:$0xff] }
 0x165   :  { %10530 = vmatprep.subr.bf16.mxu1 %v13428_v62  ;;  %v1038_v62 = vld [vmem:[%s20678_s1 + $0x1fa0] sm:$0xff]  ;;  %v13476_v3 = vcombine.high %v523_v58, %v527_v59  ;;  %v13475_v13 = vcombine.low %v523_v58, %v527_v59  ;;  %v563_v58 = vld [vmem:[%s20678_s1 + $0x10c8] sm:$0xff] }
 0x166   :  { %10160 = vmatpush1.bf16.msra.mxu0 %v13929_v60  ;;  %v1034_v60 = vld [vmem:[%s20678_s1 + $0x1f80] sm:$0xff]  ;;  %v567_v59 = vld [vmem:[%s20678_s1 + $0x10e8] sm:$0xff] }
 0x167   :  { %10161 = vmatprep.subr.bf16.mxu0 %v13938_v1  ;;  %v13467_v1 = vcombine.low %v515_v47, %v519_v48  ;;  %v13986_v4 = vcombine.high %v1034_v60, %v1038_v62  ;;  %v13985_v14 = vcombine.low %v1034_v60, %v1038_v62  ;;  %v559_v47 = vld [vmem:[%s20678_s1 + $0x10a8] sm:$0xff]  ;;  %v1066_v46 = vld [vmem:[%s20678_s1 + $0x2080] sm:$0xff] }
 0x168   :  { %10531 = vmatpush1.bf16.msra.mxu1 %v13427_v8  ;;  %v535_v8 = vld [vmem:[%s20678_s1 + $0xfe8] sm:$0xff]  ;;  %v1070_v50 = vld [vmem:[%s20678_s1 + $0x20a0] sm:$0xff] }
 0x169   :  { %10532 = vmatprep.subr.bf16.mxu1 %v13436_v10  ;;  %v1046_v10 = vld [vmem:[%s20678_s1 + $0x1fe0] sm:$0xff]  ;;  %v13484_v15 = vcombine.high %v531_v6, %v535_v8  ;;  %v13483_v24 = vcombine.low %v531_v6, %v535_v8  ;;  %v571_v6 = vld [vmem:[%s20678_s1 + $0x1108] sm:$0xff] }
 0x16a   :  { %10162 = vmatpush1.bf16.msra.mxu0 %v13937_v9  ;;  %v1042_v9 = vld [vmem:[%s20678_s1 + $0x1fc0] sm:$0xff]  ;;  %v575_v8 = vld [vmem:[%s20678_s1 + $0x1128] sm:$0xff] }
 0x16b   :  { %10163 = vmatprep.subr.bf16.mxu0 %v13946_v12  ;;  %v16448_v12 = vld [vmem:[%s20677_s0 + $0x10] sm:$0xff]  ;;  %v13994_v17 = vcombine.high %v1042_v9, %v1046_v10  ;;  %v13993_v25 = vcombine.low %v1042_v9, %v1046_v10  ;;  %v1074_v60 = vld [vmem:[%s20678_s1 + $0x20c0] sm:$0xff] }
 0x16c   :  { %10533 = vmatpush1.bf16.msra.mxu1 %v13435_v18  ;;  %v539_v18 = vld [vmem:[%s20678_s1 + $0x1008] sm:$0xff]  ;;  %v1078_v62 = vld [vmem:[%s20678_s1 + $0x20e0] sm:$0xff] }
 0x16d   :  { %10534 = vmatprep.subr.bf16.mxu1 %v13444_v20  ;;  %v16458_v20 = vrot.slane %v16448_v12, %v15256_v53  ;;  %v1082_v9 = vld [vmem:[%s20678_s1 + $0x2100] sm:$0xff] }
 0x16e   :  { %10164 = vmatpush1.bf16.msra.mxu0 %v13945_v19  ;;  %v543_v19 = vld [vmem:[%s20678_s1 + $0x1028] sm:$0xff]  ;;  %v1086_v10 = vld [vmem:[%s20678_s1 + $0x2120] sm:$0xff] }
 0x16f   :  { %10165 = vmatprep.subr.bf16.mxu0 %v13954_v21  ;;  %v1050_v21 = vld [vmem:[%s20678_s1 + $0x2000] sm:$0xff]  ;;  %v13492_v26 = vcombine.high %v539_v18, %v543_v19  ;;  %v13491_v36 = vcombine.low %v539_v18, %v543_v19  ;;  %v579_v18 = vld [vmem:[%s20678_s1 + $0x1148] sm:$0xff] }
 0x170   :  { %10535 = vmatpush1.bf16.msra.mxu1 %v13443_v27  ;;  %v14002_v27 = vcombine.high %v1050_v21, %v1054_v22  ;;  %v583_v19 = vld [vmem:[%s20678_s1 + $0x1168] sm:$0xff] }
 0x171   :  { %10536 = vmatprep.subr.bf16.mxu1 %v13452_v41  ;;  %v551_v41 = vld [vmem:[%s20678_s1 + $0x1068] sm:$0xff] }
 0x172   :  { %10166 = vmatpush1.bf16.msra.mxu0 %v13953_v29  ;;  %v547_v29 = vld [vmem:[%s20678_s1 + $0x1048] sm:$0xff] }
 0x173   :  { %10167 = vmatprep.subr.bf16.mxu0 %v13962_v33  ;;  %v1785_v33 = vcombine.high %v16458_v20, %v16458_v20 }
 0x174   :  { %10537 = vmatpush1.bf16.msra.mxu1 %v13451_v5  ;;  %v14001_v5 = vcombine.low %v1050_v21, %v1054_v22  ;;  %v1090_v21 = vld [vmem:[%s20678_s1 + $0x2140] sm:$0xff] }
 0x175   :  { %10538 = vmatprep.subr.bf16.mxu1 %v13460_v31  ;;  %v14010_v31 = vcombine.high %v1058_v34, %v1062_v63  ;;  %v16491_v48 = vrot.slane %v1785_v33, %v15256_v53  ;;  %v1094_v22 = vld [vmem:[%s20678_s1 + $0x2160] sm:$0xff] }
 0x176   :  { %10168 = vmatpush1.bf16.msra.mxu0 %v13961_v44  ;;  %v13500_v44 = vcombine.high %v547_v29, %v551_v41  ;;  %v1098_v33 = vld [vmem:[%s20678_s1 + $0x2180] sm:$0xff] }
 0x177   :  { %10169 = vmatprep.subr.bf16.mxu0 %v13970_v45  ;;  %v555_v45 = vld [vmem:[%s20678_s1 + $0x1088] sm:$0xff] }
 0x178   :  { %10539 = vmatpush1.bf16.msra.mxu1 %v13459_v51  ;;  %v13499_v51 = vcombine.low %v547_v29, %v551_v41  ;;  %v587_v29 = vld [vmem:[%s20678_s1 + $0x1188] sm:$0xff] }
 0x179   :  { %10540 = vmatprep.subr.bf16.mxu1 %v13468_v56  ;;  %v13508_v56 = vcombine.high %v555_v45, %v559_v47  ;;  %v591_v41 = vld [vmem:[%s20678_s1 + $0x11a8] sm:$0xff] }
 0x17a   :  { %10170 = vmatpush1.bf16.msra.mxu0 %v13969_v54  ;;  %v14009_v54 = vcombine.low %v1058_v34, %v1062_v63  ;;  %v1102_v34 = vld [vmem:[%s20678_s1 + $0x21a0] sm:$0xff]  ;;  %v13531_v63 = vcombine.low %v579_v18, %v583_v19 }
 0x17b   :  { %10171 = vmatprep.subr.bf16.mxu0 %v13978_v57  ;;  %v14018_v57 = vcombine.high %v1066_v46, %v1070_v50 }
 0x17c   :  { %10541 = vmatpush1.bf16.msra.mxu1 %v13467_v1  ;;  %v13507_v1 = vcombine.low %v555_v45, %v559_v47  ;;  %v599_v45 = vld [vmem:[%s20678_s1 + $0x11e8] sm:$0xff]  ;;  %v1106_v47 = vld [vmem:[%s20678_s1 + $0x21c0] sm:$0xff] }
 0x17d   :  { %10542 = vmatprep.subr.bf16.mxu1 %v13476_v3  ;;  %v13516_v3 = vcombine.high %v563_v58, %v567_v59 }
 0x17e   :  { %10172 = vmatpush1.bf16.msra.mxu0 %v13977_v2  ;;  %v14017_v2 = vcombine.low %v1066_v46, %v1070_v50  ;;  %v1110_v46 = vld [vmem:[%s20678_s1 + $0x21e0] sm:$0xff]  ;;  %v13539_v50 = vcombine.low %v587_v29, %v591_v41 }
 0x17f   :  { %10173 = vmatprep.subr.bf16.mxu0 %v13986_v4  ;;  %v14026_v4 = vcombine.high %v1074_v60, %v1078_v62 }
 0x180   :  { %10543 = vmatpush1.bf16.msra.mxu1 %v13475_v13  ;;  %v13515_v13 = vcombine.low %v563_v58, %v567_v59  ;;  %v607_v58 = vld [vmem:[%s20678_s1 + $0x1228] sm:$0xff]  ;;  %v1114_v59 = vld [vmem:[%s20678_s1 + $0x2200] sm:$0xff] }
 0x181   :  { %10544 = vmatprep.subr.bf16.mxu1 %v13484_v15  ;;  %v13524_v15 = vcombine.high %v571_v6, %v575_v8 }
 0x182   :  { %10174 = vmatpush1.bf16.msra.mxu0 %v13985_v14  ;;  %v14025_v14 = vcombine.low %v1074_v60, %v1078_v62  ;;  %v1118_v60 = vld [vmem:[%s20678_s1 + $0x2220] sm:$0xff] }
 0x183   :  { %10175 = vmatprep.subr.bf16.mxu0 %v13994_v17  ;;  %v14034_v17 = vcombine.high %v1082_v9, %v1086_v10 }
 0x184   :  { %10545 = vmatpush1.bf16.msra.mxu1 %v13483_v24  ;;  %v13523_v24 = vcombine.low %v571_v6, %v575_v8  ;;  %v615_v6 = vld [vmem:[%s20678_s1 + $0x1268] sm:$0xff]  ;;  %v1122_v8 = vld [vmem:[%s20678_s1 + $0x2240] sm:$0xff] }
 0x185   :  { %10555 = vmatprep.subr.bf16.mxu1 %v13492_v26  ;;  %v13532_v26 = vcombine.high %v579_v18, %v583_v19  ;;  %v623_v18 = vld [vmem:[%s20678_s1 + $0x12a8] sm:$0xff]  ;;  %v1130_v19 = vld [vmem:[%s20678_s1 + $0x2280] sm:$0xff] }
 0x186   :  { %10176 = vmatpush1.bf16.msra.mxu0 %v13993_v25  ;;  %v14033_v25 = vcombine.low %v1082_v9, %v1086_v10  ;;  %v1126_v9 = vld [vmem:[%s20678_s1 + $0x2260] sm:$0xff] }
 0x187   :  { %10186 = vmatprep.subr.bf16.mxu0 %v14002_v27  ;;  %10547 = vmatmul.mubr.bf16.vlgmr.msra.gmra.mrb[4].mxu1 %v15646_v55  ;;  %v14042_v27 = vcombine.high %v1090_v21, %v1094_v22 }
 0x188   :  { %10556 = vmatpush1.bf16.msra.mxu1 %v13491_v36  ;;  %10587 = vmatprep.mubr.bf16.mxu1 %v15655_v61  ;;  %v14041_v36 = vcombine.low %v1090_v21, %v1094_v22  ;;  %v1134_v21 = vld [vmem:[%s20678_s1 + $0x22a0] sm:$0xff] }
 0x189   :  { %10178 = vmatmul.mubr.bf16.vlgmr.msra.gmra.mrb[0].mxu0 %v16482_v37  ;;  %10557 = vmatprep.subr.bf16.mxu1 %v13500_v44  ;;  %v14050_v44 = vcombine.high %v1098_v33, %v1102_v34 }
 0x18a   :  { %10187 = vmatpush1.bf16.msra.mxu0 %v14001_v5  ;;  %10218 = vmatprep.mubr.bf16.mxu0 %v16491_v48  ;;  %v13540_v5 = vcombine.high %v587_v29, %v591_v41  ;;  %v631_v29 = vld [vmem:[%s20678_s1 + $0x12e8] sm:$0xff]  ;;  %v1138_v41 = vld [vmem:[%s20678_s1 + $0x22c0] sm:$0xff] }
 0x18b   :  { %10188 = vmatprep.subr.bf16.mxu0 %v14010_v31  ;;  %v595_v31 = vld [vmem:[%s20678_s1 + $0x11c8] sm:$0xff] }
 0x18c   :  { %10558 = vmatpush1.bf16.msra.mxu1 %v13499_v51  ;;  %v14049_v51 = vcombine.low %v1098_v33, %v1102_v34  ;;  %v13547_v62 = vcombine.low %v595_v31, %v599_v45  ;;  %v1142_v33 = vld [vmem:[%s20678_s1 + $0x22e0] sm:$0xff] }
 0x18d   :  { %10559 = vmatprep.subr.bf16.mxu1 %v13508_v56  ;;  %v14058_v56 = vcombine.high %v1106_v47, %v1110_v46 }
 0x18e   :  { %10189 = vmatpush1.bf16.msra.mxu0 %v14009_v54  ;;  %v13548_v54 = vcombine.high %v595_v31, %v599_v45  ;;  %v639_v31 = vld [vmem:[%s20678_s1 + $0x1328] sm:$0xff]  ;;  %v1146_v45 = vld [vmem:[%s20678_s1 + $0x2300] sm:$0xff] }
 0x18f   :  { %10190 = vmatprep.subr.bf16.mxu0 %v14018_v57  ;;  %v603_v57 = vld [vmem:[%s20678_s1 + $0x1208] sm:$0xff] }
 0x190   :  { %10560 = vmatpush1.bf16.msra.mxu1 %v13507_v1  ;;  %v14057_v1 = vcombine.low %v1106_v47, %v1110_v46  ;;  %v13555_v10 = vcombine.low %v603_v57, %v607_v58  ;;  %v1150_v47 = vld [vmem:[%s20678_s1 + $0x2320] sm:$0xff] }
 0x191   :  { %10561 = vmatprep.subr.bf16.mxu1 %v13516_v3  ;;  %v14066_v3 = vcombine.high %v1114_v59, %v1118_v60 }
 0x192   :  { %10191 = vmatpush1.bf16.msra.mxu0 %v14017_v2  ;;  %v13556_v2 = vcombine.high %v603_v57, %v607_v58  ;;  %v647_v57 = vld [vmem:[%s20678_s1 + $0x1368] sm:$0xff]  ;;  %v1154_v58 = vld [vmem:[%s20678_s1 + $0x2340] sm:$0xff] }
 0x193   :  { %10192 = vmatprep.subr.bf16.mxu0 %v14026_v4  ;;  %v611_v4 = vld [vmem:[%s20678_s1 + $0x1248] sm:$0xff] }
 0x194   :  { %10562 = vmatpush1.bf16.msra.mxu1 %v13515_v13  ;;  %v14065_v13 = vcombine.low %v1114_v59, %v1118_v60  ;;  %v13563_v22 = vcombine.low %v611_v4, %v615_v6  ;;  %v1158_v59 = vld [vmem:[%s20678_s1 + $0x2360] sm:$0xff] }
 0x195   :  { %10563 = vmatprep.subr.bf16.mxu1 %v13524_v15  ;;  %v14074_v15 = vcombine.high %v1122_v8, %v1126_v9 }
 0x196   :  { %10193 = vmatpush1.bf16.msra.mxu0 %v14025_v14  ;;  %v13564_v14 = vcombine.high %v611_v4, %v615_v6  ;;  %v655_v4 = vld [vmem:[%s20678_s1 + $0x13a8] sm:$0xff]  ;;  %v1162_v6 = vld [vmem:[%s20678_s1 + $0x2380] sm:$0xff] }
 0x197   :  { %10194 = vmatprep.subr.bf16.mxu0 %v14034_v17  ;;  %v619_v17 = vld [vmem:[%s20678_s1 + $0x1288] sm:$0xff] }
 0x198   :  { %10564 = vmatpush1.bf16.msra.mxu1 %v13523_v24  ;;  %v14073_v24 = vcombine.low %v1122_v8, %v1126_v9  ;;  %v13571_v34 = vcombine.low %v619_v17, %v623_v18  ;;  %v1166_v8 = vld [vmem:[%s20678_s1 + $0x23a0] sm:$0xff] }
 0x199   :  { %10565 = vmatprep.subr.bf16.mxu1 %v13532_v26  ;;  %v14082_v26 = vcombine.high %v1130_v19, %v1134_v21 }
 0x19a   :  { %10195 = vmatpush1.bf16.msra.mxu0 %v14033_v25  ;;  %v13572_v25 = vcombine.high %v619_v17, %v623_v18  ;;  %v663_v17 = vld [vmem:[%s20678_s1 + $0x13e8] sm:$0xff]  ;;  %v1170_v18 = vld [vmem:[%s20678_s1 + $0x23c0] sm:$0xff] }
 0x19b   :  { %10196 = vmatprep.subr.bf16.mxu0 %v14042_v27  ;;  %v627_v27 = vld [vmem:[%s20678_s1 + $0x12c8] sm:$0xff] }
 0x19c   :  { %10566 = vmatpush1.bf16.msra.mxu1 %v13531_v63  ;;  %v14081_v63 = vcombine.low %v1130_v19, %v1134_v21  ;;  %v13579_v46 = vcombine.low %v627_v27, %v631_v29  ;;  %v1174_v19 = vld [vmem:[%s20678_s1 + $0x23e0] sm:$0xff] }
 0x19d   :  { %10567 = vmatprep.subr.bf16.mxu1 %v13540_v5  ;;  %v14090_v5 = vcombine.high %v1138_v41, %v1142_v33 }
 0x19e   :  { %10197 = vmatpush1.bf16.msra.mxu0 %v14041_v36  ;;  %v13580_v36 = vcombine.high %v627_v27, %v631_v29  ;;  %v671_v27 = vld [vmem:[%s20678_s1 + $0x1428] sm:$0xff]  ;;  %v1178_v29 = vld [vmem:[%s20678_s1 + $0x2400] sm:$0xff] }
 0x19f   :  { %10198 = vmatprep.subr.bf16.mxu0 %v14050_v44  ;;  %v635_v44 = vld [vmem:[%s20678_s1 + $0x1308] sm:$0xff] }
 0x1a0   :  { %10568 = vmatpush1.bf16.msra.mxu1 %v13539_v50  ;;  %v14089_v50 = vcombine.low %v1138_v41, %v1142_v33  ;;  %v13587_v60 = vcombine.low %v635_v44, %v639_v31  ;;  %v1182_v41 = vld [vmem:[%s20678_s1 + $0x2420] sm:$0xff] }
 0x1a1   :  { %10569 = vmatprep.subr.bf16.mxu1 %v13548_v54  ;;  %v14098_v54 = vcombine.high %v1146_v45, %v1150_v47 }
 0x1a2   :  { %10199 = vmatpush1.bf16.msra.mxu0 %v14049_v51  ;;  %v13588_v51 = vcombine.high %v635_v44, %v639_v31  ;;  %v679_v44 = vld [vmem:[%s20678_s1 + $0x1468] sm:$0xff]  ;;  %v1186_v31 = vld [vmem:[%s20678_s1 + $0x2440] sm:$0xff] }
 0x1a3   :  { %10200 = vmatprep.subr.bf16.mxu0 %v14058_v56  ;;  %v643_v56 = vld [vmem:[%s20678_s1 + $0x1348] sm:$0xff] }
 0x1a4   :  { %10570 = vmatpush1.bf16.msra.mxu1 %v13547_v62  ;;  %v14097_v62 = vcombine.low %v1146_v45, %v1150_v47  ;;  %v13595_v9 = vcombine.low %v643_v56, %v647_v57  ;;  %v1190_v45 = vld [vmem:[%s20678_s1 + $0x2460] sm:$0xff] }
 0x1a5   :  { %10571 = vmatprep.subr.bf16.mxu1 %v13556_v2  ;;  %v14106_v2 = vcombine.high %v1154_v58, %v1158_v59 }
 0x1a6   :  { %10201 = vmatpush1.bf16.msra.mxu0 %v14057_v1  ;;  %v13596_v1 = vcombine.high %v643_v56, %v647_v57  ;;  %v683_v56 = vld [vmem:[%s20678_s1 + $0x1488] sm:$0xff] }
 0x1a7   :  { %10202 = vmatprep.subr.bf16.mxu0 %v14066_v3  ;;  %v651_v3 = vld [vmem:[%s20678_s1 + $0x1388] sm:$0xff] }
 0x1a8   :  { %10572 = vmatpush1.bf16.msra.mxu1 %v13555_v10  ;;  %v14105_v10 = vcombine.low %v1154_v58, %v1158_v59  ;;  %v13603_v21 = vcombine.low %v651_v3, %v655_v4  ;;  %v687_v57 = vld [vmem:[%s20678_s1 + $0x14a8] sm:$0xff]  ;;  %v16695_v58 = vcombine.high %v16491_v48, %v16491_v48  ;;  %v1198_v59 = vld [vmem:[%s20678_s1 + $0x24a0] sm:$0xff] }
 0x1a9   :  { %10573 = vmatprep.subr.bf16.mxu1 %v13564_v14  ;;  %v14114_v14 = vcombine.high %v1162_v6, %v1166_v8 }
 0x1aa   :  { %10203 = vmatpush1.bf16.msra.mxu0 %v14065_v13  ;;  %v13604_v13 = vcombine.high %v651_v3, %v655_v4  ;;  %v691_v3 = vld [vmem:[%s20678_s1 + $0x14c8] sm:$0xff] }
 0x1ab   :  { %10204 = vmatprep.subr.bf16.mxu0 %v14074_v15  ;;  %v659_v15 = vld [vmem:[%s20678_s1 + $0x13c8] sm:$0xff] }
 0x1ac   :  { %10574 = vmatpush1.bf16.msra.mxu1 %v13563_v22  ;;  %v14113_v22 = vcombine.low %v1162_v6, %v1166_v8  ;;  %v13611_v33 = vcombine.low %v659_v15, %v663_v17  ;;  %v695_v4 = vld [vmem:[%s20678_s1 + $0x14e8] sm:$0xff]  ;;  %v1202_v6 = vld [vmem:[%s20678_s1 + $0x24c0] sm:$0xff] }
 0x1ad   :  { %10575 = vmatprep.subr.bf16.mxu1 %v13572_v25  ;;  %v14122_v25 = vcombine.high %v1170_v18, %v1174_v19  ;;  %v1206_v8 = vld [vmem:[%s20678_s1 + $0x24e0] sm:$0xff] }
 0x1ae   :  { %10205 = vmatpush1.bf16.msra.mxu0 %v14073_v24  ;;  %v13612_v24 = vcombine.high %v659_v15, %v663_v17  ;;  %v699_v15 = vld [vmem:[%s20678_s1 + $0x1508] sm:$0xff] }
 0x1af   :  { %10206 = vmatprep.subr.bf16.mxu0 %v14082_v26  ;;  %v667_v26 = vld [vmem:[%s20678_s1 + $0x1408] sm:$0xff] }
 0x1b0   :  { %10576 = vmatpush1.bf16.msra.mxu1 %v13571_v34  ;;  %v14121_v34 = vcombine.low %v1170_v18, %v1174_v19  ;;  %v13619_v47 = vcombine.low %v667_v26, %v671_v27  ;;  %v703_v17 = vld [vmem:[%s20678_s1 + $0x1528] sm:$0xff]  ;;  %v1210_v18 = vld [vmem:[%s20678_s1 + $0x2500] sm:$0xff] }
 0x1b1   :  { %10577 = vmatprep.subr.bf16.mxu1 %v13580_v36  ;;  %v14130_v36 = vcombine.high %v1178_v29, %v1182_v41  ;;  %v1214_v19 = vld [vmem:[%s20678_s1 + $0x2520] sm:$0xff] }
 0x1b2   :  { %10207 = vmatpush1.bf16.msra.mxu0 %v14081_v63  ;;  %v13620_v63 = vcombine.high %v667_v26, %v671_v27  ;;  %v707_v26 = vld [vmem:[%s20678_s1 + $0x1548] sm:$0xff] }
 0x1b3   :  { %10208 = vmatprep.subr.bf16.mxu0 %v14090_v5  ;;  %v675_v5 = vld [vmem:[%s20678_s1 + $0x1448] sm:$0xff] }
 0x1b4   :  { %10578 = vmatpush1.bf16.msra.mxu1 %v13579_v46  ;;  %v16685_v46 = vrot.slane %v16458_v20, %v15256_v53  ;;  %v1194_v20 = vld [vmem:[%s20678_s1 + $0x2480] sm:$0xff]  ;;  %v711_v27 = vld [vmem:[%s20678_s1 + $0x1568] sm:$0xff] }
 0x1b5   :  { %10579 = vmatprep.subr.bf16.mxu1 %v13588_v51  ;;  %v13628_v51 = vcombine.high %v675_v5, %v679_v44 }
 0x1b6   :  { %10209 = vmatpush1.bf16.msra.mxu0 %v14089_v50  ;;  %v14129_v50 = vcombine.low %v1178_v29, %v1182_v41  ;;  %v1218_v29 = vld [vmem:[%s20678_s1 + $0x2540] sm:$0xff] }
 0x1b7   :  { %10210 = vmatprep.subr.bf16.mxu0 %v14098_v54  ;;  %v14138_v54 = vcombine.high %v1186_v31, %v1190_v45  ;;  %v1222_v41 = vld [vmem:[%s20678_s1 + $0x2560] sm:$0xff] }
 0x1b8   :  { %10580 = vmatpush1.bf16.msra.mxu1 %v13587_v60  ;;  %v13627_v60 = vcombine.low %v675_v5, %v679_v44  ;;  %v715_v5 = vld [vmem:[%s20678_s1 + $0x1588] sm:$0xff] }
 0x1b9   :  { %10581 = vmatprep.subr.bf16.mxu1 %v13596_v1  ;;  %v13636_v1 = vcombine.high %v683_v56, %v687_v57  ;;  %v719_v44 = vld [vmem:[%s20678_s1 + $0x15a8] sm:$0xff] }
 0x1ba   :  { %10211 = vmatpush1.bf16.msra.mxu0 %v14097_v62  ;;  %v14137_v62 = vcombine.low %v1186_v31, %v1190_v45  ;;  %v1226_v31 = vld [vmem:[%s20678_s1 + $0x2580] sm:$0xff] }
 0x1bb   :  { %10212 = vmatprep.subr.bf16.mxu0 %v14106_v2  ;;  %v14146_v2 = vcombine.high %v1194_v20, %v1198_v59  ;;  %v1230_v45 = vld [vmem:[%s20678_s1 + $0x25a0] sm:$0xff] }
 0x1bc   :  { %10582 = vmatpush1.bf16.msra.mxu1 %v13595_v9  ;;  %v13635_v9 = vcombine.low %v683_v56, %v687_v57  ;;  %v723_v56 = vld [vmem:[%s20678_s1 + $0x15c8] sm:$0xff] }
 0x1bd   :  { %10583 = vmatprep.subr.bf16.mxu1 %v13604_v13  ;;  %v13644_v13 = vcombine.high %v691_v3, %v695_v4  ;;  %v727_v57 = vld [vmem:[%s20678_s1 + $0x15e8] sm:$0xff] }
 0x1be   :  { %10213 = vmatpush1.bf16.msra.mxu0 %v14105_v10  ;;  %v14145_v10 = vcombine.low %v1194_v20, %v1198_v59  ;;  %v1234_v20 = vld [vmem:[%s20678_s1 + $0x25c0] sm:$0xff] }
 0x1bf   :  { %10214 = vmatprep.subr.bf16.mxu0 %v14114_v14  ;;  %v14154_v14 = vcombine.high %v1202_v6, %v1206_v8  ;;  %v1238_v59 = vld [vmem:[%s20678_s1 + $0x25e0] sm:$0xff] }
 0x1c0   :  { %10584 = vmatpush1.bf16.msra.mxu1 %v13603_v21  ;;  %v13643_v21 = vcombine.low %v691_v3, %v695_v4  ;;  %v731_v3 = vld [vmem:[%s20678_s1 + $0x1608] sm:$0xff] }
 0x1c1   :  { %10585 = vmatprep.subr.bf16.mxu1 %v13612_v24  ;;  %v13652_v24 = vcombine.high %v699_v15, %v703_v17  ;;  %v735_v4 = vld [vmem:[%s20678_s1 + $0x1628] sm:$0xff] }
 0x1c2   :  { %10215 = vmatpush1.bf16.msra.mxu0 %v14113_v22  ;;  %v14153_v22 = vcombine.low %v1202_v6, %v1206_v8  ;;  %v1242_v6 = vld [vmem:[%s20678_s1 + $0x2600] sm:$0xff] }
 0x1c3   :  { %10216 = vmatprep.subr.bf16.mxu0 %v14122_v25  ;;  %v14162_v25 = vcombine.high %v1210_v18, %v1214_v19  ;;  %v1246_v8 = vld [vmem:[%s20678_s1 + $0x2620] sm:$0xff] }
 0x1c4   :  { %10586 = vmatpush1.bf16.msra.mxu1 %v13611_v33  ;;  %v13651_v33 = vcombine.low %v699_v15, %v703_v17  ;;  %v739_v15 = vld [vmem:[%s20678_s1 + $0x1648] sm:$0xff] }
 0x1c5   :  { %10596 = vmatprep.subr.bf16.mxu1 %v13620_v63  ;;  %v13660_v63 = vcombine.high %v707_v26, %v711_v27  ;;  %v743_v17 = vld [vmem:[%s20678_s1 + $0x1668] sm:$0xff] }
 0x1c6   :  { %10217 = vmatpush1.bf16.msra.mxu0 %v14121_v34  ;;  %v14161_v34 = vcombine.low %v1210_v18, %v1214_v19  ;;  %v1250_v18 = vld [vmem:[%s20678_s1 + $0x2640] sm:$0xff] }
 0x1c7   :  { %10227 = vmatprep.subr.bf16.mxu0 %v14130_v36  ;;  %10588 = vmatmul.mubr.bf16.vlgmr.msra.gmra.mrb[4].mxu1 %v15849_v23  ;;  %v14170_v36 = vcombine.high %v1218_v29, %v1222_v41  ;;  %v1254_v19 = vld [vmem:[%s20678_s1 + $0x2660] sm:$0xff] }
 0x1c8   :  { %10597 = vmatpush1.bf16.msra.mxu1 %v13619_v47  ;;  %10628 = vmatprep.mubr.bf16.mxu1 %v15859_v30  ;;  %v13659_v47 = vcombine.low %v707_v26, %v711_v27  ;;  %v747_v26 = vld [vmem:[%s20678_s1 + $0x1688] sm:$0xff] }
 0x1c9   :  { %10219 = vmatmul.mubr.bf16.vlgmr.msra.gmra.mrb[0].mxu0 %v16685_v46  ;;  %10598 = vmatprep.subr.bf16.mxu1 %v13628_v51  ;;  %v13668_v51 = vcombine.high %v715_v5, %v719_v44  ;;  %v751_v27 = vld [vmem:[%s20678_s1 + $0x16a8] sm:$0xff] }
 0x1ca   :  { %10228 = vmatpush1.bf16.msra.mxu0 %v14129_v50  ;;  %10259 = vmatprep.mubr.bf16.mxu0 %v16695_v58  ;;  %v14169_v50 = vcombine.low %v1218_v29, %v1222_v41  ;;  %v1258_v29 = vld [vmem:[%s20678_s1 + $0x2680] sm:$0xff] }
 0x1cb   :  { %10229 = vmatprep.subr.bf16.mxu0 %v14138_v54  ;;  %v14178_v54 = vcombine.high %v1226_v31, %v1230_v45  ;;  %v1262_v41 = vld [vmem:[%s20678_s1 + $0x26a0] sm:$0xff] }
 0x1cc   :  { %10599 = vmatpush1.bf16.msra.mxu1 %v13627_v60  ;;  %v13667_v60 = vcombine.low %v715_v5, %v719_v44  ;;  %v755_v5 = vld [vmem:[%s20678_s1 + $0x16c8] sm:$0xff] }
 0x1cd   :  { %10600 = vmatprep.subr.bf16.mxu1 %v13636_v1  ;;  %v13676_v1 = vcombine.high %v723_v56, %v727_v57  ;;  %v759_v44 = vld [vmem:[%s20678_s1 + $0x16e8] sm:$0xff] }
 0x1ce   :  { %10230 = vmatpush1.bf16.msra.mxu0 %v14137_v62  ;;  %v14177_v62 = vcombine.low %v1226_v31, %v1230_v45  ;;  %v1266_v31 = vld [vmem:[%s20678_s1 + $0x26c0] sm:$0xff] }
 0x1cf   :  { %10231 = vmatprep.subr.bf16.mxu0 %v14146_v2  ;;  %v14186_v2 = vcombine.high %v1234_v20, %v1238_v59  ;;  %v1270_v45 = vld [vmem:[%s20678_s1 + $0x26e0] sm:$0xff] }
 0x1d0   :  { %10601 = vmatpush1.bf16.msra.mxu1 %v13635_v9  ;;  %v13675_v9 = vcombine.low %v723_v56, %v727_v57  ;;  %v763_v56 = vld [vmem:[%s20678_s1 + $0x1708] sm:$0xff] }
 0x1d1   :  { %10602 = vmatprep.subr.bf16.mxu1 %v13644_v13  ;;  %v13684_v13 = vcombine.high %v731_v3, %v735_v4  ;;  %v767_v57 = vld [vmem:[%s20678_s1 + $0x1728] sm:$0xff] }
 0x1d2   :  { %10232 = vmatpush1.bf16.msra.mxu0 %v14145_v10  ;;  %v14185_v10 = vcombine.low %v1234_v20, %v1238_v59  ;;  %v1274_v20 = vld [vmem:[%s20678_s1 + $0x2700] sm:$0xff] }
 0x1d3   :  { %10233 = vmatprep.subr.bf16.mxu0 %v14154_v14  ;;  %v14194_v14 = vcombine.high %v1242_v6, %v1246_v8  ;;  %v1278_v59 = vld [vmem:[%s20678_s1 + $0x2720] sm:$0xff] }
 0x1d4   :  { %10603 = vmatpush1.bf16.msra.mxu1 %v13643_v21  ;;  %v13683_v21 = vcombine.low %v731_v3, %v735_v4  ;;  %v771_v3 = vld [vmem:[%s20678_s1 + $0x1748] sm:$0xff] }
 0x1d5   :  { %10604 = vmatprep.subr.bf16.mxu1 %v13652_v24  ;;  %v13692_v24 = vcombine.high %v739_v15, %v743_v17  ;;  %v775_v4 = vld [vmem:[%s20678_s1 + $0x1768] sm:$0xff] }
 0x1d6   :  { %10234 = vmatpush1.bf16.msra.mxu0 %v14153_v22  ;;  %v14193_v22 = vcombine.low %v1242_v6, %v1246_v8  ;;  %v1282_v6 = vld [vmem:[%s20678_s1 + $0x2740] sm:$0xff] }
 0x1d7   :  { %10235 = vmatprep.subr.bf16.mxu0 %v14162_v25  ;;  %v14202_v25 = vcombine.high %v1250_v18, %v1254_v19  ;;  %v1286_v8 = vld [vmem:[%s20678_s1 + $0x2760] sm:$0xff] }
 0x1d8   :  { %10605 = vmatpush1.bf16.msra.mxu1 %v13651_v33  ;;  %v13691_v33 = vcombine.low %v739_v15, %v743_v17  ;;  %v779_v15 = vld [vmem:[%s20678_s1 + $0x1788] sm:$0xff] }
 0x1d9   :  { %10606 = vmatprep.subr.bf16.mxu1 %v13660_v63  ;;  %v13700_v63 = vcombine.high %v747_v26, %v751_v27  ;;  %v783_v17 = vld [vmem:[%s20678_s1 + $0x17a8] sm:$0xff] }
 0x1da   :  { %10236 = vmatpush1.bf16.msra.mxu0 %v14161_v34  ;;  %v14201_v34 = vcombine.low %v1250_v18, %v1254_v19  ;;  %v1290_v18 = vld [vmem:[%s20678_s1 + $0x2780] sm:$0xff] }
 0x1db   :  { %10237 = vmatprep.subr.bf16.mxu0 %v14170_v36  ;;  %v14210_v36 = vcombine.high %v1258_v29, %v1262_v41  ;;  %v1294_v19 = vld [vmem:[%s20678_s1 + $0x27a0] sm:$0xff] }
 0x1dc   :  { %10607 = vmatpush1.bf16.msra.mxu1 %v13659_v47  ;;  %v13699_v47 = vcombine.low %v747_v26, %v751_v27  ;;  %v787_v26 = vld [vmem:[%s20678_s1 + $0x17c8] sm:$0xff] }
 0x1dd   :  { %10608 = vmatprep.subr.bf16.mxu1 %v13668_v51  ;;  %v13708_v51 = vcombine.high %v755_v5, %v759_v44  ;;  %v791_v27 = vld [vmem:[%s20678_s1 + $0x17e8] sm:$0xff] }
 0x1de   :  { %10238 = vmatpush1.bf16.msra.mxu0 %v14169_v50  ;;  %v14209_v50 = vcombine.low %v1258_v29, %v1262_v41  ;;  %v1770_v29 = vcombine.high %v16448_v12, %v16448_v12  ;;  %v1298_v41 = vld [vmem:[%s20678_s1 + $0x27c0] sm:$0xff]  ;;  %v795_v12 = vld [vmem:[%s20678_s1 + $0x1808] sm:$0xff] }
 0x1df   :  { %10239 = vmatprep.subr.bf16.mxu0 %v14178_v54  ;;  %v14218_v54 = vcombine.high %v1266_v31, %v1270_v45 }
 0x1e0   :  { %10609 = vmatpush1.bf16.msra.mxu1 %v13667_v60  ;;  %v13707_v60 = vcombine.low %v755_v5, %v759_v44  ;;  %v799_v44 = vld [vmem:[%s20678_s1 + $0x1828] sm:$0xff] }
 0x1e1   :  { %10610 = vmatprep.subr.bf16.mxu1 %v13676_v1  ;;  %v13716_v1 = vcombine.high %v763_v56, %v767_v57 }
 0x1e2   :  { %10240 = vmatpush1.bf16.msra.mxu0 %v14177_v62  ;;  %v14217_v62 = vcombine.low %v1266_v31, %v1270_v45  ;;  %v16872_v31 = vrot.slane %v1770_v29, %v15256_v53  ;;  %v1306_v45 = vld [vmem:[%s20678_s1 + $0x2800] sm:$0xff] }
 0x1e3   :  { %10241 = vmatprep.subr.bf16.mxu0 %v14186_v2  ;;  %v14226_v2 = vcombine.high %v1274_v20, %v1278_v59 }
 0x1e4   :  { %10611 = vmatpush1.bf16.msra.mxu1 %v13675_v9  ;;  %v13715_v9 = vcombine.low %v763_v56, %v767_v57  ;;  %v803_v57 = vld [vmem:[%s20678_s1 + $0x1848] sm:$0xff] }
 0x1e5   :  { %10612 = vmatprep.subr.bf16.mxu1 %v13684_v13  ;;  %v13724_v13 = vcombine.high %v771_v3, %v775_v4 }
 0x1e6   :  { %10242 = vmatpush1.bf16.msra.mxu0 %v14185_v10  ;;  %v14225_v10 = vcombine.low %v1274_v20, %v1278_v59  ;;  %v807_v20 = vld [vmem:[%s20678_s1 + $0x1868] sm:$0xff]  ;;  %v1786_v59 = vcombine.high %v16872_v31, %v16872_v31 }
 0x1e7   :  { %10243 = vmatprep.subr.bf16.mxu0 %v14194_v14  ;;  %v14234_v14 = vcombine.high %v1282_v6, %v1286_v8 }
 0x1e8   :  { %10613 = vmatpush1.bf16.msra.mxu1 %v13683_v21  ;;  %v13723_v21 = vcombine.low %v771_v3, %v775_v4  ;;  %v13756_v4 = vcombine.high %v803_v57, %v807_v20 }
 0x1e9   :  { %10614 = vmatprep.subr.bf16.mxu1 %v13692_v24  ;;  %v13732_v24 = vcombine.high %v779_v15, %v783_v17 }
 0x1ea   :  { %10244 = vmatpush1.bf16.msra.mxu0 %v14193_v22  ;;  %v14233_v22 = vcombine.low %v1282_v6, %v1286_v8  ;;  %v811_v8 = vld [vmem:[%s20678_s1 + $0x1888] sm:$0xff] }
 0x1eb   :  { %10245 = vmatprep.subr.bf16.mxu0 %v14202_v25  ;;  %v14242_v25 = vcombine.high %v1290_v18, %v1294_v19 }
 0x1ec   :  { %10615 = vmatpush1.bf16.msra.mxu1 %v13691_v33  ;;  %v1302_v33 = vld [vmem:[%s20678_s1 + $0x27e0] sm:$0xff] }
 0x1ed   :  { %10616 = vmatprep.subr.bf16.mxu1 %v13700_v63  ;;  %v14241_v63 = vcombine.low %v1290_v18, %v1294_v19  ;;  %v14250_v5 = vcombine.high %v1298_v41, %v1302_v33 }
 0x1ee   :  { %10246 = vmatpush1.bf16.msra.mxu0 %v14201_v34  ;;  %v13731_v34 = vcombine.low %v779_v15, %v783_v17  ;;  %v13755_v15 = vcombine.low %v803_v57, %v807_v20 }
 0x1ef   :  { %10247 = vmatprep.subr.bf16.mxu0 %v14210_v36  ;;  %v13740_v36 = vcombine.high %v787_v26, %v791_v27 }
 0x1f0   :  { %10617 = vmatpush1.bf16.msra.mxu1 %v13699_v47  ;;  %v1310_v47 = vld [vmem:[%s20678_s1 + $0x2820] sm:$0xff] }
 0x1f1   :  { %10618 = vmatprep.subr.bf16.mxu1 %v13708_v51  ;;  %v14249_v51 = vcombine.low %v1298_v41, %v1302_v33  ;;  %v14258_v56 = vcombine.high %v1306_v45, %v1310_v47  ;;  %v14257_v3 = vcombine.low %v1306_v45, %v1310_v47  ;;  %v827_v33 = vld [vmem:[%s20678_s1 + $0x1908] sm:$0xff] }
 0x1f2   :  { %10248 = vmatpush1.bf16.msra.mxu0 %v14209_v50  ;;  %v13739_v50 = vcombine.low %v787_v26, %v791_v27  ;;  %v835_v47 = vld [vmem:[%s20678_s1 + $0x1948] sm:$0xff] }
 0x1f3   :  { %10249 = vmatprep.subr.bf16.mxu0 %v14218_v54  ;;  %v13748_v54 = vcombine.high %v795_v12, %v799_v44 }
 0x1f4   :  { %10619 = vmatpush1.bf16.msra.mxu1 %v13707_v60  ;;  %v1314_v60 = vld [vmem:[%s20678_s1 + $0x2840] sm:$0xff] }
 0x1f5   :  { %10620 = vmatprep.subr.bf16.mxu1 %v13716_v1  ;;  %v13747_v1 = vcombine.low %v795_v12, %v799_v44 }
 0x1f6   :  { %10250 = vmatpush1.bf16.msra.mxu0 %v14217_v62  ;;  %v1318_v62 = vld [vmem:[%s20678_s1 + $0x2860] sm:$0xff] }
 0x1f7   :  { %10251 = vmatprep.subr.bf16.mxu0 %v14226_v2  ;;  %v16896_v2 = vcombine.high %v16685_v46, %v16685_v46  ;;  %v14266_v6 = vcombine.high %v1314_v60, %v1318_v62  ;;  %v14265_v17 = vcombine.low %v1314_v60, %v1318_v62  ;;  %v843_v60 = vld [vmem:[%s20678_s1 + $0x1988] sm:$0xff] }
 0x1f8   :  { %10621 = vmatpush1.bf16.msra.mxu1 %v13715_v9  ;;  %v815_v9 = vld [vmem:[%s20678_s1 + $0x18a8] sm:$0xff] }
 0x1f9   :  { %10622 = vmatprep.subr.bf16.mxu1 %v13724_v13  ;;  %v1322_v13 = vld [vmem:[%s20678_s1 + $0x2880] sm:$0xff]  ;;  %v13764_v18 = vcombine.high %v811_v8, %v815_v9  ;;  %v13763_v26 = vcombine.low %v811_v8, %v815_v9  ;;  %v847_v62 = vld [vmem:[%s20678_s1 + $0x19a8] sm:$0xff] }
 0x1fa   :  { %10252 = vmatpush1.bf16.msra.mxu0 %v14225_v10  ;;  %v16905_v10 = vrot.slane %v1786_v59, %v15256_v53  ;;  %v13796_v8 = vcombine.high %v843_v60, %v847_v62 }
 0x1fb   :  { %10253 = vmatprep.subr.bf16.mxu0 %v14234_v14  ;;  %v1326_v14 = vld [vmem:[%s20678_s1 + $0x28a0] sm:$0xff] }
 0x1fc   :  { %10623 = vmatpush1.bf16.msra.mxu1 %v13723_v21  ;;  %v14274_v19 = vcombine.high %v1322_v13, %v1326_v14  ;;  %v819_v21 = vld [vmem:[%s20678_s1 + $0x18c8] sm:$0xff]  ;;  %v14273_v27 = vcombine.low %v1322_v13, %v1326_v14 }
 0x1fd   :  { %10624 = vmatprep.subr.bf16.mxu1 %v13732_v24  ;;  %v1330_v24 = vld [vmem:[%s20678_s1 + $0x28c0] sm:$0xff]  ;;  %v851_v13 = vld [vmem:[%s20678_s1 + $0x19c8] sm:$0xff] }
 0x1fe   :  { %10254 = vmatpush1.bf16.msra.mxu0 %v14233_v22  ;;  %v823_v22 = vld [vmem:[%s20678_s1 + $0x18e8] sm:$0xff] }
 0x1ff   :  { %10255 = vmatprep.subr.bf16.mxu0 %v14242_v25  ;;  %v1334_v25 = vld [vmem:[%s20678_s1 + $0x28e0] sm:$0xff]  ;;  %v13772_v29 = vcombine.high %v819_v21, %v823_v22  ;;  %v855_v14 = vld [vmem:[%s20678_s1 + $0x19e8] sm:$0xff] }
 0x200   :  { %10625 = vmatpush1.bf16.msra.mxu1 %v13731_v34  ;;  %v14282_v41 = vcombine.high %v1330_v24, %v1334_v25  ;;  %v831_v34 = vld [vmem:[%s20678_s1 + $0x1928] sm:$0xff]  ;;  %v14281_v12 = vcombine.low %v1330_v24, %v1334_v25 }
 0x201   :  { %10626 = vmatprep.subr.bf16.mxu1 %v13740_v36  ;;  %v1342_v36 = vld [vmem:[%s20678_s1 + $0x2920] sm:$0xff]  ;;  %v13780_v44 = vcombine.high %v827_v33, %v831_v34  ;;  %v859_v24 = vld [vmem:[%s20678_s1 + $0x1a08] sm:$0xff] }
 0x202   :  { %10256 = vmatpush1.bf16.msra.mxu0 %v14241_v63  ;;  %v1338_v63 = vld [vmem:[%s20678_s1 + $0x2900] sm:$0xff]  ;;  %v863_v25 = vld [vmem:[%s20678_s1 + $0x1a28] sm:$0xff] }
 0x203   :  { %10257 = vmatprep.subr.bf16.mxu0 %v14250_v5  ;;  %v13771_v5 = vcombine.low %v819_v21, %v823_v22  ;;  %v14290_v45 = vcombine.high %v1338_v63, %v1342_v36  ;;  %v14289_v57 = vcombine.low %v1338_v63, %v1342_v36  ;;  %v13804_v21 = vcombine.high %v851_v13, %v855_v14  ;;  %v867_v63 = vld [vmem:[%s20678_s1 + $0x1a48] sm:$0xff] }
 0x204   :  { %10627 = vmatpush1.bf16.msra.mxu1 %v13739_v50  ;;  %v839_v50 = vld [vmem:[%s20678_s1 + $0x1968] sm:$0xff] }
 0x205   :  { %10637 = vmatprep.subr.bf16.mxu1 %v13748_v54  ;;  %v1350_v54 = vld [vmem:[%s20678_s1 + $0x2960] sm:$0xff]  ;;  %v13788_v20 = vcombine.high %v835_v47, %v839_v50  ;;  %v871_v36 = vld [vmem:[%s20678_s1 + $0x1a68] sm:$0xff] }
 0x206   :  { %10258 = vmatpush1.bf16.msra.mxu0 %v14249_v51  ;;  %v1346_v51 = vld [vmem:[%s20678_s1 + $0x2940] sm:$0xff] }
 0x207   :  { %10268 = vmatprep.subr.bf16.mxu0 %v14258_v56  ;;  %10629 = vmatmul.mubr.bf16.vlgmr.msra.gmra.mrb[4].mxu1 %v16060_v0  ;;  %v13779_v56 = vcombine.low %v827_v33, %v831_v34  ;;  %v14298_v59 = vcombine.high %v1346_v51, %v1350_v54  ;;  %v13812_v33 = vcombine.high %v859_v24, %v863_v25 }
 0x208   :  { %10638 = vmatpush1.bf16.msra.mxu1 %v13747_v1  ;;  %10669 = vmatprep.mubr.bf16.mxu1 %v16069_v7  ;;  %v1354_v1 = vld [vmem:[%s20678_s1 + $0x2980] sm:$0xff] }
 0x209   :  { %10260 = vmatmul.mubr.bf16.vlgmr.msra.gmra.mrb[0].mxu0 %v16896_v2  ;;  %10639 = vmatprep.subr.bf16.mxu1 %v13756_v4  ;;  %v13787_v4 = vcombine.low %v835_v47, %v839_v50  ;;  %v13820_v47 = vcombine.high %v867_v63, %v871_v36 }
 0x20a   :  { %10269 = vmatpush1.bf16.msra.mxu0 %v14257_v3  ;;  %10300 = vmatprep.mubr.bf16.mxu0 %v16905_v10  ;;  %v1358_v3 = vld [vmem:[%s20678_s1 + $0x29a0] sm:$0xff] }
 0x20b   :  { %10270 = vmatprep.subr.bf16.mxu0 %v14266_v6  ;;  %v14297_v6 = vcombine.low %v1346_v51, %v1350_v54  ;;  %v14306_v9 = vcombine.high %v1354_v1, %v1358_v3  ;;  %v875_v51 = vld [vmem:[%s20678_s1 + $0x1a88] sm:$0xff] }
 0x20c   :  { %10640 = vmatpush1.bf16.msra.mxu1 %v13755_v15  ;;  %v1362_v15 = vld [vmem:[%s20678_s1 + $0x29c0] sm:$0xff]  ;;  %v879_v54 = vld [vmem:[%s20678_s1 + $0x1aa8] sm:$0xff] }
 0x20d   :  { %10641 = vmatprep.subr.bf16.mxu1 %v13764_v18  ;;  %v13795_v18 = vcombine.low %v843_v60, %v847_v62  ;;  %v13828_v60 = vcombine.high %v875_v51, %v879_v54 }
 0x20e   :  { %10271 = vmatpush1.bf16.msra.mxu0 %v14265_v17  ;;  %v1366_v17 = vld [vmem:[%s20678_s1 + $0x29e0] sm:$0xff] }
 0x20f   :  { %10272 = vmatprep.subr.bf16.mxu0 %v14274_v19  ;;  %v14305_v19 = vcombine.low %v1354_v1, %v1358_v3  ;;  %v14314_v22 = vcombine.high %v1362_v15, %v1366_v17  ;;  %v883_v1 = vld [vmem:[%s20678_s1 + $0x1ac8] sm:$0xff] }
 0x210   :  { %10642 = vmatpush1.bf16.msra.mxu1 %v13763_v26  ;;  %v1370_v26 = vld [vmem:[%s20678_s1 + $0x2a00] sm:$0xff]  ;;  %v887_v3 = vld [vmem:[%s20678_s1 + $0x1ae8] sm:$0xff] }
 0x211   :  { %10643 = vmatprep.subr.bf16.mxu1 %v13772_v29  ;;  %v13803_v29 = vcombine.low %v851_v13, %v855_v14  ;;  %v13836_v13 = vcombine.high %v883_v1, %v887_v3 }
 0x212   :  { %10273 = vmatpush1.bf16.msra.mxu0 %v14273_v27  ;;  %v1374_v27 = vld [vmem:[%s20678_s1 + $0x2a20] sm:$0xff] }
 0x213   :  { %10274 = vmatprep.subr.bf16.mxu0 %v14282_v41  ;;  %v14313_v41 = vcombine.low %v1362_v15, %v1366_v17  ;;  %v14322_v34 = vcombine.high %v1370_v26, %v1374_v27  ;;  %v891_v15 = vld [vmem:[%s20678_s1 + $0x1b08] sm:$0xff] }
 0x214   :  { %10644 = vmatpush1.bf16.msra.mxu1 %v13771_v5  ;;  %v1378_v5 = vld [vmem:[%s20678_s1 + $0x2a40] sm:$0xff]  ;;  %v895_v17 = vld [vmem:[%s20678_s1 + $0x1b28] sm:$0xff] }
 0x215   :  { %10645 = vmatprep.subr.bf16.mxu1 %v13780_v44  ;;  %v13811_v44 = vcombine.low %v859_v24, %v863_v25  ;;  %v13844_v24 = vcombine.high %v891_v15, %v895_v17 }
 0x216   :  { %10275 = vmatpush1.bf16.msra.mxu0 %v14281_v12  ;;  %v1382_v12 = vld [vmem:[%s20678_s1 + $0x2a60] sm:$0xff] }
 0x217   :  { %10276 = vmatprep.subr.bf16.mxu0 %v14290_v45  ;;  %v14321_v45 = vcombine.low %v1370_v26, %v1374_v27  ;;  %v14330_v50 = vcombine.high %v1378_v5, %v1382_v12  ;;  %v899_v26 = vld [vmem:[%s20678_s1 + $0x1b48] sm:$0xff] }
 0x218   :  { %10646 = vmatpush1.bf16.msra.mxu1 %v13779_v56  ;;  %v1386_v56 = vld [vmem:[%s20678_s1 + $0x2a80] sm:$0xff]  ;;  %v903_v27 = vld [vmem:[%s20678_s1 + $0x1b68] sm:$0xff] }
 0x219   :  { %10647 = vmatprep.subr.bf16.mxu1 %v13788_v20  ;;  %v13819_v20 = vcombine.low %v867_v63, %v871_v36  ;;  %v13852_v63 = vcombine.high %v899_v26, %v903_v27 }
 0x21a   :  { %10277 = vmatpush1.bf16.msra.mxu0 %v14289_v57  ;;  %v1390_v57 = vld [vmem:[%s20678_s1 + $0x2aa0] sm:$0xff] }
 0x21b   :  { %10278 = vmatprep.subr.bf16.mxu0 %v14298_v59  ;;  %v14329_v59 = vcombine.low %v1378_v5, %v1382_v12  ;;  %v14338_v62 = vcombine.high %v1386_v56, %v1390_v57  ;;  %v907_v5 = vld [vmem:[%s20678_s1 + $0x1b88] sm:$0xff] }
 0x21c   :  { %10648 = vmatpush1.bf16.msra.mxu1 %v13787_v4  ;;  %v1394_v4 = vld [vmem:[%s20678_s1 + $0x2ac0] sm:$0xff]  ;;  %v911_v12 = vld [vmem:[%s20678_s1 + $0x1ba8] sm:$0xff] }
 0x21d   :  { %10649 = vmatprep.subr.bf16.mxu1 %v13796_v8  ;;  %v13827_v8 = vcombine.low %v875_v51, %v879_v54  ;;  %v13860_v51 = vcombine.high %v907_v5, %v911_v12 }
 0x21e   :  { %10279 = vmatpush1.bf16.msra.mxu0 %v14297_v6  ;;  %v1398_v6 = vld [vmem:[%s20678_s1 + $0x2ae0] sm:$0xff] }
 0x21f   :  { %10280 = vmatprep.subr.bf16.mxu0 %v14306_v9  ;;  %v14337_v9 = vcombine.low %v1386_v56, %v1390_v57  ;;  %v14346_v14 = vcombine.high %v1394_v4, %v1398_v6  ;;  %v915_v56 = vld [vmem:[%s20678_s1 + $0x1bc8] sm:$0xff] }
 0x220   :  { %10650 = vmatpush1.bf16.msra.mxu1 %v13795_v18  ;;  %v1402_v18 = vld [vmem:[%s20678_s1 + $0x2b00] sm:$0xff]  ;;  %v919_v57 = vld [vmem:[%s20678_s1 + $0x1be8] sm:$0xff] }
 0x221   :  { %10651 = vmatprep.subr.bf16.mxu1 %v13804_v21  ;;  %v13835_v21 = vcombine.low %v883_v1, %v887_v3  ;;  %v13868_v1 = vcombine.high %v915_v56, %v919_v57 }
 0x222   :  { %10281 = vmatpush1.bf16.msra.mxu0 %v14305_v19  ;;  %v1406_v19 = vld [vmem:[%s20678_s1 + $0x2b20] sm:$0xff] }
 0x223   :  { %10282 = vmatprep.subr.bf16.mxu0 %v14314_v22  ;;  %v14345_v22 = vcombine.low %v1394_v4, %v1398_v6  ;;  %v14354_v25 = vcombine.high %v1402_v18, %v1406_v19  ;;  %v923_v4 = vld [vmem:[%s20678_s1 + $0x1c08] sm:$0xff] }
 0x224   :  { %10652 = vmatpush1.bf16.msra.mxu1 %v13803_v29  ;;  %v1410_v29 = vld [vmem:[%s20678_s1 + $0x2b40] sm:$0xff]  ;;  %v927_v6 = vld [vmem:[%s20678_s1 + $0x1c28] sm:$0xff] }
 0x225   :  { %10653 = vmatprep.subr.bf16.mxu1 %v13812_v33  ;;  %v13843_v33 = vcombine.low %v891_v15, %v895_v17  ;;  %v13876_v15 = vcombine.high %v923_v4, %v927_v6 }
 0x226   :  { %10283 = vmatpush1.bf16.msra.mxu0 %v14313_v41  ;;  %v1414_v41 = vld [vmem:[%s20678_s1 + $0x2b60] sm:$0xff] }
 0x227   :  { %10284 = vmatprep.subr.bf16.mxu0 %v14322_v34  ;;  %v14353_v34 = vcombine.low %v1402_v18, %v1406_v19  ;;  %v14362_v36 = vcombine.high %v1410_v29, %v1414_v41  ;;  %v931_v18 = vld [vmem:[%s20678_s1 + $0x1c48] sm:$0xff] }
 0x228   :  { %10654 = vmatpush1.bf16.msra.mxu1 %v13811_v44  ;;  %v1418_v44 = vld [vmem:[%s20678_s1 + $0x2b80] sm:$0xff]  ;;  %v935_v19 = vld [vmem:[%s20678_s1 + $0x1c68] sm:$0xff] }
 0x229   :  { %10655 = vmatprep.subr.bf16.mxu1 %v13820_v47  ;;  %v13851_v47 = vcombine.low %v899_v26, %v903_v27  ;;  %v13884_v27 = vcombine.high %v931_v18, %v935_v19 }
 0x22a   :  { %10285 = vmatpush1.bf16.msra.mxu0 %v14321_v45  ;;  %v1422_v45 = vld [vmem:[%s20678_s1 + $0x2ba0] sm:$0xff] }
 0x22b   :  { %10286 = vmatprep.subr.bf16.mxu0 %v14330_v50  ;;  %v14361_v50 = vcombine.low %v1410_v29, %v1414_v41  ;;  %v14370_v54 = vcombine.high %v1418_v44, %v1422_v45  ;;  %v939_v41 = vld [vmem:[%s20678_s1 + $0x1c88] sm:$0xff] }
 0x22c   :  { %10656 = vmatpush1.bf16.msra.mxu1 %v13819_v20  ;;  %v1426_v20 = vld [vmem:[%s20678_s1 + $0x2bc0] sm:$0xff] }
 0x22d   :  { %10657 = vmatprep.subr.bf16.mxu1 %v13828_v60  ;;  %v13859_v60 = vcombine.low %v907_v5, %v911_v12 }
 0x22e   :  { %10287 = vmatpush1.bf16.msra.mxu0 %v14329_v59  ;;  %v1430_v59 = vld [vmem:[%s20678_s1 + $0x2be0] sm:$0xff] }
 0x22f   :  { %10288 = vmatprep.subr.bf16.mxu0 %v14338_v62  ;;  %v14369_v62 = vcombine.low %v1418_v44, %v1422_v45  ;;  %v14378_v3 = vcombine.high %v1426_v20, %v1430_v59  ;;  %v947_v45 = vld [vmem:[%s20678_s1 + $0x1cc8] sm:$0xff] }
 0x230   :  { %10658 = vmatpush1.bf16.msra.mxu1 %v13827_v8  ;;  %v1434_v8 = vld [vmem:[%s20678_s1 + $0x2c00] sm:$0xff] }
 0x231   :  { %10659 = vmatprep.subr.bf16.mxu1 %v13836_v13  ;;  %v13867_v13 = vcombine.low %v915_v56, %v919_v57 }
 0x232   :  { %10289 = vmatpush1.bf16.msra.mxu0 %v14337_v9  ;;  %v1438_v9 = vld [vmem:[%s20678_s1 + $0x2c20] sm:$0xff] }
 0x233   :  { %10290 = vmatprep.subr.bf16.mxu0 %v14346_v14  ;;  %v14377_v14 = vcombine.low %v1426_v20, %v1430_v59  ;;  %v14386_v17 = vcombine.high %v1434_v8, %v1438_v9  ;;  %v14385_v26 = vcombine.low %v1434_v8, %v1438_v9  ;;  %v955_v59 = vld [vmem:[%s20678_s1 + $0x1d08] sm:$0xff] }
 0x234   :  { %10660 = vmatpush1.bf16.msra.mxu1 %v13835_v21  ;;  %v1442_v21 = vld [vmem:[%s20678_s1 + $0x2c40] sm:$0xff]  ;;  %v963_v9 = vld [vmem:[%s20678_s1 + $0x1d48] sm:$0xff] }
 0x235   :  { %10661 = vmatprep.subr.bf16.mxu1 %v13844_v24  ;;  %v13875_v24 = vcombine.low %v923_v4, %v927_v6 }
 0x236   :  { %10291 = vmatpush1.bf16.msra.mxu0 %v14345_v22  ;;  %v1446_v22 = vld [vmem:[%s20678_s1 + $0x2c60] sm:$0xff] }
 0x237   :  { %10292 = vmatprep.subr.bf16.mxu0 %v14354_v25  ;;  %v17099_v25 = vrot.slane %v16872_v31, %v15256_v53  ;;  %v14394_v29 = vcombine.high %v1442_v21, %v1446_v22  ;;  %v1450_v31 = vld [vmem:[%s20678_s1 + $0x2c80] sm:$0xff]  ;;  %v14393_v5 = vcombine.low %v1442_v21, %v1446_v22  ;;  %v971_v22 = vld [vmem:[%s20678_s1 + $0x1d88] sm:$0xff] }
 0x238   :  { %10662 = vmatpush1.bf16.msra.mxu1 %v13843_v33  ;;  %v943_v33 = vld [vmem:[%s20678_s1 + $0x1ca8] sm:$0xff] }
 0x239   :  { %10663 = vmatprep.subr.bf16.mxu1 %v13852_v63  ;;  %v1454_v63 = vld [vmem:[%s20678_s1 + $0x2ca0] sm:$0xff]  ;;  %v13892_v12 = vcombine.high %v939_v41, %v943_v33 }
 0x23a   :  { %10293 = vmatpush1.bf16.msra.mxu0 %v14353_v34  ;;  %v17109_v34 = vcombine.high %v16905_v10, %v16905_v10  ;;  %v14402_v44 = vcombine.high %v1450_v31, %v1454_v63  ;;  %v14401_v56 = vcombine.low %v1450_v31, %v1454_v63  ;;  %v979_v63 = vld [vmem:[%s20678_s1 + $0x1dc8] sm:$0xff] }
 0x23b   :  { %10294 = vmatprep.subr.bf16.mxu0 %v14362_v36  ;;  %v13883_v36 = vcombine.low %v931_v18, %v935_v19 }
 0x23c   :  { %10664 = vmatpush1.bf16.msra.mxu1 %v13851_v47  ;;  %v951_v47 = vld [vmem:[%s20678_s1 + $0x1ce8] sm:$0xff] }
 0x23d   :  { %10665 = vmatprep.subr.bf16.mxu1 %v13860_v51  ;;  %v1462_v51 = vld [vmem:[%s20678_s1 + $0x2ce0] sm:$0xff]  ;;  %v13900_v57 = vcombine.high %v947_v45, %v951_v47 }
 0x23e   :  { %10295 = vmatpush1.bf16.msra.mxu0 %v14361_v50  ;;  %v1458_v50 = vld [vmem:[%s20678_s1 + $0x2cc0] sm:$0xff] }
 0x23f   :  { %10296 = vmatprep.subr.bf16.mxu0 %v14370_v54  ;;  %v13891_v54 = vcombine.low %v939_v41, %v943_v33  ;;  %v14410_v20 = vcombine.high %v1458_v50, %v1462_v51  ;;  %v14409_v4 = vcombine.low %v1458_v50, %v1462_v51  ;;  %v987_v51 = vld [vmem:[%s20678_s1 + $0x1e08] sm:$0xff] }
 0x240   :  { %10666 = vmatpush1.bf16.msra.mxu1 %v13859_v60  ;;  %v959_v60 = vld [vmem:[%s20678_s1 + $0x1d28] sm:$0xff] }
 0x241   :  { %10667 = vmatprep.subr.bf16.mxu1 %v13868_v1  ;;  %v1470_v1 = vld [vmem:[%s20678_s1 + $0x2d20] sm:$0xff]  ;;  %v13908_v6 = vcombine.high %v955_v59, %v959_v60 }
 0x242   :  { %10297 = vmatpush1.bf16.msra.mxu0 %v14369_v62  ;;  %v1466_v62 = vld [vmem:[%s20678_s1 + $0x2d00] sm:$0xff] }
 0x243   :  { %10298 = vmatprep.subr.bf16.mxu0 %v14378_v3  ;;  %v13899_v3 = vcombine.low %v947_v45, %v951_v47  ;;  %v14418_v8 = vcombine.high %v1466_v62, %v1470_v1  ;;  %v14417_v18 = vcombine.low %v1466_v62, %v1470_v1  ;;  %v995_v1 = vld [vmem:[%s20678_s1 + $0x1e48] sm:$0xff] }
 0x244   :  { %10668 = vmatpush1.bf16.msra.mxu1 %v13867_v13  ;;  %v967_v13 = vld [vmem:[%s20678_s1 + $0x1d68] sm:$0xff] }
 0x245   :  { %10678 = vmatprep.subr.bf16.mxu1 %v13876_v15  ;;  %v1478_v15 = vld [vmem:[%s20678_s1 + $0x2d60] sm:$0xff]  ;;  %v13916_v19 = vcombine.high %v963_v9, %v967_v13 }
 0x246   :  { %10299 = vmatpush1.bf16.msra.mxu0 %v14377_v14  ;;  %v1474_v14 = vld [vmem:[%s20678_s1 + $0x2d40] sm:$0xff] }
 0x247   :  { %10309 = vmatprep.subr.bf16.mxu0 %v14386_v17  ;;  %10670 = vmatmul.mubr.bf16.vlgmr.msra.gmra.mrb[4].mxu1 %v16263_v42  ;;  %v13907_v17 = vcombine.low %v955_v59, %v959_v60  ;;  %v14426_v21 = vcombine.high %v1474_v14, %v1478_v15  ;;  %v14425_v41 = vcombine.low %v1474_v14, %v1478_v15  ;;  %v1003_v15 = vld [vmem:[%s20678_s1 + $0x1e88] sm:$0xff] }
 0x248   :  { %10679 = vmatpush1.bf16.msra.mxu1 %v13875_v24  ;;  %10710 = vmatprep.mubr.bf16.mxu1 %v16273_v49  ;;  %v975_v24 = vld [vmem:[%s20678_s1 + $0x1da8] sm:$0xff] }
 0x249   :  { %10301 = vmatmul.mubr.bf16.vlgmr.msra.gmra.mrb[0].mxu0 %v17099_v25  ;;  %10680 = vmatprep.subr.bf16.mxu1 %v13884_v27  ;;  %v1486_v27 = vld [vmem:[%s20678_s1 + $0x2da0] sm:$0xff]  ;;  %v13924_v33 = vcombine.high %v971_v22, %v975_v24 }
 0x24a   :  { %10310 = vmatpush1.bf16.msra.mxu0 %v14385_v26  ;;  %10341 = vmatprep.mubr.bf16.mxu0 %v17109_v34  ;;  %v1482_v26 = vld [vmem:[%s20678_s1 + $0x2d80] sm:$0xff] }
 0x24b   :  { %10311 = vmatprep.subr.bf16.mxu0 %v14394_v29  ;;  %v13915_v29 = vcombine.low %v963_v9, %v967_v13  ;;  %v14434_v31 = vcombine.high %v1482_v26, %v1486_v27  ;;  %v14433_v45 = vcombine.low %v1482_v26, %v1486_v27  ;;  %v1011_v27 = vld [vmem:[%s20678_s1 + $0x1ec8] sm:$0xff] }
 0x24c   :  { %10681 = vmatpush1.bf16.msra.mxu1 %v13883_v36  ;;  %v983_v36 = vld [vmem:[%s20678_s1 + $0x1de8] sm:$0xff] }
 0x24d   :  { %10682 = vmatprep.subr.bf16.mxu1 %v13892_v12  ;;  %v1494_v12 = vld [vmem:[%s20678_s1 + $0x2de0] sm:$0xff]  ;;  %v13932_v47 = vcombine.high %v979_v63, %v983_v36 }
 0x24e   :  { %10312 = vmatpush1.bf16.msra.mxu0 %v14393_v5  ;;  %v1490_v5 = vld [vmem:[%s20678_s1 + $0x2dc0] sm:$0xff] }
 0x24f   :  { %10313 = vmatprep.subr.bf16.mxu0 %v14402_v44  ;;  %v13923_v44 = vcombine.low %v971_v22, %v975_v24  ;;  %v14442_v50 = vcombine.high %v1490_v5, %v1494_v12  ;;  %v14441_v59 = vcombine.low %v1490_v5, %v1494_v12  ;;  %v1019_v12 = vld [vmem:[%s20678_s1 + $0x1f08] sm:$0xff] }
 0x250   :  { %10683 = vmatpush1.bf16.msra.mxu1 %v13891_v54  ;;  %v991_v54 = vld [vmem:[%s20678_s1 + $0x1e28] sm:$0xff] }
 0x251   :  { %10684 = vmatprep.subr.bf16.mxu1 %v13900_v57  ;;  %v1502_v57 = vld [vmem:[%s20678_s1 + $0x2e20] sm:$0xff]  ;;  %v13940_v60 = vcombine.high %v987_v51, %v991_v54 }
 0x252   :  { %10314 = vmatpush1.bf16.msra.mxu0 %v14401_v56  ;;  %v1498_v56 = vld [vmem:[%s20678_s1 + $0x2e00] sm:$0xff] }
 0x253   :  { %10315 = vmatprep.subr.bf16.mxu0 %v14410_v20  ;;  %v13931_v20 = vcombine.low %v979_v63, %v983_v36  ;;  %v14450_v62 = vcombine.high %v1498_v56, %v1502_v57  ;;  %v14449_v9 = vcombine.low %v1498_v56, %v1502_v57  ;;  %v1027_v57 = vld [vmem:[%s20678_s1 + $0x1f48] sm:$0xff] }
 0x254   :  { %10685 = vmatpush1.bf16.msra.mxu1 %v13899_v3  ;;  %v999_v3 = vld [vmem:[%s20678_s1 + $0x1e68] sm:$0xff] }
 0x255   :  { %10686 = vmatprep.subr.bf16.mxu1 %v13908_v6  ;;  %v1510_v6 = vld [vmem:[%s20678_s1 + $0x2e60] sm:$0xff]  ;;  %v13948_v13 = vcombine.high %v995_v1, %v999_v3 }
 0x256   :  { %10316 = vmatpush1.bf16.msra.mxu0 %v14409_v4  ;;  %v1506_v4 = vld [vmem:[%s20678_s1 + $0x2e40] sm:$0xff] }
 0x257   :  { %10317 = vmatprep.subr.bf16.mxu0 %v14418_v8  ;;  %v13939_v8 = vcombine.low %v987_v51, %v991_v54  ;;  %v14458_v14 = vcombine.high %v1506_v4, %v1510_v6  ;;  %v14457_v22 = vcombine.low %v1506_v4, %v1510_v6  ;;  %v1035_v6 = vld [vmem:[%s20678_s1 + $0x1f88] sm:$0xff] }
 0x258   :  { %10687 = vmatpush1.bf16.msra.mxu1 %v13907_v17  ;;  %v1007_v17 = vld [vmem:[%s20678_s1 + $0x1ea8] sm:$0xff] }
 0x259   :  { %10688 = vmatprep.subr.bf16.mxu1 %v13916_v19  ;;  %v1518_v19 = vld [vmem:[%s20678_s1 + $0x2ea0] sm:$0xff]  ;;  %v13956_v24 = vcombine.high %v1003_v15, %v1007_v17 }
 0x25a   :  { %10318 = vmatpush1.bf16.msra.mxu0 %v14417_v18  ;;  %v1514_v18 = vld [vmem:[%s20678_s1 + $0x2e80] sm:$0xff] }
 0x25b   :  { %10319 = vmatprep.subr.bf16.mxu0 %v14426_v21  ;;  %v13947_v21 = vcombine.low %v995_v1, %v999_v3  ;;  %v14466_v26 = vcombine.high %v1514_v18, %v1518_v19  ;;  %v14465_v63 = vcombine.low %v1514_v18, %v1518_v19  ;;  %v1043_v19 = vld [vmem:[%s20678_s1 + $0x1fc8] sm:$0xff] }
 0x25c   :  { %10689 = vmatpush1.bf16.msra.mxu1 %v13915_v29  ;;  %v1015_v29 = vld [vmem:[%s20678_s1 + $0x1ee8] sm:$0xff] }
 0x25d   :  { %10690 = vmatprep.subr.bf16.mxu1 %v13924_v33  ;;  %v1526_v33 = vld [vmem:[%s20678_s1 + $0x2ee0] sm:$0xff]  ;;  %v13964_v36 = vcombine.high %v1011_v27, %v1015_v29 }
 0x25e   :  { %10320 = vmatpush1.bf16.msra.mxu0 %v14425_v41  ;;  %v1522_v41 = vld [vmem:[%s20678_s1 + $0x2ec0] sm:$0xff] }
 0x25f   :  { %10321 = vmatprep.subr.bf16.mxu0 %v14434_v31  ;;  %v13955_v31 = vcombine.low %v1003_v15, %v1007_v17  ;;  %v14474_v5 = vcombine.high %v1522_v41, %v1526_v33  ;;  %v14473_v51 = vcombine.low %v1522_v41, %v1526_v33  ;;  %v1051_v33 = vld [vmem:[%s20678_s1 + $0x2008] sm:$0xff] }
 0x260   :  { %10691 = vmatpush1.bf16.msra.mxu1 %v13923_v44  ;;  %v1023_v44 = vld [vmem:[%s20678_s1 + $0x1f28] sm:$0xff] }
 0x261   :  { %10692 = vmatprep.subr.bf16.mxu1 %v13932_v47  ;;  %v1534_v47 = vld [vmem:[%s20678_s1 + $0x2f20] sm:$0xff]  ;;  %v13972_v54 = vcombine.high %v1019_v12, %v1023_v44 }
 0x262   :  { %10322 = vmatpush1.bf16.msra.mxu0 %v14433_v45  ;;  %v1530_v45 = vld [vmem:[%s20678_s1 + $0x2f00] sm:$0xff] }
 0x263   :  { %10323 = vmatprep.subr.bf16.mxu0 %v14442_v50  ;;  %v13963_v50 = vcombine.low %v1011_v27, %v1015_v29  ;;  %v14482_v56 = vcombine.high %v1530_v45, %v1534_v47  ;;  %v14481_v1 = vcombine.low %v1530_v45, %v1534_v47  ;;  %v1059_v47 = vld [vmem:[%s20678_s1 + $0x2048] sm:$0xff] }
 0x264   :  { %10693 = vmatpush1.bf16.msra.mxu1 %v13931_v20  ;;  %v1031_v20 = vld [vmem:[%s20678_s1 + $0x1f68] sm:$0xff] }
 0x265   :  { %10694 = vmatprep.subr.bf16.mxu1 %v13940_v60  ;;  %v1542_v60 = vld [vmem:[%s20678_s1 + $0x2f60] sm:$0xff]  ;;  %v13980_v3 = vcombine.high %v1027_v57, %v1031_v20 }
 0x266   :  { %10324 = vmatpush1.bf16.msra.mxu0 %v14441_v59  ;;  %v1538_v59 = vld [vmem:[%s20678_s1 + $0x2f40] sm:$0xff] }
 0x267   :  { %10325 = vmatprep.subr.bf16.mxu0 %v14450_v62  ;;  %v13971_v62 = vcombine.low %v1019_v12, %v1023_v44  ;;  %v14490_v4 = vcombine.high %v1538_v59, %v1542_v60  ;;  %v14489_v15 = vcombine.low %v1538_v59, %v1542_v60 }
 0x268   :  { %10695 = vmatpush1.bf16.msra.mxu1 %v13939_v8  ;;  %v1039_v8 = vld [vmem:[%s20678_s1 + $0x1fa8] sm:$0xff] }
 0x269   :  { %10696 = vmatprep.subr.bf16.mxu1 %v13948_v13  ;;  %v1550_v13 = vld [vmem:[%s20678_s1 + $0x2fa0] sm:$0xff]  ;;  %v13988_v17 = vcombine.high %v1035_v6, %v1039_v8 }
 0x26a   :  { %10326 = vmatpush1.bf16.msra.mxu0 %v14449_v9  ;;  %v1546_v9 = vld [vmem:[%s20678_s1 + $0x2f80] sm:$0xff] }
 0x26b   :  { %10327 = vmatprep.subr.bf16.mxu0 %v14458_v14  ;;  %v13979_v14 = vcombine.low %v1027_v57, %v1031_v20  ;;  %v14498_v18 = vcombine.high %v1546_v9, %v1550_v13  ;;  %v14497_v27 = vcombine.low %v1546_v9, %v1550_v13  ;;  %v17303_v57 = vcombine.high %v17099_v25, %v17099_v25 }
 0x26c   :  { %10697 = vmatpush1.bf16.msra.mxu1 %v13947_v21  ;;  %v1047_v21 = vld [vmem:[%s20678_s1 + $0x1fe8] sm:$0xff] }
 0x26d   :  { %10698 = vmatprep.subr.bf16.mxu1 %v13956_v24  ;;  %v1558_v24 = vld [vmem:[%s20678_s1 + $0x2fe0] sm:$0xff]  ;;  %v13996_v29 = vcombine.high %v1043_v19, %v1047_v21 }
 0x26e   :  { %10328 = vmatpush1.bf16.msra.mxu0 %v14457_v22  ;;  %v1554_v22 = vld [vmem:[%s20678_s1 + $0x2fc0] sm:$0xff] }
 0x26f   :  { %10329 = vmatprep.subr.bf16.mxu0 %v14466_v26  ;;  %v13987_v26 = vcombine.low %v1035_v6, %v1039_v8  ;;  %v14506_v41 = vcombine.high %v1554_v22, %v1558_v24  ;;  %v14505_v12 = vcombine.low %v1554_v22, %v1558_v24 }
 0x270   :  { %10699 = vmatpush1.bf16.msra.mxu1 %v13955_v31  ;;  %v1055_v31 = vld [vmem:[%s20678_s1 + $0x2028] sm:$0xff] }
 0x271   :  { %10700 = vmatprep.subr.bf16.mxu1 %v13964_v36  ;;  %v1566_v36 = vld [vmem:[%s20678_s1 + $0x3020] sm:$0xff]  ;;  %v14004_v44 = vcombine.high %v1051_v33, %v1055_v31 }
 0x272   :  { %10330 = vmatpush1.bf16.msra.mxu0 %v14465_v63  ;;  %v1562_v63 = vld [vmem:[%s20678_s1 + $0x3000] sm:$0xff] }
 0x273   :  { %10331 = vmatprep.subr.bf16.mxu0 %v14474_v5  ;;  %v13995_v5 = vcombine.low %v1043_v19, %v1047_v21  ;;  %v14514_v45 = vcombine.high %v1562_v63, %v1566_v36  ;;  %v14513_v20 = vcombine.low %v1562_v63, %v1566_v36  ;;  %v1590_v19 = vld [vmem:[%s20678_s1 + $0x30e0] sm:$0xff] }
 0x274   :  { %10701 = vmatpush1.bf16.msra.mxu1 %v13963_v50  ;;  %v1063_v50 = vld [vmem:[%s20678_s1 + $0x2068] sm:$0xff] }
 0x275   :  { %10702 = vmatprep.subr.bf16.mxu1 %v13972_v54  ;;  %v1574_v54 = vld [vmem:[%s20678_s1 + $0x3060] sm:$0xff]  ;;  %v14012_v59 = vcombine.high %v1059_v47, %v1063_v50  ;;  %v14011_v6 = vcombine.low %v1059_v47, %v1063_v50 }
 0x276   :  { %10332 = vmatpush1.bf16.msra.mxu0 %v14473_v51  ;;  %v1570_v51 = vld [vmem:[%s20678_s1 + $0x3040] sm:$0xff] }
 0x277   :  { %10333 = vmatprep.subr.bf16.mxu0 %v14482_v56  ;;  %v14003_v56 = vcombine.low %v1051_v33, %v1055_v31  ;;  %v14522_v60 = vcombine.high %v1570_v51, %v1574_v54  ;;  %v14521_v8 = vcombine.low %v1570_v51, %v1574_v54  ;;  %v1598_v33 = vld [vmem:[%s20678_s1 + $0x3120] sm:$0xff] }
 0x278   :  { %10703 = vmatpush1.bf16.msra.mxu1 %v13971_v62  ;;  %v1067_v62 = vld [vmem:[%s20678_s1 + $0x2088] sm:$0xff]  ;;  %v1606_v47 = vld [vmem:[%s20678_s1 + $0x3160] sm:$0xff] }
 0x279   :  { %10704 = vmatprep.subr.bf16.mxu1 %v13980_v3  ;;  %v1578_v3 = vld [vmem:[%s20678_s1 + $0x3080] sm:$0xff] }
 0x27a   :  { %10334 = vmatpush1.bf16.msra.mxu0 %v14481_v1  ;;  %v1071_v1 = vld [vmem:[%s20678_s1 + $0x20a8] sm:$0xff] }
 0x27b   :  { %10335 = vmatprep.subr.bf16.mxu0 %v14490_v4  ;;  %v1582_v4 = vld [vmem:[%s20678_s1 + $0x30a0] sm:$0xff]  ;;  %v14020_v9 = vcombine.high %v1067_v62, %v1071_v1  ;;  %v14019_v21 = vcombine.low %v1067_v62, %v1071_v1 }
 0x27c   :  { %10705 = vmatpush1.bf16.msra.mxu1 %v13979_v14  ;;  %v14530_v13 = vcombine.high %v1578_v3, %v1582_v4  ;;  %v1075_v14 = vld [vmem:[%s20678_s1 + $0x20c8] sm:$0xff]  ;;  %v14529_v22 = vcombine.low %v1578_v3, %v1582_v4  ;;  %v1614_v62 = vld [vmem:[%s20678_s1 + $0x31a0] sm:$0xff] }
 0x27d   :  { %10706 = vmatprep.subr.bf16.mxu1 %v13988_v17  ;;  %v15143_v17 = vmov 0  }
 0x27e   :  { %10336 = vmatpush1.bf16.msra.mxu0 %v14489_v15  ;;  %v1079_v15 = vld [vmem:[%s20678_s1 + $0x20e8] sm:$0xff] }
 0x27f   :  { %10337 = vmatprep.subr.bf16.mxu0 %v14498_v18  ;;  %v1586_v18 = vld [vmem:[%s20678_s1 + $0x30c0] sm:$0xff]  ;;  %v14028_v24 = vcombine.high %v1075_v14, %v1079_v15  ;;  %v14027_v31 = vcombine.low %v1075_v14, %v1079_v15 }
 0x280   :  { %10707 = vmatpush1.bf16.msra.mxu1 %v13987_v26  ;;  %v14538_v26 = vcombine.high %v1586_v18, %v1590_v19  ;;  %v14537_v63 = vcombine.low %v1586_v18, %v1590_v19  ;;  %v1622_v14 = vld [vmem:[%s20678_s1 + $0x31e0] sm:$0xff] }
 0x281   :  { %10708 = vmatprep.subr.bf16.mxu1 %v13996_v29  ;;  %v1087_v29 = vld [vmem:[%s20678_s1 + $0x2128] sm:$0xff] }
 0x282   :  { %10338 = vmatpush1.bf16.msra.mxu0 %v14497_v27  ;;  %v1083_v27 = vld [vmem:[%s20678_s1 + $0x2108] sm:$0xff] }
 0x283   :  { %10339 = vmatprep.subr.bf16.mxu0 %v14506_v41  ;;  %v1594_v41 = vld [vmem:[%s20678_s1 + $0x3100] sm:$0xff]  ;;  %v14036_v36 = vcombine.high %v1083_v27, %v1087_v29  ;;  %v14035_v50 = vcombine.low %v1083_v27, %v1087_v29  ;;  %v32_v27 = vld [vmem:[%s20678_s1 + $0x30] sm:$0xff] }
 0x284   :  { %10709 = vmatpush1.bf16.msra.mxu1 %v13995_v5  ;;  %v14546_v5 = vcombine.high %v1594_v41, %v1598_v33  ;;  %v14545_v51 = vcombine.low %v1594_v41, %v1598_v33  ;;  %v12976_v33 = vld.sshfl [vmem:[%s20677_s0 + $0x18] sm:$0x1 pattern:$0x75316420] }
 0x285   :  { %10719 = vmatprep.subr.bf16.mxu1 %v14004_v44  ;;  %v1095_v44 = vld [vmem:[%s20678_s1 + $0x2168] sm:$0xff] }
 0x286   :  { %10340 = vmatpush1.bf16.msra.mxu0 %v14505_v12  ;;  %v1091_v12 = vld [vmem:[%s20678_s1 + $0x2148] sm:$0xff] }
 0x287   :  { %10350 = vmatprep.subr.bf16.mxu0 %v14514_v45  ;;  %10711 = vmatmul.mubr.bf16.vlgmr.msra.gmra.mrb[4].mxu1 %v16482_v37  ;;  %v1602_v45 = vld [vmem:[%s20678_s1 + $0x3140] sm:$0xff]  ;;  %v14044_v54 = vcombine.high %v1091_v12, %v1095_v44  ;;  %v14043_v1 = vcombine.low %v1091_v12, %v1095_v44  ;;  %v36_v12 = vld [vmem:[%s20678_s1 + $0x50] sm:$0xff] }
 0x288   :  { %10720 = vmatpush1.bf16.msra.mxu1 %v14003_v56  ;;  %10751 = vmatprep.mubr.bf16.mxu1 %v16491_v48  ;;  %v14554_v56 = vcombine.high %v1602_v45, %v1606_v47  ;;  %v14553_v3 = vcombine.low %v1602_v45, %v1606_v47  ;;  %v40_v44 = vld [vmem:[%s20678_s1 + $0x70] sm:$0xff]  ;;  %v17409_v45 = vrot.slane %v12976_v33, %v15256_v53  ;;  %v1155_v33 = vld [vmem:[%s20678_s1 + $0x2348] sm:$0xff] }
 0x289   :  { %10342 = vmatmul.mubr.bf16.vlgmr.msra.gmra.mrb[0].mxu0 %v17303_v57  ;;  %10721 = vmatprep.subr.bf16.mxu1 %v14012_v59  ;;  %v1103_v59 = vld [vmem:[%s20678_s1 + $0x21a8] sm:$0xff]  ;;  %v44_v53 = vld [vmem:[%s20678_s1 + $0x90] sm:$0xff] }
 0x28a   :  { %10351 = vmatpush1.bf16.msra.mxu0 %v14513_v20  ;;  %10382 = vmatprep.mubr.bf16.mxu0 %v15143_v17  ;;  %v1099_v20 = vld [vmem:[%s20678_s1 + $0x2188] sm:$0xff] }
 0x28b   :  { %10352 = vmatprep.subr.bf16.mxu0 %v14522_v60  ;;  %v1610_v60 = vld [vmem:[%s20678_s1 + $0x3180] sm:$0xff]  ;;  %v14052_v4 = vcombine.high %v1099_v20, %v1103_v59  ;;  %v14051_v15 = vcombine.low %v1099_v20, %v1103_v59  ;;  %v1135_v20 = vld [vmem:[%s20678_s1 + $0x22a8] sm:$0xff]  ;;  %v48_v59 = vld [vmem:[%s20678_s1 + $0xb0] sm:$0xff] }
 0x28c   :  { %10722 = vmatpush1.bf16.msra.mxu1 %v14011_v6  ;;  %v14562_v6 = vcombine.high %v1610_v60, %v1614_v62  ;;  %v14561_v18 = vcombine.low %v1610_v60, %v1614_v62  ;;  %v12989_v62 = vcombine.low %v36_v12, %v40_v44 }
 0x28d   :  { %10723 = vmatprep.subr.bf16.mxu1 %v14020_v9  ;;  %v1111_v9 = vld [vmem:[%s20678_s1 + $0x21e8] sm:$0xff] }
 0x28e   :  { %10353 = vmatpush1.bf16.msra.mxu0 %v14521_v8  ;;  %v1107_v8 = vld [vmem:[%s20678_s1 + $0x21c8] sm:$0xff] }
 0x28f   :  { %10354 = vmatprep.subr.bf16.mxu0 %v14530_v13  ;;  %v1618_v13 = vld [vmem:[%s20678_s1 + $0x31c0] sm:$0xff]  ;;  %v14060_v19 = vcombine.high %v1107_v8, %v1111_v9  ;;  %v14059_v29 = vcombine.low %v1107_v8, %v1111_v9  ;;  %v52_v8 = vld [vmem:[%s20678_s1 + $0xd0] sm:$0xff] }
 0x290   :  { %10724 = vmatpush1.bf16.msra.mxu1 %v14019_v21  ;;  %v14570_v21 = vcombine.high %v1618_v13, %v1622_v14  ;;  %v14569_v41 = vcombine.low %v1618_v13, %v1622_v14  ;;  %v56_v9 = vld [vmem:[%s20678_s1 + $0xf0] sm:$0xff]  ;;  %v12997_v14 = vcombine.low %v44_v53, %v48_v59 }
 0x291   :  { %10725 = vmatprep.subr.bf16.mxu1 %v14028_v24  ;;  %v1119_v24 = vld [vmem:[%s20678_s1 + $0x2228] sm:$0xff] }
 0x292   :  { %10355 = vmatpush1.bf16.msra.mxu0 %v14529_v22  ;;  %v1115_v22 = vld [vmem:[%s20678_s1 + $0x2208] sm:$0xff] }
 0x293   :  { %10356 = vmatprep.subr.bf16.mxu0 %v14538_v26  ;;  %v28_v26 = vld [vmem:[%s20678_s1 + $0x10] sm:$0xff]  ;;  %v14067_v47 = vcombine.low %v1115_v22, %v1119_v24 }
 0x294   :  { %10726 = vmatpush1.bf16.msra.mxu1 %v14027_v31  ;;  %v14068_v31 = vcombine.high %v1115_v22, %v1119_v24  ;;  %v60_v22 = vld [vmem:[%s20678_s1 + $0x110] sm:$0xff] }
 0x295   :  { %10727 = vmatprep.subr.bf16.mxu1 %v14036_v36  ;;  %v1123_v36 = vld [vmem:[%s20678_s1 + $0x2248] sm:$0xff]  ;;  %v64_v24 = vld [vmem:[%s20678_s1 + $0x130] sm:$0xff] }
 0x296   :  { %10357 = vmatpush1.bf16.msra.mxu0 %v14537_v63  ;;  %v12982_v63 = vcombine.high %v28_v26, %v32_v27 }
 0x297   :  { %10358 = vmatprep.subr.bf16.mxu0 %v14546_v5  ;;  %v1127_v5 = vld [vmem:[%s20678_s1 + $0x2268] sm:$0xff] }
 0x298   :  { %10728 = vmatpush1.bf16.msra.mxu1 %v14035_v50  ;;  %v12981_v50 = vcombine.low %v28_v26, %v32_v27  ;;  %v14075_v60 = vcombine.low %v1123_v36, %v1127_v5  ;;  %v13005_v27 = vcombine.low %v52_v8, %v56_v9 }
 0x299   :  { %10729 = vmatprep.subr.bf16.mxu1 %v14044_v54  ;;  %v12990_v54 = vcombine.high %v36_v12, %v40_v44  ;;  %v13013_v12 = vcombine.low %v60_v22, %v64_v24 }
 0x29a   :  { %10359 = vmatpush1.bf16.msra.mxu0 %v14545_v51  ;;  %v14076_v51 = vcombine.high %v1123_v36, %v1127_v5  ;;  %v72_v36 = vld [vmem:[%s20678_s1 + $0x170] sm:$0xff] }
 0x29b   :  { %10360 = vmatprep.subr.bf16.mxu0 %v14554_v56  ;;  %v1131_v56 = vld [vmem:[%s20678_s1 + $0x2288] sm:$0xff] }
 0x29c   :  { %10730 = vmatpush1.bf16.msra.mxu1 %v14043_v1  ;;  %v14084_v1 = vcombine.high %v1131_v56, %v1135_v20  ;;  %v14083_v13 = vcombine.low %v1131_v56, %v1135_v20  ;;  %v80_v56 = vld [vmem:[%s20678_s1 + $0x1b0] sm:$0xff] }
 0x29d   :  { %10731 = vmatprep.subr.bf16.mxu1 %v14052_v4  ;;  %v1139_v4 = vld [vmem:[%s20678_s1 + $0x22c8] sm:$0xff] }
 0x29e   :  { %10361 = vmatpush1.bf16.msra.mxu0 %v14553_v3  ;;  %v12998_v3 = vcombine.high %v44_v53, %v48_v59 }
 0x29f   :  { %10362 = vmatprep.subr.bf16.mxu0 %v14562_v6  ;;  %v1143_v6 = vld [vmem:[%s20678_s1 + $0x22e8] sm:$0xff] }
 0x2a0   :  { %10732 = vmatpush1.bf16.msra.mxu1 %v14051_v15  ;;  %v14092_v15 = vcombine.high %v1139_v4, %v1143_v6  ;;  %v14091_v26 = vcombine.low %v1139_v4, %v1143_v6  ;;  %v88_v4 = vld [vmem:[%s20678_s1 + $0x1f0] sm:$0xff] }
 0x2a1   :  { %10733 = vmatprep.subr.bf16.mxu1 %v14060_v19  ;;  %v1147_v19 = vld [vmem:[%s20678_s1 + $0x2308] sm:$0xff] }
 0x2a2   :  { %10363 = vmatpush1.bf16.msra.mxu0 %v14561_v18  ;;  %v13006_v18 = vcombine.high %v52_v8, %v56_v9 }
 0x2a3   :  { %10364 = vmatprep.subr.bf16.mxu0 %v14570_v21  ;;  %v1151_v21 = vld [vmem:[%s20678_s1 + $0x2328] sm:$0xff] }
 0x2a4   :  { %10734 = vmatpush1.bf16.msra.mxu1 %v14059_v29  ;;  %v14100_v29 = vcombine.high %v1147_v19, %v1151_v21  ;;  %v14099_v5 = vcombine.low %v1147_v19, %v1151_v21  ;;  %v96_v19 = vld [vmem:[%s20678_s1 + $0x230] sm:$0xff] }
 0x2a5   :  { %10735 = vmatprep.subr.bf16.mxu1 %v14068_v31  ;;  %v1159_v31 = vld [vmem:[%s20678_s1 + $0x2368] sm:$0xff] }
 0x2a6   :  { %10365 = vmatpush1.bf16.msra.mxu0 %v14569_v41  ;;  %v13014_v41 = vcombine.high %v60_v22, %v64_v24  ;;  %v14108_v44 = vcombine.high %v1155_v33, %v1159_v31  ;;  %v14107_v20 = vcombine.low %v1155_v33, %v1159_v31  ;;  %v104_v33 = vld [vmem:[%s20678_s1 + $0x270] sm:$0xff] }
 0x2a7   :  { %10924 = vmatprep.subr.bf16.mxu0 %v12982_v63  ;;  %v68_v63 = vld [vmem:[%s20678_s1 + $0x150] sm:$0xff] }
 0x2a8   :  { %10736 = vmatpush1.bf16.msra.mxu1 %v14067_v47  ;;  %v13022_v47 = vcombine.high %v68_v63, %v72_v36  ;;  %v13021_v53 = vcombine.low %v68_v63, %v72_v36 }
 0x2a9   :  { %10383 = vmatmul.mubr.bf16.vlgmr.msra.gmra.mrb[0].mxu0 %v17409_v45  ;;  %10737 = vmatprep.subr.bf16.mxu1 %v14076_v51  ;;  %v1167_v51 = vld [vmem:[%s20678_s1 + $0x23a8] sm:$0xff] }
 0x2aa   :  { %10925 = vmatpush1.bf16.msra.mxu0 %v12981_v50  ;;  %10956 = vmatprep.mubr.bf16.mxu0 %v15294_v11  ;;  %v1163_v50 = vld [vmem:[%s20678_s1 + $0x2388] sm:$0xff] }
 0x2ab   :  { %10926 = vmatprep.subr.bf16.mxu0 %v12990_v54  ;;  %v76_v54 = vld [vmem:[%s20678_s1 + $0x190] sm:$0xff]  ;;  %v14116_v59 = vcombine.high %v1163_v50, %v1167_v51  ;;  %v14115_v6 = vcombine.low %v1163_v50, %v1167_v51 }
 0x2ac   :  { %10738 = vmatpush1.bf16.msra.mxu1 %v14075_v60  ;;  %v13030_v60 = vcombine.high %v76_v54, %v80_v56  ;;  %v13029_v8 = vcombine.low %v76_v54, %v80_v56  ;;  %v112_v50 = vld [vmem:[%s20678_s1 + $0x2b0] sm:$0xff] }
 0x2ad   :  { %10739 = vmatprep.subr.bf16.mxu1 %v14084_v1  ;;  %v1175_v1 = vld [vmem:[%s20678_s1 + $0x23e8] sm:$0xff] }
 0x2ae   :  { %10927 = vmatpush1.bf16.msra.mxu0 %v12989_v62  ;;  %v1171_v62 = vld [vmem:[%s20678_s1 + $0x23c8] sm:$0xff] }
 0x2af   :  { %10928 = vmatprep.subr.bf16.mxu0 %v12998_v3  ;;  %v84_v3 = vld [vmem:[%s20678_s1 + $0x1d0] sm:$0xff]  ;;  %v14124_v9 = vcombine.high %v1171_v62, %v1175_v1  ;;  %v14123_v21 = vcombine.low %v1171_v62, %v1175_v1 }
 0x2b0   :  { %10740 = vmatpush1.bf16.msra.mxu1 %v14083_v13  ;;  %v13038_v13 = vcombine.high %v84_v3, %v88_v4  ;;  %v13037_v22 = vcombine.low %v84_v3, %v88_v4  ;;  %v120_v62 = vld [vmem:[%s20678_s1 + $0x2f0] sm:$0xff] }
 0x2b1   :  { %10741 = vmatprep.subr.bf16.mxu1 %v14092_v15  ;;  %v1183_v15 = vld [vmem:[%s20678_s1 + $0x2428] sm:$0xff] }
 0x2b2   :  { %10929 = vmatpush1.bf16.msra.mxu0 %v12997_v14  ;;  %v1179_v14 = vld [vmem:[%s20678_s1 + $0x2408] sm:$0xff] }
 0x2b3   :  { %10930 = vmatprep.subr.bf16.mxu0 %v13006_v18  ;;  %v92_v18 = vld [vmem:[%s20678_s1 + $0x210] sm:$0xff]  ;;  %v14132_v24 = vcombine.high %v1179_v14, %v1183_v15  ;;  %v14131_v31 = vcombine.low %v1179_v14, %v1183_v15 }
 0x2b4   :  { %10742 = vmatpush1.bf16.msra.mxu1 %v14091_v26  ;;  %v13046_v26 = vcombine.high %v92_v18, %v96_v19  ;;  %v13045_v63 = vcombine.low %v92_v18, %v96_v19  ;;  %v128_v14 = vld [vmem:[%s20678_s1 + $0x330] sm:$0xff] }
 0x2b5   :  { %10743 = vmatprep.subr.bf16.mxu1 %v14100_v29  ;;  %v1191_v29 = vld [vmem:[%s20678_s1 + $0x2468] sm:$0xff] }
 0x2b6   :  { %10931 = vmatpush1.bf16.msra.mxu0 %v13005_v27  ;;  %v1187_v27 = vld [vmem:[%s20678_s1 + $0x2448] sm:$0xff] }
 0x2b7   :  { %10932 = vmatprep.subr.bf16.mxu0 %v13014_v41  ;;  %v100_v41 = vld [vmem:[%s20678_s1 + $0x250] sm:$0xff]  ;;  %v14140_v36 = vcombine.high %v1187_v27, %v1191_v29  ;;  %v14139_v51 = vcombine.low %v1187_v27, %v1191_v29 }
 0x2b8   :  { %10744 = vmatpush1.bf16.msra.mxu1 %v14099_v5  ;;  %v13054_v5 = vcombine.high %v100_v41, %v104_v33  ;;  %v13053_v54 = vcombine.low %v100_v41, %v104_v33  ;;  %v136_v27 = vld [vmem:[%s20678_s1 + $0x370] sm:$0xff] }
 0x2b9   :  { %10745 = vmatprep.subr.bf16.mxu1 %v14108_v44  ;;  %v1199_v44 = vld [vmem:[%s20678_s1 + $0x24a8] sm:$0xff] }
 0x2ba   :  { %10933 = vmatpush1.bf16.msra.mxu0 %v13013_v12  ;;  %v1195_v12 = vld [vmem:[%s20678_s1 + $0x2488] sm:$0xff] }
 0x2bb   :  { %10934 = vmatprep.subr.bf16.mxu0 %v13022_v47  ;;  %v108_v47 = vld [vmem:[%s20678_s1 + $0x290] sm:$0xff]  ;;  %v14148_v56 = vcombine.high %v1195_v12, %v1199_v44  ;;  %v14147_v1 = vcombine.low %v1195_v12, %v1199_v44 }
 0x2bc   :  { %10746 = vmatpush1.bf16.msra.mxu1 %v14107_v20  ;;  %v13062_v20 = vcombine.high %v108_v47, %v112_v50  ;;  %v13061_v3 = vcombine.low %v108_v47, %v112_v50  ;;  %v144_v12 = vld [vmem:[%s20678_s1 + $0x3b0] sm:$0xff] }
 0x2bd   :  { %10747 = vmatprep.subr.bf16.mxu1 %v14116_v59  ;;  %v1207_v59 = vld [vmem:[%s20678_s1 + $0x24e8] sm:$0xff] }
 0x2be   :  { %10935 = vmatpush1.bf16.msra.mxu0 %v13021_v53  ;;  %v1203_v53 = vld [vmem:[%s20678_s1 + $0x24c8] sm:$0xff] }
 0x2bf   :  { %10936 = vmatprep.subr.bf16.mxu0 %v13030_v60  ;;  %v116_v60 = vld [vmem:[%s20678_s1 + $0x2d0] sm:$0xff]  ;;  %v14156_v4 = vcombine.high %v1203_v53, %v1207_v59  ;;  %v14155_v15 = vcombine.low %v1203_v53, %v1207_v59 }
 0x2c0   :  { %10748 = vmatpush1.bf16.msra.mxu1 %v14115_v6  ;;  %v13070_v6 = vcombine.high %v116_v60, %v120_v62  ;;  %v13069_v18 = vcombine.low %v116_v60, %v120_v62  ;;  %v152_v53 = vld [vmem:[%s20678_s1 + $0x3f0] sm:$0xff] }
 0x2c1   :  { %10749 = vmatprep.subr.bf16.mxu1 %v14124_v9  ;;  %v1215_v9 = vld [vmem:[%s20678_s1 + $0x2528] sm:$0xff] }
 0x2c2   :  { %10937 = vmatpush1.bf16.msra.mxu0 %v13029_v8  ;;  %v1211_v8 = vld [vmem:[%s20678_s1 + $0x2508] sm:$0xff] }
 0x2c3   :  { %10938 = vmatprep.subr.bf16.mxu0 %v13038_v13  ;;  %v124_v13 = vld [vmem:[%s20678_s1 + $0x310] sm:$0xff]  ;;  %v14164_v19 = vcombine.high %v1211_v8, %v1215_v9  ;;  %v14163_v29 = vcombine.low %v1211_v8, %v1215_v9 }
 0x2c4   :  { %10750 = vmatpush1.bf16.msra.mxu1 %v14123_v21  ;;  %v13078_v21 = vcombine.high %v124_v13, %v128_v14  ;;  %v13077_v41 = vcombine.low %v124_v13, %v128_v14  ;;  %v160_v8 = vld [vmem:[%s20678_s1 + $0x430] sm:$0xff] }
 0x2c5   :  { %10760 = vmatprep.subr.bf16.mxu1 %v14132_v24  ;;  %v1223_v24 = vld [vmem:[%s20678_s1 + $0x2568] sm:$0xff] }
 0x2c6   :  { %10939 = vmatpush1.bf16.msra.mxu0 %v13037_v22  ;;  %v1219_v22 = vld [vmem:[%s20678_s1 + $0x2548] sm:$0xff] }
 0x2c7   :  { %10940 = vmatprep.subr.bf16.mxu0 %v13046_v26  ;;  %10752 = vmatmul.mubr.bf16.vlgmr.msra.gmra.mrb[4].mxu1 %v16685_v46  ;;  %v132_v26 = vld [vmem:[%s20678_s1 + $0x350] sm:$0xff]  ;;  %v14172_v33 = vcombine.high %v1219_v22, %v1223_v24  ;;  %v14171_v44 = vcombine.low %v1219_v22, %v1223_v24 }
 0x2c8   :  { %10761 = vmatpush1.bf16.msra.mxu1 %v14131_v31  ;;  %10792 = vmatprep.mubr.bf16.mxu1 %v16695_v58  ;;  %v13086_v31 = vcombine.high %v132_v26, %v136_v27  ;;  %v13085_v47 = vcombine.low %v132_v26, %v136_v27  ;;  %v168_v22 = vld [vmem:[%s20678_s1 + $0x470] sm:$0xff] }
 0x2c9   :  { %10762 = vmatprep.subr.bf16.mxu1 %v14140_v36  ;;  %v1231_v36 = vld [vmem:[%s20678_s1 + $0x25a8] sm:$0xff] }
 0x2ca   :  { %10941 = vmatpush1.bf16.msra.mxu0 %v13045_v63  ;;  %v1227_v63 = vld [vmem:[%s20678_s1 + $0x2588] sm:$0xff] }
 0x2cb   :  { %10942 = vmatprep.subr.bf16.mxu0 %v13054_v5  ;;  %v140_v5 = vld [vmem:[%s20678_s1 + $0x390] sm:$0xff]  ;;  %v14180_v50 = vcombine.high %v1227_v63, %v1231_v36  ;;  %v14179_v59 = vcombine.low %v1227_v63, %v1231_v36 }
 0x2cc   :  { %10763 = vmatpush1.bf16.msra.mxu1 %v14139_v51  ;;  %v13094_v51 = vcombine.high %v140_v5, %v144_v12  ;;  %v13093_v60 = vcombine.low %v140_v5, %v144_v12  ;;  %v176_v63 = vld [vmem:[%s20678_s1 + $0x4b0] sm:$0xff] }
 0x2cd   :  { %10764 = vmatprep.subr.bf16.mxu1 %v14148_v56  ;;  %v1239_v56 = vld [vmem:[%s20678_s1 + $0x25e8] sm:$0xff] }
 0x2ce   :  { %10943 = vmatpush1.bf16.msra.mxu0 %v13053_v54  ;;  %v1235_v54 = vld [vmem:[%s20678_s1 + $0x25c8] sm:$0xff] }
 0x2cf   :  { %10944 = vmatprep.subr.bf16.mxu0 %v13062_v20  ;;  %v148_v20 = vld [vmem:[%s20678_s1 + $0x3d0] sm:$0xff]  ;;  %v14188_v62 = vcombine.high %v1235_v54, %v1239_v56  ;;  %v14187_v9 = vcombine.low %v1235_v54, %v1239_v56 }
 0x2d0   :  { %10765 = vmatpush1.bf16.msra.mxu1 %v14147_v1  ;;  %v13102_v1 = vcombine.high %v148_v20, %v152_v53  ;;  %v13101_v13 = vcombine.low %v148_v20, %v152_v53  ;;  %v184_v54 = vld [vmem:[%s20678_s1 + $0x4f0] sm:$0xff] }
 0x2d1   :  { %10766 = vmatprep.subr.bf16.mxu1 %v14156_v4  ;;  %v1247_v4 = vld [vmem:[%s20678_s1 + $0x2628] sm:$0xff] }
 0x2d2   :  { %10945 = vmatpush1.bf16.msra.mxu0 %v13061_v3  ;;  %v1243_v3 = vld [vmem:[%s20678_s1 + $0x2608] sm:$0xff] }
 0x2d3   :  { %10946 = vmatprep.subr.bf16.mxu0 %v13070_v6  ;;  %v156_v6 = vld [vmem:[%s20678_s1 + $0x410] sm:$0xff]  ;;  %v14196_v14 = vcombine.high %v1243_v3, %v1247_v4  ;;  %v14195_v24 = vcombine.low %v1243_v3, %v1247_v4 }
 0x2d4   :  { %10767 = vmatpush1.bf16.msra.mxu1 %v14155_v15  ;;  %v13110_v15 = vcombine.high %v156_v6, %v160_v8  ;;  %v13109_v26 = vcombine.low %v156_v6, %v160_v8  ;;  %v192_v3 = vld [vmem:[%s20678_s1 + $0x530] sm:$0xff] }
 0x2d5   :  { %10768 = vmatprep.subr.bf16.mxu1 %v14164_v19  ;;  %v1255_v19 = vld [vmem:[%s20678_s1 + $0x2668] sm:$0xff] }
 0x2d6   :  { %10947 = vmatpush1.bf16.msra.mxu0 %v13069_v18  ;;  %v1251_v18 = vld [vmem:[%s20678_s1 + $0x2648] sm:$0xff] }
 0x2d7   :  { %10948 = vmatprep.subr.bf16.mxu0 %v13078_v21  ;;  %v164_v21 = vld [vmem:[%s20678_s1 + $0x450] sm:$0xff]  ;;  %v14204_v27 = vcombine.high %v1251_v18, %v1255_v19  ;;  %v14203_v36 = vcombine.low %v1251_v18, %v1255_v19 }
 0x2d8   :  { %10769 = vmatpush1.bf16.msra.mxu1 %v14163_v29  ;;  %v13118_v29 = vcombine.high %v164_v21, %v168_v22  ;;  %v13117_v5 = vcombine.low %v164_v21, %v168_v22  ;;  %v200_v18 = vld [vmem:[%s20678_s1 + $0x570] sm:$0xff] }
 0x2d9   :  { %10770 = vmatprep.subr.bf16.mxu1 %v14172_v33  ;;  %v1263_v33 = vld [vmem:[%s20678_s1 + $0x26a8] sm:$0xff] }
 0x2da   :  { %10949 = vmatpush1.bf16.msra.mxu0 %v13077_v41  ;;  %v1259_v41 = vld [vmem:[%s20678_s1 + $0x2688] sm:$0xff] }
 0x2db   :  { %10950 = vmatprep.subr.bf16.mxu0 %v13086_v31  ;;  %v172_v31 = vld [vmem:[%s20678_s1 + $0x490] sm:$0xff]  ;;  %v14212_v12 = vcombine.high %v1259_v41, %v1263_v33  ;;  %v14211_v56 = vcombine.low %v1259_v41, %v1263_v33 }
 0x2dc   :  { %10771 = vmatpush1.bf16.msra.mxu1 %v14171_v44  ;;  %v13126_v44 = vcombine.high %v172_v31, %v176_v63  ;;  %v13125_v20 = vcombine.low %v172_v31, %v176_v63  ;;  %v208_v41 = vld [vmem:[%s20678_s1 + $0x5b0] sm:$0xff] }
 0x2dd   :  { %10772 = vmatprep.subr.bf16.mxu1 %v14180_v50  ;;  %v1271_v50 = vld [vmem:[%s20678_s1 + $0x26e8] sm:$0xff] }
 0x2de   :  { %10951 = vmatpush1.bf16.msra.mxu0 %v13085_v47  ;;  %v1267_v47 = vld [vmem:[%s20678_s1 + $0x26c8] sm:$0xff] }
 0x2df   :  { %10952 = vmatprep.subr.bf16.mxu0 %v13094_v51  ;;  %v180_v51 = vld [vmem:[%s20678_s1 + $0x4d0] sm:$0xff]  ;;  %v14220_v53 = vcombine.high %v1267_v47, %v1271_v50  ;;  %v14219_v4 = vcombine.low %v1267_v47, %v1271_v50 }
 0x2e0   :  { %10773 = vmatpush1.bf16.msra.mxu1 %v14179_v59  ;;  %v13134_v59 = vcombine.high %v180_v51, %v184_v54  ;;  %v13133_v6 = vcombine.low %v180_v51, %v184_v54  ;;  %v216_v47 = vld [vmem:[%s20678_s1 + $0x5f0] sm:$0xff] }
 0x2e1   :  { %10774 = vmatprep.subr.bf16.mxu1 %v14188_v62  ;;  %v1279_v62 = vld [vmem:[%s20678_s1 + $0x2728] sm:$0xff] }
 0x2e2   :  { %10953 = vmatpush1.bf16.msra.mxu0 %v13093_v60  ;;  %v1275_v60 = vld [vmem:[%s20678_s1 + $0x2708] sm:$0xff] }
 0x2e3   :  { %10954 = vmatprep.subr.bf16.mxu0 %v13102_v1  ;;  %v188_v1 = vld [vmem:[%s20678_s1 + $0x510] sm:$0xff]  ;;  %v14228_v8 = vcombine.high %v1275_v60, %v1279_v62  ;;  %v14227_v19 = vcombine.low %v1275_v60, %v1279_v62 }
 0x2e4   :  { %10775 = vmatpush1.bf16.msra.mxu1 %v14187_v9  ;;  %v13142_v9 = vcombine.high %v188_v1, %v192_v3  ;;  %v13141_v21 = vcombine.low %v188_v1, %v192_v3  ;;  %v224_v60 = vld [vmem:[%s20678_s1 + $0x630] sm:$0xff] }
 0x2e5   :  { %10776 = vmatprep.subr.bf16.mxu1 %v14196_v14  ;;  %v1287_v14 = vld [vmem:[%s20678_s1 + $0x2768] sm:$0xff] }
 0x2e6   :  { %10955 = vmatpush1.bf16.msra.mxu0 %v13101_v13  ;;  %v1283_v13 = vld [vmem:[%s20678_s1 + $0x2748] sm:$0xff] }
 0x2e7   :  { %10965 = vmatprep.subr.bf16.mxu0 %v13110_v15  ;;  %v196_v15 = vld [vmem:[%s20678_s1 + $0x550] sm:$0xff]  ;;  %v14236_v22 = vcombine.high %v1283_v13, %v1287_v14  ;;  %v14235_v33 = vcombine.low %v1283_v13, %v1287_v14 }
 0x2e8   :  { %10777 = vmatpush1.bf16.msra.mxu1 %v14195_v24  ;;  %v13150_v24 = vcombine.high %v196_v15, %v200_v18  ;;  %v13149_v31 = vcombine.low %v196_v15, %v200_v18  ;;  %v232_v13 = vld [vmem:[%s20678_s1 + $0x670] sm:$0xff] }
 0x2e9   :  { %10957 = vmatmul.mubr.bf16.vlgmr.msra.gmra.mrb[4].mxu0 %v15413_v28  ;;  %10778 = vmatprep.subr.bf16.mxu1 %v14204_v27  ;;  %v1295_v27 = vld [vmem:[%s20678_s1 + $0x27a8] sm:$0xff] }
 0x2ea   :  { %10966 = vmatpush1.bf16.msra.mxu0 %v13109_v26  ;;  %10997 = vmatprep.mubr.bf16.mxu0 %v15439_v38  ;;  %v1291_v26 = vld [vmem:[%s20678_s1 + $0x2788] sm:$0xff] }
 0x2eb   :  { %10967 = vmatprep.subr.bf16.mxu0 %v13118_v29  ;;  %v204_v29 = vld [vmem:[%s20678_s1 + $0x590] sm:$0xff]  ;;  %v14244_v63 = vcombine.high %v1291_v26, %v1295_v27  ;;  %v14243_v50 = vcombine.low %v1291_v26, %v1295_v27 }
 0x2ec   :  { %10779 = vmatpush1.bf16.msra.mxu1 %v14203_v36  ;;  %v13158_v36 = vcombine.high %v204_v29, %v208_v41  ;;  %v13157_v51 = vcombine.low %v204_v29, %v208_v41  ;;  %v240_v26 = vld [vmem:[%s20678_s1 + $0x6b0] sm:$0xff] }
 0x2ed   :  { %10780 = vmatprep.subr.bf16.mxu1 %v14212_v12  ;;  %v1303_v12 = vld [vmem:[%s20678_s1 + $0x27e8] sm:$0xff] }
 0x2ee   :  { %10968 = vmatpush1.bf16.msra.mxu0 %v13117_v5  ;;  %v1299_v5 = vld [vmem:[%s20678_s1 + $0x27c8] sm:$0xff] }
 0x2ef   :  { %10969 = vmatprep.subr.bf16.mxu0 %v13126_v44  ;;  %v212_v44 = vld [vmem:[%s20678_s1 + $0x5d0] sm:$0xff]  ;;  %v14252_v54 = vcombine.high %v1299_v5, %v1303_v12  ;;  %v14251_v62 = vcombine.low %v1299_v5, %v1303_v12 }
 0x2f0   :  { %10781 = vmatpush1.bf16.msra.mxu1 %v14211_v56  ;;  %v13166_v56 = vcombine.high %v212_v44, %v216_v47  ;;  %v13165_v1 = vcombine.low %v212_v44, %v216_v47  ;;  %v248_v5 = vld [vmem:[%s20678_s1 + $0x6f0] sm:$0xff] }
 0x2f1   :  { %10782 = vmatprep.subr.bf16.mxu1 %v14220_v53  ;;  %v1311_v53 = vld [vmem:[%s20678_s1 + $0x2828] sm:$0xff] }
 0x2f2   :  { %10970 = vmatpush1.bf16.msra.mxu0 %v13125_v20  ;;  %v1307_v20 = vld [vmem:[%s20678_s1 + $0x2808] sm:$0xff] }
 0x2f3   :  { %10971 = vmatprep.subr.bf16.mxu0 %v13134_v59  ;;  %v220_v59 = vld [vmem:[%s20678_s1 + $0x610] sm:$0xff]  ;;  %v14260_v3 = vcombine.high %v1307_v20, %v1311_v53  ;;  %v14259_v14 = vcombine.low %v1307_v20, %v1311_v53 }
 0x2f4   :  { %10783 = vmatpush1.bf16.msra.mxu1 %v14219_v4  ;;  %v13174_v4 = vcombine.high %v220_v59, %v224_v60  ;;  %v13173_v15 = vcombine.low %v220_v59, %v224_v60  ;;  %v256_v20 = vld [vmem:[%s20678_s1 + $0x730] sm:$0xff] }
 0x2f5   :  { %10784 = vmatprep.subr.bf16.mxu1 %v14228_v8  ;;  %v1319_v8 = vld [vmem:[%s20678_s1 + $0x2868] sm:$0xff] }
 0x2f6   :  { %10972 = vmatpush1.bf16.msra.mxu0 %v13133_v6  ;;  %v1315_v6 = vld [vmem:[%s20678_s1 + $0x2848] sm:$0xff] }
 0x2f7   :  { %10973 = vmatprep.subr.bf16.mxu0 %v13142_v9  ;;  %v228_v9 = vld [vmem:[%s20678_s1 + $0x650] sm:$0xff]  ;;  %v14268_v18 = vcombine.high %v1315_v6, %v1319_v8  ;;  %v14267_v27 = vcombine.low %v1315_v6, %v1319_v8 }
 0x2f8   :  { %10785 = vmatpush1.bf16.msra.mxu1 %v14227_v19  ;;  %v13182_v19 = vcombine.high %v228_v9, %v232_v13  ;;  %v13181_v29 = vcombine.low %v228_v9, %v232_v13  ;;  %v264_v6 = vld [vmem:[%s20678_s1 + $0x770] sm:$0xff] }
 0x2f9   :  { %10786 = vmatprep.subr.bf16.mxu1 %v14236_v22  ;;  %v1327_v22 = vld [vmem:[%s20678_s1 + $0x28a8] sm:$0xff] }
 0x2fa   :  { %10974 = vmatpush1.bf16.msra.mxu0 %v13141_v21  ;;  %v1323_v21 = vld [vmem:[%s20678_s1 + $0x2888] sm:$0xff] }
 0x2fb   :  { %10975 = vmatprep.subr.bf16.mxu0 %v13150_v24  ;;  %v236_v24 = vld [vmem:[%s20678_s1 + $0x690] sm:$0xff]  ;;  %v14276_v41 = vcombine.high %v1323_v21, %v1327_v22  ;;  %v14275_v12 = vcombine.low %v1323_v21, %v1327_v22 }
 0x2fc   :  { %10787 = vmatpush1.bf16.msra.mxu1 %v14235_v33  ;;  %v13190_v33 = vcombine.high %v236_v24, %v240_v26  ;;  %v13189_v44 = vcombine.low %v236_v24, %v240_v26  ;;  %v272_v21 = vld [vmem:[%s20678_s1 + $0x7b0] sm:$0xff] }
 0x2fd   :  { %10788 = vmatprep.subr.bf16.mxu1 %v14244_v63  ;;  %v1335_v63 = vld [vmem:[%s20678_s1 + $0x28e8] sm:$0xff] }
 0x2fe   :  { %10976 = vmatpush1.bf16.msra.mxu0 %v13149_v31  ;;  %v1331_v31 = vld [vmem:[%s20678_s1 + $0x28c8] sm:$0xff] }
 0x2ff   :  { %10977 = vmatprep.subr.bf16.mxu0 %v13158_v36  ;;  %v244_v36 = vld [vmem:[%s20678_s1 + $0x6d0] sm:$0xff]  ;;  %v14284_v47 = vcombine.high %v1331_v31, %v1335_v63  ;;  %v14283_v53 = vcombine.low %v1331_v31, %v1335_v63 }
 0x300   :  { %10789 = vmatpush1.bf16.msra.mxu1 %v14243_v50  ;;  %v13198_v50 = vcombine.high %v244_v36, %v248_v5  ;;  %v13197_v59 = vcombine.low %v244_v36, %v248_v5  ;;  %v280_v31 = vld [vmem:[%s20678_s1 + $0x7f0] sm:$0xff] }
 0x301   :  { %10790 = vmatprep.subr.bf16.mxu1 %v14252_v54  ;;  %v1343_v54 = vld [vmem:[%s20678_s1 + $0x2928] sm:$0xff] }
 0x302   :  { %10978 = vmatpush1.bf16.msra.mxu0 %v13157_v51  ;;  %v1339_v51 = vld [vmem:[%s20678_s1 + $0x2908] sm:$0xff] }
 0x303   :  { %10979 = vmatprep.subr.bf16.mxu0 %v13166_v56  ;;  %v252_v56 = vld [vmem:[%s20678_s1 + $0x710] sm:$0xff]  ;;  %v14292_v60 = vcombine.high %v1339_v51, %v1343_v54  ;;  %v14291_v8 = vcombine.low %v1339_v51, %v1343_v54 }
 0x304   :  { %10791 = vmatpush1.bf16.msra.mxu1 %v14251_v62  ;;  %v13206_v62 = vcombine.high %v252_v56, %v256_v20  ;;  %v13205_v9 = vcombine.low %v252_v56, %v256_v20  ;;  %v288_v51 = vld [vmem:[%s20678_s1 + $0x830] sm:$0xff] }
 0x305   :  { %10801 = vmatprep.subr.bf16.mxu1 %v14260_v3  ;;  %v1351_v3 = vld [vmem:[%s20678_s1 + $0x2968] sm:$0xff] }
 0x306   :  { %10980 = vmatpush1.bf16.msra.mxu0 %v13165_v1  ;;  %v1347_v1 = vld [vmem:[%s20678_s1 + $0x2948] sm:$0xff] }
 0x307   :  { %10981 = vmatprep.subr.bf16.mxu0 %v13174_v4  ;;  %10793 = vmatmul.mubr.bf16.vlgmr.msra.gmra.mrb[4].mxu1 %v16896_v2  ;;  %v260_v4 = vld [vmem:[%s20678_s1 + $0x750] sm:$0xff]  ;;  %v14300_v13 = vcombine.high %v1347_v1, %v1351_v3  ;;  %v14299_v22 = vcombine.low %v1347_v1, %v1351_v3 }
 0x308   :  { %10802 = vmatpush1.bf16.msra.mxu1 %v14259_v14  ;;  %10833 = vmatprep.mubr.bf16.mxu1 %v16905_v10  ;;  %v13214_v14 = vcombine.high %v260_v4, %v264_v6  ;;  %v13213_v24 = vcombine.low %v260_v4, %v264_v6  ;;  %v296_v1 = vld [vmem:[%s20678_s1 + $0x870] sm:$0xff] }
 0x309   :  { %10803 = vmatprep.subr.bf16.mxu1 %v14268_v18  ;;  %v1359_v18 = vld [vmem:[%s20678_s1 + $0x29a8] sm:$0xff] }
 0x30a   :  { %10982 = vmatpush1.bf16.msra.mxu0 %v13173_v15  ;;  %v1355_v15 = vld [vmem:[%s20678_s1 + $0x2988] sm:$0xff] }
 0x30b   :  { %10983 = vmatprep.subr.bf16.mxu0 %v13182_v19  ;;  %v268_v19 = vld [vmem:[%s20678_s1 + $0x790] sm:$0xff]  ;;  %v14308_v26 = vcombine.high %v1355_v15, %v1359_v18  ;;  %v14307_v63 = vcombine.low %v1355_v15, %v1359_v18 }
 0x30c   :  { %10804 = vmatpush1.bf16.msra.mxu1 %v14267_v27  ;;  %v13222_v27 = vcombine.high %v268_v19, %v272_v21  ;;  %v13221_v36 = vcombine.low %v268_v19, %v272_v21  ;;  %v304_v15 = vld [vmem:[%s20678_s1 + $0x8b0] sm:$0xff] }
 0x30d   :  { %10805 = vmatprep.subr.bf16.mxu1 %v14276_v41  ;;  %v1367_v41 = vld [vmem:[%s20678_s1 + $0x29e8] sm:$0xff] }
 0x30e   :  { %10984 = vmatpush1.bf16.msra.mxu0 %v13181_v29  ;;  %v1363_v29 = vld [vmem:[%s20678_s1 + $0x29c8] sm:$0xff] }
 0x30f   :  { %10985 = vmatprep.subr.bf16.mxu0 %v13190_v33  ;;  %v276_v33 = vld [vmem:[%s20678_s1 + $0x7d0] sm:$0xff]  ;;  %v14316_v5 = vcombine.high %v1363_v29, %v1367_v41  ;;  %v14315_v54 = vcombine.low %v1363_v29, %v1367_v41 }
 0x310   :  { %10806 = vmatpush1.bf16.msra.mxu1 %v14275_v12  ;;  %v13230_v12 = vcombine.high %v276_v33, %v280_v31  ;;  %v13229_v56 = vcombine.low %v276_v33, %v280_v31  ;;  %v312_v29 = vld [vmem:[%s20678_s1 + $0x8f0] sm:$0xff] }
 0x311   :  { %10807 = vmatprep.subr.bf16.mxu1 %v14284_v47  ;;  %v1375_v47 = vld [vmem:[%s20678_s1 + $0x2a28] sm:$0xff] }
 0x312   :  { %10986 = vmatpush1.bf16.msra.mxu0 %v13189_v44  ;;  %v1371_v44 = vld [vmem:[%s20678_s1 + $0x2a08] sm:$0xff] }
 0x313   :  { %10987 = vmatprep.subr.bf16.mxu0 %v13198_v50  ;;  %v284_v50 = vld [vmem:[%s20678_s1 + $0x810] sm:$0xff]  ;;  %v14324_v20 = vcombine.high %v1371_v44, %v1375_v47  ;;  %v14323_v3 = vcombine.low %v1371_v44, %v1375_v47 }
 0x314   :  { %10808 = vmatpush1.bf16.msra.mxu1 %v14283_v53  ;;  %v13238_v53 = vcombine.high %v284_v50, %v288_v51  ;;  %v13237_v4 = vcombine.low %v284_v50, %v288_v51  ;;  %v320_v44 = vld [vmem:[%s20678_s1 + $0x930] sm:$0xff] }
 0x315   :  { %10809 = vmatprep.subr.bf16.mxu1 %v14292_v60  ;;  %v1383_v60 = vld [vmem:[%s20678_s1 + $0x2a68] sm:$0xff] }
 0x316   :  { %10988 = vmatpush1.bf16.msra.mxu0 %v13197_v59  ;;  %v1379_v59 = vld [vmem:[%s20678_s1 + $0x2a48] sm:$0xff] }
 0x317   :  { %10989 = vmatprep.subr.bf16.mxu0 %v13206_v62  ;;  %v292_v62 = vld [vmem:[%s20678_s1 + $0x850] sm:$0xff]  ;;  %v14332_v6 = vcombine.high %v1379_v59, %v1383_v60  ;;  %v14331_v18 = vcombine.low %v1379_v59, %v1383_v60 }
 0x318   :  { %10810 = vmatpush1.bf16.msra.mxu1 %v14291_v8  ;;  %v13246_v8 = vcombine.high %v292_v62, %v296_v1  ;;  %v13245_v19 = vcombine.low %v292_v62, %v296_v1  ;;  %v328_v59 = vld [vmem:[%s20678_s1 + $0x970] sm:$0xff] }
 0x319   :  { %10811 = vmatprep.subr.bf16.mxu1 %v14300_v13  ;;  %v1391_v13 = vld [vmem:[%s20678_s1 + $0x2aa8] sm:$0xff] }
 0x31a   :  { %10990 = vmatpush1.bf16.msra.mxu0 %v13205_v9  ;;  %v1387_v9 = vld [vmem:[%s20678_s1 + $0x2a88] sm:$0xff] }
 0x31b   :  { %10991 = vmatprep.subr.bf16.mxu0 %v13214_v14  ;;  %v300_v14 = vld [vmem:[%s20678_s1 + $0x890] sm:$0xff]  ;;  %v14340_v21 = vcombine.high %v1387_v9, %v1391_v13  ;;  %v14339_v41 = vcombine.low %v1387_v9, %v1391_v13 }
 0x31c   :  { %10812 = vmatpush1.bf16.msra.mxu1 %v14299_v22  ;;  %v13254_v22 = vcombine.high %v300_v14, %v304_v15  ;;  %v13253_v33 = vcombine.low %v300_v14, %v304_v15  ;;  %v336_v9 = vld [vmem:[%s20678_s1 + $0x9b0] sm:$0xff] }
 0x31d   :  { %10813 = vmatprep.subr.bf16.mxu1 %v14308_v26  ;;  %v1399_v26 = vld [vmem:[%s20678_s1 + $0x2ae8] sm:$0xff] }
 0x31e   :  { %10992 = vmatpush1.bf16.msra.mxu0 %v13213_v24  ;;  %v1395_v24 = vld [vmem:[%s20678_s1 + $0x2ac8] sm:$0xff] }
 0x31f   :  { %10993 = vmatprep.subr.bf16.mxu0 %v13222_v27  ;;  %v308_v27 = vld [vmem:[%s20678_s1 + $0x8d0] sm:$0xff]  ;;  %v14348_v31 = vcombine.high %v1395_v24, %v1399_v26  ;;  %v14347_v47 = vcombine.low %v1395_v24, %v1399_v26 }
 0x320   :  { %10814 = vmatpush1.bf16.msra.mxu1 %v14307_v63  ;;  %v13262_v63 = vcombine.high %v308_v27, %v312_v29  ;;  %v13261_v50 = vcombine.low %v308_v27, %v312_v29  ;;  %v344_v24 = vld [vmem:[%s20678_s1 + $0x9f0] sm:$0xff] }
 0x321   :  { %10815 = vmatprep.subr.bf16.mxu1 %v14316_v5  ;;  %v1407_v5 = vld [vmem:[%s20678_s1 + $0x2b28] sm:$0xff] }
 0x322   :  { %10994 = vmatpush1.bf16.msra.mxu0 %v13221_v36  ;;  %v1403_v36 = vld [vmem:[%s20678_s1 + $0x2b08] sm:$0xff] }
 0x323   :  { %10995 = vmatprep.subr.bf16.mxu0 %v13230_v12  ;;  %v316_v12 = vld [vmem:[%s20678_s1 + $0x910] sm:$0xff]  ;;  %v14356_v51 = vcombine.high %v1403_v36, %v1407_v5  ;;  %v14355_v60 = vcombine.low %v1403_v36, %v1407_v5 }
 0x324   :  { %10816 = vmatpush1.bf16.msra.mxu1 %v14315_v54  ;;  %v13270_v54 = vcombine.high %v316_v12, %v320_v44  ;;  %v13269_v62 = vcombine.low %v316_v12, %v320_v44  ;;  %v352_v36 = vld [vmem:[%s20678_s1 + $0xa30] sm:$0xff] }
 0x325   :  { %10817 = vmatprep.subr.bf16.mxu1 %v14324_v20  ;;  %v1415_v20 = vld [vmem:[%s20678_s1 + $0x2b68] sm:$0xff] }
 0x326   :  { %10996 = vmatpush1.bf16.msra.mxu0 %v13229_v56  ;;  %v1411_v56 = vld [vmem:[%s20678_s1 + $0x2b48] sm:$0xff] }
 0x327   :  { %11006 = vmatprep.subr.bf16.mxu0 %v13238_v53  ;;  %v324_v53 = vld [vmem:[%s20678_s1 + $0x950] sm:$0xff]  ;;  %v14364_v1 = vcombine.high %v1411_v56, %v1415_v20  ;;  %v14363_v13 = vcombine.low %v1411_v56, %v1415_v20 }
 0x328   :  { %10818 = vmatpush1.bf16.msra.mxu1 %v14323_v3  ;;  %v13278_v3 = vcombine.high %v324_v53, %v328_v59  ;;  %v13277_v14 = vcombine.low %v324_v53, %v328_v59  ;;  %v360_v56 = vld [vmem:[%s20678_s1 + $0xa70] sm:$0xff] }
 0x329   :  { %10998 = vmatmul.mubr.bf16.vlgmr.msra.gmra.mrb[4].mxu0 %v15642_v52  ;;  %10819 = vmatprep.subr.bf16.mxu1 %v14332_v6  ;;  %v1423_v6 = vld [vmem:[%s20678_s1 + $0x2ba8] sm:$0xff] }
 0x32a   :  { %11007 = vmatpush1.bf16.msra.mxu0 %v13237_v4  ;;  %11038 = vmatprep.mubr.bf16.mxu0 %v15306_v16  ;;  %v1419_v4 = vld [vmem:[%s20678_s1 + $0x2b88] sm:$0xff] }
 0x32b   :  { %11008 = vmatprep.subr.bf16.mxu0 %v13246_v8  ;;  %v332_v8 = vld [vmem:[%s20678_s1 + $0x990] sm:$0xff]  ;;  %v14372_v15 = vcombine.high %v1419_v4, %v1423_v6  ;;  %v14371_v26 = vcombine.low %v1419_v4, %v1423_v6 }
 0x32c   :  { %10820 = vmatpush1.bf16.msra.mxu1 %v14331_v18  ;;  %v13286_v18 = vcombine.high %v332_v8, %v336_v9  ;;  %v13285_v27 = vcombine.low %v332_v8, %v336_v9  ;;  %v368_v4 = vld [vmem:[%s20678_s1 + $0xab0] sm:$0xff] }
 0x32d   :  { %10821 = vmatprep.subr.bf16.mxu1 %v14340_v21  ;;  %v1431_v21 = vld [vmem:[%s20678_s1 + $0x2be8] sm:$0xff] }
 0x32e   :  { %11009 = vmatpush1.bf16.msra.mxu0 %v13245_v19  ;;  %v1427_v19 = vld [vmem:[%s20678_s1 + $0x2bc8] sm:$0xff] }
 0x32f   :  { %11010 = vmatprep.subr.bf16.mxu0 %v13254_v22  ;;  %v340_v22 = vld [vmem:[%s20678_s1 + $0x9d0] sm:$0xff]  ;;  %v14380_v29 = vcombine.high %v1427_v19, %v1431_v21  ;;  %v14379_v5 = vcombine.low %v1427_v19, %v1431_v21 }
 0x330   :  { %10822 = vmatpush1.bf16.msra.mxu1 %v14339_v41  ;;  %v13294_v41 = vcombine.high %v340_v22, %v344_v24  ;;  %v13293_v12 = vcombine.low %v340_v22, %v344_v24  ;;  %v376_v19 = vld [vmem:[%s20678_s1 + $0xaf0] sm:$0xff] }
 0x331   :  { %10823 = vmatprep.subr.bf16.mxu1 %v14348_v31  ;;  %v1439_v31 = vld [vmem:[%s20678_s1 + $0x2c28] sm:$0xff] }
 0x332   :  { %11011 = vmatpush1.bf16.msra.mxu0 %v13253_v33  ;;  %v1435_v33 = vld [vmem:[%s20678_s1 + $0x2c08] sm:$0xff] }
 0x333   :  { %11012 = vmatprep.subr.bf16.mxu0 %v13262_v63  ;;  %v348_v63 = vld [vmem:[%s20678_s1 + $0xa10] sm:$0xff]  ;;  %v14388_v44 = vcombine.high %v1435_v33, %v1439_v31  ;;  %v14387_v20 = vcombine.low %v1435_v33, %v1439_v31 }
 0x334   :  { %10824 = vmatpush1.bf16.msra.mxu1 %v14347_v47  ;;  %v13302_v47 = vcombine.high %v348_v63, %v352_v36  ;;  %v13301_v53 = vcombine.low %v348_v63, %v352_v36  ;;  %v384_v33 = vld [vmem:[%s20678_s1 + $0xb30] sm:$0xff] }
 0x335   :  { %10825 = vmatprep.subr.bf16.mxu1 %v14356_v51  ;;  %v1447_v51 = vld [vmem:[%s20678_s1 + $0x2c68] sm:$0xff] }
 0x336   :  { %11013 = vmatpush1.bf16.msra.mxu0 %v13261_v50  ;;  %v1443_v50 = vld [vmem:[%s20678_s1 + $0x2c48] sm:$0xff] }
 0x337   :  { %11014 = vmatprep.subr.bf16.mxu0 %v13270_v54  ;;  %v356_v54 = vld [vmem:[%s20678_s1 + $0xa50] sm:$0xff]  ;;  %v14396_v59 = vcombine.high %v1443_v50, %v1447_v51  ;;  %v14395_v6 = vcombine.low %v1443_v50, %v1447_v51 }
 0x338   :  { %10826 = vmatpush1.bf16.msra.mxu1 %v14355_v60  ;;  %v13310_v60 = vcombine.high %v356_v54, %v360_v56  ;;  %v13309_v8 = vcombine.low %v356_v54, %v360_v56  ;;  %v392_v50 = vld [vmem:[%s20678_s1 + $0xb70] sm:$0xff] }
 0x339   :  { %10827 = vmatprep.subr.bf16.mxu1 %v14364_v1  ;;  %v1455_v1 = vld [vmem:[%s20678_s1 + $0x2ca8] sm:$0xff] }
 0x33a   :  { %11015 = vmatpush1.bf16.msra.mxu0 %v13269_v62  ;;  %v1451_v62 = vld [vmem:[%s20678_s1 + $0x2c88] sm:$0xff] }
 0x33b   :  { %11016 = vmatprep.subr.bf16.mxu0 %v13278_v3  ;;  %v364_v3 = vld [vmem:[%s20678_s1 + $0xa90] sm:$0xff]  ;;  %v14404_v9 = vcombine.high %v1451_v62, %v1455_v1  ;;  %v14403_v21 = vcombine.low %v1451_v62, %v1455_v1 }
 0x33c   :  { %10828 = vmatpush1.bf16.msra.mxu1 %v14363_v13  ;;  %v13318_v13 = vcombine.high %v364_v3, %v368_v4  ;;  %v13317_v22 = vcombine.low %v364_v3, %v368_v4  ;;  %v400_v62 = vld [vmem:[%s20678_s1 + $0xbb0] sm:$0xff] }
 0x33d   :  { %10829 = vmatprep.subr.bf16.mxu1 %v14372_v15  ;;  %v1463_v15 = vld [vmem:[%s20678_s1 + $0x2ce8] sm:$0xff] }
 0x33e   :  { %11017 = vmatpush1.bf16.msra.mxu0 %v13277_v14  ;;  %v1459_v14 = vld [vmem:[%s20678_s1 + $0x2cc8] sm:$0xff] }
 0x33f   :  { %11018 = vmatprep.subr.bf16.mxu0 %v13286_v18  ;;  %v372_v18 = vld [vmem:[%s20678_s1 + $0xad0] sm:$0xff]  ;;  %v14412_v24 = vcombine.high %v1459_v14, %v1463_v15  ;;  %v14411_v31 = vcombine.low %v1459_v14, %v1463_v15 }
 0x340   :  { %10830 = vmatpush1.bf16.msra.mxu1 %v14371_v26  ;;  %v13326_v26 = vcombine.high %v372_v18, %v376_v19  ;;  %v13325_v63 = vcombine.low %v372_v18, %v376_v19  ;;  %v408_v14 = vld [vmem:[%s20678_s1 + $0xbf0] sm:$0xff] }
 0x341   :  { %10831 = vmatprep.subr.bf16.mxu1 %v14380_v29  ;;  %v1471_v29 = vld [vmem:[%s20678_s1 + $0x2d28] sm:$0xff] }
 0x342   :  { %11019 = vmatpush1.bf16.msra.mxu0 %v13285_v27  ;;  %v1467_v27 = vld [vmem:[%s20678_s1 + $0x2d08] sm:$0xff] }
 0x343   :  { %11020 = vmatprep.subr.bf16.mxu0 %v13294_v41  ;;  %v380_v41 = vld [vmem:[%s20678_s1 + $0xb10] sm:$0xff]  ;;  %v14420_v36 = vcombine.high %v1467_v27, %v1471_v29  ;;  %v14419_v51 = vcombine.low %v1467_v27, %v1471_v29 }
 0x344   :  { %10832 = vmatpush1.bf16.msra.mxu1 %v14379_v5  ;;  %v13334_v5 = vcombine.high %v380_v41, %v384_v33  ;;  %v13333_v54 = vcombine.low %v380_v41, %v384_v33  ;;  %v416_v27 = vld [vmem:[%s20678_s1 + $0xc30] sm:$0xff] }
 0x345   :  { %10842 = vmatprep.subr.bf16.mxu1 %v14388_v44  ;;  %v1479_v44 = vld [vmem:[%s20678_s1 + $0x2d68] sm:$0xff] }
 0x346   :  { %11021 = vmatpush1.bf16.msra.mxu0 %v13293_v12  ;;  %v1475_v12 = vld [vmem:[%s20678_s1 + $0x2d48] sm:$0xff] }
 0x347   :  { %11022 = vmatprep.subr.bf16.mxu0 %v13302_v47  ;;  %10834 = vmatmul.mubr.bf16.vlgmr.msra.gmra.mrb[4].mxu1 %v17099_v25  ;;  %v388_v47 = vld [vmem:[%s20678_s1 + $0xb50] sm:$0xff]  ;;  %v14428_v56 = vcombine.high %v1475_v12, %v1479_v44  ;;  %v14427_v1 = vcombine.low %v1475_v12, %v1479_v44 }
 0x348   :  { %10843 = vmatpush1.bf16.msra.mxu1 %v14387_v20  ;;  %10874 = vmatprep.mubr.bf16.mxu1 %v17109_v34  ;;  %v13342_v20 = vcombine.high %v388_v47, %v392_v50  ;;  %v13341_v3 = vcombine.low %v388_v47, %v392_v50  ;;  %v424_v12 = vld [vmem:[%s20678_s1 + $0xc70] sm:$0xff] }
 0x349   :  { %10844 = vmatprep.subr.bf16.mxu1 %v14396_v59  ;;  %v1487_v59 = vld [vmem:[%s20678_s1 + $0x2da8] sm:$0xff] }
 0x34a   :  { %11023 = vmatpush1.bf16.msra.mxu0 %v13301_v53  ;;  %v1483_v53 = vld [vmem:[%s20678_s1 + $0x2d88] sm:$0xff] }
 0x34b   :  { %11024 = vmatprep.subr.bf16.mxu0 %v13310_v60  ;;  %v396_v60 = vld [vmem:[%s20678_s1 + $0xb90] sm:$0xff]  ;;  %v14436_v4 = vcombine.high %v1483_v53, %v1487_v59  ;;  %v14435_v15 = vcombine.low %v1483_v53, %v1487_v59 }
 0x34c   :  { %10845 = vmatpush1.bf16.msra.mxu1 %v14395_v6  ;;  %v13350_v6 = vcombine.high %v396_v60, %v400_v62  ;;  %v13349_v18 = vcombine.low %v396_v60, %v400_v62  ;;  %v432_v53 = vld [vmem:[%s20678_s1 + $0xcb0] sm:$0xff] }
 0x34d   :  { %10846 = vmatprep.subr.bf16.mxu1 %v14404_v9  ;;  %v1495_v9 = vld [vmem:[%s20678_s1 + $0x2de8] sm:$0xff] }
 0x34e   :  { %11025 = vmatpush1.bf16.msra.mxu0 %v13309_v8  ;;  %v1491_v8 = vld [vmem:[%s20678_s1 + $0x2dc8] sm:$0xff] }
 0x34f   :  { %11026 = vmatprep.subr.bf16.mxu0 %v13318_v13  ;;  %v404_v13 = vld [vmem:[%s20678_s1 + $0xbd0] sm:$0xff]  ;;  %v14444_v19 = vcombine.high %v1491_v8, %v1495_v9  ;;  %v14443_v29 = vcombine.low %v1491_v8, %v1495_v9 }
 0x350   :  { %10847 = vmatpush1.bf16.msra.mxu1 %v14403_v21  ;;  %v13358_v21 = vcombine.high %v404_v13, %v408_v14  ;;  %v13357_v41 = vcombine.low %v404_v13, %v408_v14  ;;  %v440_v8 = vld [vmem:[%s20678_s1 + $0xcf0] sm:$0xff] }
 0x351   :  { %10848 = vmatprep.subr.bf16.mxu1 %v14412_v24  ;;  %v1503_v24 = vld [vmem:[%s20678_s1 + $0x2e28] sm:$0xff] }
 0x352   :  { %11027 = vmatpush1.bf16.msra.mxu0 %v13317_v22  ;;  %v1499_v22 = vld [vmem:[%s20678_s1 + $0x2e08] sm:$0xff] }
 0x353   :  { %11028 = vmatprep.subr.bf16.mxu0 %v13326_v26  ;;  %v412_v26 = vld [vmem:[%s20678_s1 + $0xc10] sm:$0xff]  ;;  %v14452_v33 = vcombine.high %v1499_v22, %v1503_v24  ;;  %v14451_v44 = vcombine.low %v1499_v22, %v1503_v24 }
 0x354   :  { %10849 = vmatpush1.bf16.msra.mxu1 %v14411_v31  ;;  %v13366_v31 = vcombine.high %v412_v26, %v416_v27  ;;  %v13365_v47 = vcombine.low %v412_v26, %v416_v27  ;;  %v448_v22 = vld [vmem:[%s20678_s1 + $0xd30] sm:$0xff] }
 0x355   :  { %10850 = vmatprep.subr.bf16.mxu1 %v14420_v36  ;;  %v1511_v36 = vld [vmem:[%s20678_s1 + $0x2e68] sm:$0xff] }
 0x356   :  { %11029 = vmatpush1.bf16.msra.mxu0 %v13325_v63  ;;  %v1507_v63 = vld [vmem:[%s20678_s1 + $0x2e48] sm:$0xff] }
 0x357   :  { %11030 = vmatprep.subr.bf16.mxu0 %v13334_v5  ;;  %v420_v5 = vld [vmem:[%s20678_s1 + $0xc50] sm:$0xff]  ;;  %v14460_v50 = vcombine.high %v1507_v63, %v1511_v36  ;;  %v14459_v59 = vcombine.low %v1507_v63, %v1511_v36  ;;  %v1626_v63 = vld [vmem:[%s20679_s2] sm:$0xff]  ;;  %v1634_v36 = vsub.s32 1, %v15241_v43 }
 0x358   :  { %10851 = vmatpush1.bf16.msra.mxu1 %v14419_v51  ;;  %v13374_v51 = vcombine.high %v420_v5, %v424_v12  ;;  %v13373_v60 = vcombine.low %v420_v5, %v424_v12  ;;  %v452_v5 = vld [vmem:[%s20678_s1 + $0xd50] sm:$0xff] }
 0x359   :  { %10852 = vmatprep.subr.bf16.mxu1 %v14428_v56  ;;  %v1519_v56 = vld [vmem:[%s20678_s1 + $0x2ea8] sm:$0xff]  ;;  %v456_v12 = vld [vmem:[%s20678_s1 + $0xd70] sm:$0xff] }
 0x35a   :  { %11031 = vmatpush1.bf16.msra.mxu0 %v13333_v54  ;;  %v1515_v54 = vld [vmem:[%s20678_s1 + $0x2e88] sm:$0xff] }
 0x35b   :  { %11032 = vmatprep.subr.bf16.mxu0 %v13342_v20  ;;  %v428_v20 = vld [vmem:[%s20678_s1 + $0xc90] sm:$0xff]  ;;  %v14468_v62 = vcombine.high %v1515_v54, %v1519_v56  ;;  %v14467_v9 = vcombine.low %v1515_v54, %v1519_v56  ;;  %v13406_v54 = vcombine.high %v452_v5, %v456_v12  ;;  %v1547_v56 = vld [vmem:[%s20678_s1 + $0x2f88] sm:$0xff] }
 0x35c   :  { %10853 = vmatpush1.bf16.msra.mxu1 %v14427_v1  ;;  %v13382_v1 = vcombine.high %v428_v20, %v432_v53  ;;  %v13381_v13 = vcombine.low %v428_v20, %v432_v53  ;;  %v1551_v20 = vld [vmem:[%s20678_s1 + $0x2fa8] sm:$0xff]  ;;  %v1635_v53 = vrot.slane %v1626_v63, %v1634_v36 }
 0x35d   :  { %10854 = vmatprep.subr.bf16.mxu1 %v14436_v4  ;;  %v1527_v4 = vld [vmem:[%s20678_s1 + $0x2ee8] sm:$0xff] }
 0x35e   :  { %11033 = vmatpush1.bf16.msra.mxu0 %v13341_v3  ;;  %v1523_v3 = vld [vmem:[%s20678_s1 + $0x2ec8] sm:$0xff] }
 0x35f   :  { %11034 = vmatprep.subr.bf16.mxu0 %v13350_v6  ;;  %v436_v6 = vld [vmem:[%s20678_s1 + $0xcd0] sm:$0xff]  ;;  %v14476_v14 = vcombine.high %v1523_v3, %v1527_v4  ;;  %v14475_v24 = vcombine.low %v1523_v3, %v1527_v4  ;;  %v14500_v3 = vcombine.high %v1547_v56, %v1551_v20 }
 0x360   :  { %10855 = vmatpush1.bf16.msra.mxu1 %v14435_v15  ;;  %v13390_v15 = vcombine.high %v436_v6, %v440_v8  ;;  %v13389_v26 = vcombine.low %v436_v6, %v440_v8  ;;  %v1555_v8 = vld [vmem:[%s20678_s1 + $0x2fc8] sm:$0xff] }
 0x361   :  { %10856 = vmatprep.subr.bf16.mxu1 %v14444_v19  ;;  %v1535_v19 = vld [vmem:[%s20678_s1 + $0x2f28] sm:$0xff] }
 0x362   :  { %11035 = vmatpush1.bf16.msra.mxu0 %v13349_v18  ;;  %v1531_v18 = vld [vmem:[%s20678_s1 + $0x2f08] sm:$0xff] }
 0x363   :  { %11036 = vmatprep.subr.bf16.mxu0 %v13358_v21  ;;  %v444_v21 = vld [vmem:[%s20678_s1 + $0xd10] sm:$0xff]  ;;  %v14484_v27 = vcombine.high %v1531_v18, %v1535_v19 }
 0x364   :  { %10857 = vmatpush1.bf16.msra.mxu1 %v14443_v29  ;;  %v1630_v29 = vsub.s32 0, %v15241_v43 }
 0x365   :  { %10858 = vmatprep.subr.bf16.mxu1 %v14452_v33  ;;  %v1539_v33 = vld [vmem:[%s20678_s1 + $0x2f48] sm:$0xff] }
 0x366   :  { %11037 = vmatpush1.bf16.msra.mxu0 %v13357_v41  ;;  %v13398_v41 = vcombine.high %v444_v21, %v448_v22 }
 0x367   :  { %11047 = vmatprep.subr.bf16.mxu0 %v13366_v31  ;;  %v1543_v31 = vld [vmem:[%s20678_s1 + $0x2f68] sm:$0xff] }
 0x368   :  { %10859 = vmatpush1.bf16.msra.mxu1 %v14451_v44  ;;  %v14483_v44 = vcombine.low %v1531_v18, %v1535_v19 }
 0x369   :  { %11039 = vmatmul.mubr.bf16.vlgmr.msra.gmra.mrb[4].mxu0 %v15423_v32  ;;  %10860 = vmatprep.subr.bf16.mxu1 %v14460_v50  ;;  %v14492_v50 = vcombine.high %v1539_v33, %v1543_v31 }
 0x36a   :  { %11048 = vmatpush1.bf16.msra.mxu0 %v13365_v47  ;;  %11079 = vmatprep.mubr.bf16.mxu0 %v15444_v39  ;;  %v13397_v47 = vcombine.low %v444_v21, %v448_v22  ;;  %v14499_v21 = vcombine.low %v1547_v56, %v1551_v20  ;;  %v484_v56 = vld [vmem:[%s20678_s1 + $0xe50] sm:$0xff] }
 0x36b   :  { %11049 = vmatprep.subr.bf16.mxu0 %v13374_v51  ;;  %v1631_v51 = vrot.slane %v1626_v63, %v1630_v29  ;;  %v476_v63 = vld [vmem:[%s20678_s1 + $0xe10] sm:$0xff] }
 0x36c   :  { %10861 = vmatpush1.bf16.msra.mxu1 %v14459_v59  ;;  %v460_v59 = vld [vmem:[%s20678_s1 + $0xd90] sm:$0xff] }
 0x36d   :  { %10862 = vmatprep.subr.bf16.mxu1 %v14468_v62  ;;  %v14491_v62 = vcombine.low %v1539_v33, %v1543_v31  ;;  %v14706_v4 = vadd.f32 %v16333_v35, %v1631_v51  ;;  %v472_v35 = vld [vmem:[%s20678_s1 + $0xdf0] sm:$0xff]  ;;  %v1563_v33 = vld [vmem:[%s20678_s1 + $0x3008] sm:$0xff] }
 0x36e   :  { %11050 = vmatpush1.bf16.msra.mxu0 %v13373_v60  ;;  %v464_v60 = vld [vmem:[%s20678_s1 + $0xdb0] sm:$0xff]  ;;  %v1567_v31 = vld [vmem:[%s20678_s1 + $0x3028] sm:$0xff] }
 0x36f   :  { %11051 = vmatprep.subr.bf16.mxu0 %v13382_v1  ;;  %v13405_v1 = vcombine.low %v452_v5, %v456_v12  ;;  %v13414_v6 = vcombine.high %v460_v59, %v464_v60  ;;  %v480_v5 = vld [vmem:[%s20678_s1 + $0xe30] sm:$0xff]  ;;  %v1571_v51 = vld [vmem:[%s20678_s1 + $0x3048] sm:$0xff] }
 0x370   :  { %10863 = vmatpush1.bf16.msra.mxu1 %v14467_v9  ;;  %v1559_v9 = vld [vmem:[%s20678_s1 + $0x2fe8] sm:$0xff]  ;;  %v488_v20 = vld [vmem:[%s20678_s1 + $0xe70] sm:$0xff] }
 0x371   :  { %10864 = vmatprep.subr.bf16.mxu1 %v14476_v14  ;;  %v14507_v12 = vcombine.low %v1555_v8, %v1559_v9 }
 0x372   :  { %11052 = vmatpush1.bf16.msra.mxu0 %v13381_v13  ;;  %v14708_v13 = vadd.f32 %v16341_v40, %v1635_v53  ;;  %v13413_v40 = vcombine.low %v460_v59, %v464_v60  ;;  %v14515_v53 = vcombine.low %v1563_v33, %v1567_v31  ;;  %v13429_v59 = vcombine.low %v476_v63, %v480_v5 }
 0x373   :  { %11053 = vmatprep.subr.bf16.mxu0 %v13390_v15  ;;  %v468_v15 = vld [vmem:[%s20678_s1 + $0xdd0] sm:$0xff] }
 0x374   :  { %10865 = vmatpush1.bf16.msra.mxu1 %v14475_v24 }
 0x375   :  { %10866 = vmatprep.subr.bf16.mxu1 %v14484_v27 }
 0x376   :  { %11054 = vmatpush1.bf16.msra.mxu0 %v13389_v26  ;;  %v14508_v26 = vcombine.high %v1555_v8, %v1559_v9  ;;  %v13437_v9 = vcombine.low %v484_v56, %v488_v20 }
 0x377   :  { %11055 = vmatprep.subr.bf16.mxu0 %v13398_v41  ;;  %v13422_v41 = vcombine.high %v468_v15, %v472_v35 }
 0x378   :  { %10867 = vmatpush1.bf16.msra.mxu1 %v14483_v44  ;;  %v13421_v44 = vcombine.low %v468_v15, %v472_v35  ;;  %v1587_v15 = vld [vmem:[%s20678_s1 + $0x30c8] sm:$0xff] }
 0x379   :  { %10868 = vmatprep.subr.bf16.mxu1 %v14492_v50  ;;  %v13430_v50 = vcombine.high %v476_v63, %v480_v5  ;;  %v1591_v35 = vld [vmem:[%s20678_s1 + $0x30e8] sm:$0xff]  ;;  %v512_v63 = vld [vmem:[%s20678_s1 + $0xf30] sm:$0xff] }
 0x37a   :  { %11056 = vmatpush1.bf16.msra.mxu0 %v13397_v47  ;;  %v14516_v47 = vcombine.high %v1563_v33, %v1567_v31  ;;  %v1599_v33 = vld [vmem:[%s20678_s1 + $0x3128] sm:$0xff]  ;;  %v508_v31 = vld [vmem:[%s20678_s1 + $0xf10] sm:$0xff]  ;;  %v14539_v5 = vcombine.low %v1587_v15, %v1591_v35 }
 0x37b   :  { %11057 = vmatprep.subr.bf16.mxu0 %v13406_v54  ;;  %v1575_v54 = vld [vmem:[%s20678_s1 + $0x3068] sm:$0xff] }
 0x37c   :  { %v10384_v14 = vpop.f32.mrb[0].mxu0  ;;  %10869 = vmatpush1.bf16.msra.mxu1 %v14491_v62  ;;  %v14524_v60 = vcombine.high %v1571_v51, %v1575_v54  ;;  %v13438_v62 = vcombine.high %v484_v56, %v488_v20  ;;  %v14523_v8 = vcombine.low %v1571_v51, %v1575_v54  ;;  %v1607_v51 = vld [vmem:[%s20678_s1 + $0x3168] sm:$0xff]  ;;  %v516_v54 = vld [vmem:[%s20678_s1 + $0xf50] sm:$0xff] }
 0x37d   :  { %v18084_v18 = vadd.f32 %v14706_v4, %v10384_v14  ;;  %v10386_v19 = vpop.f32.mrb[1].mxu0  ;;  %10870 = vmatprep.subr.bf16.mxu1 %v14500_v3  ;;  %v1583_v3 = vld [vmem:[%s20678_s1 + $0x30a8] sm:$0xff]  ;;  %v492_v4 = vld [vmem:[%s20678_s1 + $0xe90] sm:$0xff] }
 0x37e   :  { %v18086_v22 = vadd.f32 %v14708_v13, %v10386_v19  ;;  %v10388_v24 = vpop.f32.mrb[2].mxu0  ;;  %11058 = vmatpush1.bf16.msra.mxu0 %v13405_v1  ;;  %v1579_v1 = vld [vmem:[%s20678_s1 + $0x3088] sm:$0xff]  ;;  %v500_v19 = vld [vmem:[%s20678_s1 + $0xed0] sm:$0xff] }
 0x37f   :  { %v10389_v27 = vpop.f32.mrb[3].mxu0  ;;  %11059 = vmatprep.subr.bf16.mxu0 %v13414_v6  ;;  %v496_v6 = vld [vmem:[%s20678_s1 + $0xeb0] sm:$0xff]  ;;  %v14532_v13 = vcombine.high %v1579_v1, %v1583_v3  ;;  %v14531_v24 = vcombine.low %v1579_v1, %v1583_v3  ;;  %v1615_v1 = vld [vmem:[%s20678_s1 + $0x31a8] sm:$0xff] }
 0x380   :  { %10871 = vmatpush1.bf16.msra.mxu1 %v14499_v21  ;;  %v13446_v14 = vcombine.high %v492_v4, %v496_v6  ;;  %v504_v21 = vld [vmem:[%s20678_s1 + $0xef0] sm:$0xff] }
 0x381   :  { %10872 = vmatprep.subr.bf16.mxu1 %v14508_v26  ;;  %v14540_v26 = vcombine.high %v1587_v15, %v1591_v35  ;;  %v13454_v27 = vcombine.high %v500_v19, %v504_v21  ;;  %v520_v56 = vld [vmem:[%s20678_s1 + $0xf70] sm:$0xff]  ;;  %v1623_v15 = vld [vmem:[%s20678_s1 + $0x31e8] sm:$0xff] }
 0x382   :  { %11060 = vmatpush1.bf16.msra.mxu0 %v13413_v40  ;;  %v13445_v40 = vcombine.low %v492_v4, %v496_v6  ;;  %v524_v3 = vld [vmem:[%s20678_s1 + $0xf90] sm:$0xff] }
 0x383   :  { %11061 = vmatprep.subr.bf16.mxu0 %v13422_v41  ;;  %v1595_v41 = vld [vmem:[%s20678_s1 + $0x3108] sm:$0xff]  ;;  %v528_v4 = vld [vmem:[%s20678_s1 + $0xfb0] sm:$0xff] }
 0x384   :  { %10873 = vmatpush1.bf16.msra.mxu1 %v14507_v12  ;;  %v13453_v12 = vcombine.low %v500_v19, %v504_v21  ;;  %v14547_v20 = vcombine.low %v1595_v41, %v1599_v33  ;;  %v532_v35 = vld [vmem:[%s20678_s1 + $0xfd0] sm:$0xff] }
 0x385   :  { %10883 = vmatprep.subr.bf16.mxu1 %v14516_v47  ;;  %v13462_v47 = vcombine.high %v508_v31, %v512_v63  ;;  %v536_v19 = vld [vmem:[%s20678_s1 + $0xff0] sm:$0xff] }
 0x386   :  { %11062 = vmatpush1.bf16.msra.mxu0 %v13421_v44  ;;  %v14548_v44 = vcombine.high %v1595_v41, %v1599_v33  ;;  %v33_v41 = vld [vmem:[%s20678_s1 + $0x38] sm:$0xff]  ;;  %v540_v33 = vld [vmem:[%s20678_s1 + $0x1010] sm:$0xff] }
 0x387   :  { %11063 = vmatprep.subr.bf16.mxu0 %v13430_v50  ;;  %10875 = vmatmul.mubr.bf16.vlgmr.msra.gmra.mrb[4].mxu1 %v17303_v57  ;;  %v1603_v50 = vld [vmem:[%s20678_s1 + $0x3148] sm:$0xff] }
 0x388   :  { %10884 = vmatpush1.bf16.msra.mxu1 %v14515_v53  ;;  %10915 = vmatprep.mubr.bf16.mxu1 %v15143_v17  ;;  %v13461_v53 = vcombine.low %v508_v31, %v512_v63  ;;  %v14555_v6 = vcombine.low %v1603_v50, %v1607_v51  ;;  %v544_v31 = vld [vmem:[%s20678_s1 + $0x1030] sm:$0xff] }
 0x389   :  { %10885 = vmatprep.subr.bf16.mxu1 %v14524_v60  ;;  %v13470_v60 = vcombine.high %v516_v54, %v520_v56 }
 0x38a   :  { %11064 = vmatpush1.bf16.msra.mxu0 %v13429_v59  ;;  %v14556_v59 = vcombine.high %v1603_v50, %v1607_v51  ;;  %v41_v50 = vld [vmem:[%s20678_s1 + $0x78] sm:$0xff]  ;;  %v548_v51 = vld [vmem:[%s20678_s1 + $0x1050] sm:$0xff] }
 0x38b   :  { %11065 = vmatprep.subr.bf16.mxu0 %v13438_v62  ;;  %v1611_v62 = vld [vmem:[%s20678_s1 + $0x3188] sm:$0xff] }
 0x38c   :  { %10886 = vmatpush1.bf16.msra.mxu1 %v14523_v8  ;;  %v13469_v8 = vcombine.low %v516_v54, %v520_v56  ;;  %v14563_v21 = vcombine.low %v1611_v62, %v1615_v1  ;;  %v552_v54 = vld [vmem:[%s20678_s1 + $0x1070] sm:$0xff] }
 0x38d   :  { %10887 = vmatprep.subr.bf16.mxu1 %v14532_v13  ;;  %v13478_v13 = vcombine.high %v524_v3, %v528_v4 }
 0x38e   :  { %11066 = vmatpush1.bf16.msra.mxu0 %v13437_v9  ;;  %v14564_v9 = vcombine.high %v1611_v62, %v1615_v1  ;;  %v49_v62 = vld [vmem:[%s20678_s1 + $0xb8] sm:$0xff]  ;;  %v556_v1 = vld [vmem:[%s20678_s1 + $0x1090] sm:$0xff] }
 0x38f   :  { %11067 = vmatprep.subr.bf16.mxu0 %v13446_v14  ;;  %v1619_v14 = vld [vmem:[%s20678_s1 + $0x31c8] sm:$0xff] }
 0x390   :  { %10888 = vmatpush1.bf16.msra.mxu1 %v14531_v24  ;;  %v13477_v24 = vcombine.low %v524_v3, %v528_v4  ;;  %v14571_v63 = vcombine.low %v1619_v14, %v1623_v15  ;;  %v560_v3 = vld [vmem:[%s20678_s1 + $0x10b0] sm:$0xff] }
 0x391   :  { %10889 = vmatprep.subr.bf16.mxu1 %v14540_v26  ;;  %v13486_v26 = vcombine.high %v532_v35, %v536_v19 }
 0x392   :  { %11068 = vmatpush1.bf16.msra.mxu0 %v13445_v40  ;;  %v14572_v40 = vcombine.high %v1619_v14, %v1623_v15  ;;  %v57_v14 = vld [vmem:[%s20678_s1 + $0xf8] sm:$0xff]  ;;  %v564_v15 = vld [vmem:[%s20678_s1 + $0x10d0] sm:$0xff] }
 0x393   :  { %11069 = vmatprep.subr.bf16.mxu0 %v13454_v27  ;;  %v29_v27 = vld [vmem:[%s20678_s1 + $0x18] sm:$0xff] }
 0x394   :  { %10890 = vmatpush1.bf16.msra.mxu1 %v14539_v5  ;;  %v13485_v5 = vcombine.low %v532_v35, %v536_v19  ;;  %v12983_v56 = vcombine.low %v29_v27, %v33_v41  ;;  %v568_v35 = vld [vmem:[%s20678_s1 + $0x10f0] sm:$0xff] }
 0x395   :  { %10891 = vmatprep.subr.bf16.mxu1 %v14548_v44  ;;  %v13494_v44 = vcombine.high %v540_v33, %v544_v31 }
 0x396   :  { %11070 = vmatpush1.bf16.msra.mxu0 %v13453_v12  ;;  %v12984_v12 = vcombine.high %v29_v27, %v33_v41  ;;  %v65_v27 = vld [vmem:[%s20678_s1 + $0x138] sm:$0xff]  ;;  %v576_v41 = vld [vmem:[%s20678_s1 + $0x1130] sm:$0xff] }
 0x397   :  { %11071 = vmatprep.subr.bf16.mxu0 %v13462_v47  ;;  %v37_v47 = vld [vmem:[%s20678_s1 + $0x58] sm:$0xff] }
 0x398   :  { %10892 = vmatpush1.bf16.msra.mxu1 %v14547_v20  ;;  %v13493_v20 = vcombine.low %v540_v33, %v544_v31  ;;  %v12991_v4 = vcombine.low %v37_v47, %v41_v50  ;;  %v13517_v31 = vcombine.low %v564_v15, %v568_v35 }
 0x399   :  { %10893 = vmatprep.subr.bf16.mxu1 %v14556_v59  ;;  %v13502_v59 = vcombine.high %v548_v51, %v552_v54 }
 0x39a   :  { %11072 = vmatpush1.bf16.msra.mxu0 %v13461_v53  ;;  %v12992_v53 = vcombine.high %v37_v47, %v41_v50  ;;  %v580_v47 = vld [vmem:[%s20678_s1 + $0x1150] sm:$0xff] }
 0x39b   :  { %11073 = vmatprep.subr.bf16.mxu0 %v13470_v60  ;;  %v45_v60 = vld [vmem:[%s20678_s1 + $0x98] sm:$0xff]  ;;  %v584_v50 = vld [vmem:[%s20678_s1 + $0x1170] sm:$0xff] }
 0x39c   :  { %10894 = vmatpush1.bf16.msra.mxu1 %v14555_v6  ;;  %v13501_v6 = vcombine.low %v548_v51, %v552_v54  ;;  %v12999_v19 = vcombine.low %v45_v60, %v49_v62 }
 0x39d   :  { %10895 = vmatprep.subr.bf16.mxu1 %v14564_v9  ;;  %v13510_v9 = vcombine.high %v556_v1, %v560_v3 }
 0x39e   :  { %11074 = vmatpush1.bf16.msra.mxu0 %v13469_v8  ;;  %v13000_v8 = vcombine.high %v45_v60, %v49_v62  ;;  %v588_v60 = vld [vmem:[%s20678_s1 + $0x1190] sm:$0xff] }
 0x39f   :  { %11075 = vmatprep.subr.bf16.mxu0 %v13478_v13  ;;  %v53_v13 = vld [vmem:[%s20678_s1 + $0xd8] sm:$0xff]  ;;  %v592_v62 = vld [vmem:[%s20678_s1 + $0x11b0] sm:$0xff] }
 0x3a0   :  { %10896 = vmatpush1.bf16.msra.mxu1 %v14563_v21  ;;  %v13509_v21 = vcombine.low %v556_v1, %v560_v3  ;;  %v13007_v33 = vcombine.low %v53_v13, %v57_v14  ;;  %v13533_v3 = vcombine.low %v580_v47, %v584_v50 }
 0x3a1   :  { %10897 = vmatprep.subr.bf16.mxu1 %v14572_v40  ;;  %v13518_v40 = vcombine.high %v564_v15, %v568_v35  ;;  %v13541_v35 = vcombine.low %v588_v60, %v592_v62 }
 0x3a2   :  { %11076 = vmatpush1.bf16.msra.mxu0 %v13477_v24  ;;  %v13008_v24 = vcombine.high %v53_v13, %v57_v14  ;;  %v596_v13 = vld [vmem:[%s20678_s1 + $0x11d0] sm:$0xff] }
 0x3a3   :  { %11077 = vmatprep.subr.bf16.mxu0 %v13486_v26  ;;  %v61_v26 = vld [vmem:[%s20678_s1 + $0x118] sm:$0xff]  ;;  %v600_v14 = vld [vmem:[%s20678_s1 + $0x11f0] sm:$0xff] }
 0x3a4   :  { %10898 = vmatpush1.bf16.msra.mxu1 %v14571_v63  ;;  %v13016_v63 = vcombine.high %v61_v26, %v65_v27  ;;  %v13015_v51 = vcombine.low %v61_v26, %v65_v27  ;;  %v604_v26 = vld [vmem:[%s20678_s1 + $0x1210] sm:$0xff] }
 0x3a5   :  { %11457 = vmatprep.subr.bf16.mxu1 %v12984_v12  ;;  %v69_v12 = vld [vmem:[%s20678_s1 + $0x158] sm:$0xff]  ;;  %v608_v27 = vld [vmem:[%s20678_s1 + $0x1230] sm:$0xff] }
 0x3a6   :  { %11078 = vmatpush1.bf16.msra.mxu0 %v13485_v5 }
 0x3a7   :  { %11088 = vmatprep.subr.bf16.mxu0 %v13494_v44  ;;  %10916 = vmatmul.mubr.bf16.vlgmr.msra.gmra.mrb[4].mxu1 %v17409_v45  ;;  %v73_v44 = vld [vmem:[%s20678_s1 + $0x178] sm:$0xff] }
 0x3a8   :  { %11458 = vmatpush1.bf16.msra.mxu1 %v12983_v56  ;;  %11489 = vmatprep.mubr.bf16.mxu1 %v15294_v11  ;;  %v572_v11 = vld [vmem:[%s20678_s1 + $0x1110] sm:$0xff]  ;;  %v13024_v56 = vcombine.high %v69_v12, %v73_v44  ;;  %v13023_v1 = vcombine.low %v69_v12, %v73_v44 }
 0x3a9   :  { %11080 = vmatmul.mubr.bf16.vlgmr.msra.gmra.mrb[4].mxu0 %v15646_v55  ;;  %11459 = vmatprep.subr.bf16.mxu1 %v12992_v53  ;;  %v13526_v5 = vcombine.high %v572_v11, %v576_v41  ;;  %v13525_v54 = vcombine.low %v572_v11, %v576_v41  ;;  %v77_v53 = vld [vmem:[%s20678_s1 + $0x198] sm:$0xff]  ;;  %v13549_v41 = vcombine.low %v596_v13, %v600_v14  ;;  %v612_v12 = vld [vmem:[%s20678_s1 + $0x1250] sm:$0xff] }
 0x3aa   :  { %11089 = vmatpush1.bf16.msra.mxu0 %v13493_v20  ;;  %11120 = vmatprep.mubr.bf16.mxu0 %v15655_v61  ;;  %v13534_v20 = vcombine.high %v580_v47, %v584_v50  ;;  %v616_v44 = vld [vmem:[%s20678_s1 + $0x1270] sm:$0xff]  ;;  %v13557_v50 = vcombine.low %v604_v26, %v608_v27 }
 0x3ab   :  { %11090 = vmatprep.subr.bf16.mxu0 %v13502_v59  ;;  %v81_v59 = vld [vmem:[%s20678_s1 + $0x1b8] sm:$0xff] }
 0x3ac   :  { %11460 = vmatpush1.bf16.msra.mxu1 %v12991_v4  ;;  %v13032_v4 = vcombine.high %v77_v53, %v81_v59  ;;  %v13031_v15 = vcombine.low %v77_v53, %v81_v59  ;;  %v620_v53 = vld [vmem:[%s20678_s1 + $0x1290] sm:$0xff] }
 0x3ad   :  { %11461 = vmatprep.subr.bf16.mxu1 %v13000_v8  ;;  %v85_v8 = vld [vmem:[%s20678_s1 + $0x1d8] sm:$0xff]  ;;  %v624_v59 = vld [vmem:[%s20678_s1 + $0x12b0] sm:$0xff] }
 0x3ae   :  { %11091 = vmatpush1.bf16.msra.mxu0 %v13501_v6  ;;  %v13542_v6 = vcombine.high %v588_v60, %v592_v62  ;;  %v13565_v62 = vcombine.low %v612_v12, %v616_v44 }
 0x3af   :  { %11092 = vmatprep.subr.bf16.mxu0 %v13510_v9  ;;  %v89_v9 = vld [vmem:[%s20678_s1 + $0x1f8] sm:$0xff] }
 0x3b0   :  { %11462 = vmatpush1.bf16.msra.mxu1 %v12999_v19  ;;  %v13040_v19 = vcombine.high %v85_v8, %v89_v9  ;;  %v13039_v11 = vcombine.low %v85_v8, %v89_v9  ;;  %v628_v8 = vld [vmem:[%s20678_s1 + $0x12d0] sm:$0xff] }
 0x3b1   :  { %11463 = vmatprep.subr.bf16.mxu1 %v13008_v24  ;;  %v93_v24 = vld [vmem:[%s20678_s1 + $0x218] sm:$0xff]  ;;  %v632_v9 = vld [vmem:[%s20678_s1 + $0x12f0] sm:$0xff] }
 0x3b2   :  { %11093 = vmatpush1.bf16.msra.mxu0 %v13509_v21  ;;  %v13550_v21 = vcombine.high %v596_v13, %v600_v14  ;;  %v13573_v14 = vcombine.low %v620_v53, %v624_v59 }
 0x3b3   :  { %11094 = vmatprep.subr.bf16.mxu0 %v13518_v40  ;;  %v97_v40 = vld [vmem:[%s20678_s1 + $0x238] sm:$0xff] }
 0x3b4   :  { %11464 = vmatpush1.bf16.msra.mxu1 %v13007_v33  ;;  %v13048_v33 = vcombine.high %v93_v24, %v97_v40  ;;  %v13047_v47 = vcombine.low %v93_v24, %v97_v40  ;;  %v636_v24 = vld [vmem:[%s20678_s1 + $0x1310] sm:$0xff] }
 0x3b5   :  { %11465 = vmatprep.subr.bf16.mxu1 %v13016_v63  ;;  %v101_v63 = vld [vmem:[%s20678_s1 + $0x258] sm:$0xff]  ;;  %v640_v40 = vld [vmem:[%s20678_s1 + $0x1330] sm:$0xff] }
 0x3b6   :  { %11095 = vmatpush1.bf16.msra.mxu0 %v13517_v31  ;;  %v13558_v31 = vcombine.high %v604_v26, %v608_v27  ;;  %v13581_v27 = vcombine.low %v628_v8, %v632_v9 }
 0x3b7   :  { %11096 = vmatprep.subr.bf16.mxu0 %v13526_v5  ;;  %v105_v5 = vld [vmem:[%s20678_s1 + $0x278] sm:$0xff] }
 0x3b8   :  { %11466 = vmatpush1.bf16.msra.mxu1 %v13015_v51  ;;  %v13056_v51 = vcombine.high %v101_v63, %v105_v5  ;;  %v13055_v60 = vcombine.low %v101_v63, %v105_v5  ;;  %v644_v63 = vld [vmem:[%s20678_s1 + $0x1350] sm:$0xff] }
 0x3b9   :  { %11467 = vmatprep.subr.bf16.mxu1 %v13024_v56  ;;  %v109_v56 = vld [vmem:[%s20678_s1 + $0x298] sm:$0xff]  ;;  %v648_v5 = vld [vmem:[%s20678_s1 + $0x1370] sm:$0xff] }
 0x3ba   :  { %11097 = vmatpush1.bf16.msra.mxu0 %v13525_v54  ;;  %v13566_v54 = vcombine.high %v612_v12, %v616_v44  ;;  %v13589_v44 = vcombine.low %v636_v24, %v640_v40 }
 0x3bb   :  { %11098 = vmatprep.subr.bf16.mxu0 %v13534_v20  ;;  %v113_v20 = vld [vmem:[%s20678_s1 + $0x2b8] sm:$0xff] }
 0x3bc   :  { %11468 = vmatpush1.bf16.msra.mxu1 %v13023_v1  ;;  %v13064_v1 = vcombine.high %v109_v56, %v113_v20  ;;  %v13063_v13 = vcombine.low %v109_v56, %v113_v20  ;;  %v652_v56 = vld [vmem:[%s20678_s1 + $0x1390] sm:$0xff] }
 0x3bd   :  { %11469 = vmatprep.subr.bf16.mxu1 %v13032_v4  ;;  %v117_v4 = vld [vmem:[%s20678_s1 + $0x2d8] sm:$0xff]  ;;  %v656_v20 = vld [vmem:[%s20678_s1 + $0x13b0] sm:$0xff] }
 0x3be   :  { %11099 = vmatpush1.bf16.msra.mxu0 %v13533_v3  ;;  %v13574_v3 = vcombine.high %v620_v53, %v624_v59  ;;  %v13597_v59 = vcombine.low %v644_v63, %v648_v5 }
 0x3bf   :  { %11100 = vmatprep.subr.bf16.mxu0 %v13542_v6  ;;  %v121_v6 = vld [vmem:[%s20678_s1 + $0x2f8] sm:$0xff] }
 0x3c0   :  { %11470 = vmatpush1.bf16.msra.mxu1 %v13031_v15  ;;  %v13072_v15 = vcombine.high %v117_v4, %v121_v6  ;;  %v13071_v26 = vcombine.low %v117_v4, %v121_v6  ;;  %v660_v4 = vld [vmem:[%s20678_s1 + $0x13d0] sm:$0xff] }
 0x3c1   :  { %11471 = vmatprep.subr.bf16.mxu1 %v13040_v19  ;;  %v125_v19 = vld [vmem:[%s20678_s1 + $0x318] sm:$0xff]  ;;  %v664_v6 = vld [vmem:[%s20678_s1 + $0x13f0] sm:$0xff] }
 0x3c2   :  { %11101 = vmatpush1.bf16.msra.mxu0 %v13541_v35  ;;  %v13582_v35 = vcombine.high %v628_v8, %v632_v9  ;;  %v13605_v9 = vcombine.low %v652_v56, %v656_v20 }
 0x3c3   :  { %11102 = vmatprep.subr.bf16.mxu0 %v13550_v21  ;;  %v129_v21 = vld [vmem:[%s20678_s1 + $0x338] sm:$0xff] }
 0x3c4   :  { %11472 = vmatpush1.bf16.msra.mxu1 %v13039_v11  ;;  %v13080_v11 = vcombine.high %v125_v19, %v129_v21  ;;  %v13079_v12 = vcombine.low %v125_v19, %v129_v21  ;;  %v668_v19 = vld [vmem:[%s20678_s1 + $0x1410] sm:$0xff] }
 0x3c5   :  { %11473 = vmatprep.subr.bf16.mxu1 %v13048_v33  ;;  %v133_v33 = vld [vmem:[%s20678_s1 + $0x358] sm:$0xff]  ;;  %v672_v21 = vld [vmem:[%s20678_s1 + $0x1430] sm:$0xff] }
 0x3c6   :  { %11103 = vmatpush1.bf16.msra.mxu0 %v13549_v41  ;;  %v13590_v41 = vcombine.high %v636_v24, %v640_v40  ;;  %v13613_v40 = vcombine.low %v660_v4, %v664_v6 }
 0x3c7   :  { %11104 = vmatprep.subr.bf16.mxu0 %v13558_v31  ;;  %v137_v31 = vld [vmem:[%s20678_s1 + $0x378] sm:$0xff] }
 0x3c8   :  { %11474 = vmatpush1.bf16.msra.mxu1 %v13047_v47  ;;  %v13088_v47 = vcombine.high %v133_v33, %v137_v31  ;;  %v13087_v53 = vcombine.low %v133_v33, %v137_v31  ;;  %v676_v33 = vld [vmem:[%s20678_s1 + $0x1450] sm:$0xff] }
 0x3c9   :  { %11475 = vmatprep.subr.bf16.mxu1 %v13056_v51  ;;  %v141_v51 = vld [vmem:[%s20678_s1 + $0x398] sm:$0xff]  ;;  %v680_v31 = vld [vmem:[%s20678_s1 + $0x1470] sm:$0xff] }
 0x3ca   :  { %11105 = vmatpush1.bf16.msra.mxu0 %v13557_v50  ;;  %v13598_v50 = vcombine.high %v644_v63, %v648_v5  ;;  %v13621_v5 = vcombine.low %v668_v19, %v672_v21 }
 0x3cb   :  { %11106 = vmatprep.subr.bf16.mxu0 %v13566_v54  ;;  %v145_v54 = vld [vmem:[%s20678_s1 + $0x3b8] sm:$0xff] }
 0x3cc   :  { %11476 = vmatpush1.bf16.msra.mxu1 %v13055_v60  ;;  %v13096_v60 = vcombine.high %v141_v51, %v145_v54  ;;  %v13095_v8 = vcombine.low %v141_v51, %v145_v54  ;;  %v684_v51 = vld [vmem:[%s20678_s1 + $0x1490] sm:$0xff] }
 0x3cd   :  { %11477 = vmatprep.subr.bf16.mxu1 %v13064_v1  ;;  %v149_v1 = vld [vmem:[%s20678_s1 + $0x3d8] sm:$0xff]  ;;  %v688_v54 = vld [vmem:[%s20678_s1 + $0x14b0] sm:$0xff] }
 0x3ce   :  { %11107 = vmatpush1.bf16.msra.mxu0 %v13565_v62  ;;  %v13606_v62 = vcombine.high %v652_v56, %v656_v20  ;;  %v13629_v20 = vcombine.low %v676_v33, %v680_v31 }
 0x3cf   :  { %11108 = vmatprep.subr.bf16.mxu0 %v13574_v3  ;;  %v153_v3 = vld [vmem:[%s20678_s1 + $0x3f8] sm:$0xff] }
 0x3d0   :  { %11478 = vmatpush1.bf16.msra.mxu1 %v13063_v13  ;;  %v13104_v13 = vcombine.high %v149_v1, %v153_v3  ;;  %v13103_v24 = vcombine.low %v149_v1, %v153_v3  ;;  %v696_v1 = vld [vmem:[%s20678_s1 + $0x14f0] sm:$0xff] }
 0x3d1   :  { %11479 = vmatprep.subr.bf16.mxu1 %v13072_v15  ;;  %v157_v15 = vld [vmem:[%s20678_s1 + $0x418] sm:$0xff] }
 0x3d2   :  { %11109 = vmatpush1.bf16.msra.mxu0 %v13573_v14  ;;  %v13614_v14 = vcombine.high %v660_v4, %v664_v6  ;;  %v13637_v4 = vcombine.low %v684_v51, %v688_v54 }
 0x3d3   :  { %11110 = vmatprep.subr.bf16.mxu0 %v13582_v35  ;;  %v161_v35 = vld [vmem:[%s20678_s1 + $0x438] sm:$0xff] }
 0x3d4   :  { %11480 = vmatpush1.bf16.msra.mxu1 %v13071_v26  ;;  %v13112_v26 = vcombine.high %v157_v15, %v161_v35  ;;  %v13111_v63 = vcombine.low %v157_v15, %v161_v35 }
 0x3d5   :  { %11481 = vmatprep.subr.bf16.mxu1 %v13080_v11  ;;  %v165_v11 = vld [vmem:[%s20678_s1 + $0x458] sm:$0xff] }
 0x3d6   :  { %11111 = vmatpush1.bf16.msra.mxu0 %v13581_v27  ;;  %v13622_v27 = vcombine.high %v668_v19, %v672_v21 }
 0x3d7   :  { %11112 = vmatprep.subr.bf16.mxu0 %v13590_v41  ;;  %v169_v41 = vld [vmem:[%s20678_s1 + $0x478] sm:$0xff] }
 0x3d8   :  { %11482 = vmatpush1.bf16.msra.mxu1 %v13079_v12  ;;  %v13120_v12 = vcombine.high %v165_v11, %v169_v41  ;;  %v13119_v56 = vcombine.low %v165_v11, %v169_v41 }
 0x3d9   :  { %11483 = vmatprep.subr.bf16.mxu1 %v13088_v47  ;;  %v173_v47 = vld [vmem:[%s20678_s1 + $0x498] sm:$0xff] }
 0x3da   :  { %11113 = vmatpush1.bf16.msra.mxu0 %v13589_v44  ;;  %v13630_v44 = vcombine.high %v676_v33, %v680_v31 }
 0x3db   :  { %11114 = vmatprep.subr.bf16.mxu0 %v13598_v50  ;;  %v177_v50 = vld [vmem:[%s20678_s1 + $0x4b8] sm:$0xff] }
 0x3dc   :  { %11484 = vmatpush1.bf16.msra.mxu1 %v13087_v53  ;;  %v13128_v53 = vcombine.high %v173_v47, %v177_v50  ;;  %v13127_v3 = vcombine.low %v173_v47, %v177_v50 }
 0x3dd   :  { %11485 = vmatprep.subr.bf16.mxu1 %v13096_v60  ;;  %v185_v60 = vld [vmem:[%s20678_s1 + $0x4f8] sm:$0xff] }
 0x3de   :  { %11115 = vmatpush1.bf16.msra.mxu0 %v13597_v59  ;;  %v13638_v59 = vcombine.high %v684_v51, %v688_v54 }
 0x3df   :  { %11116 = vmatprep.subr.bf16.mxu0 %v13606_v62  ;;  %v692_v62 = vld [vmem:[%s20678_s1 + $0x14d0] sm:$0xff] }
 0x3e0   :  { %11486 = vmatpush1.bf16.msra.mxu1 %v13095_v8  ;;  %v13646_v8 = vcombine.high %v692_v62, %v696_v1  ;;  %v13645_v35 = vcombine.low %v692_v62, %v696_v1 }
 0x3e1   :  { %11487 = vmatprep.subr.bf16.mxu1 %v13104_v13  ;;  %v193_v13 = vld [vmem:[%s20678_s1 + $0x538] sm:$0xff] }
 0x3e2   :  { %11117 = vmatpush1.bf16.msra.mxu0 %v13605_v9  ;;  %v189_v9 = vld [vmem:[%s20678_s1 + $0x518] sm:$0xff] }
 0x3e3   :  { %11118 = vmatprep.subr.bf16.mxu0 %v13614_v14  ;;  %v704_v14 = vld [vmem:[%s20678_s1 + $0x1530] sm:$0xff]  ;;  %v13144_v19 = vcombine.high %v189_v9, %v193_v13  ;;  %v13143_v11 = vcombine.low %v189_v9, %v193_v13 }
 0x3e4   :  { %11488 = vmatpush1.bf16.msra.mxu1 %v13103_v24  ;;  %v197_v24 = vld [vmem:[%s20678_s1 + $0x558] sm:$0xff] }
 0x3e5   :  { %11498 = vmatprep.subr.bf16.mxu1 %v13112_v26  ;;  %v708_v26 = vld [vmem:[%s20678_s1 + $0x1550] sm:$0xff] }
 0x3e6   :  { %11119 = vmatpush1.bf16.msra.mxu0 %v13613_v40  ;;  %v201_v40 = vld [vmem:[%s20678_s1 + $0x578] sm:$0xff] }
 0x3e7   :  { %11129 = vmatprep.subr.bf16.mxu0 %v13622_v27  ;;  %11490 = vmatmul.mubr.bf16.vlgmr.msra.gmra.mrb[8].mxu1 %v15413_v28  ;;  %v181_v28 = vld [vmem:[%s20678_s1 + $0x4d8] sm:$0xff]  ;;  %v712_v27 = vld [vmem:[%s20678_s1 + $0x1570] sm:$0xff]  ;;  %v13152_v33 = vcombine.high %v197_v24, %v201_v40  ;;  %v13151_v47 = vcombine.low %v197_v24, %v201_v40 }
 0x3e8   :  { %11499 = vmatpush1.bf16.msra.mxu1 %v13111_v63  ;;  %11530 = vmatprep.mubr.bf16.mxu1 %v15439_v38  ;;  %v13136_v6 = vcombine.high %v181_v28, %v185_v60  ;;  %v700_v38 = vld [vmem:[%s20678_s1 + $0x1510] sm:$0xff]  ;;  %v13135_v15 = vcombine.low %v181_v28, %v185_v60  ;;  %v13662_v31 = vcombine.high %v708_v26, %v712_v27  ;;  %v205_v63 = vld [vmem:[%s20678_s1 + $0x598] sm:$0xff] }
 0x3e9   :  { %11121 = vmatmul.mubr.bf16.vlgmr.msra.gmra.mrb[4].mxu0 %v15849_v23  ;;  %11500 = vmatprep.subr.bf16.mxu1 %v13120_v12  ;;  %v13654_v21 = vcombine.high %v700_v38, %v704_v14  ;;  %v13653_v41 = vcombine.low %v700_v38, %v704_v14  ;;  %v716_v12 = vld [vmem:[%s20678_s1 + $0x1590] sm:$0xff]  ;;  %v13661_v50 = vcombine.low %v708_v26, %v712_v27 }
 0x3ea   :  { %11130 = vmatpush1.bf16.msra.mxu0 %v13621_v5  ;;  %11161 = vmatprep.mubr.bf16.mxu0 %v15859_v30  ;;  %v209_v5 = vld [vmem:[%s20678_s1 + $0x5b8] sm:$0xff] }
 0x3eb   :  { %11131 = vmatprep.subr.bf16.mxu0 %v13630_v44  ;;  %v720_v44 = vld [vmem:[%s20678_s1 + $0x15b0] sm:$0xff]  ;;  %v13160_v51 = vcombine.high %v205_v63, %v209_v5  ;;  %v13159_v28 = vcombine.low %v205_v63, %v209_v5 }
 0x3ec   :  { %11501 = vmatpush1.bf16.msra.mxu1 %v13119_v56  ;;  %v13670_v54 = vcombine.high %v716_v12, %v720_v44  ;;  %v213_v56 = vld [vmem:[%s20678_s1 + $0x5d8] sm:$0xff]  ;;  %v13669_v60 = vcombine.low %v716_v12, %v720_v44 }
 0x3ed   :  { %11502 = vmatprep.subr.bf16.mxu1 %v13128_v53  ;;  %v724_v53 = vld [vmem:[%s20678_s1 + $0x15d0] sm:$0xff] }
 0x3ee   :  { %11132 = vmatpush1.bf16.msra.mxu0 %v13629_v20  ;;  %v217_v20 = vld [vmem:[%s20678_s1 + $0x5f8] sm:$0xff] }
 0x3ef   :  { %11133 = vmatprep.subr.bf16.mxu0 %v13638_v59  ;;  %v728_v59 = vld [vmem:[%s20678_s1 + $0x15f0] sm:$0xff]  ;;  %v13168_v62 = vcombine.high %v213_v56, %v217_v20  ;;  %v13167_v9 = vcombine.low %v213_v56, %v217_v20 }
 0x3f0   :  { %11503 = vmatpush1.bf16.msra.mxu1 %v13127_v3  ;;  %v13678_v1 = vcombine.high %v724_v53, %v728_v59  ;;  %v221_v3 = vld [vmem:[%s20678_s1 + $0x618] sm:$0xff]  ;;  %v13677_v13 = vcombine.low %v724_v53, %v728_v59 }
 0x3f1   :  { %11504 = vmatprep.subr.bf16.mxu1 %v13136_v6  ;;  %v732_v6 = vld [vmem:[%s20678_s1 + $0x1610] sm:$0xff] }
 0x3f2   :  { %11134 = vmatpush1.bf16.msra.mxu0 %v13637_v4  ;;  %v225_v4 = vld [vmem:[%s20678_s1 + $0x638] sm:$0xff] }
 0x3f3   :  { %11135 = vmatprep.subr.bf16.mxu0 %v13646_v8  ;;  %v736_v8 = vld [vmem:[%s20678_s1 + $0x1630] sm:$0xff]  ;;  %v13176_v38 = vcombine.high %v221_v3, %v225_v4  ;;  %v13175_v24 = vcombine.low %v221_v3, %v225_v4 }
 0x3f4   :  { %11505 = vmatpush1.bf16.msra.mxu1 %v13135_v15  ;;  %v13686_v14 = vcombine.high %v732_v6, %v736_v8  ;;  %v229_v15 = vld [vmem:[%s20678_s1 + $0x658] sm:$0xff]  ;;  %v13685_v40 = vcombine.low %v732_v6, %v736_v8 }
 0x3f5   :  { %11506 = vmatprep.subr.bf16.mxu1 %v13144_v19  ;;  %v740_v19 = vld [vmem:[%s20678_s1 + $0x1650] sm:$0xff] }
 0x3f6   :  { %11136 = vmatpush1.bf16.msra.mxu0 %v13645_v35  ;;  %v233_v35 = vld [vmem:[%s20678_s1 + $0x678] sm:$0xff] }
 0x3f7   :  { %11137 = vmatprep.subr.bf16.mxu0 %v13654_v21  ;;  %v744_v21 = vld [vmem:[%s20678_s1 + $0x1670] sm:$0xff]  ;;  %v13184_v26 = vcombine.high %v229_v15, %v233_v35  ;;  %v13183_v63 = vcombine.low %v229_v15, %v233_v35 }
 0x3f8   :  { %11507 = vmatpush1.bf16.msra.mxu1 %v13143_v11  ;;  %v13694_v27 = vcombine.high %v740_v19, %v744_v21  ;;  %v237_v11 = vld [vmem:[%s20678_s1 + $0x698] sm:$0xff]  ;;  %v13693_v5 = vcombine.low %v740_v19, %v744_v21 }
 0x3f9   :  { %11508 = vmatprep.subr.bf16.mxu1 %v13152_v33  ;;  %v748_v33 = vld [vmem:[%s20678_s1 + $0x1690] sm:$0xff] }
 0x3fa   :  { %11138 = vmatpush1.bf16.msra.mxu0 %v13653_v41  ;;  %v241_v41 = vld [vmem:[%s20678_s1 + $0x6b8] sm:$0xff] }
 0x3fb   :  { %11139 = vmatprep.subr.bf16.mxu0 %v13662_v31  ;;  %v752_v31 = vld [vmem:[%s20678_s1 + $0x16b0] sm:$0xff]  ;;  %v13192_v12 = vcombine.high %v237_v11, %v241_v41  ;;  %v13191_v56 = vcombine.low %v237_v11, %v241_v41 }
 0x3fc   :  { %11509 = vmatpush1.bf16.msra.mxu1 %v13151_v47  ;;  %v13702_v44 = vcombine.high %v748_v33, %v752_v31  ;;  %v245_v47 = vld [vmem:[%s20678_s1 + $0x6d8] sm:$0xff]  ;;  %v13701_v20 = vcombine.low %v748_v33, %v752_v31 }
 0x3fd   :  { %11510 = vmatprep.subr.bf16.mxu1 %v13160_v51  ;;  %v756_v51 = vld [vmem:[%s20678_s1 + $0x16d0] sm:$0xff] }
 0x3fe   :  { %11140 = vmatpush1.bf16.msra.mxu0 %v13661_v50  ;;  %v249_v50 = vld [vmem:[%s20678_s1 + $0x6f8] sm:$0xff] }
 0x3ff   :  { %11141 = vmatprep.subr.bf16.mxu0 %v13670_v54  ;;  %v760_v54 = vld [vmem:[%s20678_s1 + $0x16f0] sm:$0xff]  ;;  %v13200_v53 = vcombine.high %v245_v47, %v249_v50  ;;  %v13199_v3 = vcombine.low %v245_v47, %v249_v50 }
 0x400   :  { %11511 = vmatpush1.bf16.msra.mxu1 %v13159_v28  ;;  %v13710_v59 = vcombine.high %v756_v51, %v760_v54  ;;  %v253_v28 = vld [vmem:[%s20678_s1 + $0x718] sm:$0xff]  ;;  %v13709_v4 = vcombine.low %v756_v51, %v760_v54 }
 0x401   :  { %11512 = vmatprep.subr.bf16.mxu1 %v13168_v62  ;;  %v764_v62 = vld [vmem:[%s20678_s1 + $0x1710] sm:$0xff] }
 0x402   :  { %11142 = vmatpush1.bf16.msra.mxu0 %v13669_v60  ;;  %v257_v60 = vld [vmem:[%s20678_s1 + $0x738] sm:$0xff] }
 0x403   :  { %11143 = vmatprep.subr.bf16.mxu0 %v13678_v1  ;;  %v768_v1 = vld [vmem:[%s20678_s1 + $0x1730] sm:$0xff]  ;;  %v13208_v6 = vcombine.high %v253_v28, %v257_v60  ;;  %v13207_v15 = vcombine.low %v253_v28, %v257_v60 }
 0x404   :  { %11513 = vmatpush1.bf16.msra.mxu1 %v13167_v9  ;;  %v13718_v8 = vcombine.high %v764_v62, %v768_v1  ;;  %v261_v9 = vld [vmem:[%s20678_s1 + $0x758] sm:$0xff]  ;;  %v13717_v35 = vcombine.low %v764_v62, %v768_v1 }
 0x405   :  { %11514 = vmatprep.subr.bf16.mxu1 %v13176_v38  ;;  %v772_v38 = vld [vmem:[%s20678_s1 + $0x1750] sm:$0xff] }
 0x406   :  { %11144 = vmatpush1.bf16.msra.mxu0 %v13677_v13  ;;  %v265_v13 = vld [vmem:[%s20678_s1 + $0x778] sm:$0xff] }
 0x407   :  { %11145 = vmatprep.subr.bf16.mxu0 %v13686_v14  ;;  %v776_v14 = vld [vmem:[%s20678_s1 + $0x1770] sm:$0xff]  ;;  %v13216_v19 = vcombine.high %v261_v9, %v265_v13  ;;  %v13215_v11 = vcombine.low %v261_v9, %v265_v13 }
 0x408   :  { %11515 = vmatpush1.bf16.msra.mxu1 %v13175_v24  ;;  %v13726_v21 = vcombine.high %v772_v38, %v776_v14  ;;  %v269_v24 = vld [vmem:[%s20678_s1 + $0x798] sm:$0xff]  ;;  %v13725_v41 = vcombine.low %v772_v38, %v776_v14 }
 0x409   :  { %11516 = vmatprep.subr.bf16.mxu1 %v13184_v26  ;;  %v780_v26 = vld [vmem:[%s20678_s1 + $0x1790] sm:$0xff] }
 0x40a   :  { %11146 = vmatpush1.bf16.msra.mxu0 %v13685_v40  ;;  %v273_v40 = vld [vmem:[%s20678_s1 + $0x7b8] sm:$0xff] }
 0x40b   :  { %11147 = vmatprep.subr.bf16.mxu0 %v13694_v27  ;;  %v784_v27 = vld [vmem:[%s20678_s1 + $0x17b0] sm:$0xff]  ;;  %v13224_v33 = vcombine.high %v269_v24, %v273_v40  ;;  %v13223_v47 = vcombine.low %v269_v24, %v273_v40 }
 0x40c   :  { %11517 = vmatpush1.bf16.msra.mxu1 %v13183_v63  ;;  %v13734_v31 = vcombine.high %v780_v26, %v784_v27  ;;  %v277_v63 = vld [vmem:[%s20678_s1 + $0x7d8] sm:$0xff]  ;;  %v13733_v50 = vcombine.low %v780_v26, %v784_v27 }
 0x40d   :  { %11518 = vmatprep.subr.bf16.mxu1 %v13192_v12  ;;  %v788_v12 = vld [vmem:[%s20678_s1 + $0x17d0] sm:$0xff] }
 0x40e   :  { %11148 = vmatpush1.bf16.msra.mxu0 %v13693_v5  ;;  %v281_v5 = vld [vmem:[%s20678_s1 + $0x7f8] sm:$0xff] }
 0x40f   :  { %11149 = vmatprep.subr.bf16.mxu0 %v13702_v44  ;;  %v792_v44 = vld [vmem:[%s20678_s1 + $0x17f0] sm:$0xff]  ;;  %v13232_v51 = vcombine.high %v277_v63, %v281_v5  ;;  %v13231_v28 = vcombine.low %v277_v63, %v281_v5 }
 0x410   :  { %11519 = vmatpush1.bf16.msra.mxu1 %v13191_v56  ;;  %v13742_v54 = vcombine.high %v788_v12, %v792_v44  ;;  %v285_v56 = vld [vmem:[%s20678_s1 + $0x818] sm:$0xff]  ;;  %v13741_v60 = vcombine.low %v788_v12, %v792_v44 }
 0x411   :  { %11520 = vmatprep.subr.bf16.mxu1 %v13200_v53  ;;  %v796_v53 = vld [vmem:[%s20678_s1 + $0x1810] sm:$0xff]  ;;  %v317_v44 = vld [vmem:[%s20678_s1 + $0x918] sm:$0xff] }
 0x412   :  { %11150 = vmatpush1.bf16.msra.mxu0 %v13701_v20  ;;  %v289_v20 = vld [vmem:[%s20678_s1 + $0x838] sm:$0xff] }
 0x413   :  { %11151 = vmatprep.subr.bf16.mxu0 %v13710_v59  ;;  %v800_v59 = vld [vmem:[%s20678_s1 + $0x1830] sm:$0xff]  ;;  %v13240_v62 = vcombine.high %v285_v56, %v289_v20  ;;  %v13239_v9 = vcombine.low %v285_v56, %v289_v20 }
 0x414   :  { %11521 = vmatpush1.bf16.msra.mxu1 %v13199_v3  ;;  %v13750_v1 = vcombine.high %v796_v53, %v800_v59  ;;  %v293_v3 = vld [vmem:[%s20678_s1 + $0x858] sm:$0xff]  ;;  %v13749_v13 = vcombine.low %v796_v53, %v800_v59 }
 0x415   :  { %11522 = vmatprep.subr.bf16.mxu1 %v13208_v6  ;;  %v804_v6 = vld [vmem:[%s20678_s1 + $0x1850] sm:$0xff]  ;;  %v325_v53 = vld [vmem:[%s20678_s1 + $0x958] sm:$0xff] }
 0x416   :  { %11152 = vmatpush1.bf16.msra.mxu0 %v13709_v4  ;;  %v297_v4 = vld [vmem:[%s20678_s1 + $0x878] sm:$0xff] }
 0x417   :  { %11153 = vmatprep.subr.bf16.mxu0 %v13718_v8  ;;  %v808_v8 = vld [vmem:[%s20678_s1 + $0x1870] sm:$0xff]  ;;  %v13248_v38 = vcombine.high %v293_v3, %v297_v4  ;;  %v13247_v24 = vcombine.low %v293_v3, %v297_v4  ;;  %v329_v59 = vld [vmem:[%s20678_s1 + $0x978] sm:$0xff] }
 0x418   :  { %11523 = vmatpush1.bf16.msra.mxu1 %v13207_v15  ;;  %v13758_v14 = vcombine.high %v804_v6, %v808_v8  ;;  %v301_v15 = vld [vmem:[%s20678_s1 + $0x898] sm:$0xff]  ;;  %v13757_v40 = vcombine.low %v804_v6, %v808_v8  ;;  %v13280_v3 = vcombine.high %v325_v53, %v329_v59 }
 0x419   :  { %11524 = vmatprep.subr.bf16.mxu1 %v13216_v19  ;;  %v812_v19 = vld [vmem:[%s20678_s1 + $0x1890] sm:$0xff]  ;;  %v333_v6 = vld [vmem:[%s20678_s1 + $0x998] sm:$0xff] }
 0x41a   :  { %11154 = vmatpush1.bf16.msra.mxu0 %v13717_v35  ;;  %v305_v35 = vld [vmem:[%s20678_s1 + $0x8b8] sm:$0xff] }
 0x41b   :  { %11155 = vmatprep.subr.bf16.mxu0 %v13726_v21  ;;  %v816_v21 = vld [vmem:[%s20678_s1 + $0x18b0] sm:$0xff]  ;;  %v13256_v26 = vcombine.high %v301_v15, %v305_v35  ;;  %v337_v8 = vld [vmem:[%s20678_s1 + $0x9b8] sm:$0xff] }
 0x41c   :  { %11525 = vmatpush1.bf16.msra.mxu1 %v13215_v11  ;;  %v13766_v27 = vcombine.high %v812_v19, %v816_v21  ;;  %v313_v11 = vld [vmem:[%s20678_s1 + $0x8f8] sm:$0xff]  ;;  %v13765_v63 = vcombine.low %v812_v19, %v816_v21 }
 0x41d   :  { %11526 = vmatprep.subr.bf16.mxu1 %v13224_v33  ;;  %v824_v33 = vld [vmem:[%s20678_s1 + $0x18f0] sm:$0xff]  ;;  %v341_v19 = vld [vmem:[%s20678_s1 + $0x9d8] sm:$0xff] }
 0x41e   :  { %11156 = vmatpush1.bf16.msra.mxu0 %v13725_v41  ;;  %v820_v41 = vld [vmem:[%s20678_s1 + $0x18d0] sm:$0xff]  ;;  %v345_v21 = vld [vmem:[%s20678_s1 + $0x9f8] sm:$0xff] }
 0x41f   :  { %11157 = vmatprep.subr.bf16.mxu0 %v13734_v31  ;;  %v13255_v31 = vcombine.low %v301_v15, %v305_v35  ;;  %v13774_v12 = vcombine.high %v820_v41, %v824_v33  ;;  %v13288_v15 = vcombine.high %v333_v6, %v337_v8 }
 0x420   :  { %11527 = vmatpush1.bf16.msra.mxu1 %v13223_v47  ;;  %v321_v47 = vld [vmem:[%s20678_s1 + $0x938] sm:$0xff] }
 0x421   :  { %11528 = vmatprep.subr.bf16.mxu1 %v13232_v51  ;;  %v13272_v56 = vcombine.high %v317_v44, %v321_v47 }
 0x422   :  { %11158 = vmatpush1.bf16.msra.mxu0 %v13733_v50  ;;  %v832_v50 = vld [vmem:[%s20678_s1 + $0x1930] sm:$0xff] }
 0x423   :  { %11159 = vmatprep.subr.bf16.mxu0 %v13742_v54  ;;  %v13773_v54 = vcombine.low %v820_v41, %v824_v33  ;;  %v349_v41 = vld [vmem:[%s20678_s1 + $0xa18] sm:$0xff] }
 0x424   :  { %11529 = vmatpush1.bf16.msra.mxu1 %v13231_v28  ;;  %v836_v28 = vld [vmem:[%s20678_s1 + $0x1950] sm:$0xff]  ;;  %v353_v33 = vld [vmem:[%s20678_s1 + $0xa38] sm:$0xff] }
 0x425   :  { %11539 = vmatprep.subr.bf16.mxu1 %v13240_v62  ;;  %v13271_v62 = vcombine.low %v317_v44, %v321_v47  ;;  %v13304_v44 = vcombine.high %v349_v41, %v353_v33 }
 0x426   :  { %11160 = vmatpush1.bf16.msra.mxu0 %v13741_v60  ;;  %v840_v60 = vld [vmem:[%s20678_s1 + $0x1970] sm:$0xff] }
 0x427   :  { %11170 = vmatprep.subr.bf16.mxu0 %v13750_v1  ;;  %11531 = vmatmul.mubr.bf16.vlgmr.msra.gmra.mrb[8].mxu1 %v15642_v52  ;;  %v309_v52 = vld [vmem:[%s20678_s1 + $0x8d8] sm:$0xff]  ;;  %v13790_v4 = vcombine.high %v836_v28, %v840_v60 }
 0x428   :  { %11540 = vmatpush1.bf16.msra.mxu1 %v13239_v9  ;;  %11571 = vmatprep.mubr.bf16.mxu1 %v15306_v16  ;;  %v13264_v5 = vcombine.high %v309_v52, %v313_v11  ;;  %v828_v16 = vld [vmem:[%s20678_s1 + $0x1910] sm:$0xff]  ;;  %v13263_v51 = vcombine.low %v309_v52, %v313_v11  ;;  %v13296_v52 = vcombine.high %v341_v19, %v345_v21 }
 0x429   :  { %11162 = vmatmul.mubr.bf16.vlgmr.msra.gmra.mrb[4].mxu0 %v16060_v0  ;;  %11541 = vmatprep.subr.bf16.mxu1 %v13248_v38  ;;  %v13782_v20 = vcombine.high %v828_v16, %v832_v50  ;;  %v13781_v1 = vcombine.low %v828_v16, %v832_v50  ;;  %v844_v9 = vld [vmem:[%s20678_s1 + $0x1990] sm:$0xff]  ;;  %v13279_v38 = vcombine.low %v325_v53, %v329_v59  ;;  %v357_v16 = vld [vmem:[%s20678_s1 + $0xa58] sm:$0xff] }
 0x42a   :  { %11171 = vmatpush1.bf16.msra.mxu0 %v13749_v13  ;;  %11202 = vmatprep.mubr.bf16.mxu0 %v16069_v7  ;;  %v848_v13 = vld [vmem:[%s20678_s1 + $0x19b0] sm:$0xff]  ;;  %v361_v50 = vld [vmem:[%s20678_s1 + $0xa78] sm:$0xff] }
 0x42b   :  { %11172 = vmatprep.subr.bf16.mxu0 %v13758_v14  ;;  %v13789_v14 = vcombine.low %v836_v28, %v840_v60  ;;  %v13798_v35 = vcombine.high %v844_v9, %v848_v13  ;;  %v13312_v53 = vcombine.high %v357_v16, %v361_v50  ;;  %v365_v28 = vld [vmem:[%s20678_s1 + $0xa98] sm:$0xff] }
 0x42c   :  { %11542 = vmatpush1.bf16.msra.mxu1 %v13247_v24  ;;  %v852_v24 = vld [vmem:[%s20678_s1 + $0x19d0] sm:$0xff]  ;;  %v369_v60 = vld [vmem:[%s20678_s1 + $0xab8] sm:$0xff] }
 0x42d   :  { %11543 = vmatprep.subr.bf16.mxu1 %v13256_v26  ;;  %v13287_v26 = vcombine.low %v333_v6, %v337_v8  ;;  %v13320_v6 = vcombine.high %v365_v28, %v369_v60 }
 0x42e   :  { %11173 = vmatpush1.bf16.msra.mxu0 %v13757_v40  ;;  %v856_v40 = vld [vmem:[%s20678_s1 + $0x19f0] sm:$0xff] }
 0x42f   :  { %11174 = vmatprep.subr.bf16.mxu0 %v13766_v27  ;;  %v13797_v27 = vcombine.low %v844_v9, %v848_v13  ;;  %v13806_v11 = vcombine.high %v852_v24, %v856_v40  ;;  %v373_v9 = vld [vmem:[%s20678_s1 + $0xad8] sm:$0xff] }
 0x430   :  { %11544 = vmatpush1.bf16.msra.mxu1 %v13255_v31  ;;  %v860_v31 = vld [vmem:[%s20678_s1 + $0x1a10] sm:$0xff]  ;;  %v377_v13 = vld [vmem:[%s20678_s1 + $0xaf8] sm:$0xff] }
 0x431   :  { %11545 = vmatprep.subr.bf16.mxu1 %v13264_v5  ;;  %v13295_v5 = vcombine.low %v341_v19, %v345_v21  ;;  %v13328_v19 = vcombine.high %v373_v9, %v377_v13 }
 0x432   :  { %11175 = vmatpush1.bf16.msra.mxu0 %v13765_v63  ;;  %v864_v63 = vld [vmem:[%s20678_s1 + $0x1a30] sm:$0xff] }
 0x433   :  { %11176 = vmatprep.subr.bf16.mxu0 %v13774_v12  ;;  %v13805_v12 = vcombine.low %v852_v24, %v856_v40  ;;  %v13814_v47 = vcombine.high %v860_v31, %v864_v63  ;;  %v381_v24 = vld [vmem:[%s20678_s1 + $0xb18] sm:$0xff] }
 0x434   :  { %11546 = vmatpush1.bf16.msra.mxu1 %v13263_v51  ;;  %v868_v51 = vld [vmem:[%s20678_s1 + $0x1a50] sm:$0xff]  ;;  %v385_v40 = vld [vmem:[%s20678_s1 + $0xb38] sm:$0xff] }
 0x435   :  { %11547 = vmatprep.subr.bf16.mxu1 %v13272_v56  ;;  %v13303_v56 = vcombine.low %v349_v41, %v353_v33  ;;  %v13336_v41 = vcombine.high %v381_v24, %v385_v40 }
 0x436   :  { %11177 = vmatpush1.bf16.msra.mxu0 %v13773_v54  ;;  %v872_v54 = vld [vmem:[%s20678_s1 + $0x1a70] sm:$0xff] }
 0x437   :  { %11178 = vmatprep.subr.bf16.mxu0 %v13782_v20  ;;  %v13813_v20 = vcombine.low %v860_v31, %v864_v63  ;;  %v13822_v59 = vcombine.high %v868_v51, %v872_v54  ;;  %v389_v31 = vld [vmem:[%s20678_s1 + $0xb58] sm:$0xff] }
 0x438   :  { %11548 = vmatpush1.bf16.msra.mxu1 %v13271_v62  ;;  %v876_v62 = vld [vmem:[%s20678_s1 + $0x1a90] sm:$0xff]  ;;  %v393_v63 = vld [vmem:[%s20678_s1 + $0xb78] sm:$0xff] }
 0x439   :  { %11549 = vmatprep.subr.bf16.mxu1 %v13280_v3  ;;  %v13311_v3 = vcombine.low %v357_v16, %v361_v50  ;;  %v13344_v16 = vcombine.high %v389_v31, %v393_v63 }
 0x43a   :  { %11179 = vmatpush1.bf16.msra.mxu0 %v13781_v1  ;;  %v880_v1 = vld [vmem:[%s20678_s1 + $0x1ab0] sm:$0xff] }
 0x43b   :  { %11180 = vmatprep.subr.bf16.mxu0 %v13790_v4  ;;  %v13821_v4 = vcombine.low %v868_v51, %v872_v54  ;;  %v13830_v8 = vcombine.high %v876_v62, %v880_v1  ;;  %v397_v51 = vld [vmem:[%s20678_s1 + $0xb98] sm:$0xff] }
 0x43c   :  { %11550 = vmatpush1.bf16.msra.mxu1 %v13279_v38  ;;  %v884_v38 = vld [vmem:[%s20678_s1 + $0x1ad0] sm:$0xff]  ;;  %v401_v54 = vld [vmem:[%s20678_s1 + $0xbb8] sm:$0xff] }
 0x43d   :  { %11551 = vmatprep.subr.bf16.mxu1 %v13288_v15  ;;  %v13319_v15 = vcombine.low %v365_v28, %v369_v60  ;;  %v13352_v28 = vcombine.high %v397_v51, %v401_v54 }
 0x43e   :  { %11181 = vmatpush1.bf16.msra.mxu0 %v13789_v14  ;;  %v888_v14 = vld [vmem:[%s20678_s1 + $0x1af0] sm:$0xff] }
 0x43f   :  { %11182 = vmatprep.subr.bf16.mxu0 %v13798_v35  ;;  %v13829_v35 = vcombine.low %v876_v62, %v880_v1  ;;  %v13838_v21 = vcombine.high %v884_v38, %v888_v14  ;;  %v405_v62 = vld [vmem:[%s20678_s1 + $0xbd8] sm:$0xff] }
 0x440   :  { %11552 = vmatpush1.bf16.msra.mxu1 %v13287_v26  ;;  %v892_v26 = vld [vmem:[%s20678_s1 + $0x1b10] sm:$0xff]  ;;  %v409_v1 = vld [vmem:[%s20678_s1 + $0xbf8] sm:$0xff] }
 0x441   :  { %11553 = vmatprep.subr.bf16.mxu1 %v13296_v52  ;;  %v13327_v52 = vcombine.low %v373_v9, %v377_v13  ;;  %v13360_v9 = vcombine.high %v405_v62, %v409_v1 }
 0x442   :  { %11183 = vmatpush1.bf16.msra.mxu0 %v13797_v27  ;;  %v896_v27 = vld [vmem:[%s20678_s1 + $0x1b30] sm:$0xff] }
 0x443   :  { %11184 = vmatprep.subr.bf16.mxu0 %v13806_v11  ;;  %v13837_v11 = vcombine.low %v884_v38, %v888_v14  ;;  %v13846_v33 = vcombine.high %v892_v26, %v896_v27  ;;  %v413_v38 = vld [vmem:[%s20678_s1 + $0xc18] sm:$0xff] }
 0x444   :  { %11554 = vmatpush1.bf16.msra.mxu1 %v13295_v5  ;;  %v900_v5 = vld [vmem:[%s20678_s1 + $0x1b50] sm:$0xff]  ;;  %v417_v14 = vld [vmem:[%s20678_s1 + $0xc38] sm:$0xff] }
 0x445   :  { %11555 = vmatprep.subr.bf16.mxu1 %v13304_v44  ;;  %v13335_v44 = vcombine.low %v381_v24, %v385_v40  ;;  %v13368_v24 = vcombine.high %v413_v38, %v417_v14 }
 0x446   :  { %11185 = vmatpush1.bf16.msra.mxu0 %v13805_v12  ;;  %v904_v12 = vld [vmem:[%s20678_s1 + $0x1b70] sm:$0xff] }
 0x447   :  { %11186 = vmatprep.subr.bf16.mxu0 %v13814_v47  ;;  %v13845_v47 = vcombine.low %v892_v26, %v896_v27  ;;  %v13854_v50 = vcombine.high %v900_v5, %v904_v12  ;;  %v421_v26 = vld [vmem:[%s20678_s1 + $0xc58] sm:$0xff] }
 0x448   :  { %11556 = vmatpush1.bf16.msra.mxu1 %v13303_v56  ;;  %v908_v56 = vld [vmem:[%s20678_s1 + $0x1b90] sm:$0xff]  ;;  %v425_v27 = vld [vmem:[%s20678_s1 + $0xc78] sm:$0xff] }
 0x449   :  { %11557 = vmatprep.subr.bf16.mxu1 %v13312_v53  ;;  %v13343_v53 = vcombine.low %v389_v31, %v393_v63  ;;  %v13376_v31 = vcombine.high %v421_v26, %v425_v27 }
 0x44a   :  { %11187 = vmatpush1.bf16.msra.mxu0 %v13813_v20  ;;  %v912_v20 = vld [vmem:[%s20678_s1 + $0x1bb0] sm:$0xff] }
 0x44b   :  { %11188 = vmatprep.subr.bf16.mxu0 %v13822_v59  ;;  %v13853_v59 = vcombine.low %v900_v5, %v904_v12  ;;  %v13862_v60 = vcombine.high %v908_v56, %v912_v20  ;;  %v429_v5 = vld [vmem:[%s20678_s1 + $0xc98] sm:$0xff] }
 0x44c   :  { %11558 = vmatpush1.bf16.msra.mxu1 %v13311_v3  ;;  %v916_v3 = vld [vmem:[%s20678_s1 + $0x1bd0] sm:$0xff]  ;;  %v433_v12 = vld [vmem:[%s20678_s1 + $0xcb8] sm:$0xff] }
 0x44d   :  { %11559 = vmatprep.subr.bf16.mxu1 %v13320_v6  ;;  %v13351_v6 = vcombine.low %v397_v51, %v401_v54  ;;  %v13384_v51 = vcombine.high %v429_v5, %v433_v12 }
 0x44e   :  { %11189 = vmatpush1.bf16.msra.mxu0 %v13821_v4  ;;  %v920_v4 = vld [vmem:[%s20678_s1 + $0x1bf0] sm:$0xff] }
 0x44f   :  { %11190 = vmatprep.subr.bf16.mxu0 %v13830_v8  ;;  %v13861_v8 = vcombine.low %v908_v56, %v912_v20  ;;  %v13870_v13 = vcombine.high %v916_v3, %v920_v4  ;;  %v441_v56 = vld [vmem:[%s20678_s1 + $0xcf8] sm:$0xff]  ;;  %v948_v20 = vld [vmem:[%s20678_s1 + $0x1cd0] sm:$0xff] }
 0x450   :  { %11560 = vmatpush1.bf16.msra.mxu1 %v13319_v15  ;;  %v924_v15 = vld [vmem:[%s20678_s1 + $0x1c10] sm:$0xff] }
 0x451   :  { %11561 = vmatprep.subr.bf16.mxu1 %v13328_v19  ;;  %v13359_v19 = vcombine.low %v405_v62, %v409_v1  ;;  %v445_v1 = vld [vmem:[%s20678_s1 + $0xd18] sm:$0xff] }
 0x452   :  { %11191 = vmatpush1.bf16.msra.mxu0 %v13829_v35  ;;  %v928_v35 = vld [vmem:[%s20678_s1 + $0x1c30] sm:$0xff] }
 0x453   :  { %11192 = vmatprep.subr.bf16.mxu0 %v13838_v21  ;;  %v13869_v21 = vcombine.low %v916_v3, %v920_v4  ;;  %v13878_v40 = vcombine.high %v924_v15, %v928_v35  ;;  %v449_v3 = vld [vmem:[%s20678_s1 + $0xd38] sm:$0xff]  ;;  %v960_v4 = vld [vmem:[%s20678_s1 + $0x1d30] sm:$0xff] }
 0x454   :  { %11562 = vmatpush1.bf16.msra.mxu1 %v13327_v52  ;;  %v932_v52 = vld [vmem:[%s20678_s1 + $0x1c50] sm:$0xff] }
 0x455   :  { %11563 = vmatprep.subr.bf16.mxu1 %v13336_v41  ;;  %v13367_v41 = vcombine.low %v413_v38, %v417_v14  ;;  %v453_v38 = vld [vmem:[%s20678_s1 + $0xd58] sm:$0xff] }
 0x456   :  { %11193 = vmatpush1.bf16.msra.mxu0 %v13837_v11  ;;  %v936_v11 = vld [vmem:[%s20678_s1 + $0x1c70] sm:$0xff]  ;;  %v457_v14 = vld [vmem:[%s20678_s1 + $0xd78] sm:$0xff] }
 0x457   :  { %11194 = vmatprep.subr.bf16.mxu0 %v13846_v33  ;;  %v13877_v33 = vcombine.low %v924_v15, %v928_v35  ;;  %v13886_v63 = vcombine.high %v932_v52, %v936_v11  ;;  %v964_v15 = vld [vmem:[%s20678_s1 + $0x1d50] sm:$0xff] }
 0x458   :  { %11564 = vmatpush1.bf16.msra.mxu1 %v13335_v44  ;;  %v940_v44 = vld [vmem:[%s20678_s1 + $0x1c90] sm:$0xff] }
 0x459   :  { %11565 = vmatprep.subr.bf16.mxu1 %v13344_v16  ;;  %v13375_v16 = vcombine.low %v421_v26, %v425_v27  ;;  %v968_v35 = vld [vmem:[%s20678_s1 + $0x1d70] sm:$0xff]  ;;  %v461_v26 = vld [vmem:[%s20678_s1 + $0xd98] sm:$0xff] }
 0x45a   :  { %11195 = vmatpush1.bf16.msra.mxu0 %v13845_v47  ;;  %v944_v47 = vld [vmem:[%s20678_s1 + $0x1cb0] sm:$0xff]  ;;  %v465_v27 = vld [vmem:[%s20678_s1 + $0xdb8] sm:$0xff] }
 0x45b   :  { %11196 = vmatprep.subr.bf16.mxu0 %v13854_v50  ;;  %v13885_v50 = vcombine.low %v932_v52, %v936_v11  ;;  %v13894_v54 = vcombine.high %v940_v44, %v944_v47  ;;  %v972_v52 = vld [vmem:[%s20678_s1 + $0x1d90] sm:$0xff] }
 0x45c   :  { %11566 = vmatpush1.bf16.msra.mxu1 %v13343_v53  ;;  %v952_v53 = vld [vmem:[%s20678_s1 + $0x1cf0] sm:$0xff] }
 0x45d   :  { %11567 = vmatprep.subr.bf16.mxu1 %v13352_v28  ;;  %v13893_v28 = vcombine.low %v940_v44, %v944_v47  ;;  %v13902_v62 = vcombine.high %v948_v20, %v952_v53  ;;  %v976_v11 = vld [vmem:[%s20678_s1 + $0x1db0] sm:$0xff]  ;;  %v473_v44 = vld [vmem:[%s20678_s1 + $0xdf8] sm:$0xff] }
 0x45e   :  { %11197 = vmatpush1.bf16.msra.mxu0 %v13853_v59  ;;  %v13383_v59 = vcombine.low %v429_v5, %v433_v12  ;;  %v13926_v5 = vcombine.high %v972_v52, %v976_v11  ;;  %v469_v12 = vld [vmem:[%s20678_s1 + $0xdd8] sm:$0xff] }
 0x45f   :  { %11198 = vmatprep.subr.bf16.mxu0 %v13862_v60 }
 0x460   :  { %11568 = vmatpush1.bf16.msra.mxu1 %v13351_v6 }
 0x461   :  { %11569 = vmatprep.subr.bf16.mxu1 %v13360_v9  ;;  %v13400_v9 = vcombine.high %v445_v1, %v449_v3 }
 0x462   :  { %11199 = vmatpush1.bf16.msra.mxu0 %v13861_v8  ;;  %v13901_v8 = vcombine.low %v948_v20, %v952_v53  ;;  %v13424_v20 = vcombine.high %v469_v12, %v473_v44 }
 0x463   :  { %11200 = vmatprep.subr.bf16.mxu0 %v13870_v13 }
 0x464   :  { %11570 = vmatpush1.bf16.msra.mxu1 %v13359_v19  ;;  %v13399_v19 = vcombine.low %v445_v1, %v449_v3  ;;  %v13423_v1 = vcombine.low %v469_v12, %v473_v44 }
 0x465   :  { %11580 = vmatprep.subr.bf16.mxu1 %v13368_v24  ;;  %v13408_v24 = vcombine.high %v453_v38, %v457_v14 }
 0x466   :  { %11201 = vmatpush1.bf16.msra.mxu0 %v13869_v21 }
 0x467   :  { %11211 = vmatprep.subr.bf16.mxu0 %v13878_v40  ;;  %11572 = vmatmul.mubr.bf16.vlgmr.msra.gmra.mrb[8].mxu1 %v15423_v32  ;;  %v437_v32 = vld [vmem:[%s20678_s1 + $0xcd8] sm:$0xff]  ;;  %v13918_v40 = vcombine.high %v964_v15, %v968_v35 }
 0x468   :  { %11581 = vmatpush1.bf16.msra.mxu1 %v13367_v41  ;;  %11612 = vmatprep.mubr.bf16.mxu1 %v15444_v39  ;;  %v13392_v60 = vcombine.high %v437_v32, %v441_v56  ;;  %v956_v39 = vld [vmem:[%s20678_s1 + $0x1d10] sm:$0xff]  ;;  %v13391_v6 = vcombine.low %v437_v32, %v441_v56  ;;  %v13407_v41 = vcombine.low %v453_v38, %v457_v14 }
 0x469   :  { %11203 = vmatmul.mubr.bf16.vlgmr.msra.gmra.mrb[4].mxu0 %v16263_v42  ;;  %11582 = vmatprep.subr.bf16.mxu1 %v13376_v31  ;;  %v13910_v13 = vcombine.high %v956_v39, %v960_v4  ;;  %v13909_v21 = vcombine.low %v956_v39, %v960_v4  ;;  %v13416_v31 = vcombine.high %v461_v26, %v465_v27 }
 0x46a   :  { %11212 = vmatpush1.bf16.msra.mxu0 %v13877_v33  ;;  %11243 = vmatprep.mubr.bf16.mxu0 %v16273_v49  ;;  %v13917_v33 = vcombine.low %v964_v15, %v968_v35  ;;  %v13925_v56 = vcombine.low %v972_v52, %v976_v11 }
 0x46b   :  { %11213 = vmatprep.subr.bf16.mxu0 %v13886_v63 }
 0x46c   :  { %11583 = vmatpush1.bf16.msra.mxu1 %v13375_v16  ;;  %v980_v16 = vld [vmem:[%s20678_s1 + $0x1dd0] sm:$0xff] }
 0x46d   :  { %11584 = vmatprep.subr.bf16.mxu1 %v13384_v51 }
 0x46e   :  { %11214 = vmatpush1.bf16.msra.mxu0 %v13885_v50  ;;  %v984_v50 = vld [vmem:[%s20678_s1 + $0x1df0] sm:$0xff] }
 0x46f   :  { %11215 = vmatprep.subr.bf16.mxu0 %v13894_v54  ;;  %v13415_v54 = vcombine.low %v461_v26, %v465_v27  ;;  %v13934_v53 = vcombine.high %v980_v16, %v984_v50  ;;  %v13933_v3 = vcombine.low %v980_v16, %v984_v50 }
 0x470   :  { %11585 = vmatpush1.bf16.msra.mxu1 %v13383_v59  ;;  %v477_v59 = vld [vmem:[%s20678_s1 + $0xe18] sm:$0xff] }
 0x471   :  { %11586 = vmatprep.subr.bf16.mxu1 %v13392_v60  ;;  %v988_v60 = vld [vmem:[%s20678_s1 + $0x1e10] sm:$0xff] }
 0x472   :  { %11216 = vmatpush1.bf16.msra.mxu0 %v13893_v28  ;;  %v481_v28 = vld [vmem:[%s20678_s1 + $0xe38] sm:$0xff] }
 0x473   :  { %11217 = vmatprep.subr.bf16.mxu0 %v13902_v62  ;;  %v992_v62 = vld [vmem:[%s20678_s1 + $0x1e30] sm:$0xff]  ;;  %v13432_v39 = vcombine.high %v477_v59, %v481_v28  ;;  %v13431_v38 = vcombine.low %v477_v59, %v481_v28 }
 0x474   :  { %11587 = vmatpush1.bf16.msra.mxu1 %v13391_v6  ;;  %v13942_v4 = vcombine.high %v988_v60, %v992_v62  ;;  %v485_v6 = vld [vmem:[%s20678_s1 + $0xe58] sm:$0xff]  ;;  %v13941_v14 = vcombine.low %v988_v60, %v992_v62 }
 0x475   :  { %11588 = vmatprep.subr.bf16.mxu1 %v13400_v9  ;;  %v996_v9 = vld [vmem:[%s20678_s1 + $0x1e50] sm:$0xff]  ;;  %v517_v60 = vld [vmem:[%s20678_s1 + $0xf58] sm:$0xff] }
 0x476   :  { %11218 = vmatpush1.bf16.msra.mxu0 %v13901_v8  ;;  %v489_v8 = vld [vmem:[%s20678_s1 + $0xe78] sm:$0xff] }
 0x477   :  { %11219 = vmatprep.subr.bf16.mxu0 %v13910_v13  ;;  %v1000_v13 = vld [vmem:[%s20678_s1 + $0x1e70] sm:$0xff]  ;;  %v13440_v15 = vcombine.high %v485_v6, %v489_v8  ;;  %v13439_v26 = vcombine.low %v485_v6, %v489_v8  ;;  %v521_v62 = vld [vmem:[%s20678_s1 + $0xf78] sm:$0xff] }
 0x478   :  { %11589 = vmatpush1.bf16.msra.mxu1 %v13399_v19  ;;  %v13950_v35 = vcombine.high %v996_v9, %v1000_v13  ;;  %v493_v19 = vld [vmem:[%s20678_s1 + $0xe98] sm:$0xff]  ;;  %v13949_v27 = vcombine.low %v996_v9, %v1000_v13  ;;  %v13472_v6 = vcombine.high %v517_v60, %v521_v62 }
 0x479   :  { %11590 = vmatprep.subr.bf16.mxu1 %v13408_v24  ;;  %v1004_v24 = vld [vmem:[%s20678_s1 + $0x1e90] sm:$0xff]  ;;  %v525_v9 = vld [vmem:[%s20678_s1 + $0xf98] sm:$0xff] }
 0x47a   :  { %11220 = vmatpush1.bf16.msra.mxu0 %v13909_v21  ;;  %v18862_v63 = vpop.f32.mrb[4].mxu1  ;;  %v497_v21 = vld [vmem:[%s20678_s1 + $0xeb8] sm:$0xff] }
 0x47b   :  { %11221 = vmatprep.subr.bf16.mxu0 %v13918_v40  ;;  %v18870_v47 = vpop.f32.mrb[5].mxu1  ;;  %v1008_v40 = vld [vmem:[%s20678_s1 + $0x1eb0] sm:$0xff]  ;;  %v13448_v52 = vcombine.high %v493_v19, %v497_v21  ;;  %v13447_v12 = vcombine.low %v493_v19, %v497_v21  ;;  %v529_v13 = vld [vmem:[%s20678_s1 + $0xfb8] sm:$0xff] }
 0x47c   :  { %v10921_v51 = vpop.f32.mrb[6].mxu1  ;;  %11591 = vmatpush1.bf16.msra.mxu1 %v13407_v41  ;;  %v13958_v11 = vcombine.high %v1004_v24, %v1008_v40  ;;  %v501_v41 = vld [vmem:[%s20678_s1 + $0xed8] sm:$0xff]  ;;  %v13957_v44 = vcombine.low %v1004_v24, %v1008_v40  ;;  %v13480_v19 = vcombine.high %v525_v9, %v529_v13 }
 0x47d   :  { %v10922_v32 = vpop.f32.mrb[7].mxu1  ;;  %11592 = vmatprep.subr.bf16.mxu1 %v13416_v31  ;;  %v1012_v31 = vld [vmem:[%s20678_s1 + $0x1ed0] sm:$0xff]  ;;  %v509_v51 = vld [vmem:[%s20678_s1 + $0xf18] sm:$0xff] }
 0x47e   :  { %11222 = vmatpush1.bf16.msra.mxu0 %v13917_v33  ;;  %v505_v33 = vld [vmem:[%s20678_s1 + $0xef8] sm:$0xff]  ;;  %v1020_v32 = vld [vmem:[%s20678_s1 + $0x1f10] sm:$0xff] }
 0x47f   :  { %11223 = vmatprep.subr.bf16.mxu0 %v13926_v5  ;;  %v1016_v5 = vld [vmem:[%s20678_s1 + $0x1ef0] sm:$0xff]  ;;  %v13456_v16 = vcombine.high %v501_v41, %v505_v33  ;;  %v533_v24 = vld [vmem:[%s20678_s1 + $0xfd8] sm:$0xff] }
 0x480   :  { %11593 = vmatpush1.bf16.msra.mxu1 %v13415_v54  ;;  %v13966_v50 = vcombine.high %v1012_v31, %v1016_v5  ;;  %v513_v54 = vld [vmem:[%s20678_s1 + $0xf38] sm:$0xff] }
 0x481   :  { %11594 = vmatprep.subr.bf16.mxu1 %v13424_v20  ;;  %v13455_v20 = vcombine.low %v501_v41, %v505_v33  ;;  %v13464_v59 = vcombine.high %v509_v51, %v513_v54  ;;  %v537_v40 = vld [vmem:[%s20678_s1 + $0xff8] sm:$0xff] }
 0x482   :  { %11224 = vmatpush1.bf16.msra.mxu0 %v13925_v56  ;;  %v1024_v56 = vld [vmem:[%s20678_s1 + $0x1f30] sm:$0xff]  ;;  %v13488_v41 = vcombine.high %v533_v24, %v537_v40 }
 0x483   :  { %11225 = vmatprep.subr.bf16.mxu0 %v13934_v53  ;;  %v13965_v53 = vcombine.low %v1012_v31, %v1016_v5  ;;  %v13974_v28 = vcombine.high %v1020_v32, %v1024_v56  ;;  %v541_v31 = vld [vmem:[%s20678_s1 + $0x1018] sm:$0xff] }
 0x484   :  { %11595 = vmatpush1.bf16.msra.mxu1 %v13423_v1  ;;  %v1028_v1 = vld [vmem:[%s20678_s1 + $0x1f50] sm:$0xff]  ;;  %v545_v5 = vld [vmem:[%s20678_s1 + $0x1038] sm:$0xff] }
 0x485   :  { %11596 = vmatprep.subr.bf16.mxu1 %v13432_v39  ;;  %v13463_v39 = vcombine.low %v509_v51, %v513_v54  ;;  %v13496_v51 = vcombine.high %v541_v31, %v545_v5 }
 0x486   :  { %11226 = vmatpush1.bf16.msra.mxu0 %v13933_v3  ;;  %v1032_v3 = vld [vmem:[%s20678_s1 + $0x1f70] sm:$0xff] }
 0x487   :  { %11227 = vmatprep.subr.bf16.mxu0 %v13942_v4  ;;  %v13973_v4 = vcombine.low %v1020_v32, %v1024_v56  ;;  %v13982_v8 = vcombine.high %v1028_v1, %v1032_v3  ;;  %v549_v32 = vld [vmem:[%s20678_s1 + $0x1058] sm:$0xff] }
 0x488   :  { %11597 = vmatpush1.bf16.msra.mxu1 %v13431_v38  ;;  %v1036_v38 = vld [vmem:[%s20678_s1 + $0x1f90] sm:$0xff]  ;;  %v553_v56 = vld [vmem:[%s20678_s1 + $0x1078] sm:$0xff] }
 0x489   :  { %11598 = vmatprep.subr.bf16.mxu1 %v13440_v15  ;;  %v13471_v15 = vcombine.low %v517_v60, %v521_v62  ;;  %v13504_v60 = vcombine.high %v549_v32, %v553_v56 }
 0x48a   :  { %11228 = vmatpush1.bf16.msra.mxu0 %v13941_v14  ;;  %v1040_v14 = vld [vmem:[%s20678_s1 + $0x1fb0] sm:$0xff] }
 0x48b   :  { %11229 = vmatprep.subr.bf16.mxu0 %v13950_v35  ;;  %v13981_v35 = vcombine.low %v1028_v1, %v1032_v3  ;;  %v13990_v21 = vcombine.high %v1036_v38, %v1040_v14  ;;  %v557_v1 = vld [vmem:[%s20678_s1 + $0x1098] sm:$0xff] }
 0x48c   :  { %11599 = vmatpush1.bf16.msra.mxu1 %v13439_v26  ;;  %v1044_v26 = vld [vmem:[%s20678_s1 + $0x1fd0] sm:$0xff]  ;;  %v561_v3 = vld [vmem:[%s20678_s1 + $0x10b8] sm:$0xff] }
 0x48d   :  { %11600 = vmatprep.subr.bf16.mxu1 %v13448_v52  ;;  %v13479_v52 = vcombine.low %v525_v9, %v529_v13  ;;  %v13512_v9 = vcombine.high %v557_v1, %v561_v3 }
 0x48e   :  { %11230 = vmatpush1.bf16.msra.mxu0 %v13949_v27  ;;  %v1048_v27 = vld [vmem:[%s20678_s1 + $0x1ff0] sm:$0xff] }
 0x48f   :  { %11231 = vmatprep.subr.bf16.mxu0 %v13958_v11  ;;  %v13989_v11 = vcombine.low %v1036_v38, %v1040_v14  ;;  %v13998_v33 = vcombine.high %v1044_v26, %v1048_v27  ;;  %v569_v38 = vld [vmem:[%s20678_s1 + $0x10f8] sm:$0xff]  ;;  %v1076_v14 = vld [vmem:[%s20678_s1 + $0x20d0] sm:$0xff] }
 0x490   :  { %11601 = vmatpush1.bf16.msra.mxu1 %v13447_v12  ;;  %v1052_v12 = vld [vmem:[%s20678_s1 + $0x2010] sm:$0xff] }
 0x491   :  { %11602 = vmatprep.subr.bf16.mxu1 %v13456_v16  ;;  %v13487_v16 = vcombine.low %v533_v24, %v537_v40  ;;  %v573_v40 = vld [vmem:[%s20678_s1 + $0x1118] sm:$0xff] }
 0x492   :  { %11232 = vmatpush1.bf16.msra.mxu0 %v13957_v44  ;;  %v1056_v44 = vld [vmem:[%s20678_s1 + $0x2030] sm:$0xff] }
 0x493   :  { %11233 = vmatprep.subr.bf16.mxu0 %v13966_v50  ;;  %v13997_v50 = vcombine.low %v1044_v26, %v1048_v27  ;;  %v14006_v54 = vcombine.high %v1052_v12, %v1056_v44  ;;  %v577_v26 = vld [vmem:[%s20678_s1 + $0x1138] sm:$0xff]  ;;  %v1088_v27 = vld [vmem:[%s20678_s1 + $0x2130] sm:$0xff] }
 0x494   :  { %11603 = vmatpush1.bf16.msra.mxu1 %v13455_v20  ;;  %v1060_v20 = vld [vmem:[%s20678_s1 + $0x2050] sm:$0xff] }
 0x495   :  { %11604 = vmatprep.subr.bf16.mxu1 %v13464_v59  ;;  %v13495_v59 = vcombine.low %v541_v31, %v545_v5  ;;  %v581_v31 = vld [vmem:[%s20678_s1 + $0x1158] sm:$0xff] }
 0x496   :  { %11234 = vmatpush1.bf16.msra.mxu0 %v13965_v53  ;;  %v1064_v53 = vld [vmem:[%s20678_s1 + $0x2070] sm:$0xff]  ;;  %v585_v5 = vld [vmem:[%s20678_s1 + $0x1178] sm:$0xff] }
 0x497   :  { %11235 = vmatprep.subr.bf16.mxu0 %v13974_v28  ;;  %v14005_v28 = vcombine.low %v1052_v12, %v1056_v44  ;;  %v14014_v62 = vcombine.high %v1060_v20, %v1064_v53  ;;  %v1092_v12 = vld [vmem:[%s20678_s1 + $0x2150] sm:$0xff] }
 0x498   :  { %11605 = vmatpush1.bf16.msra.mxu1 %v13463_v39  ;;  %v1068_v39 = vld [vmem:[%s20678_s1 + $0x2090] sm:$0xff] }
 0x499   :  { %11606 = vmatprep.subr.bf16.mxu1 %v13472_v6  ;;  %v13503_v6 = vcombine.low %v549_v32, %v553_v56  ;;  %v1096_v44 = vld [vmem:[%s20678_s1 + $0x2170] sm:$0xff]  ;;  %v589_v32 = vld [vmem:[%s20678_s1 + $0x1198] sm:$0xff] }
 0x49a   :  { %11236 = vmatpush1.bf16.msra.mxu0 %v13973_v4  ;;  %v1072_v4 = vld [vmem:[%s20678_s1 + $0x20b0] sm:$0xff]  ;;  %v593_v56 = vld [vmem:[%s20678_s1 + $0x11b8] sm:$0xff] }
 0x49b   :  { %11237 = vmatprep.subr.bf16.mxu0 %v13982_v8  ;;  %v14013_v8 = vcombine.low %v1060_v20, %v1064_v53  ;;  %v14022_v13 = vcombine.high %v1068_v39, %v1072_v4  ;;  %v1100_v20 = vld [vmem:[%s20678_s1 + $0x2190] sm:$0xff] }
 0x49c   :  { %11607 = vmatpush1.bf16.msra.mxu1 %v13471_v15  ;;  %v1080_v15 = vld [vmem:[%s20678_s1 + $0x20f0] sm:$0xff] }
 0x49d   :  { %11608 = vmatprep.subr.bf16.mxu1 %v13480_v19  ;;  %v14021_v19 = vcombine.low %v1068_v39, %v1072_v4  ;;  %v14030_v24 = vcombine.high %v1076_v14, %v1080_v15  ;;  %v1104_v53 = vld [vmem:[%s20678_s1 + $0x21b0] sm:$0xff] }
 0x49e   :  { %11238 = vmatpush1.bf16.msra.mxu0 %v13981_v35  ;;  %v13511_v35 = vcombine.low %v557_v1, %v561_v3  ;;  %v597_v1 = vld [vmem:[%s20678_s1 + $0x11d8] sm:$0xff]  ;;  %v1108_v39 = vld [vmem:[%s20678_s1 + $0x21d0] sm:$0xff] }
 0x49f   :  { %11239 = vmatprep.subr.bf16.mxu0 %v13990_v21  ;;  %v601_v3 = vld [vmem:[%s20678_s1 + $0x11f8] sm:$0xff]  ;;  %v1112_v4 = vld [vmem:[%s20678_s1 + $0x21f0] sm:$0xff] }
 0x4a0   :  { %11609 = vmatpush1.bf16.msra.mxu1 %v13479_v52 }
 0x4a1   :  { %11610 = vmatprep.subr.bf16.mxu1 %v13488_v41  ;;  %v13528_v41 = vcombine.high %v573_v40, %v577_v26 }
 0x4a2   :  { %11240 = vmatpush1.bf16.msra.mxu0 %v13989_v11  ;;  %v14029_v11 = vcombine.low %v1076_v14, %v1080_v15  ;;  %v1116_v14 = vld [vmem:[%s20678_s1 + $0x2210] sm:$0xff] }
 0x4a3   :  { %11241 = vmatprep.subr.bf16.mxu0 %v13998_v33  ;;  %v1120_v15 = vld [vmem:[%s20678_s1 + $0x2230] sm:$0xff] }
 0x4a4   :  { %11611 = vmatpush1.bf16.msra.mxu1 %v13487_v16  ;;  %v13527_v16 = vcombine.low %v573_v40, %v577_v26  ;;  %v613_v40 = vld [vmem:[%s20678_s1 + $0x1258] sm:$0xff] }
 0x4a5   :  { %11621 = vmatprep.subr.bf16.mxu1 %v13496_v51  ;;  %v13536_v51 = vcombine.high %v581_v31, %v585_v5  ;;  %v617_v26 = vld [vmem:[%s20678_s1 + $0x1278] sm:$0xff] }
 0x4a6   :  { %11242 = vmatpush1.bf16.msra.mxu0 %v13997_v50 }
 0x4a7   :  { %11252 = vmatprep.subr.bf16.mxu0 %v14006_v54  ;;  %11613 = vmatmul.mubr.bf16.vlgmr.msra.gmra.mrb[8].mxu1 %v15646_v55  ;;  %v565_v55 = vld [vmem:[%s20678_s1 + $0x10d8] sm:$0xff]  ;;  %v14046_v54 = vcombine.high %v1092_v12, %v1096_v44 }
 0x4a8   :  { %11622 = vmatpush1.bf16.msra.mxu1 %v13495_v59  ;;  %11653 = vmatprep.mubr.bf16.mxu1 %v15655_v61  ;;  %v13520_v21 = vcombine.high %v565_v55, %v569_v38  ;;  %v1084_v61 = vld [vmem:[%s20678_s1 + $0x2110] sm:$0xff]  ;;  %v13519_v52 = vcombine.low %v565_v55, %v569_v38  ;;  %v13535_v59 = vcombine.low %v581_v31, %v585_v5  ;;  %v605_v55 = vld [vmem:[%s20678_s1 + $0x1218] sm:$0xff] }
 0x4a9   :  { %11244 = vmatmul.mubr.bf16.vlgmr.msra.gmra.mrb[4].mxu0 %v16482_v37  ;;  %11623 = vmatprep.subr.bf16.mxu1 %v13504_v60  ;;  %v14038_v33 = vcombine.high %v1084_v61, %v1088_v27  ;;  %v14037_v50 = vcombine.low %v1084_v61, %v1088_v27  ;;  %v13544_v60 = vcombine.high %v589_v32, %v593_v56  ;;  %v609_v38 = vld [vmem:[%s20678_s1 + $0x1238] sm:$0xff]  ;;  %v1124_v61 = vld [vmem:[%s20678_s1 + $0x2250] sm:$0xff] }
 0x4aa   :  { %11253 = vmatpush1.bf16.msra.mxu0 %v14005_v28  ;;  %11284 = vmatprep.mubr.bf16.mxu0 %v16491_v48  ;;  %v14045_v28 = vcombine.low %v1092_v12, %v1096_v44  ;;  %v1128_v27 = vld [vmem:[%s20678_s1 + $0x2270] sm:$0xff]  ;;  %v621_v31 = vld [vmem:[%s20678_s1 + $0x1298] sm:$0xff] }
 0x4ab   :  { %11254 = vmatprep.subr.bf16.mxu0 %v14014_v62  ;;  %v14054_v62 = vcombine.high %v1100_v20, %v1104_v53  ;;  %v625_v5 = vld [vmem:[%s20678_s1 + $0x12b8] sm:$0xff]  ;;  %v1132_v12 = vld [vmem:[%s20678_s1 + $0x2290] sm:$0xff] }
 0x4ac   :  { %11624 = vmatpush1.bf16.msra.mxu1 %v13503_v6  ;;  %v13543_v6 = vcombine.low %v589_v32, %v593_v56  ;;  %v1136_v44 = vld [vmem:[%s20678_s1 + $0x22b0] sm:$0xff]  ;;  %v629_v32 = vld [vmem:[%s20678_s1 + $0x12d8] sm:$0xff] }
 0x4ad   :  { %11625 = vmatprep.subr.bf16.mxu1 %v13512_v9  ;;  %v13552_v9 = vcombine.high %v597_v1, %v601_v3  ;;  %v633_v56 = vld [vmem:[%s20678_s1 + $0x12f8] sm:$0xff] }
 0x4ae   :  { %11255 = vmatpush1.bf16.msra.mxu0 %v14013_v8  ;;  %v14053_v8 = vcombine.low %v1100_v20, %v1104_v53  ;;  %v1140_v20 = vld [vmem:[%s20678_s1 + $0x22d0] sm:$0xff] }
 0x4af   :  { %11256 = vmatprep.subr.bf16.mxu0 %v14022_v13  ;;  %v14062_v13 = vcombine.high %v1108_v39, %v1112_v4  ;;  %v1144_v53 = vld [vmem:[%s20678_s1 + $0x22f0] sm:$0xff] }
 0x4b0   :  { %11626 = vmatpush1.bf16.msra.mxu1 %v13511_v35  ;;  %v13551_v35 = vcombine.low %v597_v1, %v601_v3  ;;  %v637_v1 = vld [vmem:[%s20678_s1 + $0x1318] sm:$0xff] }
 0x4b1   :  { %11627 = vmatprep.subr.bf16.mxu1 %v13520_v21  ;;  %v13560_v21 = vcombine.high %v605_v55, %v609_v38  ;;  %v641_v3 = vld [vmem:[%s20678_s1 + $0x1338] sm:$0xff] }
 0x4b2   :  { %11257 = vmatpush1.bf16.msra.mxu0 %v14021_v19  ;;  %v14061_v19 = vcombine.low %v1108_v39, %v1112_v4  ;;  %v1148_v39 = vld [vmem:[%s20678_s1 + $0x2310] sm:$0xff] }
 0x4b3   :  { %11258 = vmatprep.subr.bf16.mxu0 %v14030_v24  ;;  %v14070_v24 = vcombine.high %v1116_v14, %v1120_v15  ;;  %v1152_v4 = vld [vmem:[%s20678_s1 + $0x2330] sm:$0xff] }
 0x4b4   :  { %11628 = vmatpush1.bf16.msra.mxu1 %v13519_v52  ;;  %v13559_v52 = vcombine.low %v605_v55, %v609_v38  ;;  %v645_v55 = vld [vmem:[%s20678_s1 + $0x1358] sm:$0xff] }
 0x4b5   :  { %11629 = vmatprep.subr.bf16.mxu1 %v13528_v41  ;;  %v13568_v41 = vcombine.high %v613_v40, %v617_v26  ;;  %v649_v38 = vld [vmem:[%s20678_s1 + $0x1378] sm:$0xff] }
 0x4b6   :  { %11259 = vmatpush1.bf16.msra.mxu0 %v14029_v11  ;;  %v14069_v11 = vcombine.low %v1116_v14, %v1120_v15  ;;  %v1156_v14 = vld [vmem:[%s20678_s1 + $0x2350] sm:$0xff] }
 0x4b7   :  { %11260 = vmatprep.subr.bf16.mxu0 %v14038_v33  ;;  %v14078_v33 = vcombine.high %v1124_v61, %v1128_v27  ;;  %v1160_v15 = vld [vmem:[%s20678_s1 + $0x2370] sm:$0xff] }
 0x4b8   :  { %11630 = vmatpush1.bf16.msra.mxu1 %v13527_v16  ;;  %v13567_v16 = vcombine.low %v613_v40, %v617_v26  ;;  %v653_v40 = vld [vmem:[%s20678_s1 + $0x1398] sm:$0xff] }
 0x4b9   :  { %11631 = vmatprep.subr.bf16.mxu1 %v13536_v51  ;;  %v13576_v51 = vcombine.high %v621_v31, %v625_v5  ;;  %v657_v26 = vld [vmem:[%s20678_s1 + $0x13b8] sm:$0xff] }
 0x4ba   :  { %11261 = vmatpush1.bf16.msra.mxu0 %v14037_v50  ;;  %v14077_v50 = vcombine.low %v1124_v61, %v1128_v27  ;;  %v1164_v61 = vld [vmem:[%s20678_s1 + $0x2390] sm:$0xff] }
 0x4bb   :  { %11262 = vmatprep.subr.bf16.mxu0 %v14046_v54  ;;  %v14086_v54 = vcombine.high %v1132_v12, %v1136_v44  ;;  %v1168_v27 = vld [vmem:[%s20678_s1 + $0x23b0] sm:$0xff] }
 0x4bc   :  { %11632 = vmatpush1.bf16.msra.mxu1 %v13535_v59  ;;  %v13575_v59 = vcombine.low %v621_v31, %v625_v5  ;;  %v661_v31 = vld [vmem:[%s20678_s1 + $0x13d8] sm:$0xff] }
 0x4bd   :  { %11633 = vmatprep.subr.bf16.mxu1 %v13544_v60  ;;  %v13584_v60 = vcombine.high %v629_v32, %v633_v56  ;;  %v665_v5 = vld [vmem:[%s20678_s1 + $0x13f8] sm:$0xff] }
 0x4be   :  { %11263 = vmatpush1.bf16.msra.mxu0 %v14045_v28  ;;  %v14085_v28 = vcombine.low %v1132_v12, %v1136_v44  ;;  %v1172_v12 = vld [vmem:[%s20678_s1 + $0x23d0] sm:$0xff] }
 0x4bf   :  { %11264 = vmatprep.subr.bf16.mxu0 %v14054_v62  ;;  %v14094_v62 = vcombine.high %v1140_v20, %v1144_v53  ;;  %v1176_v44 = vld [vmem:[%s20678_s1 + $0x23f0] sm:$0xff] }
 0x4c0   :  { %11634 = vmatpush1.bf16.msra.mxu1 %v13543_v6  ;;  %v13583_v6 = vcombine.low %v629_v32, %v633_v56  ;;  %v669_v32 = vld [vmem:[%s20678_s1 + $0x1418] sm:$0xff] }
 0x4c1   :  { %11635 = vmatprep.subr.bf16.mxu1 %v13552_v9  ;;  %v13592_v9 = vcombine.high %v637_v1, %v641_v3  ;;  %v673_v56 = vld [vmem:[%s20678_s1 + $0x1438] sm:$0xff] }
 0x4c2   :  { %11265 = vmatpush1.bf16.msra.mxu0 %v14053_v8  ;;  %v14093_v8 = vcombine.low %v1140_v20, %v1144_v53  ;;  %v1180_v20 = vld [vmem:[%s20678_s1 + $0x2410] sm:$0xff] }
 0x4c3   :  { %11266 = vmatprep.subr.bf16.mxu0 %v14062_v13  ;;  %v14102_v13 = vcombine.high %v1148_v39, %v1152_v4  ;;  %v1184_v53 = vld [vmem:[%s20678_s1 + $0x2430] sm:$0xff] }
 0x4c4   :  { %11636 = vmatpush1.bf16.msra.mxu1 %v13551_v35  ;;  %v13591_v35 = vcombine.low %v637_v1, %v641_v3  ;;  %v677_v1 = vld [vmem:[%s20678_s1 + $0x1458] sm:$0xff] }
 0x4c5   :  { %11637 = vmatprep.subr.bf16.mxu1 %v13560_v21  ;;  %v13600_v21 = vcombine.high %v645_v55, %v649_v38  ;;  %v681_v3 = vld [vmem:[%s20678_s1 + $0x1478] sm:$0xff] }
 0x4c6   :  { %11267 = vmatpush1.bf16.msra.mxu0 %v14061_v19  ;;  %v14101_v19 = vcombine.low %v1148_v39, %v1152_v4  ;;  %v1188_v39 = vld [vmem:[%s20678_s1 + $0x2450] sm:$0xff] }
 0x4c7   :  { %11268 = vmatprep.subr.bf16.mxu0 %v14070_v24  ;;  %v14110_v24 = vcombine.high %v1156_v14, %v1160_v15  ;;  %v1192_v4 = vld [vmem:[%s20678_s1 + $0x2470] sm:$0xff] }
 0x4c8   :  { %11638 = vmatpush1.bf16.msra.mxu1 %v13559_v52  ;;  %v13599_v52 = vcombine.low %v645_v55, %v649_v38  ;;  %v685_v55 = vld [vmem:[%s20678_s1 + $0x1498] sm:$0xff] }
 0x4c9   :  { %11639 = vmatprep.subr.bf16.mxu1 %v13568_v41  ;;  %v13608_v41 = vcombine.high %v653_v40, %v657_v26  ;;  %v689_v38 = vld [vmem:[%s20678_s1 + $0x14b8] sm:$0xff] }
 0x4ca   :  { %11269 = vmatpush1.bf16.msra.mxu0 %v14069_v11  ;;  %v14109_v11 = vcombine.low %v1156_v14, %v1160_v15  ;;  %v1196_v14 = vld [vmem:[%s20678_s1 + $0x2490] sm:$0xff] }
 0x4cb   :  { %11270 = vmatprep.subr.bf16.mxu0 %v14078_v33  ;;  %v14118_v33 = vcombine.high %v1164_v61, %v1168_v27  ;;  %v1200_v15 = vld [vmem:[%s20678_s1 + $0x24b0] sm:$0xff] }
 0x4cc   :  { %11640 = vmatpush1.bf16.msra.mxu1 %v13567_v16  ;;  %v13607_v16 = vcombine.low %v653_v40, %v657_v26  ;;  %v697_v40 = vld [vmem:[%s20678_s1 + $0x14f8] sm:$0xff]  ;;  %v1204_v26 = vld [vmem:[%s20678_s1 + $0x24d0] sm:$0xff] }
 0x4cd   :  { %11641 = vmatprep.subr.bf16.mxu1 %v13576_v51  ;;  %v13616_v51 = vcombine.high %v661_v31, %v665_v5 }
 0x4ce   :  { %11271 = vmatpush1.bf16.msra.mxu0 %v14077_v50  ;;  %v14117_v50 = vcombine.low %v1164_v61, %v1168_v27  ;;  %v1208_v61 = vld [vmem:[%s20678_s1 + $0x24f0] sm:$0xff]  ;;  %v13639_v27 = vcombine.low %v685_v55, %v689_v38 }
 0x4cf   :  { %11272 = vmatprep.subr.bf16.mxu0 %v14086_v54  ;;  %v14126_v54 = vcombine.high %v1172_v12, %v1176_v44 }
 0x4d0   :  { %11642 = vmatpush1.bf16.msra.mxu1 %v13575_v59  ;;  %v13615_v59 = vcombine.low %v661_v31, %v665_v5  ;;  %v705_v31 = vld [vmem:[%s20678_s1 + $0x1538] sm:$0xff]  ;;  %v1216_v5 = vld [vmem:[%s20678_s1 + $0x2530] sm:$0xff] }
 0x4d1   :  { %11643 = vmatprep.subr.bf16.mxu1 %v13584_v60  ;;  %v13624_v60 = vcombine.high %v669_v32, %v673_v56 }
 0x4d2   :  { %11273 = vmatpush1.bf16.msra.mxu0 %v14085_v28  ;;  %v14125_v28 = vcombine.low %v1172_v12, %v1176_v44  ;;  %v14157_v44 = vcombine.low %v1204_v26, %v1208_v61 }
 0x4d3   :  { %11274 = vmatprep.subr.bf16.mxu0 %v14094_v62  ;;  %v14134_v62 = vcombine.high %v1180_v20, %v1184_v53 }
 0x4d4   :  { %11644 = vmatpush1.bf16.msra.mxu1 %v13583_v6  ;;  %v13623_v6 = vcombine.low %v669_v32, %v673_v56  ;;  %v1220_v32 = vld [vmem:[%s20678_s1 + $0x2550] sm:$0xff] }
 0x4d5   :  { %11645 = vmatprep.subr.bf16.mxu1 %v13592_v9  ;;  %v13632_v9 = vcombine.high %v677_v1, %v681_v3  ;;  %v1224_v56 = vld [vmem:[%s20678_s1 + $0x2570] sm:$0xff] }
 0x4d6   :  { %11275 = vmatpush1.bf16.msra.mxu0 %v14093_v8  ;;  %v14133_v8 = vcombine.low %v1180_v20, %v1184_v53 }
 0x4d7   :  { %11276 = vmatprep.subr.bf16.mxu0 %v14102_v13  ;;  %v14142_v13 = vcombine.high %v1188_v39, %v1192_v4 }
 0x4d8   :  { %11646 = vmatpush1.bf16.msra.mxu1 %v13591_v35  ;;  %v13631_v35 = vcombine.low %v677_v1, %v681_v3  ;;  %v1228_v1 = vld [vmem:[%s20678_s1 + $0x2590] sm:$0xff] }
 0x4d9   :  { %11647 = vmatprep.subr.bf16.mxu1 %v13600_v21  ;;  %v13640_v21 = vcombine.high %v685_v55, %v689_v38  ;;  %v1232_v3 = vld [vmem:[%s20678_s1 + $0x25b0] sm:$0xff] }
 0x4da   :  { %11277 = vmatpush1.bf16.msra.mxu0 %v14101_v19  ;;  %v14141_v19 = vcombine.low %v1188_v39, %v1192_v4  ;;  %v14173_v4 = vcombine.low %v1220_v32, %v1224_v56  ;;  %v1236_v55 = vld [vmem:[%s20678_s1 + $0x25d0] sm:$0xff] }
 0x4db   :  { %11278 = vmatprep.subr.bf16.mxu0 %v14110_v24  ;;  %v14150_v24 = vcombine.high %v1196_v14, %v1200_v15  ;;  %v1240_v38 = vld [vmem:[%s20678_s1 + $0x25f0] sm:$0xff] }
 0x4dc   :  { %11648 = vmatpush1.bf16.msra.mxu1 %v13599_v52  ;;  %v14149_v52 = vcombine.low %v1196_v14, %v1200_v15  ;;  %v14181_v15 = vcombine.low %v1228_v1, %v1232_v3 }
 0x4dd   :  { %11649 = vmatprep.subr.bf16.mxu1 %v13608_v41  ;;  %v14158_v41 = vcombine.high %v1204_v26, %v1208_v61  ;;  %v14189_v61 = vcombine.low %v1236_v55, %v1240_v38 }
 0x4de   :  { %11279 = vmatpush1.bf16.msra.mxu0 %v14109_v11 }
 0x4df   :  { %11280 = vmatprep.subr.bf16.mxu0 %v14118_v33  ;;  %v701_v33 = vld [vmem:[%s20678_s1 + $0x1518] sm:$0xff] }
 0x4e0   :  { %11650 = vmatpush1.bf16.msra.mxu1 %v13607_v16  ;;  %v13656_v16 = vcombine.high %v701_v33, %v705_v31  ;;  %v13655_v20 = vcombine.low %v701_v33, %v705_v31  ;;  %v1252_v33 = vld [vmem:[%s20678_s1 + $0x2650] sm:$0xff] }
 0x4e1   :  { %11651 = vmatprep.subr.bf16.mxu1 %v13616_v51  ;;  %v709_v51 = vld [vmem:[%s20678_s1 + $0x1558] sm:$0xff]  ;;  %v1256_v31 = vld [vmem:[%s20678_s1 + $0x2670] sm:$0xff] }
 0x4e2   :  { %11281 = vmatpush1.bf16.msra.mxu0 %v14117_v50 }
 0x4e3   :  { %11282 = vmatprep.subr.bf16.mxu0 %v14126_v54  ;;  %v713_v54 = vld [vmem:[%s20678_s1 + $0x1578] sm:$0xff] }
 0x4e4   :  { %11652 = vmatpush1.bf16.msra.mxu1 %v13615_v59  ;;  %v13664_v59 = vcombine.high %v709_v51, %v713_v54  ;;  %v13663_v39 = vcombine.low %v709_v51, %v713_v54  ;;  %v1260_v51 = vld [vmem:[%s20678_s1 + $0x2690] sm:$0xff] }
 0x4e5   :  { %11662 = vmatprep.subr.bf16.mxu1 %v13624_v60  ;;  %v717_v60 = vld [vmem:[%s20678_s1 + $0x1598] sm:$0xff]  ;;  %v1264_v54 = vld [vmem:[%s20678_s1 + $0x26b0] sm:$0xff] }
 0x4e6   :  { %11283 = vmatpush1.bf16.msra.mxu0 %v14125_v28  ;;  %v14174_v28 = vcombine.high %v1220_v32, %v1224_v56  ;;  %v14205_v56 = vcombine.low %v1252_v33, %v1256_v31 }
 0x4e7   :  { %11293 = vmatprep.subr.bf16.mxu0 %v14134_v62  ;;  %11654 = vmatmul.mubr.bf16.vlgmr.msra.gmra.mrb[8].mxu1 %v15849_v23  ;;  %v693_v23 = vld [vmem:[%s20678_s1 + $0x14d8] sm:$0xff] }
 0x4e8   :  { %11663 = vmatpush1.bf16.msra.mxu1 %v13623_v6  ;;  %11694 = vmatprep.mubr.bf16.mxu1 %v15859_v30  ;;  %v13648_v11 = vcombine.high %v693_v23, %v697_v40  ;;  %v1212_v30 = vld [vmem:[%s20678_s1 + $0x2510] sm:$0xff]  ;;  %v13647_v12 = vcombine.low %v693_v23, %v697_v40  ;;  %v721_v62 = vld [vmem:[%s20678_s1 + $0x15b8] sm:$0xff] }
 0x4e9   :  { %11285 = vmatmul.mubr.bf16.vlgmr.msra.gmra.mrb[4].mxu0 %v16685_v46  ;;  %11664 = vmatprep.subr.bf16.mxu1 %v13632_v9  ;;  %v14166_v50 = vcombine.high %v1212_v30, %v1216_v5  ;;  %v14165_v53 = vcombine.low %v1212_v30, %v1216_v5  ;;  %v13672_v6 = vcombine.high %v717_v60, %v721_v62  ;;  %v725_v9 = vld [vmem:[%s20678_s1 + $0x15d8] sm:$0xff]  ;;  %v1244_v23 = vld [vmem:[%s20678_s1 + $0x2610] sm:$0xff] }
 0x4ea   :  { %11294 = vmatpush1.bf16.msra.mxu0 %v14133_v8  ;;  %11325 = vmatprep.mubr.bf16.mxu0 %v16695_v58  ;;  %v14182_v8 = vcombine.high %v1228_v1, %v1232_v3  ;;  %v13671_v14 = vcombine.low %v717_v60, %v721_v62  ;;  %v1248_v40 = vld [vmem:[%s20678_s1 + $0x2630] sm:$0xff]  ;;  %v14213_v3 = vcombine.low %v1260_v51, %v1264_v54 }
 0x4eb   :  { %11295 = vmatprep.subr.bf16.mxu0 %v14142_v13  ;;  %v729_v13 = vld [vmem:[%s20678_s1 + $0x15f8] sm:$0xff]  ;;  %v14197_v5 = vcombine.low %v1244_v23, %v1248_v40  ;;  %v1268_v60 = vld [vmem:[%s20678_s1 + $0x26d0] sm:$0xff] }
 0x4ec   :  { %11665 = vmatpush1.bf16.msra.mxu1 %v13631_v35  ;;  %v13680_v35 = vcombine.high %v725_v9, %v729_v13  ;;  %v13679_v26 = vcombine.low %v725_v9, %v729_v13  ;;  %v1272_v62 = vld [vmem:[%s20678_s1 + $0x26f0] sm:$0xff] }
 0x4ed   :  { %11666 = vmatprep.subr.bf16.mxu1 %v13640_v21  ;;  %v733_v21 = vld [vmem:[%s20678_s1 + $0x1618] sm:$0xff]  ;;  %v1276_v9 = vld [vmem:[%s20678_s1 + $0x2710] sm:$0xff] }
 0x4ee   :  { %11296 = vmatpush1.bf16.msra.mxu0 %v14141_v19  ;;  %v14190_v19 = vcombine.high %v1236_v55, %v1240_v38  ;;  %v1280_v13 = vld [vmem:[%s20678_s1 + $0x2730] sm:$0xff]  ;;  %v14221_v38 = vcombine.low %v1268_v60, %v1272_v62 }
 0x4ef   :  { %11297 = vmatprep.subr.bf16.mxu0 %v14150_v24  ;;  %v737_v24 = vld [vmem:[%s20678_s1 + $0x1638] sm:$0xff] }
 0x4f0   :  { %11667 = vmatpush1.bf16.msra.mxu1 %v13639_v27  ;;  %v13688_v27 = vcombine.high %v733_v21, %v737_v24  ;;  %v13687_v30 = vcombine.low %v733_v21, %v737_v24  ;;  %v1284_v21 = vld [vmem:[%s20678_s1 + $0x2750] sm:$0xff] }
 0x4f1   :  { %11668 = vmatprep.subr.bf16.mxu1 %v13648_v11  ;;  %v741_v11 = vld [vmem:[%s20678_s1 + $0x1658] sm:$0xff]  ;;  %v1288_v24 = vld [vmem:[%s20678_s1 + $0x2770] sm:$0xff] }
 0x4f2   :  { %11298 = vmatpush1.bf16.msra.mxu0 %v14149_v52  ;;  %v14198_v52 = vcombine.high %v1244_v23, %v1248_v40  ;;  %v14229_v40 = vcombine.low %v1276_v9, %v1280_v13 }
 0x4f3   :  { %11299 = vmatprep.subr.bf16.mxu0 %v14158_v41  ;;  %v745_v41 = vld [vmem:[%s20678_s1 + $0x1678] sm:$0xff] }
 0x4f4   :  { %11669 = vmatpush1.bf16.msra.mxu1 %v13647_v12  ;;  %v13696_v12 = vcombine.high %v741_v11, %v745_v41  ;;  %v13695_v32 = vcombine.low %v741_v11, %v745_v41  ;;  %v1292_v11 = vld [vmem:[%s20678_s1 + $0x2790] sm:$0xff] }
 0x4f5   :  { %11670 = vmatprep.subr.bf16.mxu1 %v13656_v16  ;;  %v749_v16 = vld [vmem:[%s20678_s1 + $0x1698] sm:$0xff]  ;;  %v1296_v41 = vld [vmem:[%s20678_s1 + $0x27b0] sm:$0xff] }
 0x4f6   :  { %11300 = vmatpush1.bf16.msra.mxu0 %v14157_v44  ;;  %v14206_v44 = vcombine.high %v1252_v33, %v1256_v31  ;;  %v14237_v31 = vcombine.low %v1284_v21, %v1288_v24 }
 0x4f7   :  { %11301 = vmatprep.subr.bf16.mxu0 %v14166_v50  ;;  %v753_v50 = vld [vmem:[%s20678_s1 + $0x16b8] sm:$0xff] }
 0x4f8   :  { %11671 = vmatpush1.bf16.msra.mxu1 %v13655_v20  ;;  %v13704_v20 = vcombine.high %v749_v16, %v753_v50  ;;  %v13703_v1 = vcombine.low %v749_v16, %v753_v50  ;;  %v1300_v16 = vld [vmem:[%s20678_s1 + $0x27d0] sm:$0xff] }
 0x4f9   :  { %11672 = vmatprep.subr.bf16.mxu1 %v13664_v59  ;;  %v757_v59 = vld [vmem:[%s20678_s1 + $0x16d8] sm:$0xff]  ;;  %v1304_v50 = vld [vmem:[%s20678_s1 + $0x27f0] sm:$0xff] }
 0x4fa   :  { %11302 = vmatpush1.bf16.msra.mxu0 %v14165_v53  ;;  %v14214_v53 = vcombine.high %v1260_v51, %v1264_v54  ;;  %v14245_v54 = vcombine.low %v1292_v11, %v1296_v41 }
 0x4fb   :  { %11303 = vmatprep.subr.bf16.mxu0 %v14174_v28  ;;  %v761_v28 = vld [vmem:[%s20678_s1 + $0x16f8] sm:$0xff] }
 0x4fc   :  { %11673 = vmatpush1.bf16.msra.mxu1 %v13663_v39  ;;  %v13712_v39 = vcombine.high %v757_v59, %v761_v28  ;;  %v13711_v55 = vcombine.low %v757_v59, %v761_v28  ;;  %v1308_v59 = vld [vmem:[%s20678_s1 + $0x2810] sm:$0xff] }
 0x4fd   :  { %11674 = vmatprep.subr.bf16.mxu1 %v13672_v6  ;;  %v765_v6 = vld [vmem:[%s20678_s1 + $0x1718] sm:$0xff]  ;;  %v1312_v28 = vld [vmem:[%s20678_s1 + $0x2830] sm:$0xff] }
 0x4fe   :  { %11304 = vmatpush1.bf16.msra.mxu0 %v14173_v4  ;;  %v14222_v4 = vcombine.high %v1268_v60, %v1272_v62  ;;  %v14253_v62 = vcombine.low %v1300_v16, %v1304_v50 }
 0x4ff   :  { %11305 = vmatprep.subr.bf16.mxu0 %v14182_v8  ;;  %v769_v8 = vld [vmem:[%s20678_s1 + $0x1738] sm:$0xff] }
 0x500   :  { %11675 = vmatpush1.bf16.msra.mxu1 %v13671_v14  ;;  %v13720_v14 = vcombine.high %v765_v6, %v769_v8  ;;  %v13719_v23 = vcombine.low %v765_v6, %v769_v8  ;;  %v1316_v6 = vld [vmem:[%s20678_s1 + $0x2850] sm:$0xff] }
 0x501   :  { %11676 = vmatprep.subr.bf16.mxu1 %v13680_v35  ;;  %v773_v35 = vld [vmem:[%s20678_s1 + $0x1758] sm:$0xff]  ;;  %v1320_v8 = vld [vmem:[%s20678_s1 + $0x2870] sm:$0xff] }
 0x502   :  { %11306 = vmatpush1.bf16.msra.mxu0 %v14181_v15  ;;  %v14230_v15 = vcombine.high %v1276_v9, %v1280_v13  ;;  %v14261_v13 = vcombine.low %v1308_v59, %v1312_v28 }
 0x503   :  { %11307 = vmatprep.subr.bf16.mxu0 %v14190_v19  ;;  %v777_v19 = vld [vmem:[%s20678_s1 + $0x1778] sm:$0xff] }
 0x504   :  { %11677 = vmatpush1.bf16.msra.mxu1 %v13679_v26  ;;  %v13728_v26 = vcombine.high %v773_v35, %v777_v19  ;;  %v13727_v33 = vcombine.low %v773_v35, %v777_v19  ;;  %v1324_v35 = vld [vmem:[%s20678_s1 + $0x2890] sm:$0xff] }
 0x505   :  { %11678 = vmatprep.subr.bf16.mxu1 %v13688_v27  ;;  %v781_v27 = vld [vmem:[%s20678_s1 + $0x1798] sm:$0xff]  ;;  %v1328_v19 = vld [vmem:[%s20678_s1 + $0x28b0] sm:$0xff] }
 0x506   :  { %11308 = vmatpush1.bf16.msra.mxu0 %v14189_v61  ;;  %v14238_v61 = vcombine.high %v1284_v21, %v1288_v24  ;;  %v14269_v24 = vcombine.low %v1316_v6, %v1320_v8 }
 0x507   :  { %11309 = vmatprep.subr.bf16.mxu0 %v14198_v52  ;;  %v785_v52 = vld [vmem:[%s20678_s1 + $0x17b8] sm:$0xff] }
 0x508   :  { %11679 = vmatpush1.bf16.msra.mxu1 %v13687_v30  ;;  %v13736_v30 = vcombine.high %v781_v27, %v785_v52  ;;  %v13735_v51 = vcombine.low %v781_v27, %v785_v52  ;;  %v1336_v27 = vld [vmem:[%s20678_s1 + $0x28f0] sm:$0xff] }
 0x509   :  { %11680 = vmatprep.subr.bf16.mxu1 %v13696_v12  ;;  %v789_v12 = vld [vmem:[%s20678_s1 + $0x17d8] sm:$0xff] }
 0x50a   :  { %11310 = vmatpush1.bf16.msra.mxu0 %v14197_v5  ;;  %v14246_v5 = vcombine.high %v1292_v11, %v1296_v41  ;;  %v14277_v11 = vcombine.low %v1324_v35, %v1328_v19 }
 0x50b   :  { %11311 = vmatprep.subr.bf16.mxu0 %v14206_v44  ;;  %v793_v44 = vld [vmem:[%s20678_s1 + $0x17f8] sm:$0xff] }
 0x50c   :  { %11681 = vmatpush1.bf16.msra.mxu1 %v13695_v32  ;;  %v13744_v32 = vcombine.high %v789_v12, %v793_v44  ;;  %v13743_v60 = vcombine.low %v789_v12, %v793_v44 }
 0x50d   :  { %11682 = vmatprep.subr.bf16.mxu1 %v13704_v20  ;;  %v797_v20 = vld [vmem:[%s20678_s1 + $0x1818] sm:$0xff] }
 0x50e   :  { %11312 = vmatpush1.bf16.msra.mxu0 %v14205_v56  ;;  %v14254_v56 = vcombine.high %v1300_v16, %v1304_v50 }
 0x50f   :  { %11313 = vmatprep.subr.bf16.mxu0 %v14214_v53  ;;  %v801_v53 = vld [vmem:[%s20678_s1 + $0x1838] sm:$0xff] }
 0x510   :  { %11683 = vmatpush1.bf16.msra.mxu1 %v13703_v1  ;;  %v13752_v1 = vcombine.high %v797_v20, %v801_v53  ;;  %v13751_v9 = vcombine.low %v797_v20, %v801_v53 }
 0x511   :  { %11684 = vmatprep.subr.bf16.mxu1 %v13712_v39  ;;  %v805_v39 = vld [vmem:[%s20678_s1 + $0x1858] sm:$0xff] }
 0x512   :  { %11314 = vmatpush1.bf16.msra.mxu0 %v14213_v3  ;;  %v14262_v3 = vcombine.high %v1308_v59, %v1312_v28 }
 0x513   :  { %11315 = vmatprep.subr.bf16.mxu0 %v14222_v4  ;;  %v809_v4 = vld [vmem:[%s20678_s1 + $0x1878] sm:$0xff] }
 0x514   :  { %11685 = vmatpush1.bf16.msra.mxu1 %v13711_v55  ;;  %v13760_v55 = vcombine.high %v805_v39, %v809_v4  ;;  %v13759_v21 = vcombine.low %v805_v39, %v809_v4 }
 0x515   :  { %11686 = vmatprep.subr.bf16.mxu1 %v13720_v14  ;;  %v813_v14 = vld [vmem:[%s20678_s1 + $0x1898] sm:$0xff] }
 0x516   :  { %11316 = vmatpush1.bf16.msra.mxu0 %v14221_v38  ;;  %v14270_v38 = vcombine.high %v1316_v6, %v1320_v8 }
 0x517   :  { %11317 = vmatprep.subr.bf16.mxu0 %v14230_v15  ;;  %v817_v15 = vld [vmem:[%s20678_s1 + $0x18b8] sm:$0xff] }
 0x518   :  { %11687 = vmatpush1.bf16.msra.mxu1 %v13719_v23  ;;  %v13768_v23 = vcombine.high %v813_v14, %v817_v15  ;;  %v13767_v52 = vcombine.low %v813_v14, %v817_v15 }
 0x519   :  { %11688 = vmatprep.subr.bf16.mxu1 %v13728_v26  ;;  %v825_v26 = vld [vmem:[%s20678_s1 + $0x18f8] sm:$0xff] }
 0x51a   :  { %11318 = vmatpush1.bf16.msra.mxu0 %v14229_v40  ;;  %v14278_v40 = vcombine.high %v1324_v35, %v1328_v19 }
 0x51b   :  { %11319 = vmatprep.subr.bf16.mxu0 %v14238_v61  ;;  %v1332_v61 = vld [vmem:[%s20678_s1 + $0x28d0] sm:$0xff] }
 0x51c   :  { %11689 = vmatpush1.bf16.msra.mxu1 %v13727_v33  ;;  %v14286_v33 = vcombine.high %v1332_v61, %v1336_v27  ;;  %v14285_v44 = vcombine.low %v1332_v61, %v1336_v27 }
 0x51d   :  { %11690 = vmatprep.subr.bf16.mxu1 %v13736_v30  ;;  %v833_v30 = vld [vmem:[%s20678_s1 + $0x1938] sm:$0xff] }
 0x51e   :  { %11320 = vmatpush1.bf16.msra.mxu0 %v14237_v31  ;;  %v829_v31 = vld [vmem:[%s20678_s1 + $0x1918] sm:$0xff] }
 0x51f   :  { %11321 = vmatprep.subr.bf16.mxu0 %v14246_v5  ;;  %v1344_v5 = vld [vmem:[%s20678_s1 + $0x2930] sm:$0xff]  ;;  %v13784_v16 = vcombine.high %v829_v31, %v833_v30  ;;  %v13783_v20 = vcombine.low %v829_v31, %v833_v30 }
 0x520   :  { %11691 = vmatpush1.bf16.msra.mxu1 %v13735_v51  ;;  %v837_v51 = vld [vmem:[%s20678_s1 + $0x1958] sm:$0xff] }
 0x521   :  { %11692 = vmatprep.subr.bf16.mxu1 %v13744_v32  ;;  %v1348_v32 = vld [vmem:[%s20678_s1 + $0x2950] sm:$0xff] }
 0x522   :  { %11322 = vmatpush1.bf16.msra.mxu0 %v14245_v54  ;;  %v841_v54 = vld [vmem:[%s20678_s1 + $0x1978] sm:$0xff] }
 0x523   :  { %11323 = vmatprep.subr.bf16.mxu0 %v14254_v56  ;;  %v1352_v56 = vld [vmem:[%s20678_s1 + $0x2970] sm:$0xff]  ;;  %v13792_v59 = vcombine.high %v837_v51, %v841_v54  ;;  %v13791_v39 = vcombine.low %v837_v51, %v841_v54 }
 0x524   :  { %11693 = vmatpush1.bf16.msra.mxu1 %v13743_v60  ;;  %v14302_v28 = vcombine.high %v1348_v32, %v1352_v56  ;;  %v845_v60 = vld [vmem:[%s20678_s1 + $0x1998] sm:$0xff]  ;;  %v14301_v4 = vcombine.low %v1348_v32, %v1352_v56 }
 0x525   :  { %11703 = vmatprep.subr.bf16.mxu1 %v13752_v1  ;;  %v1356_v1 = vld [vmem:[%s20678_s1 + $0x2990] sm:$0xff] }
 0x526   :  { %11324 = vmatpush1.bf16.msra.mxu0 %v14253_v62  ;;  %v849_v62 = vld [vmem:[%s20678_s1 + $0x19b8] sm:$0xff] }
 0x527   :  { %11334 = vmatprep.subr.bf16.mxu0 %v14262_v3  ;;  %11695 = vmatmul.mubr.bf16.vlgmr.msra.gmra.mrb[8].mxu1 %v16060_v0  ;;  %v821_v0 = vld [vmem:[%s20678_s1 + $0x18d8] sm:$0xff]  ;;  %v1360_v3 = vld [vmem:[%s20678_s1 + $0x29b0] sm:$0xff]  ;;  %v13800_v6 = vcombine.high %v845_v60, %v849_v62  ;;  %v13799_v14 = vcombine.low %v845_v60, %v849_v62 }
 0x528   :  { %11704 = vmatpush1.bf16.msra.mxu1 %v13751_v9  ;;  %11735 = vmatprep.mubr.bf16.mxu1 %v16069_v7  ;;  %v13776_v41 = vcombine.high %v821_v0, %v825_v26  ;;  %v1340_v7 = vld [vmem:[%s20678_s1 + $0x2910] sm:$0xff]  ;;  %v13775_v12 = vcombine.low %v821_v0, %v825_v26  ;;  %v14310_v8 = vcombine.high %v1356_v1, %v1360_v3  ;;  %v853_v9 = vld [vmem:[%s20678_s1 + $0x19d8] sm:$0xff] }
 0x529   :  { %11326 = vmatmul.mubr.bf16.vlgmr.msra.gmra.mrb[4].mxu0 %v16896_v2  ;;  %11705 = vmatprep.subr.bf16.mxu1 %v13760_v55  ;;  %v14294_v50 = vcombine.high %v1340_v7, %v1344_v5  ;;  %v14293_v53 = vcombine.low %v1340_v7, %v1344_v5  ;;  %v1364_v55 = vld [vmem:[%s20678_s1 + $0x29d0] sm:$0xff]  ;;  %v14309_v15 = vcombine.low %v1356_v1, %v1360_v3 }
 0x52a   :  { %11335 = vmatpush1.bf16.msra.mxu0 %v14261_v13  ;;  %11366 = vmatprep.mubr.bf16.mxu0 %v16905_v10  ;;  %v857_v13 = vld [vmem:[%s20678_s1 + $0x19f8] sm:$0xff] }
 0x52b   :  { %11336 = vmatprep.subr.bf16.mxu0 %v14270_v38  ;;  %v1368_v38 = vld [vmem:[%s20678_s1 + $0x29f0] sm:$0xff]  ;;  %v13808_v35 = vcombine.high %v853_v9, %v857_v13  ;;  %v13807_v0 = vcombine.low %v853_v9, %v857_v13 }
 0x52c   :  { %11706 = vmatpush1.bf16.msra.mxu1 %v13759_v21  ;;  %v14318_v19 = vcombine.high %v1364_v55, %v1368_v38  ;;  %v861_v21 = vld [vmem:[%s20678_s1 + $0x1a18] sm:$0xff]  ;;  %v14317_v26 = vcombine.low %v1364_v55, %v1368_v38 }
 0x52d   :  { %11707 = vmatprep.subr.bf16.mxu1 %v13768_v23  ;;  %v1372_v23 = vld [vmem:[%s20678_s1 + $0x2a10] sm:$0xff] }
 0x52e   :  { %11337 = vmatpush1.bf16.msra.mxu0 %v14269_v24  ;;  %v865_v24 = vld [vmem:[%s20678_s1 + $0x1a38] sm:$0xff] }
 0x52f   :  { %11338 = vmatprep.subr.bf16.mxu0 %v14278_v40  ;;  %v1376_v40 = vld [vmem:[%s20678_s1 + $0x2a30] sm:$0xff]  ;;  %v13816_v61 = vcombine.high %v861_v21, %v865_v24  ;;  %v13815_v31 = vcombine.low %v861_v21, %v865_v24 }
 0x530   :  { %11708 = vmatpush1.bf16.msra.mxu1 %v13767_v52  ;;  %v14326_v27 = vcombine.high %v1372_v23, %v1376_v40  ;;  %v869_v52 = vld [vmem:[%s20678_s1 + $0x1a58] sm:$0xff]  ;;  %v14325_v30 = vcombine.low %v1372_v23, %v1376_v40 }
 0x531   :  { %11709 = vmatprep.subr.bf16.mxu1 %v13776_v41  ;;  %v1380_v41 = vld [vmem:[%s20678_s1 + $0x2a50] sm:$0xff] }
 0x532   :  { %11339 = vmatpush1.bf16.msra.mxu0 %v14277_v11  ;;  %v873_v11 = vld [vmem:[%s20678_s1 + $0x1a78] sm:$0xff] }
 0x533   :  { %11340 = vmatprep.subr.bf16.mxu0 %v14286_v33  ;;  %v1384_v33 = vld [vmem:[%s20678_s1 + $0x2a70] sm:$0xff]  ;;  %v13824_v7 = vcombine.high %v869_v52, %v873_v11  ;;  %v13823_v51 = vcombine.low %v869_v52, %v873_v11 }
 0x534   :  { %11710 = vmatpush1.bf16.msra.mxu1 %v13775_v12  ;;  %v14334_v5 = vcombine.high %v1380_v41, %v1384_v33  ;;  %v877_v12 = vld [vmem:[%s20678_s1 + $0x1a98] sm:$0xff]  ;;  %v14333_v54 = vcombine.low %v1380_v41, %v1384_v33 }
 0x535   :  { %11711 = vmatprep.subr.bf16.mxu1 %v13784_v16  ;;  %v1388_v16 = vld [vmem:[%s20678_s1 + $0x2a90] sm:$0xff] }
 0x536   :  { %11341 = vmatpush1.bf16.msra.mxu0 %v14285_v44  ;;  %v881_v44 = vld [vmem:[%s20678_s1 + $0x1ab8] sm:$0xff] }
 0x537   :  { %11342 = vmatprep.subr.bf16.mxu0 %v14294_v50  ;;  %v1392_v50 = vld [vmem:[%s20678_s1 + $0x2ab0] sm:$0xff]  ;;  %v13832_v32 = vcombine.high %v877_v12, %v881_v44  ;;  %v13831_v60 = vcombine.low %v877_v12, %v881_v44 }
 0x538   :  { %11712 = vmatpush1.bf16.msra.mxu1 %v13783_v20  ;;  %v14342_v56 = vcombine.high %v1388_v16, %v1392_v50  ;;  %v885_v20 = vld [vmem:[%s20678_s1 + $0x1ad8] sm:$0xff]  ;;  %v14341_v62 = vcombine.low %v1388_v16, %v1392_v50 }
 0x539   :  { %11713 = vmatprep.subr.bf16.mxu1 %v13792_v59  ;;  %v1396_v59 = vld [vmem:[%s20678_s1 + $0x2ad0] sm:$0xff] }
 0x53a   :  { %11343 = vmatpush1.bf16.msra.mxu0 %v14293_v53  ;;  %v889_v53 = vld [vmem:[%s20678_s1 + $0x1af8] sm:$0xff] }
 0x53b   :  { %11344 = vmatprep.subr.bf16.mxu0 %v14302_v28  ;;  %v1400_v28 = vld [vmem:[%s20678_s1 + $0x2af0] sm:$0xff]  ;;  %v13840_v1 = vcombine.high %v885_v20, %v889_v53  ;;  %v13839_v9 = vcombine.low %v885_v20, %v889_v53 }
 0x53c   :  { %11714 = vmatpush1.bf16.msra.mxu1 %v13791_v39  ;;  %v14350_v3 = vcombine.high %v1396_v59, %v1400_v28  ;;  %v893_v39 = vld [vmem:[%s20678_s1 + $0x1b18] sm:$0xff]  ;;  %v14349_v13 = vcombine.low %v1396_v59, %v1400_v28 }
 0x53d   :  { %11715 = vmatprep.subr.bf16.mxu1 %v13800_v6  ;;  %v1404_v6 = vld [vmem:[%s20678_s1 + $0x2b10] sm:$0xff] }
 0x53e   :  { %11345 = vmatpush1.bf16.msra.mxu0 %v14301_v4  ;;  %v897_v4 = vld [vmem:[%s20678_s1 + $0x1b38] sm:$0xff] }
 0x53f   :  { %11346 = vmatprep.subr.bf16.mxu0 %v14310_v8  ;;  %v1408_v8 = vld [vmem:[%s20678_s1 + $0x2b30] sm:$0xff]  ;;  %v13848_v55 = vcombine.high %v893_v39, %v897_v4  ;;  %v13847_v21 = vcombine.low %v893_v39, %v897_v4 }
 0x540   :  { %11716 = vmatpush1.bf16.msra.mxu1 %v13799_v14  ;;  %v14358_v38 = vcombine.high %v1404_v6, %v1408_v8  ;;  %v901_v14 = vld [vmem:[%s20678_s1 + $0x1b58] sm:$0xff]  ;;  %v14357_v24 = vcombine.low %v1404_v6, %v1408_v8 }
 0x541   :  { %11717 = vmatprep.subr.bf16.mxu1 %v13808_v35  ;;  %v1412_v35 = vld [vmem:[%s20678_s1 + $0x2b50] sm:$0xff] }
 0x542   :  { %11347 = vmatpush1.bf16.msra.mxu0 %v14309_v15  ;;  %v905_v15 = vld [vmem:[%s20678_s1 + $0x1b78] sm:$0xff] }
 0x543   :  { %11348 = vmatprep.subr.bf16.mxu0 %v14318_v19  ;;  %v1416_v19 = vld [vmem:[%s20678_s1 + $0x2b70] sm:$0xff]  ;;  %v13856_v23 = vcombine.high %v901_v14, %v905_v15  ;;  %v13855_v52 = vcombine.low %v901_v14, %v905_v15 }
 0x544   :  { %11718 = vmatpush1.bf16.msra.mxu1 %v13807_v0  ;;  %v14366_v40 = vcombine.high %v1412_v35, %v1416_v19  ;;  %v909_v0 = vld [vmem:[%s20678_s1 + $0x1b98] sm:$0xff]  ;;  %v14365_v11 = vcombine.low %v1412_v35, %v1416_v19 }
 0x545   :  { %11719 = vmatprep.subr.bf16.mxu1 %v13816_v61  ;;  %v1420_v61 = vld [vmem:[%s20678_s1 + $0x2b90] sm:$0xff] }
 0x546   :  { %11349 = vmatpush1.bf16.msra.mxu0 %v14317_v26  ;;  %v913_v26 = vld [vmem:[%s20678_s1 + $0x1bb8] sm:$0xff] }
 0x547   :  { %11350 = vmatprep.subr.bf16.mxu0 %v14326_v27  ;;  %v1424_v27 = vld [vmem:[%s20678_s1 + $0x2bb0] sm:$0xff]  ;;  %v13864_v41 = vcombine.high %v909_v0, %v913_v26  ;;  %v13863_v12 = vcombine.low %v909_v0, %v913_v26 }
 0x548   :  { %11720 = vmatpush1.bf16.msra.mxu1 %v13815_v31  ;;  %v14374_v33 = vcombine.high %v1420_v61, %v1424_v27  ;;  %v917_v31 = vld [vmem:[%s20678_s1 + $0x1bd8] sm:$0xff]  ;;  %v14373_v44 = vcombine.low %v1420_v61, %v1424_v27 }
 0x549   :  { %11721 = vmatprep.subr.bf16.mxu1 %v13824_v7  ;;  %v1428_v7 = vld [vmem:[%s20678_s1 + $0x2bd0] sm:$0xff]  ;;  %v957_v27 = vld [vmem:[%s20678_s1 + $0x1d18] sm:$0xff] }
 0x54a   :  { %11351 = vmatpush1.bf16.msra.mxu0 %v14325_v30  ;;  %v921_v30 = vld [vmem:[%s20678_s1 + $0x1bf8] sm:$0xff] }
 0x54b   :  { %11352 = vmatprep.subr.bf16.mxu0 %v14334_v5  ;;  %v1432_v5 = vld [vmem:[%s20678_s1 + $0x2bf0] sm:$0xff]  ;;  %v13872_v16 = vcombine.high %v917_v31, %v921_v30  ;;  %v13871_v20 = vcombine.low %v917_v31, %v921_v30 }
 0x54c   :  { %11722 = vmatpush1.bf16.msra.mxu1 %v13823_v51  ;;  %v14382_v50 = vcombine.high %v1428_v7, %v1432_v5  ;;  %v925_v51 = vld [vmem:[%s20678_s1 + $0x1c18] sm:$0xff]  ;;  %v14381_v53 = vcombine.low %v1428_v7, %v1432_v5 }
 0x54d   :  { %11723 = vmatprep.subr.bf16.mxu1 %v13832_v32  ;;  %v1436_v32 = vld [vmem:[%s20678_s1 + $0x2c10] sm:$0xff]  ;;  %v965_v7 = vld [vmem:[%s20678_s1 + $0x1d58] sm:$0xff] }
 0x54e   :  { %11353 = vmatpush1.bf16.msra.mxu0 %v14333_v54  ;;  %v929_v54 = vld [vmem:[%s20678_s1 + $0x1c38] sm:$0xff] }
 0x54f   :  { %11354 = vmatprep.subr.bf16.mxu0 %v14342_v56  ;;  %v1440_v56 = vld [vmem:[%s20678_s1 + $0x2c30] sm:$0xff]  ;;  %v13880_v59 = vcombine.high %v925_v51, %v929_v54  ;;  %v13879_v39 = vcombine.low %v925_v51, %v929_v54  ;;  %v969_v5 = vld [vmem:[%s20678_s1 + $0x1d78] sm:$0xff] }
 0x550   :  { %11724 = vmatpush1.bf16.msra.mxu1 %v13831_v60  ;;  %v14390_v28 = vcombine.high %v1436_v32, %v1440_v56  ;;  %v933_v60 = vld [vmem:[%s20678_s1 + $0x1c58] sm:$0xff]  ;;  %v14389_v4 = vcombine.low %v1436_v32, %v1440_v56  ;;  %v13920_v51 = vcombine.high %v965_v7, %v969_v5 }
 0x551   :  { %11725 = vmatprep.subr.bf16.mxu1 %v13840_v1  ;;  %v1444_v1 = vld [vmem:[%s20678_s1 + $0x2c50] sm:$0xff]  ;;  %v973_v32 = vld [vmem:[%s20678_s1 + $0x1d98] sm:$0xff] }
 0x552   :  { %11355 = vmatpush1.bf16.msra.mxu0 %v14341_v62  ;;  %v937_v62 = vld [vmem:[%s20678_s1 + $0x1c78] sm:$0xff] }
 0x553   :  { %11356 = vmatprep.subr.bf16.mxu0 %v14350_v3  ;;  %v1448_v3 = vld [vmem:[%s20678_s1 + $0x2c70] sm:$0xff]  ;;  %v13888_v6 = vcombine.high %v933_v60, %v937_v62  ;;  %v13887_v14 = vcombine.low %v933_v60, %v937_v62  ;;  %v977_v56 = vld [vmem:[%s20678_s1 + $0x1db8] sm:$0xff] }
 0x554   :  { %11726 = vmatpush1.bf16.msra.mxu1 %v13839_v9  ;;  %v14398_v8 = vcombine.high %v1444_v1, %v1448_v3  ;;  %v941_v9 = vld [vmem:[%s20678_s1 + $0x1c98] sm:$0xff]  ;;  %v14397_v15 = vcombine.low %v1444_v1, %v1448_v3  ;;  %v13928_v60 = vcombine.high %v973_v32, %v977_v56 }
 0x555   :  { %11727 = vmatprep.subr.bf16.mxu1 %v13848_v55  ;;  %v1452_v55 = vld [vmem:[%s20678_s1 + $0x2c90] sm:$0xff]  ;;  %v981_v1 = vld [vmem:[%s20678_s1 + $0x1dd8] sm:$0xff] }
 0x556   :  { %11357 = vmatpush1.bf16.msra.mxu0 %v14349_v13  ;;  %v945_v13 = vld [vmem:[%s20678_s1 + $0x1cb8] sm:$0xff] }
 0x557   :  { %11358 = vmatprep.subr.bf16.mxu0 %v14358_v38  ;;  %v1456_v38 = vld [vmem:[%s20678_s1 + $0x2cb0] sm:$0xff]  ;;  %v13896_v35 = vcombine.high %v941_v9, %v945_v13  ;;  %v985_v3 = vld [vmem:[%s20678_s1 + $0x1df8] sm:$0xff] }
 0x558   :  { %11728 = vmatpush1.bf16.msra.mxu1 %v13847_v21  ;;  %v14406_v19 = vcombine.high %v1452_v55, %v1456_v38  ;;  %v953_v21 = vld [vmem:[%s20678_s1 + $0x1cf8] sm:$0xff]  ;;  %v14405_v0 = vcombine.low %v1452_v55, %v1456_v38 }
 0x559   :  { %11729 = vmatprep.subr.bf16.mxu1 %v13856_v23  ;;  %v1464_v23 = vld [vmem:[%s20678_s1 + $0x2cf0] sm:$0xff]  ;;  %v989_v55 = vld [vmem:[%s20678_s1 + $0x1e18] sm:$0xff] }
 0x55a   :  { %11359 = vmatpush1.bf16.msra.mxu0 %v14357_v24  ;;  %v1460_v24 = vld [vmem:[%s20678_s1 + $0x2cd0] sm:$0xff]  ;;  %v993_v38 = vld [vmem:[%s20678_s1 + $0x1e38] sm:$0xff] }
 0x55b   :  { %11360 = vmatprep.subr.bf16.mxu0 %v14366_v40  ;;  %v13895_v40 = vcombine.low %v941_v9, %v945_v13  ;;  %v14414_v61 = vcombine.high %v1460_v24, %v1464_v23  ;;  %v13936_v9 = vcombine.high %v981_v1, %v985_v3 }
 0x55c   :  { %11730 = vmatpush1.bf16.msra.mxu1 %v13855_v52  ;;  %v961_v52 = vld [vmem:[%s20678_s1 + $0x1d38] sm:$0xff] }
 0x55d   :  { %11731 = vmatprep.subr.bf16.mxu1 %v13864_v41  ;;  %v13912_v31 = vcombine.high %v957_v27, %v961_v52 }
 0x55e   :  { %11361 = vmatpush1.bf16.msra.mxu0 %v14365_v11  ;;  %v1472_v11 = vld [vmem:[%s20678_s1 + $0x2d30] sm:$0xff] }
 0x55f   :  { %11362 = vmatprep.subr.bf16.mxu0 %v14374_v33  ;;  %v14413_v33 = vcombine.low %v1460_v24, %v1464_v23  ;;  %v997_v24 = vld [vmem:[%s20678_s1 + $0x1e58] sm:$0xff] }
 0x560   :  { %11732 = vmatpush1.bf16.msra.mxu1 %v13863_v12  ;;  %v1476_v12 = vld [vmem:[%s20678_s1 + $0x2d50] sm:$0xff]  ;;  %v1001_v23 = vld [vmem:[%s20678_s1 + $0x1e78] sm:$0xff] }
 0x561   :  { %11733 = vmatprep.subr.bf16.mxu1 %v13872_v16  ;;  %v13911_v16 = vcombine.low %v957_v27, %v961_v52  ;;  %v13952_v27 = vcombine.high %v997_v24, %v1001_v23 }
 0x562   :  { %11363 = vmatpush1.bf16.msra.mxu0 %v14373_v44  ;;  %v1480_v44 = vld [vmem:[%s20678_s1 + $0x2d70] sm:$0xff] }
 0x563   :  { %11364 = vmatprep.subr.bf16.mxu0 %v14382_v50  ;;  %v14430_v54 = vcombine.high %v1476_v12, %v1480_v44 }
 0x564   :  { %11734 = vmatpush1.bf16.msra.mxu1 %v13871_v20  ;;  %v1484_v20 = vld [vmem:[%s20678_s1 + $0x2d90] sm:$0xff] }
 0x565   :  { %11744 = vmatprep.subr.bf16.mxu1 %v13880_v59  ;;  %v13919_v59 = vcombine.low %v965_v7, %v969_v5 }
 0x566   :  { %11365 = vmatpush1.bf16.msra.mxu0 %v14381_v53  ;;  %v1488_v53 = vld [vmem:[%s20678_s1 + $0x2db0] sm:$0xff] }
 0x567   :  { %11375 = vmatprep.subr.bf16.mxu0 %v14390_v28  ;;  %11736 = vmatmul.mubr.bf16.vlgmr.msra.gmra.mrb[8].mxu1 %v16263_v42  ;;  %v949_v42 = vld [vmem:[%s20678_s1 + $0x1cd8] sm:$0xff]  ;;  %v14429_v28 = vcombine.low %v1476_v12, %v1480_v44  ;;  %v14438_v62 = vcombine.high %v1484_v20, %v1488_v53 }
 0x568   :  { %11745 = vmatpush1.bf16.msra.mxu1 %v13879_v39  ;;  %11776 = vmatprep.mubr.bf16.mxu1 %v16273_v49  ;;  %v13904_v26 = vcombine.high %v949_v42, %v953_v21  ;;  %v1468_v49 = vld [vmem:[%s20678_s1 + $0x2d10] sm:$0xff]  ;;  %v13903_v41 = vcombine.low %v949_v42, %v953_v21  ;;  %v13944_v42 = vcombine.high %v989_v55, %v993_v38  ;;  %v1013_v12 = vld [vmem:[%s20678_s1 + $0x1ed8] sm:$0xff] }
 0x569   :  { %11367 = vmatmul.mubr.bf16.vlgmr.msra.gmra.mrb[4].mxu0 %v17099_v25  ;;  %11746 = vmatprep.subr.bf16.mxu1 %v13888_v6  ;;  %v14422_v30 = vcombine.high %v1468_v49, %v1472_v11  ;;  %v14421_v50 = vcombine.low %v1468_v49, %v1472_v11  ;;  %v1492_v39 = vld [vmem:[%s20678_s1 + $0x2dd0] sm:$0xff]  ;;  %v13927_v6 = vcombine.low %v973_v32, %v977_v56  ;;  %v1005_v49 = vld [vmem:[%s20678_s1 + $0x1e98] sm:$0xff] }
 0x56a   :  { %11376 = vmatpush1.bf16.msra.mxu0 %v14389_v4  ;;  %11407 = vmatprep.mubr.bf16.mxu0 %v17109_v34  ;;  %v1496_v4 = vld [vmem:[%s20678_s1 + $0x2df0] sm:$0xff]  ;;  %v1009_v11 = vld [vmem:[%s20678_s1 + $0x1eb8] sm:$0xff] }
 0x56b   :  { %11377 = vmatprep.subr.bf16.mxu0 %v14398_v8  ;;  %v14437_v8 = vcombine.low %v1484_v20, %v1488_v53  ;;  %v14446_v13 = vcombine.high %v1492_v39, %v1496_v4  ;;  %v13960_v7 = vcombine.high %v1005_v49, %v1009_v11  ;;  %v1017_v44 = vld [vmem:[%s20678_s1 + $0x1ef8] sm:$0xff] }
 0x56c   :  { %11747 = vmatpush1.bf16.msra.mxu1 %v13887_v14  ;;  %v1500_v14 = vld [vmem:[%s20678_s1 + $0x2e10] sm:$0xff]  ;;  %v13968_v32 = vcombine.high %v1013_v12, %v1017_v44  ;;  %v1021_v20 = vld [vmem:[%s20678_s1 + $0x1f18] sm:$0xff] }
 0x56d   :  { %11748 = vmatprep.subr.bf16.mxu1 %v13896_v35  ;;  %v13935_v35 = vcombine.low %v981_v1, %v985_v3  ;;  %v1025_v53 = vld [vmem:[%s20678_s1 + $0x1f38] sm:$0xff] }
 0x56e   :  { %11378 = vmatpush1.bf16.msra.mxu0 %v14397_v15  ;;  %v1504_v15 = vld [vmem:[%s20678_s1 + $0x2e30] sm:$0xff]  ;;  %v13976_v1 = vcombine.high %v1021_v20, %v1025_v53 }
 0x56f   :  { %11379 = vmatprep.subr.bf16.mxu0 %v14406_v19  ;;  %v14445_v19 = vcombine.low %v1492_v39, %v1496_v4  ;;  %v14454_v21 = vcombine.high %v1500_v14, %v1504_v15  ;;  %v1029_v39 = vld [vmem:[%s20678_s1 + $0x1f58] sm:$0xff] }
 0x570   :  { %11749 = vmatpush1.bf16.msra.mxu1 %v13895_v40  ;;  %v1508_v40 = vld [vmem:[%s20678_s1 + $0x2e50] sm:$0xff]  ;;  %v1033_v4 = vld [vmem:[%s20678_s1 + $0x1f78] sm:$0xff] }
 0x571   :  { %11750 = vmatprep.subr.bf16.mxu1 %v13904_v26  ;;  %v13943_v26 = vcombine.low %v989_v55, %v993_v38  ;;  %v13984_v55 = vcombine.high %v1029_v39, %v1033_v4 }
 0x572   :  { %11380 = vmatpush1.bf16.msra.mxu0 %v14405_v0  ;;  %v1512_v0 = vld [vmem:[%s20678_s1 + $0x2e70] sm:$0xff] }
 0x573   :  { %11381 = vmatprep.subr.bf16.mxu0 %v14414_v61  ;;  %v14453_v61 = vcombine.low %v1500_v14, %v1504_v15  ;;  %v14462_v52 = vcombine.high %v1508_v40, %v1512_v0  ;;  %v1037_v14 = vld [vmem:[%s20678_s1 + $0x1f98] sm:$0xff] }
 0x574   :  { %11751 = vmatpush1.bf16.msra.mxu1 %v13903_v41  ;;  %v1516_v41 = vld [vmem:[%s20678_s1 + $0x2e90] sm:$0xff]  ;;  %v1041_v15 = vld [vmem:[%s20678_s1 + $0x1fb8] sm:$0xff] }
 0x575   :  { %11752 = vmatprep.subr.bf16.mxu1 %v13912_v31  ;;  %v13951_v31 = vcombine.low %v997_v24, %v1001_v23  ;;  %v13992_v24 = vcombine.high %v1037_v14, %v1041_v15 }
 0x576   :  { %11382 = vmatpush1.bf16.msra.mxu0 %v14413_v33  ;;  %v1520_v33 = vld [vmem:[%s20678_s1 + $0x2eb0] sm:$0xff] }
 0x577   :  { %11383 = vmatprep.subr.bf16.mxu0 %v14422_v30  ;;  %v14461_v30 = vcombine.low %v1508_v40, %v1512_v0  ;;  %v14470_v5 = vcombine.high %v1516_v41, %v1520_v33  ;;  %v1045_v40 = vld [vmem:[%s20678_s1 + $0x1fd8] sm:$0xff] }
 0x578   :  { %11753 = vmatpush1.bf16.msra.mxu1 %v13911_v16  ;;  %v1524_v16 = vld [vmem:[%s20678_s1 + $0x2ed0] sm:$0xff]  ;;  %v1049_v0 = vld [vmem:[%s20678_s1 + $0x1ff8] sm:$0xff] }
 0x579   :  { %11754 = vmatprep.subr.bf16.mxu1 %v13920_v51  ;;  %v13959_v51 = vcombine.low %v1005_v49, %v1009_v11  ;;  %v14000_v49 = vcombine.high %v1045_v40, %v1049_v0 }
 0x57a   :  { %11384 = vmatpush1.bf16.msra.mxu0 %v14421_v50  ;;  %v1528_v50 = vld [vmem:[%s20678_s1 + $0x2ef0] sm:$0xff] }
 0x57b   :  { %11385 = vmatprep.subr.bf16.mxu0 %v14430_v54  ;;  %v14469_v54 = vcombine.low %v1516_v41, %v1520_v33  ;;  %v14478_v56 = vcombine.high %v1524_v16, %v1528_v50  ;;  %v1053_v41 = vld [vmem:[%s20678_s1 + $0x2018] sm:$0xff] }
 0x57c   :  { %11755 = vmatpush1.bf16.msra.mxu1 %v13919_v59  ;;  %v1532_v59 = vld [vmem:[%s20678_s1 + $0x2f10] sm:$0xff]  ;;  %v1057_v33 = vld [vmem:[%s20678_s1 + $0x2038] sm:$0xff] }
 0x57d   :  { %11756 = vmatprep.subr.bf16.mxu1 %v13928_v60  ;;  %v13967_v60 = vcombine.low %v1013_v12, %v1017_v44  ;;  %v14008_v12 = vcombine.high %v1053_v41, %v1057_v33 }
 0x57e   :  { %11386 = vmatpush1.bf16.msra.mxu0 %v14429_v28  ;;  %v1536_v28 = vld [vmem:[%s20678_s1 + $0x2f30] sm:$0xff] }
 0x57f   :  { %11387 = vmatprep.subr.bf16.mxu0 %v14438_v62  ;;  %v14477_v62 = vcombine.low %v1524_v16, %v1528_v50  ;;  %v14486_v3 = vcombine.high %v1532_v59, %v1536_v28  ;;  %v1061_v16 = vld [vmem:[%s20678_s1 + $0x2058] sm:$0xff] }
 0x580   :  { %11757 = vmatpush1.bf16.msra.mxu1 %v13927_v6  ;;  %v1540_v6 = vld [vmem:[%s20678_s1 + $0x2f50] sm:$0xff]  ;;  %v1065_v50 = vld [vmem:[%s20678_s1 + $0x2078] sm:$0xff] }
 0x581   :  { %11758 = vmatprep.subr.bf16.mxu1 %v13936_v9  ;;  %v13975_v9 = vcombine.low %v1021_v20, %v1025_v53  ;;  %v14016_v20 = vcombine.high %v1061_v16, %v1065_v50 }
 0x582   :  { %11388 = vmatpush1.bf16.msra.mxu0 %v14437_v8  ;;  %v1544_v8 = vld [vmem:[%s20678_s1 + $0x2f70] sm:$0xff] }
 0x583   :  { %11389 = vmatprep.subr.bf16.mxu0 %v14446_v13  ;;  %v14485_v13 = vcombine.low %v1532_v59, %v1536_v28  ;;  %v14494_v38 = vcombine.high %v1540_v6, %v1544_v8  ;;  %v1069_v59 = vld [vmem:[%s20678_s1 + $0x2098] sm:$0xff] }
 0x584   :  { %11759 = vmatpush1.bf16.msra.mxu1 %v13935_v35  ;;  %v1548_v35 = vld [vmem:[%s20678_s1 + $0x2f90] sm:$0xff]  ;;  %v1073_v28 = vld [vmem:[%s20678_s1 + $0x20b8] sm:$0xff] }
 0x585   :  { %11760 = vmatprep.subr.bf16.mxu1 %v13944_v42  ;;  %v13983_v42 = vcombine.low %v1029_v39, %v1033_v4  ;;  %v14024_v39 = vcombine.high %v1069_v59, %v1073_v28 }
 0x586   :  { %11390 = vmatpush1.bf16.msra.mxu0 %v14445_v19  ;;  %v1552_v19 = vld [vmem:[%s20678_s1 + $0x2fb0] sm:$0xff] }
 0x587   :  { %11391 = vmatprep.subr.bf16.mxu0 %v14454_v21  ;;  %v14493_v21 = vcombine.low %v1540_v6, %v1544_v8  ;;  %v14502_v23 = vcombine.high %v1548_v35, %v1552_v19  ;;  %v1081_v6 = vld [vmem:[%s20678_s1 + $0x20f8] sm:$0xff]  ;;  %v1588_v8 = vld [vmem:[%s20678_s1 + $0x30d0] sm:$0xff] }
 0x588   :  { %11761 = vmatpush1.bf16.msra.mxu1 %v13943_v26  ;;  %v1556_v26 = vld [vmem:[%s20678_s1 + $0x2fd0] sm:$0xff] }
 0x589   :  { %11762 = vmatprep.subr.bf16.mxu1 %v13952_v27  ;;  %v13991_v27 = vcombine.low %v1037_v14, %v1041_v15  ;;  %v1085_v15 = vld [vmem:[%s20678_s1 + $0x2118] sm:$0xff] }
 0x58a   :  { %11392 = vmatpush1.bf16.msra.mxu0 %v14453_v61  ;;  %v1560_v61 = vld [vmem:[%s20678_s1 + $0x2ff0] sm:$0xff] }
 0x58b   :  { %11393 = vmatprep.subr.bf16.mxu0 %v14462_v52  ;;  %v14501_v52 = vcombine.low %v1548_v35, %v1552_v19  ;;  %v14510_v11 = vcombine.high %v1556_v26, %v1560_v61  ;;  %v1089_v35 = vld [vmem:[%s20678_s1 + $0x2138] sm:$0xff]  ;;  %v1600_v19 = vld [vmem:[%s20678_s1 + $0x3130] sm:$0xff] }
 0x58c   :  { %11763 = vmatpush1.bf16.msra.mxu1 %v13951_v31  ;;  %v1564_v31 = vld [vmem:[%s20678_s1 + $0x3010] sm:$0xff] }
 0x58d   :  { %11764 = vmatprep.subr.bf16.mxu1 %v13960_v7  ;;  %v13999_v7 = vcombine.low %v1045_v40, %v1049_v0  ;;  %v1093_v40 = vld [vmem:[%s20678_s1 + $0x2158] sm:$0xff] }
 0x58e   :  { %11394 = vmatpush1.bf16.msra.mxu0 %v14461_v30  ;;  %v1568_v30 = vld [vmem:[%s20678_s1 + $0x3030] sm:$0xff]  ;;  %v1097_v0 = vld [vmem:[%s20678_s1 + $0x2178] sm:$0xff] }
 0x58f   :  { %11395 = vmatprep.subr.bf16.mxu0 %v14470_v5  ;;  %v14509_v5 = vcombine.low %v1556_v26, %v1560_v61  ;;  %v14518_v44 = vcombine.high %v1564_v31, %v1568_v30  ;;  %v1604_v26 = vld [vmem:[%s20678_s1 + $0x3150] sm:$0xff] }
 0x590   :  { %11765 = vmatpush1.bf16.msra.mxu1 %v13959_v51  ;;  %v1572_v51 = vld [vmem:[%s20678_s1 + $0x3050] sm:$0xff] }
 0x591   :  { %11766 = vmatprep.subr.bf16.mxu1 %v13968_v32  ;;  %v14007_v32 = vcombine.low %v1053_v41, %v1057_v33  ;;  %v1608_v61 = vld [vmem:[%s20678_s1 + $0x3170] sm:$0xff]  ;;  %v1101_v41 = vld [vmem:[%s20678_s1 + $0x2198] sm:$0xff] }
 0x592   :  { %11396 = vmatpush1.bf16.msra.mxu0 %v14469_v54  ;;  %v1576_v54 = vld [vmem:[%s20678_s1 + $0x3070] sm:$0xff]  ;;  %v1105_v33 = vld [vmem:[%s20678_s1 + $0x21b8] sm:$0xff] }
 0x593   :  { %11397 = vmatprep.subr.bf16.mxu0 %v14478_v56  ;;  %v14517_v56 = vcombine.low %v1564_v31, %v1568_v30  ;;  %v14526_v53 = vcombine.high %v1572_v51, %v1576_v54  ;;  %v1612_v31 = vld [vmem:[%s20678_s1 + $0x3190] sm:$0xff] }
 0x594   :  { %11767 = vmatpush1.bf16.msra.mxu1 %v13967_v60  ;;  %v1580_v60 = vld [vmem:[%s20678_s1 + $0x3090] sm:$0xff] }
 0x595   :  { %11768 = vmatprep.subr.bf16.mxu1 %v13976_v1  ;;  %v14015_v1 = vcombine.low %v1061_v16, %v1065_v50  ;;  %v1616_v30 = vld [vmem:[%s20678_s1 + $0x31b0] sm:$0xff]  ;;  %v1109_v16 = vld [vmem:[%s20678_s1 + $0x21d8] sm:$0xff] }
 0x596   :  { %11398 = vmatpush1.bf16.msra.mxu0 %v14477_v62  ;;  %v1584_v62 = vld [vmem:[%s20678_s1 + $0x30b0] sm:$0xff]  ;;  %v1113_v50 = vld [vmem:[%s20678_s1 + $0x21f8] sm:$0xff] }
 0x597   :  { %11399 = vmatprep.subr.bf16.mxu0 %v14486_v3  ;;  %v14525_v3 = vcombine.low %v1572_v51, %v1576_v54  ;;  %v14534_v4 = vcombine.high %v1580_v60, %v1584_v62  ;;  %v1620_v51 = vld [vmem:[%s20678_s1 + $0x31d0] sm:$0xff] }
 0x598   :  { %11769 = vmatpush1.bf16.msra.mxu1 %v13975_v9  ;;  %v1592_v9 = vld [vmem:[%s20678_s1 + $0x30f0] sm:$0xff] }
 0x599   :  { %11770 = vmatprep.subr.bf16.mxu1 %v13984_v55  ;;  %v14533_v55 = vcombine.low %v1580_v60, %v1584_v62  ;;  %v14542_v14 = vcombine.high %v1588_v8, %v1592_v9  ;;  %v1624_v54 = vld [vmem:[%s20678_s1 + $0x31f0] sm:$0xff]  ;;  %v14063_v60 = vcombine.low %v1109_v16, %v1113_v50 }
 0x59a   :  { %11400 = vmatpush1.bf16.msra.mxu0 %v14485_v13  ;;  %v14023_v13 = vcombine.low %v1069_v59, %v1073_v28  ;;  %v1117_v59 = vld [vmem:[%s20678_s1 + $0x2218] sm:$0xff]  ;;  %v14573_v62 = vcombine.low %v1620_v51, %v1624_v54 }
 0x59b   :  { %11401 = vmatprep.subr.bf16.mxu0 %v14494_v38  ;;  %v1121_v28 = vld [vmem:[%s20678_s1 + $0x2238] sm:$0xff] }
 0x59c   :  { %11771 = vmatpush1.bf16.msra.mxu1 %v13983_v42 }
 0x59d   :  { %11772 = vmatprep.subr.bf16.mxu1 %v13992_v24  ;;  %v14040_v24 = vcombine.high %v1085_v15, %v1089_v35 }
 0x59e   :  { %11402 = vmatpush1.bf16.msra.mxu0 %v14493_v21  ;;  %v14541_v21 = vcombine.low %v1588_v8, %v1592_v9  ;;  %v14924_v8 = vld [vmem:[%s20680_s3] ss:$8 sps:$4 sm:$0xff]  }
 0x59f   :  { %11403 = vmatprep.subr.bf16.mxu0 %v14502_v23 }
 0x5a0   :  { %11773 = vmatpush1.bf16.msra.mxu1 %v13991_v27  ;;  %v14039_v27 = vcombine.low %v1085_v15, %v1089_v35  ;;  %v14927_v15 = vld [vmem:[%s20680_s3 + $0x10] ss:$8 sps:$4 sm:$0xff]  }
 0x5a1   :  { %11774 = vmatprep.subr.bf16.mxu1 %v14000_v49  ;;  %v14048_v49 = vcombine.high %v1093_v40, %v1097_v0 }
 0x5a2   :  { %11404 = vmatpush1.bf16.msra.mxu0 %v14501_v52 }
 0x5a3   :  { %11405 = vmatprep.subr.bf16.mxu0 %v14510_v11  ;;  %v14558_v11 = vcombine.high %v1604_v26, %v1608_v61 }
 0x5a4   :  { %11775 = vmatpush1.bf16.msra.mxu1 %v13999_v7  ;;  %v14047_v7 = vcombine.low %v1093_v40, %v1097_v0  ;;  %v14935_v40 = vld [vmem:[%s20680_s3 + $0x34] ss:$8 sps:$4 sm:$0xff]  }
 0x5a5   :  { %11785 = vmatprep.subr.bf16.mxu1 %v14008_v12  ;;  %v14056_v12 = vcombine.high %v1101_v41, %v1105_v33  ;;  %v1149_v0 = vld [vmem:[%s20678_s1 + $0x2318] sm:$0xff] }
 0x5a6   :  { %11406 = vmatpush1.bf16.msra.mxu0 %v14509_v5  ;;  %v14557_v5 = vcombine.low %v1604_v26, %v1608_v61  ;;  %v1153_v26 = vld [vmem:[%s20678_s1 + $0x2338] sm:$0xff] }
 0x5a7   :  { %11416 = vmatprep.subr.bf16.mxu0 %v14518_v44  ;;  %11777 = vmatmul.mubr.bf16.vlgmr.msra.gmra.mrb[8].mxu1 %v16482_v37  ;;  %v1077_v37 = vld [vmem:[%s20678_s1 + $0x20d8] sm:$0xff]  ;;  %v14566_v44 = vcombine.high %v1612_v31, %v1616_v30 }
 0x5a8   :  { %11786 = vmatpush1.bf16.msra.mxu1 %v14007_v32  ;;  %11817 = vmatprep.mubr.bf16.mxu1 %v16491_v48  ;;  %v14032_v38 = vcombine.high %v1077_v37, %v1081_v6  ;;  %v1596_v48 = vld [vmem:[%s20678_s1 + $0x3110] sm:$0xff]  ;;  %v14031_v42 = vcombine.low %v1077_v37, %v1081_v6  ;;  %v14055_v32 = vcombine.low %v1101_v41, %v1105_v33  ;;  %v1129_v37 = vld [vmem:[%s20678_s1 + $0x2278] sm:$0xff] }
 0x5a9   :  { %11408 = vmatmul.mubr.bf16.vlgmr.msra.gmra.mrb[4].mxu0 %v17303_v57  ;;  %11787 = vmatprep.subr.bf16.mxu1 %v14016_v20  ;;  %v14550_v23 = vcombine.high %v1596_v48, %v1600_v19  ;;  %v14549_v52 = vcombine.low %v1596_v48, %v1600_v19  ;;  %v14064_v20 = vcombine.high %v1109_v16, %v1113_v50  ;;  %v14932_v48 = vld [vmem:[%s20680_s3 + $0x24] ss:$8 sps:$4 sm:$0xff]   ;;  %v1141_v19 = vld [vmem:[%s20678_s1 + $0x22d8] sm:$0xff] }
 0x5aa   :  { %11417 = vmatpush1.bf16.msra.mxu0 %v14517_v56  ;;  %11448 = vmatprep.mubr.bf16.mxu0 %v15143_v17  ;;  %v14565_v56 = vcombine.low %v1612_v31, %v1616_v30  ;;  %v14071_v6 = vcombine.low %v1117_v59, %v1121_v28  ;;  %v1161_v41 = vld [vmem:[%s20678_s1 + $0x2378] sm:$0xff]  ;;  %v14103_v33 = vcombine.low %v1149_v0, %v1153_v26  ;;  %v14936_v31 = vld [vmem:[%s20680_s3 + $0x40] ss:$8 sps:$4 sm:$0xff]  }
 0x5ab   :  { %11418 = vmatprep.subr.bf16.mxu0 %v14526_v53  ;;  %v14574_v53 = vcombine.high %v1620_v51, %v1624_v54  ;;  %v14939_v16 = vld [vmem:[%s20680_s3 + $0x50] ss:$8 sps:$4 sm:$0xff]   ;;  %v14944_v51 = vld [vmem:[%s20680_s3 + $0x64] ss:$8 sps:$4 sm:$0xff]  }
 0x5ac   :  { %11788 = vmatpush1.bf16.msra.mxu1 %v14015_v1  ;;  %v14072_v1 = vcombine.high %v1117_v59, %v1121_v28  ;;  %v1173_v54 = vld [vmem:[%s20678_s1 + $0x23d8] sm:$0xff] }
 0x5ad   :  { %11789 = vmatprep.subr.bf16.mxu1 %v14024_v39  ;;  %v11991_v39 = vmax.f32 %v18086_v22, 0.0  ;;  %v14929_v22 = vld [vmem:[%s20680_s3 + $0x14] ss:$8 sps:$4 sm:$0xff]  }
 0x5ae   :  { %11419 = vmatpush1.bf16.msra.mxu0 %v14525_v3  ;;  %v14926_v3 = vld [vmem:[%s20680_s3 + $0x4] ss:$8 sps:$4 sm:$0xff]   ;;  %v14947_v59 = vld [vmem:[%s20680_s3 + $0x74] ss:$8 sps:$4 sm:$0xff]  }
 0x5af   :  { %11420 = vmatprep.subr.bf16.mxu0 %v14534_v4  ;;  %v1125_v4 = vld [vmem:[%s20678_s1 + $0x2258] sm:$0xff] }
 0x5b0   :  { %11790 = vmatpush1.bf16.msra.mxu1 %v14023_v13  ;;  %v14080_v9 = vcombine.high %v1125_v4, %v1129_v37  ;;  %v1133_v13 = vld [vmem:[%s20678_s1 + $0x2298] sm:$0xff] }
 0x5b1   :  { %11791 = vmatprep.subr.bf16.mxu1 %v14032_v38  ;;  %v11999_v38 = vpack.c.bf16 %v11991_v39, %v11991_v39  ;;  %v1181_v28 = vld [vmem:[%s20678_s1 + $0x2418] sm:$0xff]  ;;  %v14950_v39 = vld [vmem:[%s20680_s3 + $0x84] ss:$8 sps:$4 sm:$0xff]  }
 0x5b2   :  { %11421 = vmatpush1.bf16.msra.mxu0 %v14533_v55  ;;  %v1137_v55 = vld [vmem:[%s20678_s1 + $0x22b8] sm:$0xff] }
 0x5b3   :  { %11422 = vmatprep.subr.bf16.mxu0 %v14542_v14  ;;  %v14079_v14 = vcombine.low %v1125_v4, %v1129_v37  ;;  %v14088_v35 = vcombine.high %v1133_v13, %v1137_v55  ;;  %v1189_v4 = vld [vmem:[%s20678_s1 + $0x2458] sm:$0xff] }
 0x5b4   :  { %11792 = vmatpush1.bf16.msra.mxu1 %v14031_v42  ;;  %v1145_v42 = vld [vmem:[%s20678_s1 + $0x22f8] sm:$0xff] }
 0x5b5   :  { %11793 = vmatprep.subr.bf16.mxu1 %v14040_v24  ;;  %v14930_v24 = vld [vmem:[%s20680_s3 + $0x20] ss:$8 sps:$4 sm:$0xff]   ;;  %v14095_v61 = vcombine.low %v1141_v19, %v1145_v42  ;;  %v1193_v37 = vld [vmem:[%s20678_s1 + $0x2478] sm:$0xff] }
 0x5b6   :  { %11423 = vmatpush1.bf16.msra.mxu0 %v14541_v21  ;;  %v14087_v21 = vcombine.low %v1133_v13, %v1137_v55  ;;  %v1197_v13 = vld [vmem:[%s20678_s1 + $0x2498] sm:$0xff] }
 0x5b7   :  { %11424 = vmatprep.subr.bf16.mxu0 %v14550_v23  ;;  %v14096_v23 = vcombine.high %v1141_v19, %v1145_v42  ;;  %v1201_v55 = vld [vmem:[%s20678_s1 + $0x24b8] sm:$0xff]  ;;  %v14954_v19 = vld [vmem:[%s20680_s3 + $0xa0] ss:$8 sps:$4 sm:$0xff]  }
 0x5b8   :  { %11794 = vmatpush1.bf16.msra.mxu1 %v14039_v27  ;;  %v14933_v27 = vld [vmem:[%s20680_s3 + $0x30] ss:$8 sps:$4 sm:$0xff]  }
 0x5b9   :  { %11795 = vmatprep.subr.bf16.mxu1 %v14048_v49  ;;  %v14938_v49 = vld [vmem:[%s20680_s3 + $0x44] ss:$8 sps:$4 sm:$0xff]  }
 0x5ba   :  { %11425 = vmatpush1.bf16.msra.mxu0 %v14549_v52  ;;  %v14104_v52 = vcombine.high %v1149_v0, %v1153_v26  ;;  %v14957_v0 = vld [vmem:[%s20680_s3 + $0xb0] ss:$8 sps:$4 sm:$0xff]  }
 0x5bb   :  { %11426 = vmatprep.subr.bf16.mxu0 %v14558_v11  ;;  %v1157_v11 = vld [vmem:[%s20678_s1 + $0x2358] sm:$0xff] }
 0x5bc   :  { %11796 = vmatpush1.bf16.msra.mxu1 %v14047_v7  ;;  %v14112_v30 = vcombine.high %v1157_v11, %v1161_v41  ;;  %v14941_v7 = vld [vmem:[%s20680_s3 + $0x54] ss:$8 sps:$4 sm:$0xff]  }
 0x5bd   :  { %11797 = vmatprep.subr.bf16.mxu1 %v14056_v12  ;;  %v1169_v12 = vld [vmem:[%s20678_s1 + $0x23b8] sm:$0xff] }
 0x5be   :  { %11427 = vmatpush1.bf16.msra.mxu0 %v14557_v5  ;;  %v1165_v5 = vld [vmem:[%s20678_s1 + $0x2398] sm:$0xff] }
 0x5bf   :  { %11428 = vmatprep.subr.bf16.mxu0 %v14566_v44  ;;  %v14111_v44 = vcombine.low %v1157_v11, %v1161_v41  ;;  %v14120_v50 = vcombine.high %v1165_v5, %v1169_v12  ;;  %v14960_v11 = vld [vmem:[%s20680_s3 + $0xc0] ss:$8 sps:$4 sm:$0xff]  }
 0x5c0   :  { %11798 = vmatpush1.bf16.msra.mxu1 %v14055_v32  ;;  %v1177_v32 = vld [vmem:[%s20678_s1 + $0x23f8] sm:$0xff] }
 0x5c1   :  { %11799 = vmatprep.subr.bf16.mxu1 %v14064_v20  ;;  %v14942_v20 = vld [vmem:[%s20680_s3 + $0x60] ss:$8 sps:$4 sm:$0xff]  }
 0x5c2   :  { %11429 = vmatpush1.bf16.msra.mxu0 %v14565_v56  ;;  %v14119_v56 = vcombine.low %v1165_v5, %v1169_v12  ;;  %v14963_v12 = vld [vmem:[%s20680_s3 + $0xd0] ss:$8 sps:$4 sm:$0xff]  }
 0x5c3   :  { %11430 = vmatprep.subr.bf16.mxu0 %v14574_v53  ;;  %v14128_v53 = vcombine.high %v1173_v54, %v1177_v32 }
 0x5c4   :  { %11800 = vmatpush1.bf16.msra.mxu1 %v14063_v60  ;;  %v1185_v60 = vld [vmem:[%s20678_s1 + $0x2438] sm:$0xff] }
 0x5c5   :  { %11801 = vmatprep.subr.bf16.mxu1 %v14072_v1  ;;  %v14945_v1 = vld [vmem:[%s20680_s3 + $0x70] ss:$8 sps:$4 sm:$0xff]  }
 0x5c6   :  { %11431 = vmatpush1.bf16.msra.mxu0 %v14573_v62  ;;  %v14127_v62 = vcombine.low %v1173_v54, %v1177_v32  ;;  %v20049_v54 = vld [vmem:[%s20679_s2] sm:$0xff] }
 0x5c7   :  { %12786 = vmatprep.subr.bf16.mxu0 %v14926_v3  ;;  %v14136_v3 = vcombine.high %v1181_v28, %v1185_v60 }
 0x5c8   :  { %11802 = vmatpush1.bf16.msra.mxu1 %v14071_v6  ;;  %v14135_v6 = vcombine.low %v1181_v28, %v1185_v60  ;;  %v1245_v28 = vld [vmem:[%s20678_s1 + $0x2618] sm:$0xff] }
 0x5c9   :  { %11449 = vmatmul.mubr.bf16.vlgmr.msra.gmra.mrb[4].mxu0 %v17409_v45  ;;  %11803 = vmatprep.subr.bf16.mxu1 %v14080_v9  ;;  %v14144_v9 = vcombine.high %v1189_v4, %v1193_v37  ;;  %v1249_v60 = vld [vmem:[%s20678_s1 + $0x2638] sm:$0xff] }
 0x5ca   :  { %12787 = vmatpush1.bf16.msra.mxu0 %v14924_v8  ;;  %12818 = vmatprep.mubr.bf16.mxu0 %v11999_v38  ;;  %v14948_v8 = vld [vmem:[%s20680_s3 + $0x80] ss:$8 sps:$4 sm:$0xff]   ;;  %v14143_v38 = vcombine.low %v1189_v4, %v1193_v37  ;;  %v11990_v4 = vmax.f32 %v18084_v18, 0.0  ;;  %v14974_v37 = vld [vmem:[%s20680_s3 + $0x104] ss:$8 sps:$4 sm:$0xff]  }
 0x5cb   :  { %12788 = vmatprep.subr.bf16.mxu0 %v14929_v22  ;;  %v14953_v22 = vld [vmem:[%s20680_s3 + $0x94] ss:$8 sps:$4 sm:$0xff]   ;;  %v14972_v18 = vld [vmem:[%s20680_s3 + $0x100] ss:$8 sps:$4 sm:$0xff]  }
 0x5cc   :  { %11804 = vmatpush1.bf16.msra.mxu1 %v14079_v14  ;;  %v14951_v14 = vld [vmem:[%s20680_s3 + $0x90] ss:$8 sps:$4 sm:$0xff]  }
 0x5cd   :  { %11805 = vmatprep.subr.bf16.mxu1 %v14088_v35  ;;  %v14956_v35 = vld [vmem:[%s20680_s3 + $0xa4] ss:$8 sps:$4 sm:$0xff]  }
 0x5ce   :  { %12789 = vmatpush1.bf16.msra.mxu0 %v14927_v15  ;;  %v14152_v15 = vcombine.high %v1197_v13, %v1201_v55 }
 0x5cf   :  { %12790 = vmatprep.subr.bf16.mxu0 %v14932_v48  ;;  %v14151_v48 = vcombine.low %v1197_v13, %v1201_v55  ;;  %v14977_v55 = vld [vmem:[%s20680_s3 + $0x114] ss:$8 sps:$4 sm:$0xff]  }
 0x5d0   :  { %11806 = vmatpush1.bf16.msra.mxu1 %v14087_v21  ;;  %v14959_v21 = vld [vmem:[%s20680_s3 + $0xb4] ss:$8 sps:$4 sm:$0xff]  }
 0x5d1   :  { %11807 = vmatprep.subr.bf16.mxu1 %v14096_v23  ;;  %v1217_v23 = vld [vmem:[%s20678_s1 + $0x2538] sm:$0xff] }
 0x5d2   :  { %12791 = vmatpush1.bf16.msra.mxu0 %v14930_v24  ;;  %v1213_v24 = vld [vmem:[%s20678_s1 + $0x2518] sm:$0xff] }
 0x5d3   :  { %12792 = vmatprep.subr.bf16.mxu0 %v14935_v40  ;;  %v14168_v26 = vcombine.high %v1213_v24, %v1217_v23 }
 0x5d4   :  { %11808 = vmatpush1.bf16.msra.mxu1 %v14095_v61  ;;  %v14962_v61 = vld [vmem:[%s20680_s3 + $0xc4] ss:$8 sps:$4 sm:$0xff]  }
 0x5d5   :  { %11809 = vmatprep.subr.bf16.mxu1 %v14104_v52  ;;  %v1225_v52 = vld [vmem:[%s20678_s1 + $0x2578] sm:$0xff] }
 0x5d6   :  { %12793 = vmatpush1.bf16.msra.mxu0 %v14933_v27  ;;  %v1221_v27 = vld [vmem:[%s20678_s1 + $0x2558] sm:$0xff] }
 0x5d7   :  { %12794 = vmatprep.subr.bf16.mxu0 %v14938_v49  ;;  %v14167_v49 = vcombine.low %v1213_v24, %v1217_v23  ;;  %v14176_v41 = vcombine.high %v1221_v27, %v1225_v52  ;;  %v14175_v5 = vcombine.low %v1221_v27, %v1225_v52  ;;  %v14978_v24 = vld [vmem:[%s20680_s3 + $0x120] ss:$8 sps:$4 sm:$0xff]   ;;  %v14981_v27 = vld [vmem:[%s20680_s3 + $0x130] ss:$8 sps:$4 sm:$0xff]  }
 0x5d8   :  { %11810 = vmatpush1.bf16.msra.mxu1 %v14103_v33  ;;  %v14965_v33 = vld [vmem:[%s20680_s3 + $0xd4] ss:$8 sps:$4 sm:$0xff]  }
 0x5d9   :  { %11811 = vmatprep.subr.bf16.mxu1 %v14112_v30  ;;  %v1233_v30 = vld [vmem:[%s20678_s1 + $0x25b8] sm:$0xff] }
 0x5da   :  { %12795 = vmatpush1.bf16.msra.mxu0 %v14936_v31  ;;  %v1229_v31 = vld [vmem:[%s20678_s1 + $0x2598] sm:$0xff] }
 0x5db   :  { %12796 = vmatprep.subr.bf16.mxu0 %v14941_v7  ;;  %v1642_v7 = vsub.s32 3, %v15241_v43 }
 0x5dc   :  { %11812 = vmatpush1.bf16.msra.mxu1 %v14111_v44  ;;  %v14184_v44 = vcombine.high %v1229_v31, %v1233_v30 }
 0x5dd   :  { %11813 = vmatprep.subr.bf16.mxu1 %v14120_v50  ;;  %v1237_v50 = vld [vmem:[%s20678_s1 + $0x25d8] sm:$0xff]  ;;  %v1643_v32 = vrot.slane %v20049_v54, %v1642_v7 }
 0x5de   :  { %12797 = vmatpush1.bf16.msra.mxu0 %v14939_v16  ;;  %v14968_v16 = vld [vmem:[%s20680_s3 + $0xe4] ss:$8 sps:$4 sm:$0xff]   ;;  %v14989_v7 = vld [vmem:[%s20680_s3 + $0x154] ss:$8 sps:$4 sm:$0xff]  }
 0x5df   :  { %12798 = vmatprep.subr.bf16.mxu0 %v14944_v51  ;;  %v1241_v51 = vld [vmem:[%s20678_s1 + $0x25f8] sm:$0xff] }
 0x5e0   :  { %11814 = vmatpush1.bf16.msra.mxu1 %v14119_v56  ;;  %v14183_v56 = vcombine.low %v1229_v31, %v1233_v30  ;;  %v14984_v31 = vld [vmem:[%s20680_s3 + $0x140] ss:$8 sps:$4 sm:$0xff]  }
 0x5e1   :  { %11815 = vmatprep.subr.bf16.mxu1 %v14128_v53  ;;  %v14192_v53 = vcombine.high %v1237_v50, %v1241_v51 }
 0x5e2   :  { %12799 = vmatpush1.bf16.msra.mxu0 %v14942_v20  ;;  %v14966_v20 = vld [vmem:[%s20680_s3 + $0xe0] ss:$8 sps:$4 sm:$0xff]  }
 0x5e3   :  { %12800 = vmatprep.subr.bf16.mxu0 %v14947_v59  ;;  %v14971_v59 = vld [vmem:[%s20680_s3 + $0xf4] ss:$8 sps:$4 sm:$0xff]  }
 0x5e4   :  { %11816 = vmatpush1.bf16.msra.mxu1 %v14127_v62  ;;  %v14711_v62 = vadd.f32 %v18870_v47, %v1643_v32  ;;  %v1253_v47 = vld [vmem:[%s20678_s1 + $0x2658] sm:$0xff] }
 0x5e5   :  { %11826 = vmatprep.subr.bf16.mxu1 %v14136_v3  ;;  %v14969_v3 = vld [vmem:[%s20680_s3 + $0xf0] ss:$8 sps:$4 sm:$0xff]  }
 0x5e6   :  { %12801 = vmatpush1.bf16.msra.mxu0 %v14945_v1  ;;  %v14191_v1 = vcombine.low %v1237_v50, %v1241_v51  ;;  %v14992_v51 = vld [vmem:[%s20680_s3 + $0x164] ss:$8 sps:$4 sm:$0xff]   ;;  %v1301_v32 = vld [vmem:[%s20678_s1 + $0x27d8] sm:$0xff] }
 0x5e7   :  { %12802 = vmatprep.subr.bf16.mxu0 %v14950_v39  ;;  %11818 = vmatmul.mubr.bf16.vlgmr.msra.gmra.mrb[8].mxu1 %v16685_v46  ;;  %v1205_v46 = vld [vmem:[%s20678_s1 + $0x24d8] sm:$0xff]  ;;  %v14200_v39 = vcombine.high %v1245_v28, %v1249_v60 }
 0x5e8   :  { %11827 = vmatpush1.bf16.msra.mxu1 %v14135_v6  ;;  %11858 = vmatprep.mubr.bf16.mxu1 %v16695_v58  ;;  %v1209_v58 = vld [vmem:[%s20678_s1 + $0x24f8] sm:$0xff]  ;;  %v11993_v6 = vmax.f32 %v14711_v62, 0.0 }
 0x5e9   :  { %11828 = vmatprep.subr.bf16.mxu1 %v14144_v9  ;;  %v14160_v42 = vcombine.high %v1205_v46, %v1209_v58  ;;  %v14159_v40 = vcombine.low %v1205_v46, %v1209_v58  ;;  %v14199_v9 = vcombine.low %v1245_v28, %v1249_v60  ;;  %v14975_v46 = vld [vmem:[%s20680_s3 + $0x110] ss:$8 sps:$4 sm:$0xff]   ;;  %v14995_v28 = vld [vmem:[%s20680_s3 + $0x174] ss:$8 sps:$4 sm:$0xff]  }
 0x5ea   :  { %12803 = vmatpush1.bf16.msra.mxu0 %v14948_v8  ;;  %v1257_v8 = vld [vmem:[%s20678_s1 + $0x2678] sm:$0xff] }
 0x5eb   :  { %12804 = vmatprep.subr.bf16.mxu0 %v14953_v22  ;;  %v11998_v22 = vpack.c.bf16 %v11990_v4, %v11990_v4  ;;  %v14208_v13 = vcombine.high %v1253_v47, %v1257_v8  ;;  %v1309_v60 = vld [vmem:[%s20678_s1 + $0x2818] sm:$0xff]  ;;  %v14998_v4 = vld [vmem:[%s20680_s3 + $0x184] ss:$8 sps:$4 sm:$0xff]  }
 0x5ec   :  { %11829 = vmatpush1.bf16.msra.mxu1 %v14143_v38  ;;  %v1261_v38 = vld [vmem:[%s20678_s1 + $0x2698] sm:$0xff] }
 0x5ed   :  { %11830 = vmatprep.subr.bf16.mxu1 %v14152_v15  ;;  %v12001_v15 = vpack.c.bf16 %v11993_v6, %v11993_v6  ;;  %v1313_v62 = vld [vmem:[%s20678_s1 + $0x2838] sm:$0xff] }
 0x5ee   :  { %12805 = vmatpush1.bf16.msra.mxu0 %v14951_v14  ;;  %v1265_v14 = vld [vmem:[%s20678_s1 + $0x26b8] sm:$0xff] }
 0x5ef   :  { %12806 = vmatprep.subr.bf16.mxu0 %v14956_v35  ;;  %v14207_v35 = vcombine.low %v1253_v47, %v1257_v8  ;;  %v14216_v58 = vcombine.high %v1261_v38, %v1265_v14  ;;  %v1321_v6 = vld [vmem:[%s20678_s1 + $0x2878] sm:$0xff]  ;;  %v14263_v47 = vcombine.low %v1309_v60, %v1313_v62  ;;  %v14996_v8 = vld [vmem:[%s20680_s3 + $0x180] ss:$8 sps:$4 sm:$0xff]  }
 0x5f0   :  { %11831 = vmatpush1.bf16.msra.mxu1 %v14151_v48  ;;  %v14980_v48 = vld [vmem:[%s20680_s3 + $0x124] ss:$8 sps:$4 sm:$0xff]  }
 0x5f1   :  { %11832 = vmatprep.subr.bf16.mxu1 %v14160_v42  ;;  %v1273_v42 = vld [vmem:[%s20678_s1 + $0x26f8] sm:$0xff] }
 0x5f2   :  { %12807 = vmatpush1.bf16.msra.mxu0 %v14954_v19  ;;  %v1269_v19 = vld [vmem:[%s20678_s1 + $0x26d8] sm:$0xff] }
 0x5f3   :  { %12808 = vmatprep.subr.bf16.mxu0 %v14959_v21  ;;  %v14215_v21 = vcombine.low %v1261_v38, %v1265_v14  ;;  %v14224_v23 = vcombine.high %v1269_v19, %v1273_v42  ;;  %v14999_v38 = vld [vmem:[%s20680_s3 + $0x190] ss:$8 sps:$4 sm:$0xff]  }
 0x5f4   :  { %11833 = vmatpush1.bf16.msra.mxu1 %v14159_v40  ;;  %v14983_v40 = vld [vmem:[%s20680_s3 + $0x134] ss:$8 sps:$4 sm:$0xff]  }
 0x5f5   :  { %11834 = vmatprep.subr.bf16.mxu1 %v14168_v26  ;;  %v1281_v26 = vld [vmem:[%s20678_s1 + $0x2738] sm:$0xff] }
 0x5f6   :  { %12809 = vmatpush1.bf16.msra.mxu0 %v14957_v0  ;;  %v1277_v0 = vld [vmem:[%s20678_s1 + $0x2718] sm:$0xff] }
 0x5f7   :  { %12810 = vmatprep.subr.bf16.mxu0 %v14962_v61  ;;  %v14223_v61 = vcombine.low %v1269_v19, %v1273_v42  ;;  %v14232_v52 = vcombine.high %v1277_v0, %v1281_v26  ;;  %v1341_v19 = vld [vmem:[%s20678_s1 + $0x2918] sm:$0xff] }
 0x5f8   :  { %11835 = vmatpush1.bf16.msra.mxu1 %v14167_v49  ;;  %v14986_v49 = vld [vmem:[%s20680_s3 + $0x144] ss:$8 sps:$4 sm:$0xff]   ;;  %v1345_v42 = vld [vmem:[%s20678_s1 + $0x2938] sm:$0xff] }
 0x5f9   :  { %11836 = vmatprep.subr.bf16.mxu1 %v14176_v41  ;;  %v1289_v41 = vld [vmem:[%s20678_s1 + $0x2778] sm:$0xff] }
 0x5fa   :  { %12811 = vmatpush1.bf16.msra.mxu0 %v14960_v11  ;;  %v1285_v11 = vld [vmem:[%s20678_s1 + $0x2758] sm:$0xff] }
 0x5fb   :  { %12812 = vmatprep.subr.bf16.mxu0 %v14965_v33  ;;  %v14231_v33 = vcombine.low %v1277_v0, %v1281_v26  ;;  %v14240_v30 = vcombine.high %v1285_v11, %v1289_v41  ;;  %v1349_v0 = vld [vmem:[%s20678_s1 + $0x2958] sm:$0xff] }
 0x5fc   :  { %11837 = vmatpush1.bf16.msra.mxu1 %v14175_v5  ;;  %v1293_v5 = vld [vmem:[%s20678_s1 + $0x2798] sm:$0xff] }
 0x5fd   :  { %11838 = vmatprep.subr.bf16.mxu1 %v14184_v44  ;;  %v14239_v44 = vcombine.low %v1285_v11, %v1289_v41  ;;  %v1353_v26 = vld [vmem:[%s20678_s1 + $0x2978] sm:$0xff] }
 0x5fe   :  { %12813 = vmatpush1.bf16.msra.mxu0 %v14963_v12  ;;  %v1297_v12 = vld [vmem:[%s20678_s1 + $0x27b8] sm:$0xff] }
 0x5ff   :  { %12814 = vmatprep.subr.bf16.mxu0 %v14968_v16  ;;  %v14987_v16 = vld [vmem:[%s20680_s3 + $0x150] ss:$8 sps:$4 sm:$0xff]   ;;  %v14248_v50 = vcombine.high %v1293_v5, %v1297_v12  ;;  %v15013_v11 = vld [vmem:[%s20680_s3 + $0x1d4] ss:$8 sps:$4 sm:$0xff]  }
 0x600   :  { %11839 = vmatpush1.bf16.msra.mxu1 %v14183_v56  ;;  %v1305_v56 = vld [vmem:[%s20678_s1 + $0x27f8] sm:$0xff] }
 0x601   :  { %11840 = vmatprep.subr.bf16.mxu1 %v14192_v53  ;;  %v14990_v53 = vld [vmem:[%s20680_s3 + $0x160] ss:$8 sps:$4 sm:$0xff]   ;;  %v1357_v41 = vld [vmem:[%s20678_s1 + $0x2998] sm:$0xff] }
 0x602   :  { %12815 = vmatpush1.bf16.msra.mxu0 %v14966_v20  ;;  %v14247_v20 = vcombine.low %v1293_v5, %v1297_v12  ;;  %v15016_v12 = vld [vmem:[%s20680_s3 + $0x1e4] ss:$8 sps:$4 sm:$0xff]  }
 0x603   :  { %12816 = vmatprep.subr.bf16.mxu0 %v14971_v59  ;;  %v14256_v59 = vcombine.high %v1301_v32, %v1305_v56 }
 0x604   :  { %11841 = vmatpush1.bf16.msra.mxu1 %v14191_v1  ;;  %v14255_v1 = vcombine.low %v1301_v32, %v1305_v56 }
 0x605   :  { %11842 = vmatprep.subr.bf16.mxu1 %v14200_v39  ;;  %v14264_v39 = vcombine.high %v1309_v60, %v1313_v62 }
 0x606   :  { %12817 = vmatpush1.bf16.msra.mxu0 %v14969_v3  ;;  %v14993_v3 = vld [vmem:[%s20680_s3 + $0x170] ss:$8 sps:$4 sm:$0xff]  }
 0x607   :  { %12827 = vmatprep.subr.bf16.mxu0 %v14974_v37  ;;  %v1317_v37 = vld [vmem:[%s20678_s1 + $0x2858] sm:$0xff] }
 0x608   :  { %11843 = vmatpush1.bf16.msra.mxu1 %v14199_v9  ;;  %v14272_v9 = vcombine.high %v1317_v37, %v1321_v6 }
 0x609   :  { %12819 = vmatmul.mubr.bf16.vlgmr.msra.gmra.mrb[8].mxu0 %v11998_v22  ;;  %11844 = vmatprep.subr.bf16.mxu1 %v14208_v13  ;;  %v1325_v22 = vld [vmem:[%s20678_s1 + $0x2898] sm:$0xff] }
 0x60a   :  { %12828 = vmatpush1.bf16.msra.mxu0 %v14972_v18  ;;  %12859 = vmatprep.mubr.bf16.mxu0 %v12001_v15  ;;  %v15001_v18 = vld [vmem:[%s20680_s3 + $0x194] ss:$8 sps:$4 sm:$0xff]   ;;  %v15004_v15 = vld [vmem:[%s20680_s3 + $0x1a4] ss:$8 sps:$4 sm:$0xff]  }
 0x60b   :  { %12829 = vmatprep.subr.bf16.mxu0 %v14977_v55  ;;  %v1329_v13 = vld [vmem:[%s20678_s1 + $0x28b8] sm:$0xff]  ;;  %v14271_v55 = vcombine.low %v1317_v37, %v1321_v6  ;;  %v15020_v6 = vld [vmem:[%s20680_s3 + $0x200] ss:$8 sps:$4 sm:$0xff]  }
 0x60c   :  { %11845 = vmatpush1.bf16.msra.mxu1 %v14207_v35  ;;  %v14280_v14 = vcombine.high %v1325_v22, %v1329_v13  ;;  %v14279_v35 = vcombine.low %v1325_v22, %v1329_v13 }
 0x60d   :  { %11846 = vmatprep.subr.bf16.mxu1 %v14216_v58 }
 0x60e   :  { %12830 = vmatpush1.bf16.msra.mxu0 %v14975_v46  ;;  %v15002_v46 = vld [vmem:[%s20680_s3 + $0x1a0] ss:$8 sps:$4 sm:$0xff]  }
 0x60f   :  { %12831 = vmatprep.subr.bf16.mxu0 %v14980_v48  ;;  %v15007_v48 = vld [vmem:[%s20680_s3 + $0x1b4] ss:$8 sps:$4 sm:$0xff]  }
 0x610   :  { %11847 = vmatpush1.bf16.msra.mxu1 %v14215_v21 }
 0x611   :  { %11848 = vmatprep.subr.bf16.mxu1 %v14224_v23  ;;  %v14296_v23 = vcombine.high %v1341_v19, %v1345_v42 }
 0x612   :  { %12832 = vmatpush1.bf16.msra.mxu0 %v14978_v24  ;;  %v15005_v24 = vld [vmem:[%s20680_s3 + $0x1b0] ss:$8 sps:$4 sm:$0xff]  }
 0x613   :  { %12833 = vmatprep.subr.bf16.mxu0 %v14983_v40  ;;  %v15010_v40 = vld [vmem:[%s20680_s3 + $0x1c4] ss:$8 sps:$4 sm:$0xff]  }
 0x614   :  { %11849 = vmatpush1.bf16.msra.mxu1 %v14223_v61  ;;  %v14295_v61 = vcombine.low %v1341_v19, %v1345_v42 }
 0x615   :  { %11850 = vmatprep.subr.bf16.mxu1 %v14232_v52  ;;  %v14304_v52 = vcombine.high %v1349_v0, %v1353_v26 }
 0x616   :  { %12834 = vmatpush1.bf16.msra.mxu0 %v14981_v27  ;;  %v15008_v27 = vld [vmem:[%s20680_s3 + $0x1c0] ss:$8 sps:$4 sm:$0xff]  }
 0x617   :  { %12835 = vmatprep.subr.bf16.mxu0 %v14986_v49  ;;  %v1638_v49 = vsub.s32 2, %v15241_v43 }
 0x618   :  { %11851 = vmatpush1.bf16.msra.mxu1 %v14231_v33  ;;  %v1361_v33 = vld [vmem:[%s20678_s1 + $0x29b8] sm:$0xff] }
 0x619   :  { %11852 = vmatprep.subr.bf16.mxu1 %v14240_v30  ;;  %v15011_v30 = vld [vmem:[%s20680_s3 + $0x1d0] ss:$8 sps:$4 sm:$0xff]   ;;  %v1639_v5 = vrot.slane %v20049_v54, %v1638_v49  ;;  %v15037_v49 = vld [vmem:[%s20680_s3 + $0x254] ss:$8 sps:$4 sm:$0xff]  }
 0x61a   :  { %12836 = vmatpush1.bf16.msra.mxu0 %v14984_v31  ;;  %v14303_v31 = vcombine.low %v1349_v0, %v1353_v26 }
 0x61b   :  { %12837 = vmatprep.subr.bf16.mxu0 %v14989_v7  ;;  %v14312_v7 = vcombine.high %v1357_v41, %v1361_v33  ;;  %v14710_v56 = vadd.f32 %v18862_v63, %v1639_v5  ;;  %v15017_v63 = vld [vmem:[%s20680_s3 + $0x1f0] ss:$8 sps:$4 sm:$0xff]  }
 0x61c   :  { %11853 = vmatpush1.bf16.msra.mxu1 %v14239_v44  ;;  %v1365_v44 = vld [vmem:[%s20678_s1 + $0x29d8] sm:$0xff] }
 0x61d   :  { %11854 = vmatprep.subr.bf16.mxu1 %v14248_v50  ;;  %v14311_v50 = vcombine.low %v1357_v41, %v1361_v33  ;;  %v11992_v62 = vmax.f32 %v14710_v56, 0.0  ;;  %v15035_v33 = vld [vmem:[%s20680_s3 + $0x250] ss:$8 sps:$4 sm:$0xff]  }
 0x61e   :  { %12838 = vmatpush1.bf16.msra.mxu0 %v14987_v16  ;;  %v1369_v16 = vld [vmem:[%s20678_s1 + $0x29f8] sm:$0xff] }
 0x61f   :  { %12839 = vmatprep.subr.bf16.mxu0 %v14992_v51  ;;  %v15014_v51 = vld [vmem:[%s20680_s3 + $0x1e0] ss:$8 sps:$4 sm:$0xff]   ;;  %v14320_v32 = vcombine.high %v1365_v44, %v1369_v16 }
 0x620   :  { %11855 = vmatpush1.bf16.msra.mxu1 %v14247_v20  ;;  %v15019_v20 = vld [vmem:[%s20680_s3 + $0x1f4] ss:$8 sps:$4 sm:$0xff]  }
 0x621   :  { %11856 = vmatprep.subr.bf16.mxu1 %v14256_v59  ;;  %v1377_v59 = vld [vmem:[%s20678_s1 + $0x2a38] sm:$0xff] }
 0x622   :  { %12840 = vmatpush1.bf16.msra.mxu0 %v14990_v53  ;;  %v1373_v53 = vld [vmem:[%s20678_s1 + $0x2a18] sm:$0xff] }
 0x623   :  { %12841 = vmatprep.subr.bf16.mxu0 %v14995_v28  ;;  %v14319_v28 = vcombine.low %v1365_v44, %v1369_v16  ;;  %v14328_v60 = vcombine.high %v1373_v53, %v1377_v59  ;;  %v15038_v44 = vld [vmem:[%s20680_s3 + $0x260] ss:$8 sps:$4 sm:$0xff]   ;;  %v1437_v16 = vld [vmem:[%s20678_s1 + $0x2c18] sm:$0xff] }
 0x624   :  { %11857 = vmatpush1.bf16.msra.mxu1 %v14255_v1  ;;  %v1381_v1 = vld [vmem:[%s20678_s1 + $0x2a58] sm:$0xff] }
 0x625   :  { %11867 = vmatprep.subr.bf16.mxu1 %v14264_v39  ;;  %v15022_v39 = vld [vmem:[%s20680_s3 + $0x204] ss:$8 sps:$4 sm:$0xff]  }
 0x626   :  { %12842 = vmatpush1.bf16.msra.mxu0 %v14993_v3  ;;  %v1385_v3 = vld [vmem:[%s20678_s1 + $0x2a78] sm:$0xff] }
 0x627   :  { %12843 = vmatprep.subr.bf16.mxu0 %v14998_v4  ;;  %11859 = vmatmul.mubr.bf16.vlgmr.msra.gmra.mrb[8].mxu1 %v16896_v2  ;;  %v1333_v2 = vld [vmem:[%s20678_s1 + $0x28d8] sm:$0xff]  ;;  %v14327_v4 = vcombine.low %v1373_v53, %v1377_v59  ;;  %v14336_v37 = vcombine.high %v1381_v1, %v1385_v3  ;;  %v14335_v22 = vcombine.low %v1381_v1, %v1385_v3 }
 0x628   :  { %11868 = vmatpush1.bf16.msra.mxu1 %v14263_v47  ;;  %11899 = vmatprep.mubr.bf16.mxu1 %v16905_v10  ;;  %v1337_v10 = vld [vmem:[%s20678_s1 + $0x28f8] sm:$0xff]  ;;  %v12000_v47 = vpack.c.bf16 %v11992_v62, %v11992_v62  ;;  %v15044_v62 = vld [vmem:[%s20680_s3 + $0x280] ss:$8 sps:$4 sm:$0xff]  }
 0x629   :  { %11869 = vmatprep.subr.bf16.mxu1 %v14272_v9  ;;  %v14288_v58 = vcombine.high %v1333_v2, %v1337_v10  ;;  %v14287_v21 = vcombine.low %v1333_v2, %v1337_v10  ;;  %v1393_v9 = vld [vmem:[%s20678_s1 + $0x2ab8] sm:$0xff] }
 0x62a   :  { %12844 = vmatpush1.bf16.msra.mxu0 %v14996_v8  ;;  %v1389_v8 = vld [vmem:[%s20678_s1 + $0x2a98] sm:$0xff] }
 0x62b   :  { %12845 = vmatprep.subr.bf16.mxu0 %v15001_v18  ;;  %v15025_v18 = vld [vmem:[%s20680_s3 + $0x214] ss:$8 sps:$4 sm:$0xff]   ;;  %v14344_v13 = vcombine.high %v1389_v8, %v1393_v9  ;;  %v14343_v2 = vcombine.low %v1389_v8, %v1393_v9 }
 0x62c   :  { %11870 = vmatpush1.bf16.msra.mxu1 %v14271_v55  ;;  %v15023_v55 = vld [vmem:[%s20680_s3 + $0x210] ss:$8 sps:$4 sm:$0xff]  }
 0x62d   :  { %11871 = vmatprep.subr.bf16.mxu1 %v14280_v14  ;;  %v1401_v14 = vld [vmem:[%s20678_s1 + $0x2af8] sm:$0xff] }
 0x62e   :  { %12846 = vmatpush1.bf16.msra.mxu0 %v14999_v38  ;;  %v1397_v38 = vld [vmem:[%s20678_s1 + $0x2ad8] sm:$0xff] }
 0x62f   :  { %12847 = vmatprep.subr.bf16.mxu0 %v15004_v15  ;;  %v15028_v15 = vld [vmem:[%s20680_s3 + $0x224] ss:$8 sps:$4 sm:$0xff]   ;;  %v14352_v10 = vcombine.high %v1397_v38, %v1401_v14  ;;  %v14351_v19 = vcombine.low %v1397_v38, %v1401_v14  ;;  %v1445_v53 = vld [vmem:[%s20678_s1 + $0x2c58] sm:$0xff] }
 0x630   :  { %11872 = vmatpush1.bf16.msra.mxu1 %v14279_v35  ;;  %v15026_v35 = vld [vmem:[%s20680_s3 + $0x220] ss:$8 sps:$4 sm:$0xff]   ;;  %v1449_v59 = vld [vmem:[%s20678_s1 + $0x2c78] sm:$0xff] }
 0x631   :  { %11873 = vmatprep.subr.bf16.mxu1 %v14288_v58  ;;  %v1409_v58 = vld [vmem:[%s20678_s1 + $0x2b38] sm:$0xff] }
 0x632   :  { %12848 = vmatpush1.bf16.msra.mxu0 %v15002_v46  ;;  %v1405_v46 = vld [vmem:[%s20678_s1 + $0x2b18] sm:$0xff] }
 0x633   :  { %12849 = vmatprep.subr.bf16.mxu0 %v15007_v48  ;;  %v15031_v48 = vld [vmem:[%s20680_s3 + $0x234] ss:$8 sps:$4 sm:$0xff]   ;;  %v14360_v42 = vcombine.high %v1405_v46, %v1409_v58  ;;  %v14359_v0 = vcombine.low %v1405_v46, %v1409_v58 }
 0x634   :  { %11874 = vmatpush1.bf16.msra.mxu1 %v14287_v21  ;;  %v15029_v21 = vld [vmem:[%s20680_s3 + $0x230] ss:$8 sps:$4 sm:$0xff]  }
 0x635   :  { %11875 = vmatprep.subr.bf16.mxu1 %v14296_v23  ;;  %v1417_v23 = vld [vmem:[%s20678_s1 + $0x2b78] sm:$0xff] }
 0x636   :  { %12850 = vmatpush1.bf16.msra.mxu0 %v15005_v24  ;;  %v1413_v24 = vld [vmem:[%s20678_s1 + $0x2b58] sm:$0xff] }
 0x637   :  { %12851 = vmatprep.subr.bf16.mxu0 %v15010_v40  ;;  %v15034_v40 = vld [vmem:[%s20680_s3 + $0x244] ss:$8 sps:$4 sm:$0xff]   ;;  %v14368_v26 = vcombine.high %v1413_v24, %v1417_v23  ;;  %v1453_v1 = vld [vmem:[%s20678_s1 + $0x2c98] sm:$0xff] }
 0x638   :  { %11876 = vmatpush1.bf16.msra.mxu1 %v14295_v61  ;;  %v15032_v61 = vld [vmem:[%s20680_s3 + $0x240] ss:$8 sps:$4 sm:$0xff]   ;;  %v1457_v3 = vld [vmem:[%s20678_s1 + $0x2cb8] sm:$0xff] }
 0x639   :  { %11877 = vmatprep.subr.bf16.mxu1 %v14304_v52  ;;  %v1425_v52 = vld [vmem:[%s20678_s1 + $0x2bb8] sm:$0xff] }
 0x63a   :  { %12852 = vmatpush1.bf16.msra.mxu0 %v15008_v27  ;;  %v1421_v27 = vld [vmem:[%s20678_s1 + $0x2b98] sm:$0xff] }
 0x63b   :  { %12853 = vmatprep.subr.bf16.mxu0 %v15013_v11  ;;  %v14367_v11 = vcombine.low %v1413_v24, %v1417_v23  ;;  %v14376_v41 = vcombine.high %v1421_v27, %v1425_v52  ;;  %v14375_v5 = vcombine.low %v1421_v27, %v1425_v52  ;;  %v1465_v8 = vld [vmem:[%s20678_s1 + $0x2cf8] sm:$0xff] }
 0x63c   :  { %11878 = vmatpush1.bf16.msra.mxu1 %v14303_v31  ;;  %v1429_v31 = vld [vmem:[%s20678_s1 + $0x2bd8] sm:$0xff] }
 0x63d   :  { %11879 = vmatprep.subr.bf16.mxu1 %v14312_v7  ;;  %v15040_v7 = vld [vmem:[%s20680_s3 + $0x264] ss:$8 sps:$4 sm:$0xff]  }
 0x63e   :  { %12854 = vmatpush1.bf16.msra.mxu0 %v15011_v30  ;;  %v1433_v30 = vld [vmem:[%s20678_s1 + $0x2bf8] sm:$0xff] }
 0x63f   :  { %12855 = vmatprep.subr.bf16.mxu0 %v15016_v12  ;;  %v14384_v12 = vcombine.high %v1429_v31, %v1433_v30 }
 0x640   :  { %11880 = vmatpush1.bf16.msra.mxu1 %v14311_v50  ;;  %v1441_v50 = vld [vmem:[%s20678_s1 + $0x2c38] sm:$0xff] }
 0x641   :  { %11881 = vmatprep.subr.bf16.mxu1 %v14320_v32  ;;  %v14383_v32 = vcombine.low %v1429_v31, %v1433_v30  ;;  %v14392_v56 = vcombine.high %v1437_v16, %v1441_v50 }
 0x642   :  { %12856 = vmatpush1.bf16.msra.mxu0 %v15014_v51  ;;  %v15043_v51 = vld [vmem:[%s20680_s3 + $0x274] ss:$8 sps:$4 sm:$0xff]  }
 0x643   :  { %12857 = vmatprep.subr.bf16.mxu0 %v15019_v20  ;;  %v15041_v20 = vld [vmem:[%s20680_s3 + $0x270] ss:$8 sps:$4 sm:$0xff]  }
 0x644   :  { %11882 = vmatpush1.bf16.msra.mxu1 %v14319_v28  ;;  %v15046_v28 = vld [vmem:[%s20680_s3 + $0x284] ss:$8 sps:$4 sm:$0xff]  }
 0x645   :  { %11883 = vmatprep.subr.bf16.mxu1 %v14328_v60  ;;  %v14400_v60 = vcombine.high %v1445_v53, %v1449_v59 }
 0x646   :  { %12858 = vmatpush1.bf16.msra.mxu0 %v15017_v63  ;;  %v14391_v63 = vcombine.low %v1437_v16, %v1441_v50 }
 0x647   :  { %12868 = vmatprep.subr.bf16.mxu0 %v15022_v39  ;;  %v15049_v39 = vld [vmem:[%s20680_s3 + $0x294] ss:$8 sps:$4 sm:$0xff]  }
 0x648   :  { %11884 = vmatpush1.bf16.msra.mxu1 %v14327_v4  ;;  %v14399_v4 = vcombine.low %v1445_v53, %v1449_v59  ;;  %v1525_v53 = vld [vmem:[%s20678_s1 + $0x2ed8] sm:$0xff] }
 0x649   :  { %12860 = vmatmul.mubr.bf16.vlgmr.msra.gmra.mrb[8].mxu0 %v12000_v47  ;;  %11885 = vmatprep.subr.bf16.mxu1 %v14336_v37  ;;  %v14408_v37 = vcombine.high %v1453_v1, %v1457_v3  ;;  %v1461_v47 = vld [vmem:[%s20678_s1 + $0x2cd8] sm:$0xff] }
 0x64a   :  { %12869 = vmatpush1.bf16.msra.mxu0 %v15020_v6  ;;  %v15047_v6 = vld [vmem:[%s20680_s3 + $0x290] ss:$8 sps:$4 sm:$0xff]   ;;  %v14416_v9 = vcombine.high %v1461_v47, %v1465_v8  ;;  %v14415_v38 = vcombine.low %v1461_v47, %v1465_v8  ;;  %v1650_v47 = vsub.s32 5, %v15241_v43 }
 0x64b   :  { %12870 = vmatprep.subr.bf16.mxu0 %v15025_v18  ;;  %v15050_v18 = vld [vmem:[%s20680_s3 + $0x2a0] ss:$8 sps:$4 sm:$0xff]   ;;  %v1529_v59 = vld [vmem:[%s20678_s1 + $0x2ef8] sm:$0xff] }
 0x64c   :  { %11886 = vmatpush1.bf16.msra.mxu1 %v14335_v22  ;;  %v1469_v22 = vld [vmem:[%s20678_s1 + $0x2d18] sm:$0xff] }
 0x64d   :  { %11887 = vmatprep.subr.bf16.mxu1 %v14344_v13  ;;  %v1473_v13 = vld [vmem:[%s20678_s1 + $0x2d38] sm:$0xff] }
 0x64e   :  { %12871 = vmatpush1.bf16.msra.mxu0 %v15023_v55  ;;  %v15055_v55 = vld [vmem:[%s20680_s3 + $0x2b4] ss:$8 sps:$4 sm:$0xff]   ;;  %v14424_v14 = vcombine.high %v1469_v22, %v1473_v13  ;;  %v14423_v46 = vcombine.low %v1469_v22, %v1473_v13  ;;  %v1651_v22 = vrot.slane %v20049_v54, %v1650_v47 }
 0x64f   :  { %12872 = vmatprep.subr.bf16.mxu0 %v15028_v15  ;;  %v15053_v15 = vld [vmem:[%s20680_s3 + $0x2b0] ss:$8 sps:$4 sm:$0xff]  }
 0x650   :  { %11888 = vmatpush1.bf16.msra.mxu1 %v14343_v2  ;;  %v1477_v2 = vld [vmem:[%s20678_s1 + $0x2d58] sm:$0xff] }
 0x651   :  { %11889 = vmatprep.subr.bf16.mxu1 %v14352_v10  ;;  %v1481_v10 = vld [vmem:[%s20678_s1 + $0x2d78] sm:$0xff] }
 0x652   :  { %12873 = vmatpush1.bf16.msra.mxu0 %v15026_v35  ;;  %v15058_v35 = vld [vmem:[%s20680_s3 + $0x2c4] ss:$8 sps:$4 sm:$0xff]   ;;  %v14432_v58 = vcombine.high %v1477_v2, %v1481_v10  ;;  %v14431_v24 = vcombine.low %v1477_v2, %v1481_v10 }
 0x653   :  { %12874 = vmatprep.subr.bf16.mxu0 %v15031_v48  ;;  %v15056_v48 = vld [vmem:[%s20680_s3 + $0x2c0] ss:$8 sps:$4 sm:$0xff]  }
 0x654   :  { %11890 = vmatpush1.bf16.msra.mxu1 %v14351_v19  ;;  %v1485_v19 = vld [vmem:[%s20678_s1 + $0x2d98] sm:$0xff] }
 0x655   :  { %11891 = vmatprep.subr.bf16.mxu1 %v14360_v42  ;;  %v1489_v42 = vld [vmem:[%s20678_s1 + $0x2db8] sm:$0xff] }
 0x656   :  { %12875 = vmatpush1.bf16.msra.mxu0 %v15029_v21  ;;  %v15061_v21 = vld [vmem:[%s20680_s3 + $0x2d4] ss:$8 sps:$4 sm:$0xff]   ;;  %v14440_v23 = vcombine.high %v1485_v19, %v1489_v42  ;;  %v14439_v27 = vcombine.low %v1485_v19, %v1489_v42 }
 0x657   :  { %12876 = vmatprep.subr.bf16.mxu0 %v15034_v40  ;;  %v15059_v40 = vld [vmem:[%s20680_s3 + $0x2d0] ss:$8 sps:$4 sm:$0xff]  }
 0x658   :  { %11892 = vmatpush1.bf16.msra.mxu1 %v14359_v0  ;;  %v1493_v0 = vld [vmem:[%s20678_s1 + $0x2dd8] sm:$0xff] }
 0x659   :  { %11893 = vmatprep.subr.bf16.mxu1 %v14368_v26  ;;  %v1497_v26 = vld [vmem:[%s20678_s1 + $0x2df8] sm:$0xff] }
 0x65a   :  { %12877 = vmatpush1.bf16.msra.mxu0 %v15032_v61  ;;  %v15064_v61 = vld [vmem:[%s20680_s3 + $0x2e4] ss:$8 sps:$4 sm:$0xff]   ;;  %v14448_v52 = vcombine.high %v1493_v0, %v1497_v26  ;;  %v14447_v31 = vcombine.low %v1493_v0, %v1497_v26  ;;  %v1565_v19 = vld [vmem:[%s20678_s1 + $0x3018] sm:$0xff]  ;;  %v15068_v0 = vld [vmem:[%s20680_s3 + $0x300] ss:$8 sps:$4 sm:$0xff]  }
 0x65b   :  { %12878 = vmatprep.subr.bf16.mxu0 %v15037_v49  ;;  %v15062_v49 = vld [vmem:[%s20680_s3 + $0x2e0] ss:$8 sps:$4 sm:$0xff]   ;;  %v1569_v42 = vld [vmem:[%s20678_s1 + $0x3038] sm:$0xff] }
 0x65c   :  { %11894 = vmatpush1.bf16.msra.mxu1 %v14367_v11  ;;  %v1501_v11 = vld [vmem:[%s20678_s1 + $0x2e18] sm:$0xff] }
 0x65d   :  { %11895 = vmatprep.subr.bf16.mxu1 %v14376_v41  ;;  %v1505_v41 = vld [vmem:[%s20678_s1 + $0x2e38] sm:$0xff] }
 0x65e   :  { %12879 = vmatpush1.bf16.msra.mxu0 %v15035_v33  ;;  %v15067_v33 = vld [vmem:[%s20680_s3 + $0x2f4] ss:$8 sps:$4 sm:$0xff]   ;;  %v14456_v30 = vcombine.high %v1501_v11, %v1505_v41  ;;  %v14455_v16 = vcombine.low %v1501_v11, %v1505_v41  ;;  %v15071_v41 = vld [vmem:[%s20680_s3 + $0x310] ss:$8 sps:$4 sm:$0xff]  }
 0x65f   :  { %12880 = vmatprep.subr.bf16.mxu0 %v15040_v7  ;;  %v15065_v7 = vld [vmem:[%s20680_s3 + $0x2f0] ss:$8 sps:$4 sm:$0xff]  }
 0x660   :  { %11896 = vmatpush1.bf16.msra.mxu1 %v14375_v5  ;;  %v1509_v5 = vld [vmem:[%s20678_s1 + $0x2e58] sm:$0xff] }
 0x661   :  { %11897 = vmatprep.subr.bf16.mxu1 %v14384_v12  ;;  %v1513_v12 = vld [vmem:[%s20678_s1 + $0x2e78] sm:$0xff] }
 0x662   :  { %12881 = vmatpush1.bf16.msra.mxu0 %v15038_v44  ;;  %v15070_v44 = vld [vmem:[%s20680_s3 + $0x304] ss:$8 sps:$4 sm:$0xff]   ;;  %v14464_v50 = vcombine.high %v1509_v5, %v1513_v12 }
 0x663   :  { %12882 = vmatprep.subr.bf16.mxu0 %v15043_v51  ;;  %v1517_v51 = vld [vmem:[%s20678_s1 + $0x2e98] sm:$0xff] }
 0x664   :  { %11898 = vmatpush1.bf16.msra.mxu1 %v14383_v32  ;;  %v1521_v32 = vld [vmem:[%s20678_s1 + $0x2eb8] sm:$0xff] }
 0x665   :  { %11908 = vmatprep.subr.bf16.mxu1 %v14392_v56  ;;  %v14463_v56 = vcombine.low %v1509_v5, %v1513_v12  ;;  %v15074_v12 = vld [vmem:[%s20680_s3 + $0x320] ss:$8 sps:$4 sm:$0xff]  }
 0x666   :  { %12883 = vmatpush1.bf16.msra.mxu0 %v15041_v20  ;;  %v14472_v20 = vcombine.high %v1517_v51, %v1521_v32 }
 0x667   :  { %12884 = vmatprep.subr.bf16.mxu0 %v15046_v28  ;;  %11900 = vmatmul.mubr.bf16.vlgmr.msra.gmra.mrb[8].mxu1 %v17099_v25  ;;  %v15052_v25 = vld [vmem:[%s20680_s3 + $0x2a4] ss:$8 sps:$4 sm:$0xff]   ;;  %v14471_v28 = vcombine.low %v1517_v51, %v1521_v32  ;;  %v15077_v51 = vld [vmem:[%s20680_s3 + $0x330] ss:$8 sps:$4 sm:$0xff]  }
 0x668   :  { %11909 = vmatpush1.bf16.msra.mxu1 %v14391_v63  ;;  %11940 = vmatprep.mubr.bf16.mxu1 %v17109_v34  ;;  %v14407_v34 = vcombine.low %v1453_v1, %v1457_v3  ;;  %v14480_v63 = vcombine.high %v1525_v53, %v1529_v59  ;;  %v14479_v1 = vcombine.low %v1525_v53, %v1529_v59  ;;  %v1597_v32 = vld [vmem:[%s20678_s1 + $0x3118] sm:$0xff] }
 0x669   :  { %11910 = vmatprep.subr.bf16.mxu1 %v14400_v60  ;;  %v1533_v60 = vld [vmem:[%s20678_s1 + $0x2f18] sm:$0xff] }
 0x66a   :  { %12885 = vmatpush1.bf16.msra.mxu0 %v15044_v62  ;;  %v1537_v62 = vld [vmem:[%s20678_s1 + $0x2f38] sm:$0xff] }
 0x66b   :  { %12886 = vmatprep.subr.bf16.mxu0 %v15049_v39  ;;  %v14488_v3 = vcombine.high %v1533_v60, %v1537_v62  ;;  %v1541_v39 = vld [vmem:[%s20678_s1 + $0x2f58] sm:$0xff] }
 0x66c   :  { %11911 = vmatpush1.bf16.msra.mxu1 %v14399_v4  ;;  %v1545_v4 = vld [vmem:[%s20678_s1 + $0x2f78] sm:$0xff] }
 0x66d   :  { %11912 = vmatprep.subr.bf16.mxu1 %v14408_v37  ;;  %v14487_v37 = vcombine.low %v1533_v60, %v1537_v62  ;;  %v14496_v8 = vcombine.high %v1541_v39, %v1545_v4  ;;  %v1609_v60 = vld [vmem:[%s20678_s1 + $0x3178] sm:$0xff] }
 0x66e   :  { %12887 = vmatpush1.bf16.msra.mxu0 %v15047_v6  ;;  %v1646_v6 = vsub.s32 4, %v15241_v43  ;;  %v15085_v62 = vld [vmem:[%s20680_s3 + $0x354] ss:$8 sps:$4 sm:$0xff]  }
 0x66f   :  { %12888 = vmatprep.subr.bf16.mxu0 %v15052_v25  ;;  %v1549_v25 = vld [vmem:[%s20678_s1 + $0x2f98] sm:$0xff] }
 0x670   :  { %11913 = vmatpush1.bf16.msra.mxu1 %v14407_v34  ;;  %v1553_v34 = vld [vmem:[%s20678_s1 + $0x2fb8] sm:$0xff] }
 0x671   :  { %11914 = vmatprep.subr.bf16.mxu1 %v14416_v9  ;;  %v1647_v9 = vrot.slane %v20049_v54, %v1646_v6  ;;  %v14504_v13 = vcombine.high %v1549_v25, %v1553_v34  ;;  %v14503_v10 = vcombine.low %v1549_v25, %v1553_v34  ;;  %v15088_v6 = vld [vmem:[%s20680_s3 + $0x364] ss:$8 sps:$4 sm:$0xff]   ;;  %v15086_v25 = vld [vmem:[%s20680_s3 + $0x360] ss:$8 sps:$4 sm:$0xff]   ;;  %v1621_v34 = vld [vmem:[%s20678_s1 + $0x31d8] sm:$0xff] }
 0x672   :  { %12889 = vmatpush1.bf16.msra.mxu0 %v15050_v18  ;;  %v14495_v18 = vcombine.low %v1541_v39, %v1545_v4  ;;  %v15083_v39 = vld [vmem:[%s20680_s3 + $0x350] ss:$8 sps:$4 sm:$0xff]  }
 0x673   :  { %12890 = vmatprep.subr.bf16.mxu0 %v15055_v55  ;;  %v1557_v55 = vld [vmem:[%s20678_s1 + $0x2fd8] sm:$0xff] }
 0x674   :  { %11915 = vmatpush1.bf16.msra.mxu1 %v14415_v38  ;;  %v1561_v38 = vld [vmem:[%s20678_s1 + $0x2ff8] sm:$0xff] }
 0x675   :  { %11916 = vmatprep.subr.bf16.mxu1 %v14424_v14  ;;  %v1613_v4 = vld [vmem:[%s20678_s1 + $0x3198] sm:$0xff] }
 0x676   :  { %12891 = vmatpush1.bf16.msra.mxu0 %v15053_v15 }
 0x677   :  { %12892 = vmatprep.subr.bf16.mxu0 %v15058_v35 }
 0x678   :  { %11917 = vmatpush1.bf16.msra.mxu1 %v14423_v46 }
 0x679   :  { %11918 = vmatprep.subr.bf16.mxu1 %v14432_v58  ;;  %v14512_v58 = vcombine.high %v1557_v55, %v1561_v38 }
 0x67a   :  { %12893 = vmatpush1.bf16.msra.mxu0 %v15056_v48 }
 0x67b   :  { %12894 = vmatprep.subr.bf16.mxu0 %v15061_v21 }
 0x67c   :  { %11919 = vmatpush1.bf16.msra.mxu1 %v14431_v24  ;;  %v14511_v24 = vcombine.low %v1557_v55, %v1561_v38  ;;  %v15089_v55 = vld [vmem:[%s20680_s3 + $0x370] ss:$8 sps:$4 sm:$0xff]   ;;  %v15094_v38 = vld [vmem:[%s20680_s3 + $0x384] ss:$8 sps:$4 sm:$0xff]  }
 0x67d   :  { %11920 = vmatprep.subr.bf16.mxu1 %v14440_v23 }
 0x67e   :  { %12895 = vmatpush1.bf16.msra.mxu0 %v15059_v40  ;;  %v14520_v40 = vcombine.high %v1565_v19, %v1569_v42 }
 0x67f   :  { %12896 = vmatprep.subr.bf16.mxu0 %v15064_v61  ;;  %v1573_v61 = vld [vmem:[%s20678_s1 + $0x3058] sm:$0xff] }
 0x680   :  { %11921 = vmatpush1.bf16.msra.mxu1 %v14439_v27  ;;  %v1577_v27 = vld [vmem:[%s20678_s1 + $0x3078] sm:$0xff] }
 0x681   :  { %11922 = vmatprep.subr.bf16.mxu1 %v14448_v52  ;;  %v15073_v52 = vld [vmem:[%s20680_s3 + $0x314] ss:$8 sps:$4 sm:$0xff]   ;;  %v14528_v11 = vcombine.high %v1573_v61, %v1577_v27 }
 0x682   :  { %12897 = vmatpush1.bf16.msra.mxu0 %v15062_v49  ;;  %v14519_v49 = vcombine.low %v1565_v19, %v1569_v42  ;;  %v15109_v19 = vld [vmem:[%s20680_s3 + $0x3d4] ss:$8 sps:$4 sm:$0xff]   ;;  %v15107_v42 = vld [vmem:[%s20680_s3 + $0x3d0] ss:$8 sps:$4 sm:$0xff]  }
 0x683   :  { %12898 = vmatprep.subr.bf16.mxu0 %v15067_v33  ;;  %v1581_v33 = vld [vmem:[%s20678_s1 + $0x3098] sm:$0xff] }
 0x684   :  { %11923 = vmatpush1.bf16.msra.mxu1 %v14447_v31  ;;  %v1585_v31 = vld [vmem:[%s20678_s1 + $0x30b8] sm:$0xff] }
 0x685   :  { %11924 = vmatprep.subr.bf16.mxu1 %v14456_v30  ;;  %v15076_v30 = vld [vmem:[%s20680_s3 + $0x324] ss:$8 sps:$4 sm:$0xff]   ;;  %v14536_v5 = vcombine.high %v1581_v33, %v1585_v31 }
 0x686   :  { %12899 = vmatpush1.bf16.msra.mxu0 %v15065_v7  ;;  %v14527_v7 = vcombine.low %v1573_v61, %v1577_v27  ;;  %v15117_v61 = vld [vmem:[%s20679_s2] sm:$0xff]  ;;  %s15144_s2 = smov [#allocation2]  }
 0x687   :  { %12909 = vmatprep.subr.bf16.mxu0 %v15070_v44  ;;  %v1589_v44 = vld [vmem:[%s20678_s1 + $0x30d8] sm:$0xff]  ;;  %s12968_s6 = sshll.u32 %s15144_s2, 4  ;;  %s12969_s6 = int_to_ptr.vmem [resolvable:$true] %s12968_s6 }
 0x688   :  { %11925 = vmatpush1.bf16.msra.mxu1 %v14455_v16  ;;  %v1593_v16 = vld [vmem:[%s20678_s1 + $0x30f8] sm:$0xff]  ;;  %s15118_s7 = scalar_lea.vmem %s12969_s6, 64  ;;  %p15123_p1 = scmp.lt.s32.totalorder %s12969_s6, %s12969_s6 }
 0x689   :  { %11926 = vmatprep.subr.bf16.mxu1 %v14464_v50  ;;  %v14544_v50 = vcombine.high %v1589_v44, %v1593_v16  ;;  %v14543_v53 = vcombine.low %v1589_v44, %v1593_v16  ;;  %v12134_v16 = vld [vmem:[%s20681_s4] sm:$0x3]  ;;  %p15119_p0 = scmp.ne.s32.totalorder %s12969_s6, %s15118_s7  ;;  %p15124_p2 = scmp.lt.s32.totalorder %s15118_s7, %s15118_s7 }
 0x68b   :  { %p15125_p3 = por %p15124_p2, %p15123_p1 }
 0x68c   :  { %11927 = vmatpush1.bf16.msra.mxu1 %v14463_v56  ;;  %v1601_v56 = vld [vmem:[%s20678_s1 + $0x3138] sm:$0xff] }
 0x68d   :  { %11928 = vmatprep.subr.bf16.mxu1 %v14472_v20  ;;  %v15082_v20 = vld [vmem:[%s20680_s3 + $0x344] ss:$8 sps:$4 sm:$0xff]   ;;  %v14552_v59 = vcombine.high %v1597_v32, %v1601_v56  ;;  %p15126_p4 = pnand %p15125_p3, %p15119_p0 }
 0x690   :  { %11929 = vmatpush1.bf16.msra.mxu1 %v14471_v28  ;;  %v15080_v28 = vld [vmem:[%s20680_s3 + $0x340] ss:$8 sps:$4 sm:$0xff]  }
 0x691   :  { %11930 = vmatprep.subr.bf16.mxu1 %v14480_v63  ;;  %v1605_v63 = vld [vmem:[%s20678_s1 + $0x3158] sm:$0xff] }
 0x692   :  { %v14559_v47 = vcombine.low %v1605_v63, %v1609_v60 }
 0x694   :  { %11931 = vmatpush1.bf16.msra.mxu1 %v14479_v1  ;;  %v14551_v1 = vcombine.low %v1597_v32, %v1601_v56 }
 0x695   :  { %11932 = vmatprep.subr.bf16.mxu1 %v14488_v3  ;;  %v14560_v3 = vcombine.high %v1605_v63, %v1609_v60 }
 0x698   :  { %11933 = vmatpush1.bf16.msra.mxu1 %v14487_v37  ;;  %v1617_v37 = vld [vmem:[%s20678_s1 + $0x31b8] sm:$0xff] }
 0x699   :  { %11934 = vmatprep.subr.bf16.mxu1 %v14496_v8  ;;  %v14568_v8 = vcombine.high %v1613_v4, %v1617_v37 }
 0x69c   :  { %v11450_v14 = vpop.f32.mrb[4].mxu0  ;;  %11935 = vmatpush1.bf16.msra.mxu1 %v14495_v18  ;;  %v15091_v18 = vld [vmem:[%s20680_s3 + $0x374] ss:$8 sps:$4 sm:$0xff]  }
 0x69d   :  { %v14712_v15 = vadd.f32 %v11450_v14, %v1647_v9  ;;  %v11452_v2 = vpop.f32.mrb[5].mxu0  ;;  %11936 = vmatprep.subr.bf16.mxu1 %v14504_v13  ;;  %v1625_v9 = vld [vmem:[%s20678_s1 + $0x31f8] sm:$0xff] }
 0x69e   :  { %v14713_v35 = vadd.f32 %v11452_v2, %v1651_v22  ;;  %v11454_v46 = vpop.f32.mrb[6].mxu0  ;;  %v14567_v22 = vcombine.low %v1613_v4, %v1617_v37  ;;  %v14576_v13 = vcombine.high %v1621_v34, %v1625_v9  ;;  %v14575_v14 = vcombine.low %v1621_v34, %v1625_v9  ;;  %v15097_v2 = vld [vmem:[%s20680_s3 + $0x394] ss:$8 sps:$4 sm:$0xff]  }
 0x69f   :  { %v11994_v54 = vmax.f32 %v14712_v15, 0.0  ;;  %v11455_v48 = vpop.f32.mrb[7].mxu0  ;;  %v15092_v15 = vld [vmem:[%s20680_s3 + $0x380] ss:$8 sps:$4 sm:$0xff]  }
 0x6a0   :  { %v11995_v21 = vmax.f32 %v14713_v35, 0.0  ;;  %11937 = vmatpush1.bf16.msra.mxu1 %v14503_v10  ;;  %v15095_v10 = vld [vmem:[%s20680_s3 + $0x390] ss:$8 sps:$4 sm:$0xff]   ;;  %v15100_v35 = vld [vmem:[%s20680_s3 + $0x3a4] ss:$8 sps:$4 sm:$0xff]  }
 0x6a1   :  { %11938 = vmatprep.subr.bf16.mxu1 %v14512_v58  ;;  %v12002_v26 = vpack.c.bf16 %v11994_v54, %v11994_v54  ;;  %v15098_v46 = vld [vmem:[%s20680_s3 + $0x3a0] ss:$8 sps:$4 sm:$0xff]   ;;  %v15103_v58 = vld [vmem:[%s20680_s3 + $0x3b4] ss:$8 sps:$4 sm:$0xff]   ;;  %v15101_v54 = vld [vmem:[%s20680_s3 + $0x3b0] ss:$8 sps:$4 sm:$0xff]  }
 0x6a2   :  { %v12003_v23 = vpack.c.bf16 %v11995_v21, %v11995_v21  ;;  %v15104_v48 = vld [vmem:[%s20680_s3 + $0x3c0] ss:$8 sps:$4 sm:$0xff]   ;;  %v15112_v21 = vld [vmem:[%s20680_s3 + $0x3e4] ss:$8 sps:$4 sm:$0xff]  }
 0x6a4   :  { %12900 = vmatprep.mubr.bf16.mxu0 %v12003_v23  ;;  %11939 = vmatpush1.bf16.msra.mxu1 %v14511_v24  ;;  %v15110_v24 = vld [vmem:[%s20680_s3 + $0x3e0] ss:$8 sps:$4 sm:$0xff]   ;;  %v15115_v23 = vld [vmem:[%s20680_s3 + $0x3f4] ss:$8 sps:$4 sm:$0xff]  }
 0x6a5   :  { %12901 = vmatmul.mubr.bf16.vlgmr.msra.gmra.mrb[8].mxu0 %v12002_v26  ;;  %11949 = vmatprep.subr.bf16.mxu1 %v14520_v40  ;;  %v15113_v40 = vld [vmem:[%s20680_s3 + $0x3f0] ss:$8 sps:$4 sm:$0xff]   ;;  %v1658_v26 = vsub.s32 7, %v15241_v43 }
 0x6a6   :  { %12910 = vmatpush1.bf16.msra.mxu0 %v15068_v0  ;;  %v1654_v0 = vsub.s32 6, %v15241_v43 }
 0x6a7   :  { %12911 = vmatprep.subr.bf16.mxu0 %v15073_v52  ;;  %11941 = vmatmul.mubr.bf16.vlgmr.msra.gmra.mrb[8].mxu1 %v17303_v57  ;;  %v15079_v57 = vld [vmem:[%s20680_s3 + $0x334] ss:$8 sps:$4 sm:$0xff]   ;;  %v1659_v52 = vrot.slane %v15117_v61, %v1658_v26 }
 0x6a8   :  { %11950 = vmatpush1.bf16.msra.mxu1 %v14519_v49  ;;  %11981 = vmatprep.mubr.bf16.mxu1 %v15143_v17  ;;  %v14535_v17 = vcombine.low %v1581_v33, %v1585_v31  ;;  %v1655_v27 = vrot.slane %v15117_v61, %v1654_v0 }
 0x6a9   :  { %11951 = vmatprep.subr.bf16.mxu1 %v14528_v11 }
 0x6aa   :  { %12912 = vmatpush1.bf16.msra.mxu0 %v15071_v41 }
 0x6ab   :  { %12913 = vmatprep.subr.bf16.mxu0 %v15076_v30 }
 0x6ac   :  { %11952 = vmatpush1.bf16.msra.mxu1 %v14527_v7 }
 0x6ad   :  { %11953 = vmatprep.subr.bf16.mxu1 %v14536_v5 }
 0x6ae   :  { %12914 = vmatpush1.bf16.msra.mxu0 %v15074_v12 }
 0x6af   :  { %12915 = vmatprep.subr.bf16.mxu0 %v15079_v57  ;;  %v12139_v57 = vrot.slane %v12134_v16, %v1630_v29 }
 0x6b0   :  { %11954 = vmatpush1.bf16.msra.mxu1 %v14535_v17  ;;  %v12143_v17 = vrot.slane %v12134_v16, %v1634_v36 }
 0x6b1   :  { %11955 = vmatprep.subr.bf16.mxu1 %v14544_v50 }
 0x6b2   :  { %12916 = vmatpush1.bf16.msra.mxu0 %v15077_v51 }
 0x6b3   :  { %12917 = vmatprep.subr.bf16.mxu0 %v15082_v20 }
 0x6b4   :  { %11956 = vmatpush1.bf16.msra.mxu1 %v14543_v53 }
 0x6b5   :  { %11957 = vmatprep.subr.bf16.mxu1 %v14552_v59 }
 0x6b6   :  { %12918 = vmatpush1.bf16.msra.mxu0 %v15080_v28 }
 0x6b7   :  { %12919 = vmatprep.subr.bf16.mxu0 %v15085_v62 }
 0x6b8   :  { %11958 = vmatpush1.bf16.msra.mxu1 %v14551_v1 }
 0x6b9   :  { %11959 = vmatprep.subr.bf16.mxu1 %v14560_v3 }
 0x6ba   :  { %12920 = vmatpush1.bf16.msra.mxu0 %v15083_v39 }
 0x6bb   :  { %12921 = vmatprep.subr.bf16.mxu0 %v15088_v6 }
 0x6bc   :  { %11960 = vmatpush1.bf16.msra.mxu1 %v14559_v47 }
 0x6bd   :  { %11961 = vmatprep.subr.bf16.mxu1 %v14568_v8 }
 0x6be   :  { %12922 = vmatpush1.bf16.msra.mxu0 %v15086_v25 }
 0x6bf   :  { %12923 = vmatprep.subr.bf16.mxu0 %v15091_v18 }
 0x6c0   :  { %11962 = vmatpush1.bf16.msra.mxu1 %v14567_v22 }
 0x6c1   :  { %11963 = vmatprep.subr.bf16.mxu1 %v14576_v13 }
 0x6c2   :  { %12924 = vmatpush1.bf16.msra.mxu0 %v15089_v55 }
 0x6c3   :  { %12925 = vmatprep.subr.bf16.mxu0 %v15094_v38 }
 0x6c4   :  { %11964 = vmatpush1.bf16.msra.mxu1 %v14575_v14 }
 0x6c6   :  { %12926 = vmatpush1.bf16.msra.mxu0 %v15092_v15 }
 0x6c7   :  { %12927 = vmatprep.subr.bf16.mxu0 %v15097_v2  ;;  %11982 = vmatmul.mubr.bf16.vlgmr.msra.gmra.mrb[8].mxu1 %v17409_v45  ;;  %v15106_v45 = vld [vmem:[%s20680_s3 + $0x3c4] ss:$8 sps:$4 sm:$0xff]  }
 0x6ca   :  { %12928 = vmatpush1.bf16.msra.mxu0 %v15095_v10 }
 0x6cb   :  { %12929 = vmatprep.subr.bf16.mxu0 %v15100_v35 }
 0x6ce   :  { %12930 = vmatpush1.bf16.msra.mxu0 %v15098_v46 }
 0x6cf   :  { %12931 = vmatprep.subr.bf16.mxu0 %v15103_v58 }
 0x6d2   :  { %12932 = vmatpush1.bf16.msra.mxu0 %v15101_v54 }
 0x6d3   :  { %12933 = vmatprep.subr.bf16.mxu0 %v15106_v45 }
 0x6d6   :  { %12934 = vmatpush1.bf16.msra.mxu0 %v15104_v48 }
 0x6d7   :  { %12935 = vmatprep.subr.bf16.mxu0 %v15109_v19 }
 0x6da   :  { %12936 = vmatpush1.bf16.msra.mxu0 %v15107_v42 }
 0x6db   :  { %12937 = vmatprep.subr.bf16.mxu0 %v15112_v21 }
 0x6de   :  { %12938 = vmatpush1.bf16.msra.mxu0 %v15110_v24 }
 0x6df   :  { %12939 = vmatprep.subr.bf16.mxu0 %v15115_v23 }
 0x6e2   :  { %12940 = vmatpush1.bf16.msra.mxu0 %v15113_v40 }
 0x79a   :  { %v11983_v49 = vpop.f32.mrb[8].mxu1 }
 0x79b   :  { %v14714_v11 = vadd.f32 %v11983_v49, %v1655_v27  ;;  %v11985_v41 = vpop.f32.mrb[9].mxu1 }
 0x79c   :  { %v14715_v33 = vadd.f32 %v11985_v41, %v1659_v52  ;;  %v11987_v31 = vpop.f32.mrb[10].mxu1 }
 0x79d   :  { %v11996_v30 = vmax.f32 %v14714_v11, 0.0  ;;  %v11988_v7 = vpop.f32.mrb[11].mxu1 }
 0x79e   :  { %v11997_v5 = vmax.f32 %v14715_v33, 0.0 }
 0x79f   :  { %v12004_v44 = vpack.c.bf16 %v11996_v30, %v11996_v30 }
 0x7a0   :  { %v12005_v12 = vpack.c.bf16 %v11997_v5, %v11997_v5 }
 0x7a2   :  { %12941 = vmatprep.mubr.bf16.mxu0 %v12005_v12 }
 0x7a3   :  { %12942 = vmatmul.mubr.bf16.vlgmr.msra.gmra.mrb[8].mxu0 %v12004_v44 }
 0x876   :  { %v12943_v50 = vpop.f32.mrb[8].mxu0 }
 0x877   :  { %v14716_v51 = vadd.f32 %v12943_v50, %v12139_v57  ;;  %v12945_v32 = vpop.f32.mrb[9].mxu0 }
 0x878   :  { %v14717_v56 = vadd.f32 %v12945_v32, %v12143_v17  ;;  %v12947_v20 = vpop.f32.mrb[10].mxu0 }
 0x879   :  { %v12948_v53 = vpop.f32.mrb[11].mxu0 }
 0x87a   :  { %v12952_v59 = vcombine.low %v14716_v51, %v14717_v56 }
 0x87c   :  { %14705 = vst.sshfl [vmem:[#allocation2] sm:$0x33 pattern:$0x76325410] %v12952_v59 }
 0x87d   :  { %15129 = shalt.err (!%p15126_p4)
}
 0x87e   :  { %s15130_s9 = scalar_lea.hbm %s20682_s5, 64 }
 0x87f   :  { %p15131_p5 = scmp.ne.s32.totalorder %s20682_s5, %s15130_s9  ;;  %p15134_p6 = scmp.lt.u32.totalorder %s15130_s9, %s20682_s5 }
 0x881   :  { %p15136_p7 = pnand %p15134_p6, %p15131_p5 }
 0x883   :  { %15139 = shalt.err (!%p15136_p7)
}
 0x884   :  { %12971 = dma.vmem_to_hbm [thread:$0]  %s12969_s6, 64, %s20682_s5, [#allocation3]  }
 0x885   :  { %15140 = dma.done.wait [#allocation3], 64  }
 0x886   :  { %15141 = vsyncadd [#allocation3], 4294967232 }
 0x887   :  { %12975 = vsyncpa [#allocation3], 1 }

</bundles_post_ra>
